<compile_context>
chip_gen: v7x
topology: tpu7x:2x2x1
jax: 0.10.0
libtpu: 0.0.40
codegen_flags: <defaults>
</compile_context>

<pallas_src>
import functools

import numpy as np
import jax
import jax.numpy as jnp
from jax.experimental import pallas as pl
from jax.experimental.pallas import tpu as pltpu

N_CLASSES = 10
EPS = 1e-5


# ----------------------------- host-built structural constants -----------------------------
def _make_band(w_np, out_w, q, padded_w):
    """Fold a 3x3 conv weight (KH,KW,Cin,Cout) into KH banded matmul operands.

    Padded-slab lanes: lane = wp*Cin + ci, real pixel w stored at wp = q + w.
    Output-slab lanes: lane = wo*Cout + co.
    Returns (KH*padded_w*Cin, out_w*Cout); band kh lives in rows [kh*Kp, (kh+1)*Kp).
    """
    kh_n, kw_n, cin, cout = w_np.shape
    kp, n = padded_w * cin, out_w * cout
    band = np.zeros((kh_n, kp, n), np.float32)
    for kh in range(kh_n):
        for kw in range(kw_n):
            for wo in range(out_w):
                wp = q + wo + kw - 1
                band[kh, wp * cin:(wp + 1) * cin, wo * cout:(wo + 1) * cout] = w_np[kh, kw]
    return band.reshape(kh_n * kp, n)


def _make_expander(c, out_w):
    """E[c, w*C + c] = 1 : broadcasts a per-channel vector onto a (W*C)-lane slab."""
    e = np.zeros((c, out_w * c), np.float32)
    for w in range(out_w):
        e[np.arange(c), w * c + np.arange(c)] = 1.0
    return e


def _make_col_pool(c, in_w):
    """Even / odd pixel-column selectors (in_w*C, (in_w//2)*C) for 2x-pooling along W."""
    out_w = in_w // 2
    se = np.zeros((in_w * c, out_w * c), np.float32)
    so = np.zeros_like(se)
    for w2 in range(out_w):
        for ci in range(c):
            se[(2 * w2) * c + ci, w2 * c + ci] = 1.0
            so[(2 * w2 + 1) * c + ci, w2 * c + ci] = 1.0
    return se, so


def _make_row_pool(batch, rows):
    """Row selector for 2x-pooling along H on a batch-merged (batch*rows, X) slab."""
    out_rows = rows // 2
    r = np.zeros((batch * out_rows, batch * rows - 1), np.float32)
    for b in range(batch):
        for j in range(out_rows):
            r[b * out_rows + j, b * rows + 2 * j] = 1.0
    return r


# -------------------------------------- fused kernel --------------------------------------
def _convnet_kernel(xpad_ref, band1_ref, bandb_ref, bnp_ref,
                    e1_ref, e1t_ref, eb_ref, ebt_ref, rh_ref,
                    s1e_ref, s1o_ref, s2e_ref, s2o_ref,
                    wfc1_ref, bfc1_ref, wfc2_ref, bfc2_ref,
                    out_ref, o1_ref, p2_ref, *, n_blocks):
    f32 = jnp.float32
    B, hp1, kp1 = xpad_ref.shape
    H = hp1 - 2
    C = e1t_ref.shape[1]
    N1 = band1_ref.shape[1]            # W * C   (= 512)
    W = N1 // C
    H2, W2 = H // 2, W // 2
    KPB = p2_ref.shape[2]              # padded block-conv slab lanes (= 400)
    NB = bandb_ref.shape[1]            # W2 * C  (= 256)
    N4 = s2e_ref.shape[1]              # (W2//2) * C (= 128)
    ILANE = KPB - NB - C               # interior lane offset in p2 (= 128, vreg aligned)
    RP = H2 // 2                       # pooled rows per chunk / final height (= 8)

    def bn_affine(sum_row, sq_row, et, e, gamma, beta, count):
        """Training-mode BatchNorm (biased var) -> slab-broadcast scale/shift.

        Stats folded per channel and broadcast back to slab lanes with tiny matmuls;
        rsqrt goes to the otherwise idle EUP slot."""
        stats = jnp.concatenate([sum_row, sq_row], axis=0)               # (2, K)
        ch = jnp.dot(stats, et, preferred_element_type=f32)              # (2, C)
        mean = ch[0:1, :] * (1.0 / count)
        var = ch[1:2, :] * (1.0 / count) - mean * mean
        scale = gamma * jax.lax.rsqrt(var + EPS)
        shift = beta - mean * scale
        coefs = jnp.dot(jnp.concatenate([scale, shift], axis=0), e,
                        preferred_element_type=f32)                      # (2, N)
        return coefs[0:1, :], coefs[1:2, :]

    # ---------------- stage 1: conv1 as banded matmul, BN stats carried in vregs ----------------
    RC1 = 16                                           # output rows per chunk (per image)
    sum1 = jnp.zeros((1, N1), f32)
    sq1 = jnp.zeros((1, N1), f32)
    for r0 in range(0, H, RC1):                        # 2 unrolled chunks
        acc = jnp.zeros((B * RC1, N1), f32)
        for kh in range(3):
            patch = xpad_ref[:, r0 + kh:r0 + kh + RC1, :].reshape(B * RC1, kp1)
            acc = acc + jnp.dot(patch, band1_ref[kh * kp1:(kh + 1) * kp1, :],
                                preferred_element_type=f32)
        o1_ref[:, r0:r0 + RC1, :] = acc.reshape(B, RC1, N1)
        sum1 = sum1 + jnp.sum(acc, axis=0, keepdims=True)
        sq1 = sq1 + jnp.sum(acc * acc, axis=0, keepdims=True)

    cnt1 = float(B * H * W)
    s1_slab, t1_slab = bn_affine(sum1, sq1, e1t_ref[...], e1_ref[...],
                                 bnp_ref[0:1, :], bnp_ref[1:2, :], cnt1)

    # ---------------- stage 2: block-BN affine + ReLU, bn1 stats, 2x2 max-pool ----------------
    p2_ref[...] = jnp.zeros(p2_ref.shape, f32)         # zero padded buffer once (halo persists)
    rh = rh_ref[...]                                   # (B*RP, B*H2 - 1) row-pool selector
    sum2 = jnp.zeros((1, N1), f32)
    sq2 = jnp.zeros((1, N1), f32)
    pooled_chunks = []
    for p0 in range(0, H2, RP):                        # 2 unrolled chunks
        v = o1_ref[:, 2 * p0:2 * p0 + H2, :].reshape(B * H2, N1)
        y = jnp.maximum(v * s1_slab + t1_slab, 0.0)    # block BN + ReLU
        # TODO(synk): F.dropout2d(p=0.1, training=True) applied as identity here.
        sum2 = sum2 + jnp.sum(y, axis=0, keepdims=True)
        sq2 = sq2 + jnp.sum(y * y, axis=0, keepdims=True)
        m = jnp.maximum(y[0:B * H2 - 1, :], y[1:B * H2, :])          # adjacent-row max
        ph = jnp.dot(rh, m, preferred_element_type=f32)              # H-pooled (B*RP, N1)
        pw = jnp.maximum(jnp.dot(ph, s1e_ref[...], preferred_element_type=f32),
                         jnp.dot(ph, s1o_ref[...], preferred_element_type=f32))
        pooled_chunks.append(pw)                                     # (B*RP, NB)

    # bn1 (gamma=1): scale > 0 so the affine commutes with max-pool -> apply after pooling
    s2_slab, t2_slab = bn_affine(sum2, sq2, e1t_ref[...], eb_ref[...],
                                 bnp_ref[2:3, :], bnp_ref[3:4, :], cnt1)
    for i, p0 in enumerate(range(0, H2, RP)):
        z = jnp.maximum(pooled_chunks[i] * s2_slab + t2_slab, 0.0)
        p2_ref[:, 1 + p0:1 + p0 + RP, ILANE:ILANE + NB] = z.reshape(B, RP, NB)

    # ---------------- stage 3: n_blocks applications of the SAME ConvBlock ----------------
    gb, bb = bnp_ref[4:5, :], bnp_ref[5:6, :]
    cntb = float(B * H2 * W2)
    y_last = None
    for blk in range(n_blocks):
        acc = jnp.zeros((B * H2, NB), f32)
        for kh in range(3):
            patch = p2_ref[:, kh:kh + H2, :].reshape(B * H2, KPB)
            acc = acc + jnp.dot(patch, bandb_ref[kh * KPB:(kh + 1) * KPB, :],
                                preferred_element_type=f32)
        ssum = jnp.sum(acc, axis=0, keepdims=True)
        ssq = jnp.sum(acc * acc, axis=0, keepdims=True)
        sc_slab, sh_slab = bn_affine(ssum, ssq, ebt_ref[...], eb_ref[...], gb, bb, cntb)
        y = jnp.maximum(acc * sc_slab + sh_slab, 0.0)
        # TODO(synk): dropout2d identity (training-mode RNG not reproduced).
        if blk < n_blocks - 1:
            p2_ref[:, 1:1 + H2, ILANE:ILANE + NB] = y.reshape(B, H2, NB)
        else:
            y_last = y                                               # (B*H2, NB), stays in vregs

    # ---------------- stage 4: final 2x2 max-pool + fc1(+ReLU) + fc2 ----------------
    m = jnp.maximum(y_last[0:B * H2 - 1, :], y_last[1:B * H2, :])
    ph = jnp.dot(rh, m, preferred_element_type=f32)                  # (B*RP, NB)
    pw = jnp.maximum(jnp.dot(ph, s2e_ref[...], preferred_element_type=f32),
                     jnp.dot(ph, s2o_ref[...], preferred_element_type=f32))   # (B*RP, N4)
    pooled = pw.reshape(B, RP, N4)                                   # (B, 8, 128) lane-dense

    h = jnp.zeros((B, wfc1_ref.shape[1]), f32)
    for r in range(RP):                                              # NCHW->slab flatten folded
        h = h + jnp.dot(pooled[:, r, :], wfc1_ref[r * N4:(r + 1) * N4, :],
                        preferred_element_type=f32)
    h = jnp.maximum(h + bfc1_ref[...], 0.0)
    out_ref[...] = jnp.dot(h, wfc2_ref[...], preferred_element_type=f32) + bfc2_ref[...]


# ----------------------------- parameters (mirrors PyTorch __init__) -----------------------------
def init_params(key, n_chans=16, n_blocks=2, batch=2, height=32, width=32):
    c, h, w = n_chans, height, width
    h2, w2 = h // 2, w // 2
    assert h == 32 and w == 32 and 128 % c == 0
    keys = jax.random.split(key, 6)
    std1 = (2.0 / (3 * 3 * 3)) ** 0.5            # kaiming_normal_, fan_in = 3*3*3
    stdb = (2.0 / (c * 3 * 3)) ** 0.5            # kaiming_normal_, fan_in = C*3*3
    w1 = jax.random.normal(keys[0], (3, 3, 3, c), jnp.float32) * std1   # conv1 (KH,KW,Cin,Cout)
    wb = jax.random.normal(keys[1], (3, 3, c, c), jnp.float32) * stdb   # shared ConvBlock weight

    qb = 128 // c                                # interior starts on a 128-lane boundary
    band1 = _make_band(np.asarray(w1), out_w=w, q=1, padded_w=w + 2)
    bandb = _make_band(np.asarray(wb), out_w=w2, q=qb, padded_w=qb + w2 + 1)

    e1 = _make_expander(c, w)
    eb = _make_expander(c, w2)
    s1e, s1o = _make_col_pool(c, w)
    s2e, s2o = _make_col_pool(c, w2)
    rh = _make_row_pool(batch, h2)

    fan1 = c * (h // 4) * (w // 4)
    lim1 = 1.0 / fan1 ** 0.5
    lim2 = 1.0 / 32.0 ** 0.5
    # fc1 generated in PyTorch's NCHW-flatten row order, permuted so the kernel's
    # (h, w, c) slab flatten needs no runtime transpose (flatten folded into the weight).
    w_fc1_chw = jax.random.uniform(keys[2], (fan1, 32), jnp.float32, -lim1, lim1)
    w_fc1 = (w_fc1_chw.reshape(c, h // 4, w // 4, 32).transpose(1, 2, 0, 3).reshape(fan1, 32))

    bnp = jnp.stack([
        jnp.full((c,), 0.5, jnp.float32), jnp.zeros((c,), jnp.float32),   # conv1 block BN
        jnp.ones((c,), jnp.float32), jnp.zeros((c,), jnp.float32),        # bn1
        jnp.full((c,), 0.5, jnp.float32), jnp.zeros((c,), jnp.float32),   # shared block BN
    ])

    return dict(
        band1=jnp.asarray(band1), bandb=jnp.asarray(bandb), bnp=bnp,
        e1=jnp.asarray(e1), e1t=jnp.asarray(np.ascontiguousarray(e1.T)),
        eb=jnp.asarray(eb), ebt=jnp.asarray(np.ascontiguousarray(eb.T)),
        rh=jnp.asarray(rh),
        s1e=jnp.asarray(s1e), s1o=jnp.asarray(s1o),
        s2e=jnp.asarray(s2e), s2o=jnp.asarray(s2o),
        w_fc1=w_fc1,
        b_fc1=jax.random.uniform(keys[3], (1, 32), jnp.float32, -lim1, lim1),
        w_fc2=jax.random.uniform(keys[4], (32, N_CLASSES), jnp.float32, -lim2, lim2),
        b_fc2=jax.random.uniform(keys[5], (1, N_CLASSES), jnp.float32, -lim2, lim2),
    )


# ------------------------------------ full forward pass ------------------------------------
@functools.partial(jax.jit, static_argnames=("n_blocks",))
def convnet_forward(x_nchw, params, n_blocks=2):
    x = jnp.transpose(x_nchw, (0, 2, 3, 1)).astype(jnp.float32)           # NCHW -> NHWC
    B, H, W, Cin = x.shape
    xpad = jnp.pad(x, ((0, 0), (1, 1), (1, 1), (0, 0))).reshape(B, H + 2, (W + 2) * Cin)
    N1 = params["band1"].shape[1]
    KPB = params["bandb"].shape[0] // 3
    kernel = functools.partial(_convnet_kernel, n_blocks=n_blocks)
    return pl.pallas_call(
        kernel,
        out_shape=jax.ShapeDtypeStruct((B, N_CLASSES), jnp.float32),
        in_specs=[pl.BlockSpec(memory_space=pltpu.MemorySpace.VMEM)] * 17,
        out_specs=pl.BlockSpec(memory_space=pltpu.MemorySpace.VMEM),
        scratch_shapes=[
            pltpu.VMEM((B, H, N1), jnp.float32),            # conv1 output slab (lane dense)
            pltpu.VMEM((B, H // 2 + 2, KPB), jnp.float32),  # padded block-conv input slab
        ],
        compiler_params=pltpu.CompilerParams(vmem_limit_bytes=32 * 1024 * 1024),
    )(xpad, params["band1"], params["bandb"], params["bnp"],
      params["e1"], params["e1t"], params["eb"], params["ebt"], params["rh"],
      params["s1e"], params["s1o"], params["s2e"], params["s2o"],
      params["w_fc1"], params["b_fc1"], params["w_fc2"], params["b_fc2"])


if __name__ == "__main__":
    key = jax.random.PRNGKey(0)
    pkey, xkey = jax.random.split(key)
    params = init_params(pkey)
    # 32x32 spatial input is required by fc1 (n_chans * 8 * 8 after two 2x2 pools)
    x = jax.random.normal(xkey, (2, 3, 32, 32), jnp.float32)              # NCHW, like PyTorch
    out = jax.block_until_ready(convnet_forward(x, params))
    assert out.shape == (2, N_CLASSES) and out.dtype == jnp.float32
    print("KERNEL_OK")
</pallas_src>

<mosaic_0001>
module attributes {stable_mosaic.version = 11 : i64} {
  func.func @_convnet_kernel(%arg0: memref<2x34x102xf32, #tpu.memory_space<vmem>>, %arg1: memref<306x512xf32, #tpu.memory_space<vmem>>, %arg2: memref<1200x256xf32, #tpu.memory_space<vmem>>, %arg3: memref<6x16xf32, #tpu.memory_space<vmem>>, %arg4: memref<16x512xf32, #tpu.memory_space<vmem>>, %arg5: memref<512x16xf32, #tpu.memory_space<vmem>>, %arg6: memref<16x256xf32, #tpu.memory_space<vmem>>, %arg7: memref<256x16xf32, #tpu.memory_space<vmem>>, %arg8: memref<16x31xf32, #tpu.memory_space<vmem>>, %arg9: memref<512x256xf32, #tpu.memory_space<vmem>>, %arg10: memref<512x256xf32, #tpu.memory_space<vmem>>, %arg11: memref<256x128xf32, #tpu.memory_space<vmem>>, %arg12: memref<256x128xf32, #tpu.memory_space<vmem>>, %arg13: memref<1024x32xf32, #tpu.memory_space<vmem>>, %arg14: memref<1x32xf32, #tpu.memory_space<vmem>>, %arg15: memref<32x10xf32, #tpu.memory_space<vmem>>, %arg16: memref<1x10xf32, #tpu.memory_space<vmem>>, %arg17: memref<2x10xf32, #tpu.memory_space<vmem>>, %arg18: memref<2x32x512xf32, #tpu.memory_space<vmem>>, %arg19: memref<2x18x400xf32, #tpu.memory_space<vmem>>) attributes {dimension_semantics = [], scalar_prefetch = 0 : i64, scratch_operands = 2 : i64, tpu.core_type = #tpu.core_type<tc>} {
    %cst = arith.constant 0.000000e+00 : f32
    %0 = vector.broadcast %cst : f32 to vector<1x512xf32>
    %cst_0 = arith.constant 0.000000e+00 : f32
    %1 = vector.broadcast %cst_0 : f32 to vector<1x512xf32>
    %cst_1 = arith.constant 0.000000e+00 : f32
    %2 = vector.broadcast %cst_1 : f32 to vector<32x512xf32>
    %c0 = arith.constant 0 : index
    %c0_2 = arith.constant 0 : index
    %c0_3 = arith.constant 0 : index
    %3 = vector.load %arg0[%c0, %c0_2, %c0_3] : memref<2x34x102xf32, #tpu.memory_space<vmem>>, vector<2x16x102xf32>
    %4 = vector.shape_cast %3 : vector<2x16x102xf32> to vector<32x102xf32>
    %c0_4 = arith.constant 0 : index
    %c0_5 = arith.constant 0 : index
    %5 = vector.load %arg1[%c0_4, %c0_5] : memref<306x512xf32, #tpu.memory_space<vmem>>, vector<102x512xf32>
    %cst_6 = arith.constant dense<0.000000e+00> : vector<32x512xf32>
    %6 = tpu.matmul %4, %5, %cst_6 {dimension_numbers = #tpu.dot_dimension_numbers<[1], [0], [0], [1], [0, 0, 1, 1], [], []>} : vector<32x102xf32>, vector<102x512xf32>, vector<32x512xf32> -> vector<32x512xf32>
    %7 = arith.addf %2, %6 : vector<32x512xf32>
    %c0_7 = arith.constant 0 : index
    %c1 = arith.constant 1 : index
    %c0_8 = arith.constant 0 : index
    %8 = vector.load %arg0[%c0_7, %c1, %c0_8] : memref<2x34x102xf32, #tpu.memory_space<vmem>>, vector<2x16x102xf32>
    %9 = vector.shape_cast %8 : vector<2x16x102xf32> to vector<32x102xf32>
    %c102 = arith.constant 102 : index
    %c0_9 = arith.constant 0 : index
    %10 = vector.load %arg1[%c102, %c0_9] : memref<306x512xf32, #tpu.memory_space<vmem>>, vector<102x512xf32>
    %cst_10 = arith.constant dense<0.000000e+00> : vector<32x512xf32>
    %11 = tpu.matmul %9, %10, %cst_10 {dimension_numbers = #tpu.dot_dimension_numbers<[1], [0], [0], [1], [0, 0, 1, 1], [], []>} : vector<32x102xf32>, vector<102x512xf32>, vector<32x512xf32> -> vector<32x512xf32>
    %12 = arith.addf %7, %11 : vector<32x512xf32>
    %c0_11 = arith.constant 0 : index
    %c2 = arith.constant 2 : index
    %c0_12 = arith.constant 0 : index
    %13 = vector.load %arg0[%c0_11, %c2, %c0_12] : memref<2x34x102xf32, #tpu.memory_space<vmem>>, vector<2x16x102xf32>
    %14 = vector.shape_cast %13 : vector<2x16x102xf32> to vector<32x102xf32>
    %c204 = arith.constant 204 : index
    %c0_13 = arith.constant 0 : index
    %15 = vector.load %arg1[%c204, %c0_13] : memref<306x512xf32, #tpu.memory_space<vmem>>, vector<102x512xf32>
    %cst_14 = arith.constant dense<0.000000e+00> : vector<32x512xf32>
    %16 = tpu.matmul %14, %15, %cst_14 {dimension_numbers = #tpu.dot_dimension_numbers<[1], [0], [0], [1], [0, 0, 1, 1], [], []>} : vector<32x102xf32>, vector<102x512xf32>, vector<32x512xf32> -> vector<32x512xf32>
    %17 = arith.addf %12, %16 : vector<32x512xf32>
    %18 = vector.shape_cast %17 : vector<32x512xf32> to vector<2x16x512xf32>
    %c0_15 = arith.constant 0 : index
    %c0_16 = arith.constant 0 : index
    %c0_17 = arith.constant 0 : index
    %19 = vector.load %arg18[%c0_15, %c0_16, %c0_17] : memref<2x32x512xf32, #tpu.memory_space<vmem>>, vector<2x16x512xf32>
    tpu.vector_store %arg18[%c0_15, %c0_16, %c0_17], %18 {strides = array<i32>} : memref<2x32x512xf32, #tpu.memory_space<vmem>>, vector<2x16x512xf32>,
    %cst_18 = arith.constant dense<0.000000e+00> : vector<512xf32>
    %20 = vector.multi_reduction <add>, %17, %cst_18 [0] : vector<32x512xf32> to vector<512xf32>
    %21 = vector.shape_cast %20 : vector<512xf32> to vector<1x512xf32>
    %22 = arith.addf %0, %21 : vector<1x512xf32>
    %23 = arith.mulf %17, %17 : vector<32x512xf32>
    %cst_19 = arith.constant dense<0.000000e+00> : vector<512xf32>
    %24 = vector.multi_reduction <add>, %23, %cst_19 [0] : vector<32x512xf32> to vector<512xf32>
    %25 = vector.shape_cast %24 : vector<512xf32> to vector<1x512xf32>
    %26 = arith.addf %1, %25 : vector<1x512xf32>
    %cst_20 = arith.constant 0.000000e+00 : f32
    %27 = vector.broadcast %cst_20 : f32 to vector<32x512xf32>
    %c0_21 = arith.constant 0 : index
    %c16 = arith.constant 16 : index
    %c0_22 = arith.constant 0 : index
    %28 = vector.load %arg0[%c0_21, %c16, %c0_22] : memref<2x34x102xf32, #tpu.memory_space<vmem>>, vector<2x16x102xf32>
    %29 = vector.shape_cast %28 : vector<2x16x102xf32> to vector<32x102xf32>
    %c0_23 = arith.constant 0 : index
    %c0_24 = arith.constant 0 : index
    %30 = vector.load %arg1[%c0_23, %c0_24] : memref<306x512xf32, #tpu.memory_space<vmem>>, vector<102x512xf32>
    %cst_25 = arith.constant dense<0.000000e+00> : vector<32x512xf32>
    %31 = tpu.matmul %29, %30, %cst_25 {dimension_numbers = #tpu.dot_dimension_numbers<[1], [0], [0], [1], [0, 0, 1, 1], [], []>} : vector<32x102xf32>, vector<102x512xf32>, vector<32x512xf32> -> vector<32x512xf32>
    %32 = arith.addf %27, %31 : vector<32x512xf32>
    %c0_26 = arith.constant 0 : index
    %c17 = arith.constant 17 : index
    %c0_27 = arith.constant 0 : index
    %33 = vector.load %arg0[%c0_26, %c17, %c0_27] : memref<2x34x102xf32, #tpu.memory_space<vmem>>, vector<2x16x102xf32>
    %34 = vector.shape_cast %33 : vector<2x16x102xf32> to vector<32x102xf32>
    %c102_28 = arith.constant 102 : index
    %c0_29 = arith.constant 0 : index
    %35 = vector.load %arg1[%c102_28, %c0_29] : memref<306x512xf32, #tpu.memory_space<vmem>>, vector<102x512xf32>
    %cst_30 = arith.constant dense<0.000000e+00> : vector<32x512xf32>
    %36 = tpu.matmul %34, %35, %cst_30 {dimension_numbers = #tpu.dot_dimension_numbers<[1], [0], [0], [1], [0, 0, 1, 1], [], []>} : vector<32x102xf32>, vector<102x512xf32>, vector<32x512xf32> -> vector<32x512xf32>
    %37 = arith.addf %32, %36 : vector<32x512xf32>
    %c0_31 = arith.constant 0 : index
    %c18 = arith.constant 18 : index
    %c0_32 = arith.constant 0 : index
    %38 = vector.load %arg0[%c0_31, %c18, %c0_32] : memref<2x34x102xf32, #tpu.memory_space<vmem>>, vector<2x16x102xf32>
    %39 = vector.shape_cast %38 : vector<2x16x102xf32> to vector<32x102xf32>
    %c204_33 = arith.constant 204 : index
    %c0_34 = arith.constant 0 : index
    %40 = vector.load %arg1[%c204_33, %c0_34] : memref<306x512xf32, #tpu.memory_space<vmem>>, vector<102x512xf32>
    %cst_35 = arith.constant dense<0.000000e+00> : vector<32x512xf32>
    %41 = tpu.matmul %39, %40, %cst_35 {dimension_numbers = #tpu.dot_dimension_numbers<[1], [0], [0], [1], [0, 0, 1, 1], [], []>} : vector<32x102xf32>, vector<102x512xf32>, vector<32x512xf32> -> vector<32x512xf32>
    %42 = arith.addf %37, %41 : vector<32x512xf32>
    %43 = vector.shape_cast %42 : vector<32x512xf32> to vector<2x16x512xf32>
    %c0_36 = arith.constant 0 : index
    %c16_37 = arith.constant 16 : index
    %c0_38 = arith.constant 0 : index
    %44 = vector.load %arg18[%c0_36, %c16_37, %c0_38] : memref<2x32x512xf32, #tpu.memory_space<vmem>>, vector<2x16x512xf32>
    tpu.vector_store %arg18[%c0_36, %c16_37, %c0_38], %43 {strides = array<i32>} : memref<2x32x512xf32, #tpu.memory_space<vmem>>, vector<2x16x512xf32>,
    %cst_39 = arith.constant dense<0.000000e+00> : vector<512xf32>
    %45 = vector.multi_reduction <add>, %42, %cst_39 [0] : vector<32x512xf32> to vector<512xf32>
    %46 = vector.shape_cast %45 : vector<512xf32> to vector<1x512xf32>
    %47 = arith.addf %22, %46 : vector<1x512xf32>
    %48 = arith.mulf %42, %42 : vector<32x512xf32>
    %cst_40 = arith.constant dense<0.000000e+00> : vector<512xf32>
    %49 = vector.multi_reduction <add>, %48, %cst_40 [0] : vector<32x512xf32> to vector<512xf32>
    %50 = vector.shape_cast %49 : vector<512xf32> to vector<1x512xf32>
    %51 = arith.addf %26, %50 : vector<1x512xf32>
    %c0_41 = arith.constant 0 : index
    %c0_42 = arith.constant 0 : index
    %52 = vector.load %arg5[%c0_41, %c0_42] : memref<512x16xf32, #tpu.memory_space<vmem>>, vector<512x16xf32>
    %c0_43 = arith.constant 0 : index
    %c0_44 = arith.constant 0 : index
    %53 = vector.load %arg4[%c0_43, %c0_44] : memref<16x512xf32, #tpu.memory_space<vmem>>, vector<16x512xf32>
    %c0_45 = arith.constant 0 : index
    %c0_46 = arith.constant 0 : index
    %54 = vector.load %arg3[%c0_45, %c0_46] : memref<6x16xf32, #tpu.memory_space<vmem>>, vector<1x16xf32>
    %c1_47 = arith.constant 1 : index
    %c0_48 = arith.constant 0 : index
    %55 = vector.load %arg3[%c1_47, %c0_48] : memref<6x16xf32, #tpu.memory_space<vmem>>, vector<1x16xf32>
    %56 = tpu.concatenate %47, %51 in 0 : vector<1x512xf32>, vector<1x512xf32> -> vector<2x512xf32>
    %cst_49 = arith.constant dense<0.000000e+00> : vector<2x16xf32>
    %57 = tpu.matmul %56, %52, %cst_49 {dimension_numbers = #tpu.dot_dimension_numbers<[1], [0], [0], [1], [0, 0, 1, 1], [], []>} : vector<2x512xf32>, vector<512x16xf32>, vector<2x16xf32> -> vector<2x16xf32>
    %58 = vector.extract_strided_slice %57 {offsets = [0, 0], sizes = [1, 16], strides = [1, 1]} : vector<2x16xf32> to vector<1x16xf32>
    %cst_50 = arith.constant 4.8828125E-4 : f32
    %59 = vector.broadcast %cst_50 : f32 to vector<1x16xf32>
    %60 = arith.mulf %58, %59 : vector<1x16xf32>
    %61 = vector.extract_strided_slice %57 {offsets = [1, 0], sizes = [1, 16], strides = [1, 1]} : vector<2x16xf32> to vector<1x16xf32>
    %cst_51 = arith.constant 4.8828125E-4 : f32
    %62 = vector.broadcast %cst_51 : f32 to vector<1x16xf32>
    %63 = arith.mulf %61, %62 : vector<1x16xf32>
    %64 = arith.mulf %60, %60 : vector<1x16xf32>
    %65 = arith.subf %63, %64 : vector<1x16xf32>
    %cst_52 = arith.constant 9.99999974E-6 : f32
    %66 = vector.broadcast %cst_52 : f32 to vector<1x16xf32>
    %67 = arith.addf %65, %66 : vector<1x16xf32>
    %68 = math.rsqrt %67 : vector<1x16xf32>
    %69 = arith.mulf %54, %68 : vector<1x16xf32>
    %70 = arith.mulf %60, %69 : vector<1x16xf32>
    %71 = arith.subf %55, %70 : vector<1x16xf32>
    %72 = tpu.concatenate %69, %71 in 0 : vector<1x16xf32>, vector<1x16xf32> -> vector<2x16xf32>
    %cst_53 = arith.constant dense<0.000000e+00> : vector<2x512xf32>
    %73 = tpu.matmul %72, %53, %cst_53 {dimension_numbers = #tpu.dot_dimension_numbers<[1], [0], [0], [1], [0, 0, 1, 1], [], []>} : vector<2x16xf32>, vector<16x512xf32>, vector<2x512xf32> -> vector<2x512xf32>
    %74 = vector.extract_strided_slice %73 {offsets = [0, 0], sizes = [1, 512], strides = [1, 1]} : vector<2x512xf32> to vector<1x512xf32>
    %75 = vector.extract_strided_slice %73 {offsets = [1, 0], sizes = [1, 512], strides = [1, 1]} : vector<2x512xf32> to vector<1x512xf32>
    %cst_54 = arith.constant 0.000000e+00 : f32
    %76 = vector.broadcast %cst_54 : f32 to vector<2x18x400xf32>
    %c0_55 = arith.constant 0 : index
    %c0_56 = arith.constant 0 : index
    %c0_57 = arith.constant 0 : index
    %77 = vector.load %arg19[%c0_55, %c0_56, %c0_57] : memref<2x18x400xf32, #tpu.memory_space<vmem>>, vector<2x18x400xf32>
    tpu.vector_store %arg19[%c0_55, %c0_56, %c0_57], %76 {strides = array<i32>} : memref<2x18x400xf32, #tpu.memory_space<vmem>>, vector<2x18x400xf32>,
    %c0_58 = arith.constant 0 : index
    %c0_59 = arith.constant 0 : index
    %78 = vector.load %arg8[%c0_58, %c0_59] : memref<16x31xf32, #tpu.memory_space<vmem>>, vector<16x31xf32>
    %cst_60 = arith.constant 0.000000e+00 : f32
    %79 = vector.broadcast %cst_60 : f32 to vector<1x512xf32>
    %cst_61 = arith.constant 0.000000e+00 : f32
    %80 = vector.broadcast %cst_61 : f32 to vector<1x512xf32>
    %c0_62 = arith.constant 0 : index
    %c0_63 = arith.constant 0 : index
    %c0_64 = arith.constant 0 : index
    %81 = vector.load %arg18[%c0_62, %c0_63, %c0_64] : memref<2x32x512xf32, #tpu.memory_space<vmem>>, vector<2x16x512xf32>
    %82 = vector.shape_cast %81 : vector<2x16x512xf32> to vector<32x512xf32>
    %83 = vector.broadcast %74 : vector<1x512xf32> to vector<32x512xf32>
    %84 = arith.mulf %82, %83 : vector<32x512xf32>
    %85 = vector.broadcast %75 : vector<1x512xf32> to vector<32x512xf32>
    %86 = arith.addf %84, %85 : vector<32x512xf32>
    %cst_65 = arith.constant 0.000000e+00 : f32
    %87 = vector.broadcast %cst_65 : f32 to vector<32x512xf32>
    %88 = arith.maximumf %86, %87 : vector<32x512xf32>
    %cst_66 = arith.constant dense<0.000000e+00> : vector<512xf32>
    %89 = vector.multi_reduction <add>, %88, %cst_66 [0] : vector<32x512xf32> to vector<512xf32>
    %90 = vector.shape_cast %89 : vector<512xf32> to vector<1x512xf32>
    %91 = arith.addf %79, %90 : vector<1x512xf32>
    %92 = arith.mulf %88, %88 : vector<32x512xf32>
    %cst_67 = arith.constant dense<0.000000e+00> : vector<512xf32>
    %93 = vector.multi_reduction <add>, %92, %cst_67 [0] : vector<32x512xf32> to vector<512xf32>
    %94 = vector.shape_cast %93 : vector<512xf32> to vector<1x512xf32>
    %95 = arith.addf %80, %94 : vector<1x512xf32>
    %96 = vector.extract_strided_slice %88 {offsets = [0, 0], sizes = [31, 512], strides = [1, 1]} : vector<32x512xf32> to vector<31x512xf32>
    %97 = vector.extract_strided_slice %88 {offsets = [1, 0], sizes = [31, 512], strides = [1, 1]} : vector<32x512xf32> to vector<31x512xf32>
    %98 = arith.maximumf %96, %97 : vector<31x512xf32>
    %cst_68 = arith.constant dense<0.000000e+00> : vector<16x512xf32>
    %99 = tpu.matmul %78, %98, %cst_68 {dimension_numbers = #tpu.dot_dimension_numbers<[1], [0], [0], [1], [0, 0, 1, 1], [], []>} : vector<16x31xf32>, vector<31x512xf32>, vector<16x512xf32> -> vector<16x512xf32>
    %c0_69 = arith.constant 0 : index
    %c0_70 = arith.constant 0 : index
    %100 = vector.load %arg9[%c0_69, %c0_70] : memref<512x256xf32, #tpu.memory_space<vmem>>, vector<512x256xf32>
    %cst_71 = arith.constant dense<0.000000e+00> : vector<16x256xf32>
    %101 = tpu.matmul %99, %100, %cst_71 {dimension_numbers = #tpu.dot_dimension_numbers<[1], [0], [0], [1], [0, 0, 1, 1], [], []>} : vector<16x512xf32>, vector<512x256xf32>, vector<16x256xf32> -> vector<16x256xf32>
    %c0_72 = arith.constant 0 : index
    %c0_73 = arith.constant 0 : index
    %102 = vector.load %arg10[%c0_72, %c0_73] : memref<512x256xf32, #tpu.memory_space<vmem>>, vector<512x256xf32>
    %cst_74 = arith.constant dense<0.000000e+00> : vector<16x256xf32>
    %103 = tpu.matmul %99, %102, %cst_74 {dimension_numbers = #tpu.dot_dimension_numbers<[1], [0], [0], [1], [0, 0, 1, 1], [], []>} : vector<16x512xf32>, vector<512x256xf32>, vector<16x256xf32> -> vector<16x256xf32>
    %104 = arith.maximumf %101, %103 : vector<16x256xf32>
    %c0_75 = arith.constant 0 : index
    %c16_76 = arith.constant 16 : index
    %c0_77 = arith.constant 0 : index
    %105 = vector.load %arg18[%c0_75, %c16_76, %c0_77] : memref<2x32x512xf32, #tpu.memory_space<vmem>>, vector<2x16x512xf32>
    %106 = vector.shape_cast %105 : vector<2x16x512xf32> to vector<32x512xf32>
    %107 = vector.broadcast %74 : vector<1x512xf32> to vector<32x512xf32>
    %108 = arith.mulf %106, %107 : vector<32x512xf32>
    %109 = vector.broadcast %75 : vector<1x512xf32> to vector<32x512xf32>
    %110 = arith.addf %108, %109 : vector<32x512xf32>
    %cst_78 = arith.constant 0.000000e+00 : f32
    %111 = vector.broadcast %cst_78 : f32 to vector<32x512xf32>
    %112 = arith.maximumf %110, %111 : vector<32x512xf32>
    %cst_79 = arith.constant dense<0.000000e+00> : vector<512xf32>
    %113 = vector.multi_reduction <add>, %112, %cst_79 [0] : vector<32x512xf32> to vector<512xf32>
    %114 = vector.shape_cast %113 : vector<512xf32> to vector<1x512xf32>
    %115 = arith.addf %91, %114 : vector<1x512xf32>
    %116 = arith.mulf %112, %112 : vector<32x512xf32>
    %cst_80 = arith.constant dense<0.000000e+00> : vector<512xf32>
    %117 = vector.multi_reduction <add>, %116, %cst_80 [0] : vector<32x512xf32> to vector<512xf32>
    %118 = vector.shape_cast %117 : vector<512xf32> to vector<1x512xf32>
    %119 = arith.addf %95, %118 : vector<1x512xf32>
    %120 = vector.extract_strided_slice %112 {offsets = [0, 0], sizes = [31, 512], strides = [1, 1]} : vector<32x512xf32> to vector<31x512xf32>
    %121 = vector.extract_strided_slice %112 {offsets = [1, 0], sizes = [31, 512], strides = [1, 1]} : vector<32x512xf32> to vector<31x512xf32>
    %122 = arith.maximumf %120, %121 : vector<31x512xf32>
    %cst_81 = arith.constant dense<0.000000e+00> : vector<16x512xf32>
    %123 = tpu.matmul %78, %122, %cst_81 {dimension_numbers = #tpu.dot_dimension_numbers<[1], [0], [0], [1], [0, 0, 1, 1], [], []>} : vector<16x31xf32>, vector<31x512xf32>, vector<16x512xf32> -> vector<16x512xf32>
    %c0_82 = arith.constant 0 : index
    %c0_83 = arith.constant 0 : index
    %124 = vector.load %arg9[%c0_82, %c0_83] : memref<512x256xf32, #tpu.memory_space<vmem>>, vector<512x256xf32>
    %cst_84 = arith.constant dense<0.000000e+00> : vector<16x256xf32>
    %125 = tpu.matmul %123, %124, %cst_84 {dimension_numbers = #tpu.dot_dimension_numbers<[1], [0], [0], [1], [0, 0, 1, 1], [], []>} : vector<16x512xf32>, vector<512x256xf32>, vector<16x256xf32> -> vector<16x256xf32>
    %c0_85 = arith.constant 0 : index
    %c0_86 = arith.constant 0 : index
    %126 = vector.load %arg10[%c0_85, %c0_86] : memref<512x256xf32, #tpu.memory_space<vmem>>, vector<512x256xf32>
    %cst_87 = arith.constant dense<0.000000e+00> : vector<16x256xf32>
    %127 = tpu.matmul %123, %126, %cst_87 {dimension_numbers = #tpu.dot_dimension_numbers<[1], [0], [0], [1], [0, 0, 1, 1], [], []>} : vector<16x512xf32>, vector<512x256xf32>, vector<16x256xf32> -> vector<16x256xf32>
    %128 = arith.maximumf %125, %127 : vector<16x256xf32>
    %c0_88 = arith.constant 0 : index
    %c0_89 = arith.constant 0 : index
    %129 = vector.load %arg5[%c0_88, %c0_89] : memref<512x16xf32, #tpu.memory_space<vmem>>, vector<512x16xf32>
    %c0_90 = arith.constant 0 : index
    %c0_91 = arith.constant 0 : index
    %130 = vector.load %arg6[%c0_90, %c0_91] : memref<16x256xf32, #tpu.memory_space<vmem>>, vector<16x256xf32>
    %c2_92 = arith.constant 2 : index
    %c0_93 = arith.constant 0 : index
    %131 = vector.load %arg3[%c2_92, %c0_93] : memref<6x16xf32, #tpu.memory_space<vmem>>, vector<1x16xf32>
    %c3 = arith.constant 3 : index
    %c0_94 = arith.constant 0 : index
    %132 = vector.load %arg3[%c3, %c0_94] : memref<6x16xf32, #tpu.memory_space<vmem>>, vector<1x16xf32>
    %133 = tpu.concatenate %115, %119 in 0 : vector<1x512xf32>, vector<1x512xf32> -> vector<2x512xf32>
    %cst_95 = arith.constant dense<0.000000e+00> : vector<2x16xf32>
    %134 = tpu.matmul %133, %129, %cst_95 {dimension_numbers = #tpu.dot_dimension_numbers<[1], [0], [0], [1], [0, 0, 1, 1], [], []>} : vector<2x512xf32>, vector<512x16xf32>, vector<2x16xf32> -> vector<2x16xf32>
    %135 = vector.extract_strided_slice %134 {offsets = [0, 0], sizes = [1, 16], strides = [1, 1]} : vector<2x16xf32> to vector<1x16xf32>
    %cst_96 = arith.constant 4.8828125E-4 : f32
    %136 = vector.broadcast %cst_96 : f32 to vector<1x16xf32>
    %137 = arith.mulf %135, %136 : vector<1x16xf32>
    %138 = vector.extract_strided_slice %134 {offsets = [1, 0], sizes = [1, 16], strides = [1, 1]} : vector<2x16xf32> to vector<1x16xf32>
    %cst_97 = arith.constant 4.8828125E-4 : f32
    %139 = vector.broadcast %cst_97 : f32 to vector<1x16xf32>
    %140 = arith.mulf %138, %139 : vector<1x16xf32>
    %141 = arith.mulf %137, %137 : vector<1x16xf32>
    %142 = arith.subf %140, %141 : vector<1x16xf32>
    %cst_98 = arith.constant 9.99999974E-6 : f32
    %143 = vector.broadcast %cst_98 : f32 to vector<1x16xf32>
    %144 = arith.addf %142, %143 : vector<1x16xf32>
    %145 = math.rsqrt %144 : vector<1x16xf32>
    %146 = arith.mulf %131, %145 : vector<1x16xf32>
    %147 = arith.mulf %137, %146 : vector<1x16xf32>
    %148 = arith.subf %132, %147 : vector<1x16xf32>
    %149 = tpu.concatenate %146, %148 in 0 : vector<1x16xf32>, vector<1x16xf32> -> vector<2x16xf32>
    %cst_99 = arith.constant dense<0.000000e+00> : vector<2x256xf32>
    %150 = tpu.matmul %149, %130, %cst_99 {dimension_numbers = #tpu.dot_dimension_numbers<[1], [0], [0], [1], [0, 0, 1, 1], [], []>} : vector<2x16xf32>, vector<16x256xf32>, vector<2x256xf32> -> vector<2x256xf32>
    %151 = vector.extract_strided_slice %150 {offsets = [0, 0], sizes = [1, 256], strides = [1, 1]} : vector<2x256xf32> to vector<1x256xf32>
    %152 = vector.extract_strided_slice %150 {offsets = [1, 0], sizes = [1, 256], strides = [1, 1]} : vector<2x256xf32> to vector<1x256xf32>
    %153 = vector.broadcast %151 : vector<1x256xf32> to vector<16x256xf32>
    %154 = arith.mulf %104, %153 : vector<16x256xf32>
    %155 = vector.broadcast %152 : vector<1x256xf32> to vector<16x256xf32>
    %156 = arith.addf %154, %155 : vector<16x256xf32>
    %cst_100 = arith.constant 0.000000e+00 : f32
    %157 = vector.broadcast %cst_100 : f32 to vector<16x256xf32>
    %158 = arith.maximumf %156, %157 : vector<16x256xf32>
    %159 = vector.shape_cast %158 : vector<16x256xf32> to vector<2x8x256xf32>
    %c0_101 = arith.constant 0 : index
    %c1_102 = arith.constant 1 : index
    %c128 = arith.constant 128 : index
    %160 = vector.load %arg19[%c0_101, %c1_102, %c128] : memref<2x18x400xf32, #tpu.memory_space<vmem>>, vector<2x8x256xf32>
    tpu.vector_store %arg19[%c0_101, %c1_102, %c128], %159 {strides = array<i32>} : memref<2x18x400xf32, #tpu.memory_space<vmem>>, vector<2x8x256xf32>,
    %161 = vector.broadcast %151 : vector<1x256xf32> to vector<16x256xf32>
    %162 = arith.mulf %128, %161 : vector<16x256xf32>
    %163 = vector.broadcast %152 : vector<1x256xf32> to vector<16x256xf32>
    %164 = arith.addf %162, %163 : vector<16x256xf32>
    %cst_103 = arith.constant 0.000000e+00 : f32
    %165 = vector.broadcast %cst_103 : f32 to vector<16x256xf32>
    %166 = arith.maximumf %164, %165 : vector<16x256xf32>
    %167 = vector.shape_cast %166 : vector<16x256xf32> to vector<2x8x256xf32>
    %c0_104 = arith.constant 0 : index
    %c9 = arith.constant 9 : index
    %c128_105 = arith.constant 128 : index
    %168 = vector.load %arg19[%c0_104, %c9, %c128_105] : memref<2x18x400xf32, #tpu.memory_space<vmem>>, vector<2x8x256xf32>
    tpu.vector_store %arg19[%c0_104, %c9, %c128_105], %167 {strides = array<i32>} : memref<2x18x400xf32, #tpu.memory_space<vmem>>, vector<2x8x256xf32>,
    %c4 = arith.constant 4 : index
    %c0_106 = arith.constant 0 : index
    %169 = vector.load %arg3[%c4, %c0_106] : memref<6x16xf32, #tpu.memory_space<vmem>>, vector<1x16xf32>
    %c5 = arith.constant 5 : index
    %c0_107 = arith.constant 0 : index
    %170 = vector.load %arg3[%c5, %c0_107] : memref<6x16xf32, #tpu.memory_space<vmem>>, vector<1x16xf32>
    %cst_108 = arith.constant 0.000000e+00 : f32
    %171 = vector.broadcast %cst_108 : f32 to vector<32x256xf32>
    %c0_109 = arith.constant 0 : index
    %c0_110 = arith.constant 0 : index
    %c0_111 = arith.constant 0 : index
    %172 = vector.load %arg19[%c0_109, %c0_110, %c0_111] : memref<2x18x400xf32, #tpu.memory_space<vmem>>, vector<2x16x400xf32>
    %173 = vector.shape_cast %172 : vector<2x16x400xf32> to vector<32x400xf32>
    %c0_112 = arith.constant 0 : index
    %c0_113 = arith.constant 0 : index
    %174 = vector.load %arg2[%c0_112, %c0_113] : memref<1200x256xf32, #tpu.memory_space<vmem>>, vector<400x256xf32>
    %cst_114 = arith.constant dense<0.000000e+00> : vector<32x256xf32>
    %175 = tpu.matmul %173, %174, %cst_114 {dimension_numbers = #tpu.dot_dimension_numbers<[1], [0], [0], [1], [0, 0, 1, 1], [], []>} : vector<32x400xf32>, vector<400x256xf32>, vector<32x256xf32> -> vector<32x256xf32>
    %176 = arith.addf %171, %175 : vector<32x256xf32>
    %c0_115 = arith.constant 0 : index
    %c1_116 = arith.constant 1 : index
    %c0_117 = arith.constant 0 : index
    %177 = vector.load %arg19[%c0_115, %c1_116, %c0_117] : memref<2x18x400xf32, #tpu.memory_space<vmem>>, vector<2x16x400xf32>
    %178 = vector.shape_cast %177 : vector<2x16x400xf32> to vector<32x400xf32>
    %c400 = arith.constant 400 : index
    %c0_118 = arith.constant 0 : index
    %179 = vector.load %arg2[%c400, %c0_118] : memref<1200x256xf32, #tpu.memory_space<vmem>>, vector<400x256xf32>
    %cst_119 = arith.constant dense<0.000000e+00> : vector<32x256xf32>
    %180 = tpu.matmul %178, %179, %cst_119 {dimension_numbers = #tpu.dot_dimension_numbers<[1], [0], [0], [1], [0, 0, 1, 1], [], []>} : vector<32x400xf32>, vector<400x256xf32>, vector<32x256xf32> -> vector<32x256xf32>
    %181 = arith.addf %176, %180 : vector<32x256xf32>
    %c0_120 = arith.constant 0 : index
    %c2_121 = arith.constant 2 : index
    %c0_122 = arith.constant 0 : index
    %182 = vector.load %arg19[%c0_120, %c2_121, %c0_122] : memref<2x18x400xf32, #tpu.memory_space<vmem>>, vector<2x16x400xf32>
    %183 = vector.shape_cast %182 : vector<2x16x400xf32> to vector<32x400xf32>
    %c800 = arith.constant 800 : index
    %c0_123 = arith.constant 0 : index
    %184 = vector.load %arg2[%c800, %c0_123] : memref<1200x256xf32, #tpu.memory_space<vmem>>, vector<400x256xf32>
    %cst_124 = arith.constant dense<0.000000e+00> : vector<32x256xf32>
    %185 = tpu.matmul %183, %184, %cst_124 {dimension_numbers = #tpu.dot_dimension_numbers<[1], [0], [0], [1], [0, 0, 1, 1], [], []>} : vector<32x400xf32>, vector<400x256xf32>, vector<32x256xf32> -> vector<32x256xf32>
    %186 = arith.addf %181, %185 : vector<32x256xf32>
    %cst_125 = arith.constant dense<0.000000e+00> : vector<256xf32>
    %187 = vector.multi_reduction <add>, %186, %cst_125 [0] : vector<32x256xf32> to vector<256xf32>
    %188 = vector.shape_cast %187 : vector<256xf32> to vector<1x256xf32>
    %189 = arith.mulf %186, %186 : vector<32x256xf32>
    %cst_126 = arith.constant dense<0.000000e+00> : vector<256xf32>
    %190 = vector.multi_reduction <add>, %189, %cst_126 [0] : vector<32x256xf32> to vector<256xf32>
    %191 = vector.shape_cast %190 : vector<256xf32> to vector<1x256xf32>
    %c0_127 = arith.constant 0 : index
    %c0_128 = arith.constant 0 : index
    %192 = vector.load %arg7[%c0_127, %c0_128] : memref<256x16xf32, #tpu.memory_space<vmem>>, vector<256x16xf32>
    %c0_129 = arith.constant 0 : index
    %c0_130 = arith.constant 0 : index
    %193 = vector.load %arg6[%c0_129, %c0_130] : memref<16x256xf32, #tpu.memory_space<vmem>>, vector<16x256xf32>
    %194 = tpu.concatenate %188, %191 in 0 : vector<1x256xf32>, vector<1x256xf32> -> vector<2x256xf32>
    %cst_131 = arith.constant dense<0.000000e+00> : vector<2x16xf32>
    %195 = tpu.matmul %194, %192, %cst_131 {dimension_numbers = #tpu.dot_dimension_numbers<[1], [0], [0], [1], [0, 0, 1, 1], [], []>} : vector<2x256xf32>, vector<256x16xf32>, vector<2x16xf32> -> vector<2x16xf32>
    %196 = vector.extract_strided_slice %195 {offsets = [0, 0], sizes = [1, 16], strides = [1, 1]} : vector<2x16xf32> to vector<1x16xf32>
    %cst_132 = arith.constant 0.001953125 : f32
    %197 = vector.broadcast %cst_132 : f32 to vector<1x16xf32>
    %198 = arith.mulf %196, %197 : vector<1x16xf32>
    %199 = vector.extract_strided_slice %195 {offsets = [1, 0], sizes = [1, 16], strides = [1, 1]} : vector<2x16xf32> to vector<1x16xf32>
    %cst_133 = arith.constant 0.001953125 : f32
    %200 = vector.broadcast %cst_133 : f32 to vector<1x16xf32>
    %201 = arith.mulf %199, %200 : vector<1x16xf32>
    %202 = arith.mulf %198, %198 : vector<1x16xf32>
    %203 = arith.subf %201, %202 : vector<1x16xf32>
    %cst_134 = arith.constant 9.99999974E-6 : f32
    %204 = vector.broadcast %cst_134 : f32 to vector<1x16xf32>
    %205 = arith.addf %203, %204 : vector<1x16xf32>
    %206 = math.rsqrt %205 : vector<1x16xf32>
    %207 = arith.mulf %169, %206 : vector<1x16xf32>
    %208 = arith.mulf %198, %207 : vector<1x16xf32>
    %209 = arith.subf %170, %208 : vector<1x16xf32>
    %210 = tpu.concatenate %207, %209 in 0 : vector<1x16xf32>, vector<1x16xf32> -> vector<2x16xf32>
    %cst_135 = arith.constant dense<0.000000e+00> : vector<2x256xf32>
    %211 = tpu.matmul %210, %193, %cst_135 {dimension_numbers = #tpu.dot_dimension_numbers<[1], [0], [0], [1], [0, 0, 1, 1], [], []>} : vector<2x16xf32>, vector<16x256xf32>, vector<2x256xf32> -> vector<2x256xf32>
    %212 = vector.extract_strided_slice %211 {offsets = [0, 0], sizes = [1, 256], strides = [1, 1]} : vector<2x256xf32> to vector<1x256xf32>
    %213 = vector.extract_strided_slice %211 {offsets = [1, 0], sizes = [1, 256], strides = [1, 1]} : vector<2x256xf32> to vector<1x256xf32>
    %214 = vector.broadcast %212 : vector<1x256xf32> to vector<32x256xf32>
    %215 = arith.mulf %186, %214 : vector<32x256xf32>
    %216 = vector.broadcast %213 : vector<1x256xf32> to vector<32x256xf32>
    %217 = arith.addf %215, %216 : vector<32x256xf32>
    %cst_136 = arith.constant 0.000000e+00 : f32
    %218 = vector.broadcast %cst_136 : f32 to vector<32x256xf32>
    %219 = arith.maximumf %217, %218 : vector<32x256xf32>
    %220 = vector.shape_cast %219 : vector<32x256xf32> to vector<2x16x256xf32>
    %c0_137 = arith.constant 0 : index
    %c1_138 = arith.constant 1 : index
    %c128_139 = arith.constant 128 : index
    %221 = vector.load %arg19[%c0_137, %c1_138, %c128_139] : memref<2x18x400xf32, #tpu.memory_space<vmem>>, vector<2x16x256xf32>
    tpu.vector_store %arg19[%c0_137, %c1_138, %c128_139], %220 {strides = array<i32>} : memref<2x18x400xf32, #tpu.memory_space<vmem>>, vector<2x16x256xf32>,
    %cst_140 = arith.constant 0.000000e+00 : f32
    %222 = vector.broadcast %cst_140 : f32 to vector<32x256xf32>
    %c0_141 = arith.constant 0 : index
    %c0_142 = arith.constant 0 : index
    %c0_143 = arith.constant 0 : index
    %223 = vector.load %arg19[%c0_141, %c0_142, %c0_143] : memref<2x18x400xf32, #tpu.memory_space<vmem>>, vector<2x16x400xf32>
    %224 = vector.shape_cast %223 : vector<2x16x400xf32> to vector<32x400xf32>
    %c0_144 = arith.constant 0 : index
    %c0_145 = arith.constant 0 : index
    %225 = vector.load %arg2[%c0_144, %c0_145] : memref<1200x256xf32, #tpu.memory_space<vmem>>, vector<400x256xf32>
    %cst_146 = arith.constant dense<0.000000e+00> : vector<32x256xf32>
    %226 = tpu.matmul %224, %225, %cst_146 {dimension_numbers = #tpu.dot_dimension_numbers<[1], [0], [0], [1], [0, 0, 1, 1], [], []>} : vector<32x400xf32>, vector<400x256xf32>, vector<32x256xf32> -> vector<32x256xf32>
    %227 = arith.addf %222, %226 : vector<32x256xf32>
    %c0_147 = arith.constant 0 : index
    %c1_148 = arith.constant 1 : index
    %c0_149 = arith.constant 0 : index
    %228 = vector.load %arg19[%c0_147, %c1_148, %c0_149] : memref<2x18x400xf32, #tpu.memory_space<vmem>>, vector<2x16x400xf32>
    %229 = vector.shape_cast %228 : vector<2x16x400xf32> to vector<32x400xf32>
    %c400_150 = arith.constant 400 : index
    %c0_151 = arith.constant 0 : index
    %230 = vector.load %arg2[%c400_150, %c0_151] : memref<1200x256xf32, #tpu.memory_space<vmem>>, vector<400x256xf32>
    %cst_152 = arith.constant dense<0.000000e+00> : vector<32x256xf32>
    %231 = tpu.matmul %229, %230, %cst_152 {dimension_numbers = #tpu.dot_dimension_numbers<[1], [0], [0], [1], [0, 0, 1, 1], [], []>} : vector<32x400xf32>, vector<400x256xf32>, vector<32x256xf32> -> vector<32x256xf32>
    %232 = arith.addf %227, %231 : vector<32x256xf32>
    %c0_153 = arith.constant 0 : index
    %c2_154 = arith.constant 2 : index
    %c0_155 = arith.constant 0 : index
    %233 = vector.load %arg19[%c0_153, %c2_154, %c0_155] : memref<2x18x400xf32, #tpu.memory_space<vmem>>, vector<2x16x400xf32>
    %234 = vector.shape_cast %233 : vector<2x16x400xf32> to vector<32x400xf32>
    %c800_156 = arith.constant 800 : index
    %c0_157 = arith.constant 0 : index
    %235 = vector.load %arg2[%c800_156, %c0_157] : memref<1200x256xf32, #tpu.memory_space<vmem>>, vector<400x256xf32>
    %cst_158 = arith.constant dense<0.000000e+00> : vector<32x256xf32>
    %236 = tpu.matmul %234, %235, %cst_158 {dimension_numbers = #tpu.dot_dimension_numbers<[1], [0], [0], [1], [0, 0, 1, 1], [], []>} : vector<32x400xf32>, vector<400x256xf32>, vector<32x256xf32> -> vector<32x256xf32>
    %237 = arith.addf %232, %236 : vector<32x256xf32>
    %cst_159 = arith.constant dense<0.000000e+00> : vector<256xf32>
    %238 = vector.multi_reduction <add>, %237, %cst_159 [0] : vector<32x256xf32> to vector<256xf32>
    %239 = vector.shape_cast %238 : vector<256xf32> to vector<1x256xf32>
    %240 = arith.mulf %237, %237 : vector<32x256xf32>
    %cst_160 = arith.constant dense<0.000000e+00> : vector<256xf32>
    %241 = vector.multi_reduction <add>, %240, %cst_160 [0] : vector<32x256xf32> to vector<256xf32>
    %242 = vector.shape_cast %241 : vector<256xf32> to vector<1x256xf32>
    %c0_161 = arith.constant 0 : index
    %c0_162 = arith.constant 0 : index
    %243 = vector.load %arg7[%c0_161, %c0_162] : memref<256x16xf32, #tpu.memory_space<vmem>>, vector<256x16xf32>
    %c0_163 = arith.constant 0 : index
    %c0_164 = arith.constant 0 : index
    %244 = vector.load %arg6[%c0_163, %c0_164] : memref<16x256xf32, #tpu.memory_space<vmem>>, vector<16x256xf32>
    %245 = tpu.concatenate %239, %242 in 0 : vector<1x256xf32>, vector<1x256xf32> -> vector<2x256xf32>
    %cst_165 = arith.constant dense<0.000000e+00> : vector<2x16xf32>
    %246 = tpu.matmul %245, %243, %cst_165 {dimension_numbers = #tpu.dot_dimension_numbers<[1], [0], [0], [1], [0, 0, 1, 1], [], []>} : vector<2x256xf32>, vector<256x16xf32>, vector<2x16xf32> -> vector<2x16xf32>
    %247 = vector.extract_strided_slice %246 {offsets = [0, 0], sizes = [1, 16], strides = [1, 1]} : vector<2x16xf32> to vector<1x16xf32>
    %cst_166 = arith.constant 0.001953125 : f32
    %248 = vector.broadcast %cst_166 : f32 to vector<1x16xf32>
    %249 = arith.mulf %247, %248 : vector<1x16xf32>
    %250 = vector.extract_strided_slice %246 {offsets = [1, 0], sizes = [1, 16], strides = [1, 1]} : vector<2x16xf32> to vector<1x16xf32>
    %cst_167 = arith.constant 0.001953125 : f32
    %251 = vector.broadcast %cst_167 : f32 to vector<1x16xf32>
    %252 = arith.mulf %250, %251 : vector<1x16xf32>
    %253 = arith.mulf %249, %249 : vector<1x16xf32>
    %254 = arith.subf %252, %253 : vector<1x16xf32>
    %cst_168 = arith.constant 9.99999974E-6 : f32
    %255 = vector.broadcast %cst_168 : f32 to vector<1x16xf32>
    %256 = arith.addf %254, %255 : vector<1x16xf32>
    %257 = math.rsqrt %256 : vector<1x16xf32>
    %258 = arith.mulf %169, %257 : vector<1x16xf32>
    %259 = arith.mulf %249, %258 : vector<1x16xf32>
    %260 = arith.subf %170, %259 : vector<1x16xf32>
    %261 = tpu.concatenate %258, %260 in 0 : vector<1x16xf32>, vector<1x16xf32> -> vector<2x16xf32>
    %cst_169 = arith.constant dense<0.000000e+00> : vector<2x256xf32>
    %262 = tpu.matmul %261, %244, %cst_169 {dimension_numbers = #tpu.dot_dimension_numbers<[1], [0], [0], [1], [0, 0, 1, 1], [], []>} : vector<2x16xf32>, vector<16x256xf32>, vector<2x256xf32> -> vector<2x256xf32>
    %263 = vector.extract_strided_slice %262 {offsets = [0, 0], sizes = [1, 256], strides = [1, 1]} : vector<2x256xf32> to vector<1x256xf32>
    %264 = vector.extract_strided_slice %262 {offsets = [1, 0], sizes = [1, 256], strides = [1, 1]} : vector<2x256xf32> to vector<1x256xf32>
    %265 = vector.broadcast %263 : vector<1x256xf32> to vector<32x256xf32>
    %266 = arith.mulf %237, %265 : vector<32x256xf32>
    %267 = vector.broadcast %264 : vector<1x256xf32> to vector<32x256xf32>
    %268 = arith.addf %266, %267 : vector<32x256xf32>
    %cst_170 = arith.constant 0.000000e+00 : f32
    %269 = vector.broadcast %cst_170 : f32 to vector<32x256xf32>
    %270 = arith.maximumf %268, %269 : vector<32x256xf32>
    %271 = vector.extract_strided_slice %270 {offsets = [0, 0], sizes = [31, 256], strides = [1, 1]} : vector<32x256xf32> to vector<31x256xf32>
    %272 = vector.extract_strided_slice %270 {offsets = [1, 0], sizes = [31, 256], strides = [1, 1]} : vector<32x256xf32> to vector<31x256xf32>
    %273 = arith.maximumf %271, %272 : vector<31x256xf32>
    %cst_171 = arith.constant dense<0.000000e+00> : vector<16x256xf32>
    %274 = tpu.matmul %78, %273, %cst_171 {dimension_numbers = #tpu.dot_dimension_numbers<[1], [0], [0], [1], [0, 0, 1, 1], [], []>} : vector<16x31xf32>, vector<31x256xf32>, vector<16x256xf32> -> vector<16x256xf32>
    %c0_172 = arith.constant 0 : index
    %c0_173 = arith.constant 0 : index
    %275 = vector.load %arg11[%c0_172, %c0_173] : memref<256x128xf32, #tpu.memory_space<vmem>>, vector<256x128xf32>
    %cst_174 = arith.constant dense<0.000000e+00> : vector<16x128xf32>
    %276 = tpu.matmul %274, %275, %cst_174 {dimension_numbers = #tpu.dot_dimension_numbers<[1], [0], [0], [1], [0, 0, 1, 1], [], []>} : vector<16x256xf32>, vector<256x128xf32>, vector<16x128xf32> -> vector<16x128xf32>
    %c0_175 = arith.constant 0 : index
    %c0_176 = arith.constant 0 : index
    %277 = vector.load %arg12[%c0_175, %c0_176] : memref<256x128xf32, #tpu.memory_space<vmem>>, vector<256x128xf32>
    %cst_177 = arith.constant dense<0.000000e+00> : vector<16x128xf32>
    %278 = tpu.matmul %274, %277, %cst_177 {dimension_numbers = #tpu.dot_dimension_numbers<[1], [0], [0], [1], [0, 0, 1, 1], [], []>} : vector<16x256xf32>, vector<256x128xf32>, vector<16x128xf32> -> vector<16x128xf32>
    %279 = arith.maximumf %276, %278 : vector<16x128xf32>
    %280 = vector.shape_cast %279 : vector<16x128xf32> to vector<2x8x128xf32>
    %cst_178 = arith.constant 0.000000e+00 : f32
    %281 = vector.broadcast %cst_178 : f32 to vector<2x32xf32>
    %282 = vector.extract_strided_slice %280 {offsets = [0, 0, 0], sizes = [2, 1, 128], strides = [1, 1, 1]} : vector<2x8x128xf32> to vector<2x1x128xf32>
    %283 = vector.shape_cast %282 : vector<2x1x128xf32> to vector<2x128xf32>
    %c0_179 = arith.constant 0 : index
    %c0_180 = arith.constant 0 : index
    %284 = vector.load %arg13[%c0_179, %c0_180] : memref<1024x32xf32, #tpu.memory_space<vmem>>, vector<128x32xf32>
    %cst_181 = arith.constant dense<0.000000e+00> : vector<2x32xf32>
    %285 = tpu.matmul %283, %284, %cst_181 {dimension_numbers = #tpu.dot_dimension_numbers<[1], [0], [0], [1], [0, 0, 1, 1], [], []>} : vector<2x128xf32>, vector<128x32xf32>, vector<2x32xf32> -> vector<2x32xf32>
    %286 = arith.addf %281, %285 : vector<2x32xf32>
    %287 = vector.extract_strided_slice %280 {offsets = [0, 1, 0], sizes = [2, 1, 128], strides = [1, 1, 1]} : vector<2x8x128xf32> to vector<2x1x128xf32>
    %288 = vector.shape_cast %287 : vector<2x1x128xf32> to vector<2x128xf32>
    %c128_182 = arith.constant 128 : index
    %c0_183 = arith.constant 0 : index
    %289 = vector.load %arg13[%c128_182, %c0_183] : memref<1024x32xf32, #tpu.memory_space<vmem>>, vector<128x32xf32>
    %cst_184 = arith.constant dense<0.000000e+00> : vector<2x32xf32>
    %290 = tpu.matmul %288, %289, %cst_184 {dimension_numbers = #tpu.dot_dimension_numbers<[1], [0], [0], [1], [0, 0, 1, 1], [], []>} : vector<2x128xf32>, vector<128x32xf32>, vector<2x32xf32> -> vector<2x32xf32>
    %291 = arith.addf %286, %290 : vector<2x32xf32>
    %292 = vector.extract_strided_slice %280 {offsets = [0, 2, 0], sizes = [2, 1, 128], strides = [1, 1, 1]} : vector<2x8x128xf32> to vector<2x1x128xf32>
    %293 = vector.shape_cast %292 : vector<2x1x128xf32> to vector<2x128xf32>
    %c256 = arith.constant 256 : index
    %c0_185 = arith.constant 0 : index
    %294 = vector.load %arg13[%c256, %c0_185] : memref<1024x32xf32, #tpu.memory_space<vmem>>, vector<128x32xf32>
    %cst_186 = arith.constant dense<0.000000e+00> : vector<2x32xf32>
    %295 = tpu.matmul %293, %294, %cst_186 {dimension_numbers = #tpu.dot_dimension_numbers<[1], [0], [0], [1], [0, 0, 1, 1], [], []>} : vector<2x128xf32>, vector<128x32xf32>, vector<2x32xf32> -> vector<2x32xf32>
    %296 = arith.addf %291, %295 : vector<2x32xf32>
    %297 = vector.extract_strided_slice %280 {offsets = [0, 3, 0], sizes = [2, 1, 128], strides = [1, 1, 1]} : vector<2x8x128xf32> to vector<2x1x128xf32>
    %298 = vector.shape_cast %297 : vector<2x1x128xf32> to vector<2x128xf32>
    %c384 = arith.constant 384 : index
    %c0_187 = arith.constant 0 : index
    %299 = vector.load %arg13[%c384, %c0_187] : memref<1024x32xf32, #tpu.memory_space<vmem>>, vector<128x32xf32>
    %cst_188 = arith.constant dense<0.000000e+00> : vector<2x32xf32>
    %300 = tpu.matmul %298, %299, %cst_188 {dimension_numbers = #tpu.dot_dimension_numbers<[1], [0], [0], [1], [0, 0, 1, 1], [], []>} : vector<2x128xf32>, vector<128x32xf32>, vector<2x32xf32> -> vector<2x32xf32>
    %301 = arith.addf %296, %300 : vector<2x32xf32>
    %302 = vector.extract_strided_slice %280 {offsets = [0, 4, 0], sizes = [2, 1, 128], strides = [1, 1, 1]} : vector<2x8x128xf32> to vector<2x1x128xf32>
    %303 = vector.shape_cast %302 : vector<2x1x128xf32> to vector<2x128xf32>
    %c512 = arith.constant 512 : index
    %c0_189 = arith.constant 0 : index
    %304 = vector.load %arg13[%c512, %c0_189] : memref<1024x32xf32, #tpu.memory_space<vmem>>, vector<128x32xf32>
    %cst_190 = arith.constant dense<0.000000e+00> : vector<2x32xf32>
    %305 = tpu.matmul %303, %304, %cst_190 {dimension_numbers = #tpu.dot_dimension_numbers<[1], [0], [0], [1], [0, 0, 1, 1], [], []>} : vector<2x128xf32>, vector<128x32xf32>, vector<2x32xf32> -> vector<2x32xf32>
    %306 = arith.addf %301, %305 : vector<2x32xf32>
    %307 = vector.extract_strided_slice %280 {offsets = [0, 5, 0], sizes = [2, 1, 128], strides = [1, 1, 1]} : vector<2x8x128xf32> to vector<2x1x128xf32>
    %308 = vector.shape_cast %307 : vector<2x1x128xf32> to vector<2x128xf32>
    %c640 = arith.constant 640 : index
    %c0_191 = arith.constant 0 : index
    %309 = vector.load %arg13[%c640, %c0_191] : memref<1024x32xf32, #tpu.memory_space<vmem>>, vector<128x32xf32>
    %cst_192 = arith.constant dense<0.000000e+00> : vector<2x32xf32>
    %310 = tpu.matmul %308, %309, %cst_192 {dimension_numbers = #tpu.dot_dimension_numbers<[1], [0], [0], [1], [0, 0, 1, 1], [], []>} : vector<2x128xf32>, vector<128x32xf32>, vector<2x32xf32> -> vector<2x32xf32>
    %311 = arith.addf %306, %310 : vector<2x32xf32>
    %312 = vector.extract_strided_slice %280 {offsets = [0, 6, 0], sizes = [2, 1, 128], strides = [1, 1, 1]} : vector<2x8x128xf32> to vector<2x1x128xf32>
    %313 = vector.shape_cast %312 : vector<2x1x128xf32> to vector<2x128xf32>
    %c768 = arith.constant 768 : index
    %c0_193 = arith.constant 0 : index
    %314 = vector.load %arg13[%c768, %c0_193] : memref<1024x32xf32, #tpu.memory_space<vmem>>, vector<128x32xf32>
    %cst_194 = arith.constant dense<0.000000e+00> : vector<2x32xf32>
    %315 = tpu.matmul %313, %314, %cst_194 {dimension_numbers = #tpu.dot_dimension_numbers<[1], [0], [0], [1], [0, 0, 1, 1], [], []>} : vector<2x128xf32>, vector<128x32xf32>, vector<2x32xf32> -> vector<2x32xf32>
    %316 = arith.addf %311, %315 : vector<2x32xf32>
    %317 = vector.extract_strided_slice %280 {offsets = [0, 7, 0], sizes = [2, 1, 128], strides = [1, 1, 1]} : vector<2x8x128xf32> to vector<2x1x128xf32>
    %318 = vector.shape_cast %317 : vector<2x1x128xf32> to vector<2x128xf32>
    %c896 = arith.constant 896 : index
    %c0_195 = arith.constant 0 : index
    %319 = vector.load %arg13[%c896, %c0_195] : memref<1024x32xf32, #tpu.memory_space<vmem>>, vector<128x32xf32>
    %cst_196 = arith.constant dense<0.000000e+00> : vector<2x32xf32>
    %320 = tpu.matmul %318, %319, %cst_196 {dimension_numbers = #tpu.dot_dimension_numbers<[1], [0], [0], [1], [0, 0, 1, 1], [], []>} : vector<2x128xf32>, vector<128x32xf32>, vector<2x32xf32> -> vector<2x32xf32>
    %321 = arith.addf %316, %320 : vector<2x32xf32>
    %c0_197 = arith.constant 0 : index
    %c0_198 = arith.constant 0 : index
    %322 = vector.load %arg14[%c0_197, %c0_198] : memref<1x32xf32, #tpu.memory_space<vmem>>, vector<1x32xf32>
    %323 = vector.broadcast %322 : vector<1x32xf32> to vector<2x32xf32>
    %324 = arith.addf %321, %323 : vector<2x32xf32>
    %cst_199 = arith.constant 0.000000e+00 : f32
    %325 = vector.broadcast %cst_199 : f32 to vector<2x32xf32>
    %326 = arith.maximumf %324, %325 : vector<2x32xf32>
    %c0_200 = arith.constant 0 : index
    %c0_201 = arith.constant 0 : index
    %327 = vector.load %arg15[%c0_200, %c0_201] : memref<32x10xf32, #tpu.memory_space<vmem>>, vector<32x10xf32>
    %cst_202 = arith.constant dense<0.000000e+00> : vector<2x10xf32>
    %328 = tpu.matmul %326, %327, %cst_202 {dimension_numbers = #tpu.dot_dimension_numbers<[1], [0], [0], [1], [0, 0, 1, 1], [], []>} : vector<2x32xf32>, vector<32x10xf32>, vector<2x10xf32> -> vector<2x10xf32>
    %c0_203 = arith.constant 0 : index
    %c0_204 = arith.constant 0 : index
    %329 = vector.load %arg16[%c0_203, %c0_204] : memref<1x10xf32, #tpu.memory_space<vmem>>, vector<1x10xf32>
    %330 = vector.broadcast %329 : vector<1x10xf32> to vector<2x10xf32>
    %331 = arith.addf %328, %330 : vector<2x10xf32>
    %c0_205 = arith.constant 0 : index
    %c0_206 = arith.constant 0 : index
    %332 = vector.load %arg17[%c0_205, %c0_206] : memref<2x10xf32, #tpu.memory_space<vmem>>, vector<2x10xf32>
    tpu.vector_store %arg17[%c0_205, %c0_206], %331 {strides = array<i32>} : memref<2x10xf32, #tpu.memory_space<vmem>>, vector<2x10xf32>,
    return
  }
}

</mosaic_0001>

<bundles_post_ra>
// kernel: convnet_forward.1
= control target key start
LH: loop header
LB: loop body
LE: loop exit
PB: predicated region body
PF: predicated region fallthrough
CT: control target
= control target key end

     0   :  { %s18668_s0 = inlined_call_operand.vmem [shape: f32[2,34,102], index: 0, kind: input, shape index: {}]   ;;  %s18669_s1 = inlined_call_operand.hbm [shape: f32[306,512], index: 1, kind: input, shape index: {}]   ;;  %s18670_s2 = inlined_call_operand.vmem [shape: f32[1200,256], index: 2, kind: input, shape index: {}]   ;;  %s18671_s3 = inlined_call_operand.vmem [shape: f32[6,16], index: 3, kind: input, shape index: {}]   ;;  %s18672_s4 = inlined_call_operand.vmem [shape: f32[16,512], index: 4, kind: input, shape index: {}]   ;;  %s18673_s5 = inlined_call_operand.vmem [shape: f32[512,16], index: 5, kind: input, shape index: {}]   ;;  %s18674_s6 = inlined_call_operand.vmem [shape: f32[16,256], index: 6, kind: input, shape index: {}]   ;;  %s18675_s7 = inlined_call_operand.vmem [shape: f32[256,16], index: 7, kind: input, shape index: {}]   ;;  %s18676_s8 = inlined_call_operand.vmem [shape: f32[16,31], index: 8, kind: input, shape index: {}]   ;;  %s18677_s9 = inlined_call_operand.hbm [shape: f32[512,256], index: 9, kind: input, shape index: {}]   ;;  %s18678_s10 = inlined_call_operand.hbm [shape: f32[512,256], index: 10, kind: input, shape index: {}]   ;;  %s18679_s11 = inlined_call_operand.vmem [shape: f32[256,128], index: 11, kind: input, shape index: {}]   ;;  %s18680_s12 = inlined_call_operand.vmem [shape: f32[256,128], index: 12, kind: input, shape index: {}]   ;;  %s18681_s13 = inlined_call_operand.vmem [shape: f32[1024,32], index: 13, kind: input, shape index: {}]   ;;  %s18682_s14 = inlined_call_operand.vmem [shape: f32[1,32], index: 14, kind: input, shape index: {}]   ;;  %s18683_s15 = inlined_call_operand.vmem [shape: f32[32,10], index: 15, kind: input, shape index: {}]   ;;  %s18684_s16 = inlined_call_operand.vmem [shape: f32[1,10], index: 16, kind: input, shape index: {}]   ;;  %s18685_s17 = inlined_call_operand.hbm [shape: f32[2,10], index: 17, kind: output, shape index: {}]  }
   0x1   :  { %18826 = sst [smem:[#allocation106_spill]] %s18668_s0 }
   0x2   :  { %18827 = sst [smem:[#allocation107_spill]] %s18669_s1 }
   0x3   :  { %18828 = sst [smem:[#allocation108_spill]] %s18685_s17 }
   0x4   :  { %22 = vsyncpa [#allocation5], 0 }
   0x5   :  { %23 = vsyncpa [#allocation8], 0 }
   0x6   :  { %24 = vsyncpa [#allocation6], 0  ;;  %s12241_s24 = smov [#allocation7]   ;;  %s12147_s28 = scalar_lea.hbm %s18677_s9, 16384 }
   0x7   :  { %s58_s25 = sshll.u32 %s12241_s24, 4  ;;  %p12148_p0 = scmp.ne.s32.totalorder %s18677_s9, %s12147_s28  ;;  %s59_s25 = int_to_ptr.vmem [resolvable:$true] %s58_s25 }
   0x8   :  { %p12151_p1 = scmp.lt.u32.totalorder %s12147_s28, %s18677_s9 }
   0xa   :  { %p12153_p2 = pnand %p12151_p1, %p12148_p0 }
   0xc   :  { %12156 = shalt.err (!%p12153_p2)
}
   0xd   :  { %s12157_s19 = scalar_lea.vmem %s59_s25, 16384  ;;  %p12162_p4 = scmp.lt.s32.totalorder %s59_s25, %s59_s25 }
   0xe   :  { %p12158_p3 = scmp.ne.s32.totalorder %s59_s25, %s12157_s19  ;;  %p12163_p5 = scmp.lt.s32.totalorder %s12157_s19, %s12157_s19 }
  0x10   :  { %p12164_p6 = por %p12163_p5, %p12162_p4 }
  0x12   :  { %p12165_p7 = pnand %p12164_p6, %p12158_p3 }
  0x14   :  { %12168 = shalt.err (!%p12165_p7)
}
  0x15   :  { %s18689_s1 = smov 256   ;;  %s12243_s20 = smov 16  }
  0x16   :  { %64 = dma.hbm_to_vmem [thread:$0]  %s18677_s9, 16384, %s59_s25, [#allocation8], %s18689_s1, %s18689_s1, %s12243_s20  }
  0x17   :  { %s12244_s23 = smov [#allocation4]   ;;  %s18829_s28 = sld [smem:[#allocation107_spill]] }
  0x18   :  { %s32_s24 = sshll.u32 %s12244_s23, 4  ;;  %s33_s24 = int_to_ptr.vmem [resolvable:$true] %s32_s24 }
  0x1d   :  { %s12169_s29 = scalar_lea.hbm %s18829_s28, 19968 }
  0x1e   :  { %p12170_p8 = scmp.ne.s32.totalorder %s18829_s28, %s12169_s29  ;;  %p12173_p9 = scmp.lt.u32.totalorder %s12169_s29, %s18829_s28 }
  0x20   :  { %p12175_p10 = pnand %p12173_p9, %p12170_p8 }
  0x22   :  { %12178 = shalt.err (!%p12175_p10)
}
  0x23   :  { %s12179_s17 = scalar_lea.vmem %s33_s24, 19968  ;;  %p12184_p12 = scmp.lt.s32.totalorder %s33_s24, %s33_s24 }
  0x24   :  { %p12180_p11 = scmp.ne.s32.totalorder %s33_s24, %s12179_s17  ;;  %p12185_p13 = scmp.lt.s32.totalorder %s12179_s17, %s12179_s17 }
  0x26   :  { %p12186_p0 = por %p12185_p13, %p12184_p12 }
  0x28   :  { %p12187_p1 = pnand %p12186_p0, %p12180_p11 }
  0x2a   :  { %12190 = shalt.err (!%p12187_p1)
}
  0x2b   :  { %s12245_s9 = smov 512   ;;  %s12246_s25 = smov 32  }
  0x2c   :  { %38 = dma.hbm_to_vmem [thread:$0]  %s18829_s28, 19968, %s33_s24, [#allocation5], %s12245_s9, %s12245_s9, %s12246_s25  }
  0x2d   :  { %s12247_s23 = smov [#allocation9]   ;;  %s12191_s0 = scalar_lea.hbm %s18678_s10, 16384 }
  0x2e   :  { %s70_s26 = sshll.u32 %s12247_s23, 4  ;;  %p12192_p2 = scmp.ne.s32.totalorder %s18678_s10, %s12191_s0  ;;  %s71_s26 = int_to_ptr.vmem [resolvable:$true] %s70_s26 }
  0x2f   :  { %p12195_p3 = scmp.lt.u32.totalorder %s12191_s0, %s18678_s10 }
  0x31   :  { %p12197_p4 = pnand %p12195_p3, %p12192_p2 }
  0x33   :  { %12200 = shalt.err (!%p12197_p4)
}
  0x34   :  { %s12201_s1 = scalar_lea.vmem %s71_s26, 16384  ;;  %p12206_p6 = scmp.lt.s32.totalorder %s71_s26, %s71_s26 }
  0x35   :  { %p12202_p5 = scmp.ne.s32.totalorder %s71_s26, %s12201_s1  ;;  %p12207_p7 = scmp.lt.s32.totalorder %s12201_s1, %s12201_s1 }
  0x37   :  { %p12208_p8 = por %p12207_p7, %p12206_p6 }
  0x39   :  { %p12209_p9 = pnand %p12208_p8, %p12202_p5 }
  0x3b   :  { %12212 = shalt.err (!%p12209_p9)
}
  0x3c   :  { %s18830_s24 = smov 256  }
  0x3d   :  { %76 = dma.hbm_to_vmem [thread:$0]  %s18678_s10, 16384, %s71_s26, [#allocation8], %s18830_s24, %s18830_s24, %s12243_s20  }
  0x3e   :  { %12235 = dma.done.wait [#allocation5], 19968  }
  0x3f   :  { %12236 = vsyncadd [#allocation5], 4294947328 }
  0x40   :  { %12237 = dma.done.wait [#allocation8], 32768  }
  0x41   :  { %12238 = vsyncadd [#allocation8], 4294934528  ;;  %v12248_v0 = vmov 0.0   ;;  %v159_v1 = vld [vmem:[#allocation4 + $0x188] sm:$0xc0]  ;;  %vm270_vm0 = vcmask 1041408  }
  0x42   :  { %513 = vmatprep.mubr.f32.mxu0 %v12248_v0  ;;  %3137 = vst [vmem:[#allocation3] sm:$0xff] %v12248_v0  ;;  %3138 = vst [vmem:[#allocation3 + $0x8] sm:$0xff] %v12248_v0  ;;  %602 = vmatprep.mubr.f32.mxu1 %v12248_v0  ;;  %v163_v2 = vld [vmem:[#allocation4 + $0x1a8] sm:$0xff]  ;;  %v274_v4 = vrot.slane %v159_v1, 6  ;;  %v161_v7 = vld [vmem:[#allocation4 + $0x198] sm:$0xc0] }
  0x43   :  { %3139 = vst [vmem:[#allocation3 + $0x10] sm:$0xff] %v12248_v0  ;;  %3142 = vst [vmem:[#allocation3 + $0x28] sm:$0xff] %v12248_v0  ;;  %v167_v3 = vld [vmem:[#allocation4 + $0x1c8] sm:$0xff]  ;;  %v275_v5 = vrot.slane %v163_v2, 6  ;;  %v165_v8 = vld [vmem:[#allocation4 + $0x1b8] sm:$0xff]  ;;  %v280_v10 = vrot.slane %v161_v7, 6 }
  0x44   :  { %3143 = vst [vmem:[#allocation3 + $0x30] sm:$0xff] %v12248_v0  ;;  %3145 = vst [vmem:[#allocation3 + $0x40] sm:$0x3] %v12248_v0  ;;  %v285_v6 = vrot.slane %v167_v3, 6  ;;  %v169_v9 = vld [vmem:[#allocation4 + $0x1d8] sm:$0xff]  ;;  %v281_v11 = vrot.slane %v165_v8, 6 }
  0x45   :  { %3146 = vst [vmem:[#allocation3 + $0x48] sm:$0x3] %v12248_v0  ;;  %3147 = vst [vmem:[#allocation3 + $0x50] sm:$0x3] %v12248_v0  ;;  %v158_v12 = vld [vmem:[#allocation4 + $0x180] sm:$0xc0]  ;;  %v276_v14 = vsel %vm270_vm0, %v274_v4, %v275_v5 }
  0x46   :  { %3150 = vst [vmem:[#allocation3 + $0x60] sm:$0xff] %v12248_v0  ;;  %3151 = vst [vmem:[#allocation3 + $0x68] sm:$0xff] %v12248_v0  ;;  %v162_v13 = vld [vmem:[#allocation4 + $0x1a0] sm:$0xff]  ;;  %v286_v15 = vsel %vm270_vm0, %v275_v5, %v285_v6  ;;  %v289_v16 = vrot.slane %v169_v9, 6  ;;  %v271_v18 = vrot.slane %v158_v12, 6  ;;  %v164_v20 = vld [vmem:[#allocation4 + $0x1b0] sm:$0xff]  ;;  %v282_v22 = vsel %vm270_vm0, %v280_v10, %v281_v11 }
  0x47   :  { %3152 = vst [vmem:[#allocation3 + $0x70] sm:$0xff] %v12248_v0  ;;  %3155 = vst [vmem:[#allocation3 + $0x88] sm:$0xff] %v12248_v0  ;;  %v166_v17 = vld [vmem:[#allocation4 + $0x1c0] sm:$0xff]  ;;  %v160_v19 = vld [vmem:[#allocation4 + $0x190] sm:$0xc0]  ;;  %v10026_v21 = vpack.c.bf16 %v286_v15, %v276_v14  ;;  %v272_v23 = vrot.slane %v162_v13, 6 }
  0x48   :  { %3156 = vst [vmem:[#allocation3 + $0x90] sm:$0xff] %v12248_v0  ;;  %3158 = vst [vmem:[#allocation3 + $0xa0] sm:$0x3] %v12248_v0  ;;  %v283_v24 = vrot.slane %v166_v17, 6  ;;  %v168_v25 = vld [vmem:[#allocation4 + $0x1d0] sm:$0xff]  ;;  %v171_v26 = vld [vmem:[#allocation4 + $0x1e8] sm:$0xff]  ;;  %v290_v28 = vsel %vm270_vm0, %v281_v11, %v289_v16 }
  0x49   :  { %3159 = vst [vmem:[#allocation3 + $0xa8] sm:$0x3] %v12248_v0  ;;  %3160 = vst [vmem:[#allocation3 + $0xb0] sm:$0x3] %v12248_v0  ;;  %v175_v27 = vld [vmem:[#allocation4 + $0x208] sm:$0xff]  ;;  %v277_v29 = vrot.slane %v160_v19, 6  ;;  %10027 = vmatprep.subr.bf16.mxu0 %v10026_v21  ;;  %v10050_v34 = vpack.c.bf16 %v290_v28, %v282_v22  ;;  %v273_v35 = vsel %vm270_vm0, %v271_v18, %v272_v23 }
  0x4a   :  { %v278_v30 = vrot.slane %v164_v20, 6  ;;  %v287_v31 = vrot.slane %v168_v25, 6  ;;  %v173_v32 = vld [vmem:[#allocation4 + $0x1f8] sm:$0xff]  ;;  %v284_v36 = vsel %vm270_vm0, %v272_v23, %v283_v24  ;;  %v293_v37 = vrot.slane %v171_v26, 6  ;;  %v170_v38 = vld [vmem:[#allocation4 + $0x1e0] sm:$0xff]  ;;  %v172_v40 = vld [vmem:[#allocation4 + $0x1f0] sm:$0xff] }
  0x4b   :  { %v12407_v33 = vld [vmem:[#allocation4 + $0x218] sm:$0xff]  ;;  %v174_v39 = vld [vmem:[#allocation4 + $0x200] sm:$0xff]  ;;  %v10028_v41 = vpack.c.bf16 %v284_v36, %v273_v35  ;;  %v301_v44 = vrot.slane %v175_v27, 6  ;;  %v176_v45 = vld [vmem:[#allocation4 + $0x210] sm:$0xff]  ;;  %10051 = vmatprep.subr.bf16.mxu1 %v10050_v34  ;;  %v297_v48 = vrot.slane %v173_v32, 6  ;;  %v291_v51 = vrot.slane %v170_v38, 6 }
  0x4c   :  { %v279_v42 = vsel %vm270_vm0, %v277_v29, %v278_v30  ;;  %v288_v43 = vsel %vm270_vm0, %v278_v30, %v287_v31  ;;  %v294_v47 = vsel %vm270_vm0, %v285_v6, %v293_v37  ;;  %v305_v49 = vrot.slane %v12407_v33, 6  ;;  %v179_v54 = vld [vmem:[#allocation4 + $0x228] sm:$0xff]  ;;  %v181_v60 = vld [vmem:[#allocation4 + $0x238] sm:$0xff]  ;;  %v178_v62 = vld [vmem:[#allocation4 + $0x220] sm:$0xff]  ;;  %s18831_s20 = sld [smem:[#allocation106_spill]] }
  0x4d   :  { %v10052_v46 = vpack.c.bf16 %v288_v43, %v279_v42  ;;  %10029 = vmatpush1.bf16.msra.mxu0 %v10028_v41  ;;  %v302_v50 = vsel %vm270_vm0, %v293_v37, %v301_v44  ;;  %v299_v52 = vrot.slane %v174_v39, 6  ;;  %v295_v53 = vrot.slane %v172_v40, 6  ;;  %v12416_v55 = vld [vmem:[#allocation4 + $0x248] sm:$0xff]  ;;  %v185_v61 = vld [vmem:[#allocation4 + $0x258] sm:$0xff]  ;;  %v182_v4 = vld [vmem:[#allocation4 + $0x240] sm:$0xff] }
  0x4e   :  { %v10030_v56 = vpack.c.bf16 %v302_v50, %v294_v47  ;;  %v298_v57 = vsel %vm270_vm0, %v289_v16, %v297_v48  ;;  %v306_v58 = vsel %vm270_vm0, %v297_v48, %v305_v49  ;;  %v303_v59 = vrot.slane %v176_v45, 6  ;;  %v180_v5 = vld [vmem:[#allocation4 + $0x230] sm:$0xff]  ;;  %v187_v19 = vld [vmem:[#allocation4 + $0x268] sm:$0xff]  ;;  %v189_v21 = vld [vmem:[#allocation4 + $0x278] sm:$0xff] }
  0x4f   :  { %10053 = vmatpush1.bf16.msra.mxu1 %v10052_v46  ;;  %v10054_v63 = vpack.c.bf16 %v306_v58, %v298_v57  ;;  %v292_v1 = vsel %vm270_vm0, %v283_v24, %v291_v51  ;;  %v300_v2 = vsel %vm270_vm0, %v291_v51, %v299_v52  ;;  %v296_v3 = vsel %vm270_vm0, %v287_v31, %v295_v53  ;;  %v184_v14 = vld [vmem:[#allocation4 + $0x250] sm:$0xff]  ;;  %v12427_v20 = vld [vmem:[#allocation4 + $0x288] sm:$0xff]  ;;  %v193_v26 = vld [vmem:[#allocation4 + $0x298] sm:$0xff] }
  0x50   :  { %10031 = vmatprep.subr.bf16.mxu0 %v10030_v56  ;;  %v10032_v6 = vpack.c.bf16 %v300_v2, %v292_v1  ;;  %v304_v7 = vsel %vm270_vm0, %v295_v53, %v303_v59  ;;  %v309_v8 = vrot.slane %v179_v54, 6  ;;  %v317_v9 = vrot.slane %v12416_v55, 6  ;;  %v186_v27 = vld [vmem:[#allocation4 + $0x260] sm:$0xff]  ;;  %v188_v41 = vld [vmem:[#allocation4 + $0x270] sm:$0xff]  ;;  %v195_v43 = vld [vmem:[#allocation4 + $0x2a8] sm:$0xff] }
  0x51   :  { %10055 = vmatprep.subr.bf16.mxu1 %v10054_v63  ;;  %v10056_v10 = vpack.c.bf16 %v304_v7, %v296_v3  ;;  %v313_v11 = vrot.slane %v181_v60, 6  ;;  %v321_v12 = vrot.slane %v185_v61, 6  ;;  %v307_v13 = vrot.slane %v178_v62, 6  ;;  %v12432_v28 = vld [vmem:[#allocation4 + $0x280] sm:$0xff]  ;;  %v12439_v42 = vld [vmem:[#allocation4 + $0x290] sm:$0xff]  ;;  %v12444_v48 = vld [vmem:[#allocation4 + $0x2c8] sm:$0xff] }
  0x52   :  { %10033 = vmatpush1.bf16.msra.mxu0 %v10032_v6  ;;  %v310_v15 = vsel %vm270_vm0, %v301_v44, %v309_v8  ;;  %v318_v16 = vsel %vm270_vm0, %v309_v8, %v317_v9  ;;  %v315_v17 = vrot.slane %v182_v4, 6  ;;  %v311_v18 = vrot.slane %v180_v5, 6  ;;  %v12446_v50 = vld [vmem:[#allocation4 + $0x2d8] sm:$0xff]  ;;  %v194_v55 = vld [vmem:[#allocation4 + $0x2a0] sm:$0xff]  ;;  %v196_v6 = vld [vmem:[#allocation4 + $0x2b0] sm:$0xff] }
  0x53   :  { %10057 = vmatpush1.bf16.msra.mxu1 %v10056_v10  ;;  %v10034_v22 = vpack.c.bf16 %v318_v16, %v310_v15  ;;  %v314_v23 = vsel %vm270_vm0, %v305_v49, %v313_v11  ;;  %v322_v24 = vsel %vm270_vm0, %v313_v11, %v321_v12  ;;  %v308_v25 = vsel %vm270_vm0, %v299_v52, %v307_v13  ;;  %v197_v49 = vld [vmem:[#allocation4 + $0x2b8] sm:$0xff]  ;;  %v12451_v56 = vld [vmem:[#allocation4 + $0x2c0] sm:$0xff]  ;;  %v12459_v7 = vld [vmem:[#allocation4 + $0x2d0] sm:$0xff] }
  0x54   :  { %v10058_v29 = vpack.c.bf16 %v322_v24, %v314_v23  ;;  %v316_v30 = vsel %vm270_vm0, %v307_v13, %v315_v17  ;;  %v312_v31 = vsel %vm270_vm0, %v303_v59, %v311_v18  ;;  %v319_v32 = vrot.slane %v184_v14, 6  ;;  %v203_v8 = vld [vmem:[#allocation4 + $0x2e8] sm:$0xff]  ;;  %v205_v14 = vld [vmem:[#allocation4 + $0x2f8] sm:$0xff] }
  0x55   :  { %10035 = vmatprep.subr.bf16.mxu0 %v10034_v22  ;;  %v10036_v33 = vpack.c.bf16 %v316_v30, %v308_v25  ;;  %v325_v34 = vrot.slane %v187_v19, 6  ;;  %v333_v35 = vrot.slane %v12427_v20, 6  ;;  %v329_v36 = vrot.slane %v189_v21, 6  ;;  %v12464_v13 = vld [vmem:[#allocation4 + $0x308] sm:$0xff]  ;;  %v12466_v15 = vld [vmem:[#allocation4 + $0x318] sm:$0xff]  ;;  %v202_v20 = vld [vmem:[#allocation4 + $0x2e0] sm:$0xff] }
  0x56   :  { %10059 = vmatprep.subr.bf16.mxu1 %v10058_v29  ;;  %v320_v37 = vsel %vm270_vm0, %v311_v18, %v319_v32  ;;  %v337_v38 = vrot.slane %v193_v26, 6  ;;  %v323_v39 = vrot.slane %v186_v27, 6  ;;  %v331_v40 = vrot.slane %v12432_v28, 6  ;;  %v12471_v21 = vld [vmem:[#allocation4 + $0x300] sm:$0xff]  ;;  %v204_v30 = vld [vmem:[#allocation4 + $0x2f0] sm:$0xff] }
  0x57   :  { %10037 = vmatpush1.bf16.msra.mxu0 %v10036_v33  ;;  %v10060_v44 = vpack.c.bf16 %v320_v37, %v312_v31  ;;  %v326_v45 = vsel %vm270_vm0, %v317_v9, %v325_v34  ;;  %v334_v46 = vsel %vm270_vm0, %v325_v34, %v333_v35  ;;  %v330_v47 = vsel %vm270_vm0, %v321_v12, %v329_v36  ;;  %v12481_v37 = vld [vmem:[#allocation4 + $0x8] sm:$0xff] }
  0x58   :  { %v10038_v51 = vpack.c.bf16 %v334_v46, %v326_v45  ;;  %v338_v52 = vsel %vm270_vm0, %v329_v36, %v337_v38  ;;  %v324_v53 = vsel %vm270_vm0, %v315_v17, %v323_v39  ;;  %v332_v54 = vsel %vm270_vm0, %v323_v39, %v331_v40  ;;  %v211_v36 = vld [vmem:[#allocation4 + $0x328] sm:$0xf] }
  0x59   :  { %10061 = vmatpush1.bf16.msra.mxu1 %v10060_v44  ;;  %v10062_v57 = vpack.c.bf16 %v338_v52, %v330_v47  ;;  %v10040_v58 = vpack.c.bf16 %v332_v54, %v324_v53  ;;  %v327_v59 = vrot.slane %v188_v41, 6  ;;  %v335_v60 = vrot.slane %v12439_v42, 6  ;;  %v213_v42 = vld [vmem:[#allocation4 + $0x338] sm:$0xf]  ;;  %v12488_v44 = vld [vmem:[#allocation4 + $0x330] sm:$0xf] }
  0x5a   :  { %10039 = vmatprep.subr.bf16.mxu0 %v10038_v51  ;;  %v341_v61 = vrot.slane %v195_v43, 6  ;;  %v349_v62 = vrot.slane %v12444_v48, 6  ;;  %v345_v63 = vrot.slane %v197_v49, 6  ;;  %v353_v1 = vrot.slane %v12446_v50, 6  ;;  %v210_v43 = vld [vmem:[#allocation4 + $0x320] sm:$0xf] }
  0x5b   :  { %10063 = vmatprep.subr.bf16.mxu1 %v10062_v57  ;;  %10041 = vmatpush1.bf16.msra.mxu0 %v10040_v58  ;;  %v328_v2 = vsel %vm270_vm0, %v319_v32, %v327_v59  ;;  %v336_v3 = vsel %vm270_vm0, %v327_v59, %v335_v60  ;;  %v339_v4 = vrot.slane %v194_v55, 6  ;;  %v347_v5 = vrot.slane %v12451_v56, 6  ;;  %v12493_v49 = vld [vmem:[#allocation4 + $0x28] sm:$0xff]  ;;  %v12495_v50 = vld [vmem:[#allocation4] sm:$0xff]  ;;  %v12500_v56 = vld [vmem:[#allocation4 + $0x18] sm:$0xff] }
  0x5c   :  { %v10064_v9 = vpack.c.bf16 %v336_v3, %v328_v2  ;;  %v342_v10 = vsel %vm270_vm0, %v333_v35, %v341_v61  ;;  %v350_v11 = vsel %vm270_vm0, %v341_v61, %v349_v62  ;;  %v346_v12 = vsel %vm270_vm0, %v337_v38, %v345_v63  ;;  %v12479_v35 = vld [vmem:[#allocation4 + $0x310] sm:$0xff]  ;;  %v12497_v51 = vld [vmem:[#allocation4 + $0x20] sm:$0xff]  ;;  %v12502_v57 = vld [vmem:[#allocation4 + $0x38] sm:$0xff] }
  0x5d   :  { %vm440_vm1 = vcmask 1045504   ;;  %v10042_v16 = vpack.c.bf16 %v350_v11, %v342_v10  ;;  %v354_v17 = vsel %vm270_vm0, %v345_v63, %v353_v1  ;;  %v340_v18 = vsel %vm270_vm0, %v331_v40, %v339_v4  ;;  %v12504_v58 = vld [vmem:[#allocation4 + $0x10] sm:$0xff]  ;;  %v12510_v61 = vld [vmem:[#allocation4 + $0x68] sm:$0xff]  ;;  %v12513_v3 = vld [vmem:[#allocation4 + $0x58] sm:$0xff] }
  0x5e   :  { %v348_v19 = vsel %vm270_vm0, %v339_v4, %v347_v5  ;;  %10065 = vmatpush1.bf16.msra.mxu1 %v10064_v9  ;;  %v10066_v22 = vpack.c.bf16 %v354_v17, %v346_v12  ;;  %v343_v24 = vrot.slane %v196_v6, 6  ;;  %v351_v25 = vrot.slane %v12459_v7, 6  ;;  %v12506_v59 = vld [vmem:[#allocation4 + $0x30] sm:$0xff]  ;;  %v12515_v4 = vld [vmem:[#allocation4 + $0x78] sm:$0xff]  ;;  %v12519_v6 = vld [vmem:[#allocation4 + $0x60] sm:$0xff] }
  0x5f   :  { %v10044_v23 = vpack.c.bf16 %v348_v19, %v340_v18  ;;  %10043 = vmatprep.subr.bf16.mxu0 %v10042_v16  ;;  %v357_v26 = vrot.slane %v203_v8, 6  ;;  %v365_v27 = vrot.slane %v12464_v13, 6  ;;  %v361_v28 = vrot.slane %v205_v14, 6  ;;  %v12521_v7 = vld [vmem:[#allocation4 + $0x50] sm:$0xff]  ;;  %v12532_v12 = vld [vmem:[%s18831_s20 + $0x1] sm:$0xff]  ;;  %v12538_v16 = vld [vmem:[#allocation4 + $0x98] sm:$0xff] }
  0x60   :  { %v369_v29 = vrot.slane %v12466_v15, 6  ;;  %10067 = vmatprep.subr.bf16.mxu1 %v10066_v22  ;;  %v344_v31 = vsel %vm270_vm0, %v335_v60, %v343_v24  ;;  %v352_v32 = vsel %vm270_vm0, %v343_v24, %v351_v25  ;;  %v355_v33 = vrot.slane %v202_v20, 6  ;;  %v12508_v60 = vld [vmem:[#allocation4 + $0x48] sm:$0xff]  ;;  %v12523_v8 = vld [vmem:[#allocation4 + $0x70] sm:$0xff]  ;;  %v12540_v17 = vld [vmem:[#allocation4 + $0xb8] sm:$0xff] }
  0x61   :  { %10045 = vmatpush1.bf16.msra.mxu0 %v10044_v23  ;;  %v363_v34 = vrot.slane %v12471_v21, 6  ;;  %v10068_v38 = vpack.c.bf16 %v352_v32, %v344_v31  ;;  %v358_v39 = vsel %vm270_vm0, %v349_v62, %v357_v26  ;;  %v366_v40 = vsel %vm270_vm0, %v357_v26, %v365_v27  ;;  %v12534_v14 = vld [vmem:[#allocation4 + $0x88] sm:$0xff]  ;;  %v12542_v18 = vld [vmem:[#allocation4 + $0x80] sm:$0xff]  ;;  %v12551_v24 = vld [vmem:[#allocation4 + $0x90] sm:$0xff] }
  0x62   :  { %v362_v41 = vsel %vm270_vm0, %v353_v1, %v361_v28  ;;  %v10046_v45 = vpack.c.bf16 %v366_v40, %v358_v39  ;;  %v370_v46 = vsel %vm270_vm0, %v361_v28, %v369_v29  ;;  %v356_v47 = vsel %vm270_vm0, %v347_v5, %v355_v33  ;;  %v12517_v5 = vld [vmem:[#allocation4 + $0x40] sm:$0xff]  ;;  %v12536_v15 = vld [vmem:[#allocation4 + $0xa8] sm:$0xff]  ;;  %v12561_v31 = vld [vmem:[#allocation4 + $0xf8] sm:$0xff] }
  0x63   :  { %v364_v48 = vsel %vm270_vm0, %v355_v33, %v363_v34  ;;  %10069 = vmatpush1.bf16.msra.mxu1 %v10068_v38  ;;  %v10070_v52 = vpack.c.bf16 %v370_v46, %v362_v41  ;;  %v359_v54 = vrot.slane %v204_v30, 6  ;;  %v367_v55 = vrot.slane %v12479_v35, 6  ;;  %v12544_v19 = vld [vmem:[#allocation4 + $0xa0] sm:$0xff]  ;;  %v12555_v26 = vld [vmem:[#allocation4 + $0xc8] sm:$0xff]  ;;  %v12559_v30 = vld [vmem:[#allocation4 + $0xd8] sm:$0xff] }
  0x64   :  { %v10048_v53 = vpack.c.bf16 %v364_v48, %v356_v47  ;;  %10047 = vmatprep.subr.bf16.mxu0 %v10046_v45  ;;  %v373_v62 = vrot.slane %v211_v36, 6  ;;  %v377_v63 = vrot.slane %v213_v42, 6  ;;  %v371_v1 = vrot.slane %v210_v43, 6  ;;  %v12557_v28 = vld [vmem:[#allocation4 + $0xe8] sm:$0xff]  ;;  %v12570_v32 = vld [vmem:[#allocation4 + $0xd0] sm:$0xff]  ;;  %v12585_v40 = vld [vmem:[#allocation4 + $0x118] sm:$0xff] }
  0x65   :  { %v375_v2 = vrot.slane %v12488_v44, 6  ;;  %10071 = vmatprep.subr.bf16.mxu1 %v10070_v52  ;;  %v360_v9 = vsel %vm270_vm0, %v351_v25, %v359_v54  ;;  %v368_v10 = vsel %vm270_vm0, %v359_v54, %v367_v55  ;;  %v10074_v11 = vpack.c.bf16 %v12493_v49, %v12481_v37  ;;  %v12553_v25 = vld [vmem:[#allocation4 + $0xb0] sm:$0xff]  ;;  %v12583_v39 = vld [vmem:[#allocation4 + $0x128] sm:$0xff]  ;;  %v12587_v41 = vld [vmem:[#allocation4 + $0x138] sm:$0xff] }
  0x66   :  { %10049 = vmatpush1.bf16.msra.mxu0 %v10048_v53  ;;  %v10072_v20 = vpack.c.bf16 %v368_v10, %v360_v9  ;;  %v374_v21 = vsel %vm270_vm0, %v365_v27, %v373_v62  ;;  %v378_v22 = vsel %vm270_vm0, %v369_v29, %v377_v63  ;;  %v372_v23 = vsel %vm270_vm0, %v363_v34, %v371_v1  ;;  %v12566_v27 = vld [vmem:[#allocation4 + $0xc0] sm:$0xff]  ;;  %v12572_v33 = vld [vmem:[#allocation4 + $0xf0] sm:$0xff]  ;;  %v12574_v34 = vld [vmem:[#allocation4 + $0x108] sm:$0xff] }
  0x67   :  { %9184 = vmatprep.subr.msk.mxu0 %vm440_vm1, %v374_v21  ;;  %vm427_vm2 = vcmask 834560   ;;  %v10076_v13 = vpack.c.bf16 %v12497_v51, %v12495_v50  ;;  %v12568_v29 = vld [vmem:[#allocation4 + $0xe0] sm:$0xff]  ;;  %v376_v35 = vsel %vm270_vm0, %v367_v55, %v375_v2  ;;  %v10098_v36 = vpack.c.bf16 %v12502_v57, %v12500_v56  ;;  %v12601_v47 = vld [vmem:[#allocation4 + $0x110] sm:$0xff]  ;;  %v12613_v52 = vld [vmem:[#allocation4 + $0x148] sm:$0xff] }
  0x68   :  { %10073 = vmatpush1.bf16.msra.mxu1 %v10072_v20  ;;  %v10100_v37 = vpack.c.bf16 %v12506_v59, %v12504_v58  ;;  %v10078_v38 = vpack.c.bf16 %v12510_v61, %v12508_v60  ;;  %v10102_v42 = vpack.c.bf16 %v12515_v4, %v12513_v3  ;;  %v10080_v43 = vpack.c.bf16 %v12519_v6, %v12517_v5  ;;  %v12597_v45 = vld [vmem:[#allocation4 + $0x100] sm:$0xff]  ;;  %v12611_v51 = vld [vmem:[#allocation4 + $0x130] sm:$0xff]  ;;  %v12615_v53 = vld [vmem:[#allocation4 + $0x168] sm:$0xff] }
  0x69   :  { %9190 = vmatprep.subr.msk.mxu1 %vm440_vm1, %v378_v22  ;;  %v10104_v44 = vpack.c.bf16 %v12523_v8, %v12521_v7  ;;  %v12599_v46 = vld [vmem:[#allocation4 + $0x120] sm:$0xff]  ;;  %v10082_v48 = vpack.c.bf16 %v12536_v15, %v12534_v14  ;;  %v10106_v49 = vpack.c.bf16 %v12540_v17, %v12538_v16  ;;  %v10084_v50 = vpack.c.bf16 %v12544_v19, %v12542_v18  ;;  %v155_v57 = vld [vmem:[%s18831_s20 + $0x9] sm:$0xff]  ;;  %v12636_v1 = vld [vmem:[#allocation4 + $0x158] sm:$0xff] }
  0x6a   :  { %9185 = vmatpush1.msk.msra.mxu0 %vm440_vm1, %v372_v23  ;;  %v10108_v54 = vpack.c.bf16 %v12553_v25, %v12551_v24  ;;  %v10086_v55 = vpack.c.bf16 %v12557_v28, %v12555_v26  ;;  %v10110_v56 = vpack.c.bf16 %v12561_v31, %v12559_v30  ;;  %v834_v58 = vld [vmem:[#allocation4 + $0x328] sm:$0xf0]  ;;  %vm945_vm3 = vcmask 1043456   ;;  %v12638_v2 = vld [vmem:[#allocation4 + $0x178] sm:$0xff]  ;;  %v12640_v3 = vld [vmem:[#allocation4 + $0x140] sm:$0xff] }
  0x6b   :  { %10075 = vmatprep.subr.bf16.mxu0 %v10074_v11  ;;  %9186 = vmatmul.mubr.msk.f32.vlgmr.msra.gmra.mrb[0].mxu0 %vm427_vm2, %v12532_v12  ;;  %v838_v59 = vld [vmem:[#allocation4 + $0x348] sm:$0xff]  ;;  %v10088_v61 = vpack.c.bf16 %v12568_v29, %v12566_v27  ;;  %v12642_v4 = vld [vmem:[#allocation4 + $0x160] sm:$0xff]  ;;  %v949_v5 = vrot.slane %v834_v58, 4  ;;  %v836_v6 = vld [vmem:[#allocation4 + $0x338] sm:$0xf0]  ;;  %vm2828_vm4 = vcmask 1040384  }
  0x6c   :  { %10077 = vmatpush1.bf16.msra.mxu0 %v10076_v13  ;;  %519 = vmatprep.mubr.f32.mxu0 %v12248_v0  ;;  %v12627_v60 = vld [vmem:[#allocation4 + $0x368] sm:$0xff]  ;;  %v840_v9 = vld [vmem:[#allocation4 + $0x358] sm:$0xff]  ;;  %v12654_v20 = vld [vmem:[#allocation4 + $0x150] sm:$0xff]  ;;  %v950_v22 = vrot.slane %v838_v59, 4  ;;  %vm2991_vm5 = vcmask 130048   ;;  %vm3372_vm6 = vcmask 1046528  }
  0x6d   :  { %9191 = vmatpush1.msk.msra.mxu1 %vm440_vm1, %v376_v35  ;;  %10079 = vmatprep.subr.bf16.mxu0 %v10078_v38  ;;  %v12644_v10 = vld [vmem:[#allocation4 + $0x378] sm:$0xff]  ;;  %v12656_v21 = vld [vmem:[#allocation4 + $0x170] sm:$0xff]  ;;  %v833_v23 = vld [vmem:[#allocation4 + $0x320] sm:$0xf0]  ;;  %v960_v35 = vrot.slane %v12627_v60, 4  ;;  %v956_v38 = vrot.slane %v840_v9, 4 }
  0x6e   :  { %10099 = vmatprep.subr.bf16.mxu1 %v10098_v36  ;;  %9192 = vmatmul.mubr.msk.f32.vlgmr.msra.gmra.mrb[0].mxu1 %vm427_vm2, %v12532_v12  ;;  %v837_v13 = vld [vmem:[#allocation4 + $0x340] sm:$0xff]  ;;  %v955_v36 = vrot.slane %v836_v6, 4  ;;  %v835_v15 = vld [vmem:[#allocation4 + $0x330] sm:$0xf0]  ;;  %v12665_v14 = vsel %vm945_vm3, %v949_v5, %v950_v22  ;;  %v964_v59 = vrot.slane %v12644_v10, 4  ;;  %v846_v12 = vld [vmem:[#allocation4 + $0x388] sm:$0xff] }
  0x6f   :  { %10101 = vmatpush1.bf16.msra.mxu1 %v10100_v37  ;;  %608 = vmatprep.mubr.f32.mxu1 %v12248_v0  ;;  %v12662_v58 = vld [vmem:[#allocation4 + $0x360] sm:$0xff]  ;;  %v946_v37 = vrot.slane %v833_v23, 4  ;;  %v947_v11 = vrot.slane %v837_v13, 4  ;;  %v839_v62 = vld [vmem:[#allocation4 + $0x350] sm:$0xff]  ;;  %v12672_v60 = vsel %vm945_vm3, %v950_v22, %v960_v35  ;;  %v952_v5 = vrot.slane %v835_v15, 4  ;;  %v12678_v6 = vld [vmem:[#allocation4 + $0x3a8] sm:$0xff] }
  0x70   :  { %10103 = vmatprep.subr.bf16.mxu1 %v10102_v42  ;;  %10081 = vmatpush1.bf16.msra.mxu0 %v10080_v43  ;;  %v12668_v63 = vld [vmem:[#allocation4 + $0x370] sm:$0xff]  ;;  %v12675_v42 = vsel %vm945_vm3, %v955_v36, %v956_v38  ;;  %v958_v43 = vrot.slane %v12662_v58, 4  ;;  %v848_v9 = vld [vmem:[#allocation4 + $0x398] sm:$0xff]  ;;  %v12690_v23 = vsel %vm945_vm3, %v956_v38, %v964_v59  ;;  %v953_v15 = vrot.slane %v839_v62, 4  ;;  %v845_v36 = vld [vmem:[#allocation4 + $0x380] sm:$0xff] }
  0x71   :  { %10083 = vmatprep.subr.bf16.mxu0 %v10082_v48  ;;  %9187 = vmatmul.mubr.msk.f32.gmra.mrb[2].mxu0 %vm427_vm2, %v155_v57  ;;  %v156_v48 = vld [vmem:[%s18831_s20 + $0x29] sm:$0xff]  ;;  %v12692_v13 = vld [vmem:[#allocation4 + $0x3b8] sm:$0xff]  ;;  %v10122_v58 = vpack.c.bf16 %v12672_v60, %v12665_v14  ;;  %v962_v22 = vrot.slane %v12668_v63, 4  ;;  %v968_v38 = vrot.slane %v846_v12, 4  ;;  %v12703_v10 = vld [vmem:[#allocation4 + $0x3a0] sm:$0xff]  ;;  %v10146_v7 = vpack.c.bf16 %v12690_v23, %v12675_v42 }
  0x72   :  { %9193 = vmatmul.mubr.msk.f32.gmra.mrb[2].mxu1 %vm427_vm2, %v155_v57  ;;  %525 = vmatprep.mubr.f32.mxu0 %v12248_v0  ;;  %v10120_v57 = vpack.c.bf16 %v12656_v21, %v12654_v20  ;;  %v12714_v8 = vsel %vm945_vm3, %v946_v37, %v947_v11  ;;  %v972_v62 = vrot.slane %v848_v9, 4  ;;  %v847_v63 = vld [vmem:[#allocation4 + $0x390] sm:$0xff]  ;;  %v12722_v16 = vsel %vm945_vm3, %v947_v11, %v958_v43  ;;  %v12745_v37 = vld [vmem:[#allocation4 + $0x3e8] sm:$0xff]  ;;  %v12972_v42 = vld [vmem:[#allocation3] sm:$0xff] }
  0x73   :  { %10105 = vmatpush1.bf16.msra.mxu1 %v10104_v44  ;;  %614 = vmatprep.mubr.f32.mxu1 %v12248_v0  ;;  %v976_v44 = vrot.slane %v12678_v6, 4  ;;  %v12725_v17 = vsel %vm945_vm3, %v952_v5, %v953_v15  ;;  %v980_v18 = vrot.slane %v12692_v13, 4  ;;  %v966_v19 = vrot.slane %v845_v36, 4  ;;  %v157_v26 = vld [vmem:[%s18831_s20 + $0x31] sm:$0xff] }
  0x74   :  { %10107 = vmatprep.subr.bf16.mxu1 %v10106_v49  ;;  %10085 = vmatpush1.bf16.msra.mxu0 %v10084_v50  ;;  %v12728_v49 = vld [vmem:[#allocation4 + $0x3b0] sm:$0xff]  ;;  %v854_v50 = vld [vmem:[#allocation4 + $0x3c8] sm:$0xff]  ;;  %v12736_v28 = vsel %vm945_vm3, %v953_v15, %v962_v22  ;;  %v974_v12 = vrot.slane %v12703_v10, 4  ;;  %v856_v5 = vld [vmem:[#allocation4 + $0x3d8] sm:$0xff]  ;;  %v12752_v6 = vsel %vm945_vm3, %v964_v59, %v972_v62  ;;  %v10124_v24 = vpack.c.bf16 %v12722_v16, %v12714_v8 }
  0x75   :  { %10087 = vmatprep.subr.bf16.mxu0 %v10086_v55  ;;  %9188 = vmatmul.mubr.msk.f32.gmra.mrb[4].mxu0 %vm427_vm2, %v156_v48  ;;  %v12739_v55 = vsel %vm945_vm3, %v960_v35, %v968_v38  ;;  %v12742_v11 = vsel %vm945_vm3, %v968_v38, %v976_v44  ;;  %v12755_v35 = vsel %vm945_vm3, %v972_v62, %v980_v18  ;;  %v12760_v10 = vld [vmem:[#allocation4 + $0x3f8] sm:$0xff]  ;;  %v853_v15 = vld [vmem:[#allocation4 + $0x3c0] sm:$0xff]  ;;  %v984_v59 = vrot.slane %v854_v50, 4  ;;  %v12792_v38 = vld [vmem:[#allocation4 + $0x3f0] sm:$0xff] }
  0x76   :  { %9194 = vmatmul.mubr.msk.f32.gmra.mrb[4].mxu1 %vm427_vm2, %v156_v48  ;;  %531 = vmatprep.mubr.f32.mxu0 %v12248_v0  ;;  %v12758_v9 = vsel %vm945_vm3, %v958_v43, %v966_v19  ;;  %v970_v48 = vrot.slane %v847_v63, 4  ;;  %v12771_v25 = vsel %vm945_vm3, %v966_v19, %v974_v12  ;;  %v12774_v43 = vld [vmem:[#allocation4 + $0x3e0] sm:$0xff]  ;;  %v18832_v13 = vpack.c.bf16 %v12583_v39, %v12574_v34  ;;  %v862_v62 = vld [vmem:[#allocation4 + $0x408] sm:$0xff] }
  0x77   :  { %10109 = vmatpush1.bf16.msra.mxu1 %v10108_v54  ;;  %620 = vmatprep.mubr.f32.mxu1 %v12248_v0  ;;  %v978_v54 = vrot.slane %v12728_v49, 4  ;;  %v10148_v30 = vpack.c.bf16 %v12736_v28, %v12725_v17  ;;  %v10126_v31 = vpack.c.bf16 %v12742_v11, %v12739_v55  ;;  %v992_v27 = vrot.slane %v12745_v37, 4  ;;  %v12808_v37 = vld [vmem:[#allocation4 + $0x428] sm:$0xff] }
  0x78   :  { %10111 = vmatprep.subr.bf16.mxu1 %v10110_v56  ;;  %10089 = vmatpush1.bf16.msra.mxu0 %v10088_v61  ;;  %v988_v29 = vrot.slane %v856_v5, 4  ;;  %v855_v56 = vld [vmem:[#allocation4 + $0x3d0] sm:$0xff]  ;;  %v10150_v34 = vpack.c.bf16 %v12755_v35, %v12752_v6  ;;  %v10128_v39 = vpack.c.bf16 %v12771_v25, %v12758_v9  ;;  %v996_v61 = vrot.slane %v12760_v10, 4  ;;  %v864_v5 = vld [vmem:[#allocation4 + $0x418] sm:$0xff]  ;;  %v99_v55 = vld [vmem:[%s18831_s20 + $0x8] sm:$0xff] }
  0x79   :  { %10091 = vmatprep.subr.bf16.mxu0 %v18832_v13  ;;  %9189 = vmatmul.mubr.msk.f32.gmra.mrb[6].mxu0 %vm427_vm2, %v157_v26  ;;  %v982_v36 = vrot.slane %v853_v15, 4  ;;  %v18833_v63 = vpack.c.bf16 %v12572_v33, %v12570_v32  ;;  %v12799_v19 = vsel %vm945_vm3, %v962_v22, %v970_v48  ;;  %v12802_v49 = vsel %vm945_vm3, %v970_v48, %v978_v54  ;;  %v12825_v15 = vld [vmem:[#allocation4 + $0x438] sm:$0xff]  ;;  %v151_v13 = vld [vmem:[#allocation4 + $0x188] sm:$0x3f] }
  0x7a   :  { %9195 = vmatmul.mubr.msk.f32.gmra.mrb[6].mxu1 %vm427_vm2, %v157_v26  ;;  %715 = vmatprep.mubr.f32.mxu0 %v12248_v0  ;;  %v12805_v50 = vsel %vm945_vm3, %v976_v44, %v984_v59  ;;  %v990_v26 = vrot.slane %v12774_v43, 4  ;;  %v18834_v32 = vpack.c.bf16 %v12587_v41, %v12585_v40  ;;  %v18835_v33 = vpack.c.bf16 %v12599_v46, %v12597_v45  ;;  %v861_v43 = vld [vmem:[#allocation4 + $0x400] sm:$0xff] }
  0x7b   :  { %10113 = vmatpush1.bf16.msra.mxu1 %v18833_v63  ;;  %804 = vmatprep.mubr.f32.mxu1 %v12248_v0  ;;  %v12817_v22 = vsel %vm945_vm3, %v984_v59, %v992_v27  ;;  %v12820_v48 = vsel %vm945_vm3, %v980_v18, %v988_v29  ;;  %v12823_v44 = vsel %vm945_vm3, %v988_v29, %v996_v61  ;;  %v986_v10 = vrot.slane %v855_v56, 4  ;;  %v12837_v59 = vld [vmem:[#allocation4 + $0x420] sm:$0xff] }
  0x7c   :  { %10115 = vmatprep.subr.bf16.mxu1 %v18834_v32  ;;  %10093 = vmatpush1.bf16.msra.mxu0 %v18835_v33  ;;  %v18836_v40 = vpack.c.bf16 %v12615_v53, %v12613_v52  ;;  %v12831_v41 = vsel %vm945_vm3, %v974_v12, %v982_v36  ;;  %v12834_v45 = vsel %vm945_vm3, %v982_v36, %v990_v26  ;;  %v994_v46 = vrot.slane %v12792_v38, 4  ;;  %v863_v12 = vld [vmem:[#allocation4 + $0x410] sm:$0xff] }
  0x7d   :  { %v1000_v18 = vrot.slane %v862_v62, 4  ;;  %v12842_v56 = vsel %vm945_vm3, %v978_v54, %v986_v10  ;;  %v1008_v52 = vrot.slane %v12808_v37, 4  ;;  %v1004_v53 = vrot.slane %v864_v5, 4  ;;  %v12854_v33 = vld [vmem:[#allocation4 + $0x430] sm:$0xff]  ;;  %v870_v54 = vld [vmem:[#allocation4 + $0x448] sm:$0xff]  ;;  %v12893_v5 = vld [vmem:[#allocation4 + $0x460] sm:$0xff] }
  0x7e   :  { %10095 = vmatprep.subr.bf16.mxu0 %v18836_v40  ;;  %v18837_v36 = vpack.c.bf16 %v12611_v51, %v12601_v47  ;;  %v10130_v38 = vpack.c.bf16 %v12817_v22, %v12805_v50  ;;  %v12851_v62 = vsel %vm945_vm3, %v986_v10, %v994_v46  ;;  %v1012_v63 = vrot.slane %v12825_v15, 4  ;;  %v153_v51 = vld [vmem:[#allocation4 + $0x198] sm:$0x3f]  ;;  %v12870_v40 = vld [vmem:[#allocation4 + $0x468] sm:$0xff] }
  0x7f   :  { %v998_v32 = vrot.slane %v861_v43, 4  ;;  %v18838_v37 = vpack.c.bf16 %v12638_v2, %v12636_v1  ;;  %v18839_v47 = vpack.c.bf16 %v12642_v4, %v12640_v3  ;;  %v12867_v15 = vsel %vm945_vm3, %v992_v27, %v1000_v18  ;;  %v872_v1 = vld [vmem:[#allocation4 + $0x458] sm:$0xff]  ;;  %v150_v2 = vld [vmem:[#allocation4 + $0x180] sm:$0x3f]  ;;  %v100_v50 = vld [vmem:[%s18831_s20 + $0x28] sm:$0xff] }
  0x80   :  { %10117 = vmatpush1.bf16.msra.mxu1 %v18837_v36  ;;  %v1006_v43 = vrot.slane %v12837_v59, 4  ;;  %v12876_v4 = vsel %vm945_vm3, %v1000_v18, %v1008_v52  ;;  %v12879_v36 = vsel %vm945_vm3, %v996_v61, %v1004_v53  ;;  %v12881_v27 = vld [vmem:[#allocation4 + $0x478] sm:$0xff]  ;;  %v98_v59 = vld [vmem:[%s18831_s20] sm:$0xff]  ;;  %v1010_v18 = vrot.slane %v12854_v33, 4  ;;  %v152_v33 = vld [vmem:[#allocation4 + $0x190] sm:$0x3f] }
  0x81   :  { %10119 = vmatprep.subr.bf16.mxu1 %v18838_v37  ;;  %10097 = vmatpush1.bf16.msra.mxu0 %v18839_v47  ;;  %v1002_v37 = vrot.slane %v863_v12, 4  ;;  %v869_v47 = vld [vmem:[#allocation4 + $0x440] sm:$0xff]  ;;  %v12890_v10 = vsel %vm945_vm3, %v990_v26, %v998_v32  ;;  %v1016_v3 = vrot.slane %v870_v54, 4  ;;  %v1020_v29 = vrot.slane %v872_v1, 4  ;;  %v871_v26 = vld [vmem:[#allocation4 + $0x450] sm:$0xff] }
  0x82   :  { %9196 = vmatprep.subr.msk.mxu0 %vm440_vm1, %v151_v13  ;;  %v12887_v13 = vsel %vm945_vm3, %v1004_v53, %v1012_v63  ;;  %v12899_v61 = vsel %vm945_vm3, %v998_v32, %v1006_v43  ;;  %v1024_v53 = vrot.slane %v12870_v40, 4  ;;  %v1028_v21 = vrot.slane %v12881_v27, 4  ;;  %v878_v32 = vld [vmem:[#allocation4 + $0x488] sm:$0xff]  ;;  %v877_v27 = vld [vmem:[#allocation4 + $0x480] sm:$0xff] }
  0x83   :  { %v12902_v12 = vsel %vm945_vm3, %v994_v46, %v1002_v37  ;;  %v12908_v54 = vsel %vm945_vm3, %v1002_v37, %v1010_v18  ;;  %v12911_v20 = vsel %vm945_vm3, %v1008_v52, %v1016_v3  ;;  %v12914_v46 = vld [vmem:[#allocation4 + $0x470] sm:$0xff]  ;;  %v10158_v40 = vpack.c.bf16 %v12887_v13, %v12879_v36  ;;  %v880_v37 = vld [vmem:[#allocation4 + $0x498] sm:$0xff] }
  0x84   :  { %10121 = vmatpush1.bf16.msra.mxu1 %v10120_v57  ;;  %v1014_v57 = vrot.slane %v869_v47, 4  ;;  %v12925_v52 = vsel %vm945_vm3, %v1016_v3, %v1024_v53  ;;  %v1022_v1 = vrot.slane %v12893_v5, 4  ;;  %v10136_v14 = vpack.c.bf16 %v12899_v61, %v12890_v10  ;;  %v12941_v5 = vld [vmem:[#allocation4 + $0x4b8] sm:$0xff] }
  0x85   :  { %9202 = vmatprep.subr.msk.mxu1 %vm440_vm1, %v153_v51  ;;  %9197 = vmatpush1.msk.msra.mxu0 %vm440_vm1, %v150_v2  ;;  %v10134_v51 = vpack.c.bf16 %v12876_v4, %v12867_v15  ;;  %v12928_v2 = vld [vmem:[#allocation4 + $0x4a8] sm:$0xff]  ;;  %v10160_v60 = vpack.c.bf16 %v12908_v54, %v12902_v12  ;;  %v1018_v3 = vrot.slane %v871_v26, 4  ;;  %v12950_v8 = vsel %vm945_vm3, %v1020_v29, %v1028_v21  ;;  %v879_v26 = vld [vmem:[#allocation4 + $0x490] sm:$0xff] }
  0x86   :  { %10123 = vmatprep.subr.bf16.mxu0 %v10122_v58  ;;  %9198 = vmatmul.mubr.msk.f32.vlgmr.msra.gmra.mrb[0].mxu0 %vm427_vm2, %v98_v59  ;;  %v12939_v58 = vsel %vm945_vm3, %v1012_v63, %v1020_v29  ;;  %v1026_v16 = vrot.slane %v12914_v46, 4  ;;  %v12953_v63 = vld [vmem:[#allocation4 + $0x4a0] sm:$0xff]  ;;  %v12963_v11 = vsel %vm945_vm3, %v1006_v43, %v1014_v57  ;;  %v1040_v29 = vrot.slane %v12928_v2, 4  ;;  %v13000_v46 = vld [vmem:[#allocation4 + $0x4d8] sm:$0x3]  ;;  %v1493_v2 = vld [vmem:[#allocation4 + $0x1a8] sm:$0xff] }
  0x87   :  { %10125 = vmatpush1.bf16.msra.mxu0 %v10124_v24  ;;  %721 = vmatprep.mubr.f32.mxu0 %v12248_v0  ;;  %v10138_v0 = vpack.c.bf16 %v12925_v52, %v12911_v20  ;;  %v1032_v24 = vrot.slane %v878_v32, 4  ;;  %v1036_v47 = vrot.slane %v880_v37, 4  ;;  %v12976_v23 = vsel %vm945_vm3, %v1010_v18, %v1018_v3  ;;  %v13031_v32 = vld [vmem:[#allocation4 + $0x4d0] sm:$0x3] }
  0x88   :  { %9203 = vmatpush1.msk.msra.mxu1 %vm440_vm1, %v152_v33  ;;  %10127 = vmatprep.subr.bf16.mxu0 %v10126_v31  ;;  %v12966_v31 = vsel %vm945_vm3, %v1014_v57, %v1022_v1  ;;  %v1044_v43 = vrot.slane %v12941_v5, 4  ;;  %v12982_v33 = vld [vmem:[#allocation4 + $0x4b0] sm:$0xff]  ;;  %v886_v57 = vld [vmem:[#allocation4 + $0x4c8] sm:$0x3]  ;;  %v1038_v18 = vrot.slane %v12953_v63, 4  ;;  %v10162_v6 = vpack.c.bf16 %v12950_v8, %v12939_v58 }
  0x89   :  { %10147 = vmatprep.subr.bf16.mxu1 %v10146_v7  ;;  %9204 = vmatmul.mubr.msk.f32.vlgmr.msra.gmra.mrb[0].mxu1 %vm427_vm2, %v98_v59  ;;  %v12979_v7 = vsel %vm945_vm3, %v1018_v3, %v1026_v16  ;;  %v1030_v59 = vrot.slane %v877_v27, 4  ;;  %v12991_v17 = vsel %vm945_vm3, %v1024_v53, %v1032_v24  ;;  %v12994_v28 = vsel %vm945_vm3, %v1032_v24, %v1040_v29  ;;  %v13043_v24 = vld [vmem:[#allocation4 + $0x1c8] sm:$0xff]  ;;  %v13060_v27 = vld [vmem:[#allocation4 + $0x1d8] sm:$0xff]  ;;  %v101_v15 = vld [vmem:[%s18831_s20 + $0x30] sm:$0xff] }
  0x8a   :  { %10149 = vmatpush1.bf16.msra.mxu1 %v10148_v30  ;;  %810 = vmatprep.mubr.f32.mxu1 %v12972_v42  ;;  %v12997_v30 = vsel %vm945_vm3, %v1028_v21, %v1036_v47  ;;  %v10140_v35 = vpack.c.bf16 %v12966_v31, %v12963_v11  ;;  %v13013_v9 = vsel %vm945_vm3, %v1036_v47, %v1044_v43  ;;  %v1034_v25 = vrot.slane %v879_v26, 4  ;;  %v1495_v47 = vld [vmem:[#allocation4 + $0x1b8] sm:$0xff] }
  0x8b   :  { %10151 = vmatprep.subr.bf16.mxu1 %v10150_v34  ;;  %10129 = vmatpush1.bf16.msra.mxu0 %v10128_v39  ;;  %v13015_v34 = vld [vmem:[#allocation4 + $0x4c0] sm:$0x3]  ;;  %v1489_v39 = vld [vmem:[#allocation4 + $0x188] sm:$0xc0]  ;;  %v13023_v22 = vsel %vm945_vm3, %v1022_v1, %v1030_v59  ;;  %v1042_v53 = vrot.slane %v12982_v33, 4  ;;  %v1048_v21 = vrot.slane %v886_v57, 4  ;;  %v18840_v37 = vpack.c.bf16 %v12802_v49, %v12799_v19 }
  0x8c   :  { %10131 = vmatprep.subr.bf16.mxu0 %v10130_v38  ;;  %9199 = vmatmul.mubr.msk.f32.gmra.mrb[2].mxu0 %vm427_vm2, %v99_v55  ;;  %v13028_v38 = vsel %vm945_vm3, %v1030_v59, %v1038_v18  ;;  %v10142_v3 = vpack.c.bf16 %v12994_v28, %v12991_v17  ;;  %v18841_v26 = vpack.c.bf16 %v12823_v44, %v12820_v48  ;;  %v1052_v57 = vrot.slane %v13000_v46, 4  ;;  %v1488_v1 = vld [vmem:[#allocation4 + $0x180] sm:$0xc0]  ;;  %v13088_v44 = vld [vmem:[#allocation4 + $0x1d0] sm:$0xff]  ;;  %v13171_v33 = vld [vmem:[#allocation4 + $0x248] sm:$0xff] }
  0x8d   :  { %9205 = vmatmul.mubr.msk.f32.gmra.mrb[2].mxu1 %vm427_vm2, %v99_v55  ;;  %727 = vmatprep.mubr.f32.mxu0 %v12972_v42  ;;  %v1491_v55 = vld [vmem:[#allocation4 + $0x198] sm:$0xc0]  ;;  %v18842_v19 = vpack.c.bf16 %v12834_v45, %v12831_v41  ;;  %v13052_v49 = vsel %vm945_vm3, %v1026_v16, %v1034_v25  ;;  %v13057_v59 = vsel %vm945_vm3, %v1034_v25, %v1042_v53  ;;  %v1492_v48 = vld [vmem:[#allocation4 + $0x1a0] sm:$0xff]  ;;  %v1046_v45 = vrot.slane %v13015_v34, 4  ;;  %v1490_v25 = vld [vmem:[#allocation4 + $0x190] sm:$0xc0] }
  0x8e   :  { %10153 = vmatpush1.bf16.msra.mxu1 %v18840_v37  ;;  %816 = vmatprep.mubr.f32.mxu1 %v12972_v42  ;;  %v1603_v37 = vrot.slane %v1489_v39, 6  ;;  %v13069_v41 = vsel %vm945_vm3, %v1040_v29, %v1048_v21  ;;  %v1604_v16 = vrot.slane %v1493_v2, 6  ;;  %v13072_v46 = vld [vmem:[#allocation4 + $0x1c0] sm:$0xff]  ;;  %v1050_v4 = vrot.slane %v13031_v32, 4  ;;  %v1494_v21 = vld [vmem:[#allocation4 + $0x1b0] sm:$0xff]  ;;  %v1501_v32 = vld [vmem:[#allocation4 + $0x1e8] sm:$0xff] }
  0x8f   :  { %10155 = vmatprep.subr.bf16.mxu1 %v18841_v26  ;;  %10133 = vmatpush1.bf16.msra.mxu0 %v18842_v19  ;;  %v1609_v29 = vrot.slane %v1491_v55, 6  ;;  %v1610_v39 = vrot.slane %v1495_v47, 6  ;;  %v18843_v34 = vpack.c.bf16 %v12851_v62, %v12842_v56  ;;  %v1618_v2 = vrot.slane %v13060_v27, 6  ;;  %v1503_v55 = vld [vmem:[#allocation4 + $0x1f8] sm:$0xff] }
  0x90   :  { %10135 = vmatprep.subr.bf16.mxu0 %v10134_v51  ;;  %9200 = vmatmul.mubr.msk.f32.gmra.mrb[4].mxu0 %vm427_vm2, %v100_v50  ;;  %v1614_v51 = vrot.slane %v13043_v24, 6  ;;  %v1600_v26 = vrot.slane %v1488_v1, 6  ;;  %v1601_v19 = vrot.slane %v1492_v48, 6  ;;  %v13099_v56 = vsel %vm945_vm3, %v1044_v43, %v1052_v57  ;;  %v13105_v24 = vld [vmem:[#allocation4 + $0x208] sm:$0xff]  ;;  %v13131_v43 = vld [vmem:[#allocation4 + $0x200] sm:$0xff] }
  0x91   :  { %9206 = vmatmul.mubr.msk.f32.gmra.mrb[4].mxu1 %vm427_vm2, %v100_v50  ;;  %733 = vmatprep.mubr.f32.mxu0 %v12972_v42  ;;  %v10168_v50 = vpack.c.bf16 %v13057_v59, %v13052_v49  ;;  %v13102_v62 = vsel %vm270_vm0, %v1603_v37, %v1604_v16  ;;  %v1612_v1 = vrot.slane %v13072_v46, 6  ;;  %v1606_v27 = vrot.slane %v1490_v25, 6 }
  0x92   :  { %10157 = vmatpush1.bf16.msra.mxu1 %v18843_v34  ;;  %822 = vmatprep.mubr.f32.mxu1 %v12972_v42  ;;  %v13112_v10 = vsel %vm270_vm0, %v1604_v16, %v1614_v51  ;;  %v13115_v36 = vsel %vm270_vm0, %v1609_v29, %v1610_v39  ;;  %v13118_v13 = vsel %vm270_vm0, %v1610_v39, %v1618_v2  ;;  %v1607_v61 = vrot.slane %v1494_v21, 6  ;;  %v1508_v16 = vld [vmem:[#allocation4 + $0x220] sm:$0xff] }
  0x93   :  { %10159 = vmatprep.subr.bf16.mxu1 %v10158_v40  ;;  %10137 = vmatpush1.bf16.msra.mxu0 %v10136_v14  ;;  %v13120_v40 = vld [vmem:[#allocation4 + $0x218] sm:$0xff]  ;;  %v1500_v14 = vld [vmem:[#allocation4 + $0x1e0] sm:$0xff]  ;;  %v13125_v20 = vsel %vm270_vm0, %v1600_v26, %v1601_v19  ;;  %v13128_v52 = vsel %vm270_vm0, %v1601_v19, %v1612_v1  ;;  %v1616_v5 = vrot.slane %v13088_v44, 6  ;;  %v1047_v47 = vsel %vm945_vm3, %v1038_v18, %v1046_v45  ;;  %v1502_v44 = vld [vmem:[#allocation4 + $0x1f0] sm:$0xff] }
  0x94   :  { %10139 = vmatprep.subr.bf16.mxu0 %v10138_v0  ;;  %9201 = vmatmul.mubr.msk.f32.gmra.mrb[6].mxu0 %vm427_vm2, %v101_v15  ;;  %v1622_v0 = vrot.slane %v1501_v32, 6  ;;  %v13141_v57 = vsel %vm270_vm0, %v1606_v27, %v1607_v61  ;;  %v1630_v37 = vrot.slane %v13105_v24, 6  ;;  %v1626_v48 = vrot.slane %v1503_v55, 6  ;;  %v13159_v18 = vld [vmem:[#allocation4 + $0x210] sm:$0xff]  ;;  %v1509_v45 = vld [vmem:[#allocation4 + $0x228] sm:$0xff]  ;;  %v13191_v29 = vld [vmem:[#allocation4 + $0x240] sm:$0xff] }
  0x95   :  { %9207 = vmatmul.mubr.msk.f32.gmra.mrb[6].mxu1 %vm427_vm2, %v101_v15  ;;  %1186 = vmatprep.mubr.f32.mxu0 %v12972_v42  ;;  %v13153_v12 = vsel %vm945_vm3, %v1042_v53, %v1050_v4  ;;  %v13156_v54 = vsel %vm270_vm0, %v1607_v61, %v1616_v5  ;;  %v1620_v63 = vrot.slane %v1500_v14, 6  ;;  %v10170_v58 = vpack.c.bf16 %v13112_v10, %v13102_v62  ;;  %v1510_v26 = vld [vmem:[#allocation4 + $0x230] sm:$0xff]  ;;  %v1517_v32 = vld [vmem:[#allocation4 + $0x268] sm:$0xff]  ;;  %v1519_v10 = vld [vmem:[#allocation4 + $0x278] sm:$0xff] }
  0x96   :  { %10161 = vmatpush1.bf16.msra.mxu1 %v10160_v60  ;;  %1275 = vmatprep.mubr.f32.mxu1 %v12972_v42  ;;  %v1634_v60 = vrot.slane %v13120_v40, 6  ;;  %v10194_v8 = vpack.c.bf16 %v13118_v13, %v13115_v36  ;;  %v10172_v11 = vpack.c.bf16 %v13128_v52, %v13125_v20  ;;  %v1628_v31 = vrot.slane %v13131_v43, 6  ;;  %v13215_v19 = vld [vmem:[#allocation4 + $0x250] sm:$0xff]  ;;  %v829_v62 = vld [vmem:[%s18831_s20 + $0x2] sm:$0xff]  ;;  %v13241_v52 = vld [vmem:[#allocation4 + $0x298] sm:$0xff] }
  0x97   :  { %10163 = vmatprep.subr.bf16.mxu1 %v10162_v6  ;;  %10141 = vmatpush1.bf16.msra.mxu0 %v10140_v35  ;;  %v1511_v6 = vld [vmem:[#allocation4 + $0x238] sm:$0xff]  ;;  %v10196_v35 = vpack.c.bf16 %v13156_v54, %v13141_v57  ;;  %v13176_v17 = vsel %vm270_vm0, %v1614_v51, %v1622_v0  ;;  %v1631_v28 = vsel %vm270_vm0, %v1622_v0, %v1630_v37  ;;  %v1624_v53 = vrot.slane %v1502_v44, 6  ;;  %v13228_v55 = vld [vmem:[#allocation4 + $0x288] sm:$0xff]  ;;  %v13251_v43 = vld [vmem:[#allocation4 + $0x280] sm:$0xff] }
  0x98   :  { %10143 = vmatprep.subr.bf16.mxu0 %v10142_v3  ;;  %v13179_v3 = vld [vmem:[#allocation4 + $0x258] sm:$0xff]  ;;  %v18844_v46 = vpack.c.bf16 %v12979_v7, %v12976_v23  ;;  %v13185_v25 = vsel %vm270_vm0, %v1618_v2, %v1626_v48  ;;  %v13188_v15 = vsel %vm270_vm0, %v1626_v48, %v1634_v60  ;;  %v1632_v4 = vrot.slane %v13159_v18, 6  ;;  %v831_v57 = vld [vmem:[%s18831_s20 + $0x2a] sm:$0xff] }
  0x99   :  { %v1638_v51 = vrot.slane %v1509_v45, 6  ;;  %v18845_v39 = vpack.c.bf16 %v13013_v9, %v12997_v30  ;;  %v18846_v21 = vpack.c.bf16 %v13028_v38, %v13023_v22  ;;  %v13200_v23 = vsel %vm270_vm0, %v1612_v1, %v1620_v63  ;;  %v1518_v45 = vld [vmem:[#allocation4 + $0x270] sm:$0xff] }
  0x9a   :  { %10165 = vmatpush1.bf16.msra.mxu1 %v18844_v46  ;;  %v13203_v7 = vsel %vm270_vm0, %v1620_v63, %v1628_v31  ;;  %v1646_v34 = vrot.slane %v13171_v33, 6  ;;  %v1642_v2 = vrot.slane %v1511_v6, 6  ;;  %v13209_v30 = vsel %vm270_vm0, %v1616_v5, %v1624_v53  ;;  %v1516_v5 = vld [vmem:[#allocation4 + $0x260] sm:$0xff] }
  0x9b   :  { %10167 = vmatprep.subr.bf16.mxu1 %v18845_v39  ;;  %10145 = vmatpush1.bf16.msra.mxu0 %v18846_v21  ;;  %v13212_v9 = vsel %vm270_vm0, %v1624_v53, %v1632_v4  ;;  %v1650_v22 = vrot.slane %v13179_v3, 6  ;;  %v1636_v38 = vrot.slane %v1508_v16, 6  ;;  %v10174_v1 = vpack.c.bf16 %v1631_v28, %v13176_v17  ;;  %v13286_v53 = vld [vmem:[#allocation4 + $0x2c8] sm:$0xff] }
  0x9c   :  { %9208 = vmatprep.subr.msk.mxu0 %vm440_vm1, %v13069_v41  ;;  %v13222_v41 = vsel %vm270_vm0, %v1630_v37, %v1638_v51  ;;  %v13225_v27 = vsel %vm270_vm0, %v1638_v51, %v1646_v34  ;;  %v1644_v24 = vrot.slane %v13191_v29, 6  ;;  %v10198_v61 = vpack.c.bf16 %v13188_v15, %v13185_v25  ;;  %v13299_v25 = vld [vmem:[#allocation4 + $0x2d8] sm:$0xff]  ;;  %v13308_v51 = vld [vmem:[#allocation4 + $0x2c0] sm:$0xff] }
  0x9d   :  { %v13236_v40 = vsel %vm270_vm0, %v1634_v60, %v1642_v2  ;;  %v13239_v14 = vsel %vm270_vm0, %v1642_v2, %v1650_v22  ;;  %v1640_v20 = vrot.slane %v1510_v26, 6  ;;  %v10176_v49 = vpack.c.bf16 %v13203_v7, %v13200_v23  ;;  %v1526_v2 = vld [vmem:[#allocation4 + $0x2b0] sm:$0xff] }
  0x9e   :  { %10169 = vmatpush1.bf16.msra.mxu1 %v10168_v50  ;;  %v10200_v59 = vpack.c.bf16 %v13212_v9, %v13209_v30  ;;  %v1648_v50 = vrot.slane %v13215_v19, 6  ;;  %v1654_v0 = vrot.slane %v1517_v32, 6  ;;  %v10178_v37 = vpack.c.bf16 %v13225_v27, %v13222_v41  ;;  %v13328_v26 = vld [vmem:[#allocation4 + $0x2d0] sm:$0xff]  ;;  %v13334_v41 = vld [vmem:[#allocation4 + $0x308] sm:$0xff]  ;;  %v1535_v27 = vld [vmem:[#allocation4 + $0x2f8] sm:$0xff] }
  0x9f   :  { %9214 = vmatprep.subr.msk.mxu1 %vm440_vm1, %v13099_v56  ;;  %9209 = vmatpush1.msk.msra.mxu0 %vm440_vm1, %v1047_v47  ;;  %v13257_v56 = vsel %vm270_vm0, %v1628_v31, %v1636_v38  ;;  %v1662_v47 = vrot.slane %v13228_v55, 6  ;;  %v1658_v48 = vrot.slane %v1519_v10, 6  ;;  %v10202_v44 = vpack.c.bf16 %v13239_v14, %v13236_v40  ;;  %v1525_v31 = vld [vmem:[#allocation4 + $0x2a8] sm:$0xff]  ;;  %v1532_v40 = vld [vmem:[#allocation4 + $0x2e0] sm:$0xff]  ;;  %v832_v19 = vld [vmem:[%s18831_s20 + $0x32] sm:$0xff] }
  0xa0   :  { %9210 = vmatmul.mubr.msk.f32.vlgmr.msra.gmra.mrb[0].mxu0 %vm427_vm2, %v829_v62  ;;  %10171 = vmatprep.subr.bf16.mxu0 %v10170_v58  ;;  %v13264_v60 = vsel %vm270_vm0, %v1636_v38, %v1644_v24  ;;  %v1666_v63 = vrot.slane %v13241_v52, 6  ;;  %v1652_v18 = vrot.slane %v1516_v5, 6  ;;  %v13267_v58 = vld [vmem:[#allocation4 + $0x290] sm:$0xff]  ;;  %v13275_v33 = vsel %vm270_vm0, %v1632_v4, %v1640_v20  ;;  %v1524_v4 = vld [vmem:[#allocation4 + $0x2a0] sm:$0xff] }
  0xa1   :  { %10173 = vmatpush1.bf16.msra.mxu0 %v10172_v11  ;;  %1192 = vmatprep.mubr.f32.mxu0 %v12972_v42  ;;  %v830_v11 = vld [vmem:[%s18831_s20 + $0xa] sm:$0xff]  ;;  %v13280_v6 = vsel %vm270_vm0, %v1640_v20, %v1648_v50  ;;  %v13283_v17 = vsel %vm270_vm0, %v1646_v34, %v1654_v0  ;;  %v1660_v28 = vrot.slane %v13251_v43, 6  ;;  %v1663_v3 = vsel %vm270_vm0, %v1654_v0, %v1662_v47  ;;  %v13352_v52 = vld [vmem:[#allocation4 + $0x300] sm:$0xff] }
  0xa2   :  { %9215 = vmatpush1.msk.msra.mxu1 %vm440_vm1, %v13153_v12  ;;  %10175 = vmatprep.subr.bf16.mxu0 %v10174_v1  ;;  %v1527_v12 = vld [vmem:[#allocation4 + $0x2b8] sm:$0xff]  ;;  %v13294_v16 = vsel %vm270_vm0, %v1650_v22, %v1658_v48  ;;  %v13297_v46 = vsel %vm270_vm0, %v1658_v48, %v1666_v63  ;;  %v10180_v36 = vpack.c.bf16 %v13264_v60, %v13257_v56  ;;  %v1656_v13 = vrot.slane %v1518_v45, 6  ;;  %v1533_v22 = vld [vmem:[#allocation4 + $0x2e8] sm:$0xff]  ;;  %v1534_v0 = vld [vmem:[#allocation4 + $0x2f0] sm:$0xff] }
  0xa3   :  { %9216 = vmatmul.mubr.msk.f32.vlgmr.msra.gmra.mrb[0].mxu1 %vm427_vm2, %v829_v62  ;;  %10195 = vmatprep.subr.bf16.mxu1 %v10194_v8  ;;  %v1664_v8 = vrot.slane %v13267_v58, 6  ;;  %v1670_v15 = vrot.slane %v1525_v31, 6  ;;  %v13315_v54 = vsel %vm270_vm0, %v1644_v24, %v1652_v18  ;;  %v1678_v29 = vrot.slane %v13286_v53, 6 }
  0xa4   :  { %10197 = vmatpush1.bf16.msra.mxu1 %v10196_v35  ;;  %1281 = vmatprep.mubr.f32.mxu1 %v12972_v42  ;;  %v1661_v35 = vsel %vm270_vm0, %v1652_v18, %v1660_v28  ;;  %v1674_v39 = vrot.slane %v1527_v12, 6  ;;  %v10204_v21 = vpack.c.bf16 %v13280_v6, %v13275_v33  ;;  %v10182_v23 = vpack.c.bf16 %v1663_v3, %v13283_v17  ;;  %v1541_v6 = vld [vmem:[#allocation4 + $0x328] sm:$0xf] }
  0xa5   :  { %9211 = vmatmul.mubr.msk.f32.gmra.mrb[2].mxu0 %vm427_vm2, %v830_v11  ;;  %10199 = vmatprep.subr.bf16.mxu1 %v10198_v61  ;;  %v10206_v7 = vpack.c.bf16 %v13297_v46, %v13294_v16  ;;  %v1682_v34 = vrot.slane %v13299_v25, 6  ;;  %v1671_v38 = vsel %vm270_vm0, %v1662_v47, %v1670_v15  ;;  %v1679_v32 = vsel %vm270_vm0, %v1670_v15, %v1678_v29  ;;  %v13347_v61 = vld [vmem:[#allocation4 + $0x318] sm:$0xff] }
  0xa6   :  { %10177 = vmatpush1.bf16.msra.mxu0 %v10176_v49  ;;  %1198 = vmatprep.mubr.f32.mxu0 %v12972_v42  ;;  %v1668_v62 = vrot.slane %v1524_v4, 6  ;;  %v1676_v1 = vrot.slane %v13308_v51, 6  ;;  %v10184_v24 = vpack.c.bf16 %v1661_v35, %v13315_v54  ;;  %v1657_v55 = vsel %vm270_vm0, %v1648_v50, %v1656_v13  ;;  %v1543_v46 = vld [vmem:[#allocation4 + $0x338] sm:$0xf]  ;;  %v1542_v54 = vld [vmem:[#allocation4 + $0x330] sm:$0xf] }
  0xa7   :  { %9217 = vmatmul.mubr.msk.f32.gmra.mrb[2].mxu1 %vm427_vm2, %v830_v11  ;;  %10179 = vmatprep.subr.bf16.mxu0 %v10178_v37  ;;  %v1665_v10 = vsel %vm270_vm0, %v1656_v13, %v1664_v8  ;;  %v1675_v30 = vsel %vm270_vm0, %v1666_v63, %v1674_v39  ;;  %v1672_v9 = vrot.slane %v1526_v2, 6  ;;  %v1680_v14 = vrot.slane %v13328_v26, 6  ;;  %v1540_v13 = vld [vmem:[#allocation4 + $0x320] sm:$0xf] }
  0xa8   :  { %10201 = vmatpush1.bf16.msra.mxu1 %v10200_v59  ;;  %1287 = vmatprep.mubr.f32.mxu1 %v12972_v42  ;;  %v1686_v20 = vrot.slane %v1533_v22, 6  ;;  %v10186_v5 = vpack.c.bf16 %v1679_v32, %v1671_v38  ;;  %v1683_v49 = vsel %vm270_vm0, %v1674_v39, %v1682_v34  ;;  %v1694_v59 = vrot.slane %v13334_v41, 6  ;;  %v1432_v2 = vld [vmem:[#allocation4] sm:$0xff]  ;;  %v1439_v38 = vld [vmem:[#allocation4 + $0x38] sm:$0xff] }
  0xa9   :  { %9212 = vmatmul.mubr.msk.f32.gmra.mrb[4].mxu0 %vm427_vm2, %v831_v57  ;;  %10203 = vmatprep.subr.bf16.mxu1 %v10202_v44  ;;  %v1690_v50 = vrot.slane %v1535_v27, 6  ;;  %v1669_v37 = vsel %vm270_vm0, %v1660_v28, %v1668_v62  ;;  %v1677_v56 = vsel %vm270_vm0, %v1668_v62, %v1676_v1  ;;  %v1698_v47 = vrot.slane %v13347_v61, 6  ;;  %v13366_v44 = vld [vmem:[#allocation4 + $0x310] sm:$0xff]  ;;  %v1436_v26 = vld [vmem:[#allocation4 + $0x20] sm:$0xff]  ;;  %v1443_v61 = vld [vmem:[#allocation4 + $0x58] sm:$0xff] }
  0xaa   :  { %10181 = vmatpush1.bf16.msra.mxu0 %v10180_v36  ;;  %1204 = vmatprep.mubr.f32.mxu0 %v12972_v42  ;;  %v1684_v48 = vrot.slane %v1532_v40, 6  ;;  %v10208_v60 = vpack.c.bf16 %v1665_v10, %v1657_v55  ;;  %v1687_v63 = vsel %vm270_vm0, %v1678_v29, %v1686_v20  ;;  %v1695_v18 = vsel %vm270_vm0, %v1686_v20, %v1694_v59  ;;  %v1484_v32 = vld [vmem:[%s18831_s20 + $0x11] sm:$0xff]  ;;  %v1445_v55 = vld [vmem:[#allocation4 + $0x68] sm:$0xff]  ;;  %v1444_v20 = vld [vmem:[#allocation4 + $0x60] sm:$0xff] }
  0xab   :  { %9218 = vmatmul.mubr.msk.f32.gmra.mrb[4].mxu1 %vm427_vm2, %v831_v57  ;;  %10183 = vmatprep.subr.bf16.mxu0 %v10182_v23  ;;  %v1692_v45 = vrot.slane %v13352_v52, 6  ;;  %v10210_v43 = vpack.c.bf16 %v1683_v49, %v1675_v30  ;;  %v1673_v31 = vsel %vm270_vm0, %v1664_v8, %v1672_v9  ;;  %v1681_v11 = vsel %vm270_vm0, %v1672_v9, %v1680_v14  ;;  %v1437_v23 = vld [vmem:[#allocation4 + $0x28] sm:$0xff]  ;;  %v1434_v62 = vld [vmem:[#allocation4 + $0x10] sm:$0xff]  ;;  %v1447_v40 = vld [vmem:[#allocation4 + $0x78] sm:$0xff] }
  0xac   :  { %10205 = vmatpush1.bf16.msra.mxu1 %v10204_v21  ;;  %1293 = vmatprep.mubr.f32.mxu1 %v12972_v42  ;;  %v1688_v33 = vrot.slane %v1534_v0, 6  ;;  %v10188_v17 = vpack.c.bf16 %v1677_v56, %v1669_v37  ;;  %v1691_v28 = vsel %vm270_vm0, %v1682_v34, %v1690_v50  ;;  %v1699_v53 = vsel %vm270_vm0, %v1690_v50, %v1698_v47  ;;  %v1433_v21 = vld [vmem:[#allocation4 + $0x8] sm:$0xff]  ;;  %v1435_v34 = vld [vmem:[#allocation4 + $0x18] sm:$0xff]  ;;  %v1438_v27 = vld [vmem:[#allocation4 + $0x30] sm:$0xff] }
  0xad   :  { %9213 = vmatmul.mubr.msk.f32.gmra.mrb[6].mxu0 %vm427_vm2, %v832_v19  ;;  %10207 = vmatprep.subr.bf16.mxu1 %v10206_v7  ;;  %v1696_v12 = vrot.slane %v13366_v44, 6  ;;  %v10190_v58 = vpack.c.bf16 %v1695_v18, %v1687_v63  ;;  %v1685_v3 = vsel %vm270_vm0, %v1676_v1, %v1684_v48  ;;  %v1693_v16 = vsel %vm270_vm0, %v1684_v48, %v1692_v45  ;;  %v1440_v30 = vld [vmem:[#allocation4 + $0x40] sm:$0xff]  ;;  %v1442_v52 = vld [vmem:[#allocation4 + $0x50] sm:$0xff]  ;;  %v1453_v50 = vld [vmem:[#allocation4 + $0xa8] sm:$0xff] }
  0xae   :  { %10185 = vmatpush1.bf16.msra.mxu0 %v10184_v24  ;;  %1840 = vmatprep.mubr.f32.mxu0 %v12972_v42  ;;  %v10212_v25 = vpack.c.bf16 %v1681_v11, %v1673_v31  ;;  %v1702_v36 = vrot.slane %v1541_v6, 6  ;;  %v10214_v8 = vpack.c.bf16 %v1699_v53, %v1691_v28  ;;  %v1689_v15 = vsel %vm270_vm0, %v1680_v14, %v1688_v33  ;;  %v1441_v24 = vld [vmem:[#allocation4 + $0x48] sm:$0xff]  ;;  %v1451_v0 = vld [vmem:[#allocation4 + $0x98] sm:$0xff]  ;;  %v13400_v48 = vld [vmem:[#allocation4 + $0xa0] sm:$0xff] }
  0xaf   :  { %9219 = vmatmul.mubr.msk.f32.gmra.mrb[6].mxu1 %vm427_vm2, %v832_v19  ;;  %10187 = vmatprep.subr.bf16.mxu0 %v10186_v5  ;;  %v1697_v4 = vsel %vm270_vm0, %v1688_v33, %v1696_v12  ;;  %v10192_v51 = vpack.c.bf16 %v1693_v16, %v1685_v3  ;;  %v1706_v57 = vrot.slane %v1543_v46, 6  ;;  %v1700_v35 = vrot.slane %v1540_v13, 6  ;;  %v1446_v19 = vld [vmem:[#allocation4 + $0x70] sm:$0xff]  ;;  %v1455_v56 = vld [vmem:[#allocation4 + $0xb8] sm:$0xff]  ;;  %v13407_v18 = vld [vmem:[#allocation4 + $0xc8] sm:$0xff] }
  0xb0   :  { %10209 = vmatpush1.bf16.msra.mxu1 %v10208_v60  ;;  %1929 = vmatprep.mubr.f32.mxu1 %v12972_v42  ;;  %v10216_v29 = vpack.c.bf16 %v1697_v4, %v1689_v15  ;;  %v1703_v39 = vsel %vm270_vm0, %v1694_v59, %v1702_v36  ;;  %v1704_v7 = vrot.slane %v1542_v54, 6  ;;  %v10218_v41 = vpack.c.bf16 %v1437_v23, %v1433_v21  ;;  %v1449_v59 = vld [vmem:[#allocation4 + $0x88] sm:$0xff]  ;;  %v13403_v60 = vld [vmem:[#allocation4 + $0x90] sm:$0xff]  ;;  %v13412_v31 = vld [vmem:[#allocation4 + $0xd8] sm:$0xff] }
  0xb1   :  { %10211 = vmatprep.subr.bf16.mxu1 %v10210_v43  ;;  %v1707_v22 = vsel %vm270_vm0, %v1698_v47, %v1706_v57  ;;  %v1701_v1 = vsel %vm270_vm0, %v1692_v45, %v1700_v35  ;;  %v10220_v10 = vpack.c.bf16 %v1436_v26, %v1432_v2  ;;  %v10242_v14 = vpack.c.bf16 %v1439_v38, %v1435_v34  ;;  %v13398_v47 = vld [vmem:[#allocation4 + $0x80] sm:$0xff]  ;;  %v13405_v63 = vld [vmem:[#allocation4 + $0xb0] sm:$0xff]  ;;  %v13410_v43 = vld [vmem:[#allocation4 + $0xe8] sm:$0xff] }
  0xb2   :  { %10189 = vmatpush1.bf16.msra.mxu0 %v10188_v17  ;;  %v1705_v9 = vsel %vm270_vm0, %v1696_v12, %v1704_v7  ;;  %v10244_v5 = vpack.c.bf16 %v1438_v27, %v1434_v62  ;;  %v10222_v49 = vpack.c.bf16 %v1445_v55, %v1441_v24  ;;  %v10246_v37 = vpack.c.bf16 %v1447_v40, %v1443_v61  ;;  %v13414_v11 = vld [vmem:[#allocation4 + $0xf8] sm:$0xff]  ;;  %v13416_v6 = vld [vmem:[#allocation4 + $0xc0] sm:$0xff]  ;;  %v13423_v12 = vld [vmem:[#allocation4 + $0xd0] sm:$0xff] }
  0xb3   :  { %10191 = vmatprep.subr.bf16.mxu0 %v10190_v58  ;;  %v10224_v44 = vpack.c.bf16 %v1444_v20, %v1440_v30  ;;  %v10226_v45 = vpack.c.bf16 %v1453_v50, %v1449_v59  ;;  %v10248_v33 = vpack.c.bf16 %v1446_v19, %v1442_v52  ;;  %v13418_v17 = vld [vmem:[#allocation4 + $0xe0] sm:$0xff]  ;;  %v10250_v53 = vpack.c.bf16 %v1455_v56, %v1451_v0  ;;  %v13425_v58 = vld [vmem:[#allocation4 + $0xf0] sm:$0xff]  ;;  %v13428_v3 = vld [vmem:[#allocation4 + $0x328] sm:$0xf0] }
  0xb4   :  { %10213 = vmatpush1.bf16.msra.mxu1 %v10212_v25  ;;  %v1485_v28 = vld [vmem:[%s18831_s20 + $0x19] sm:$0xff]  ;;  %v13430_v16 = vld [vmem:[#allocation4 + $0x348] sm:$0xff]  ;;  %v10228_v25 = vpack.c.bf16 %v13400_v48, %v13398_v47  ;;  %v2160_v21 = vld [vmem:[#allocation4 + $0x320] sm:$0xf0]  ;;  %v10254_v34 = vpack.c.bf16 %v13414_v11, %v13412_v31  ;;  %v10232_v2 = vpack.c.bf16 %v13418_v17, %v13416_v6  ;;  %v10256_v61 = vpack.c.bf16 %v13425_v58, %v13423_v12 }
  0xb5   :  { %10215 = vmatprep.subr.bf16.mxu1 %v10214_v8  ;;  %v13432_v46 = vld [vmem:[#allocation4 + $0x368] sm:$0xff]  ;;  %v13441_v8 = vld [vmem:[#allocation4 + $0x118] sm:$0xff]  ;;  %v13445_v4 = vld [vmem:[#allocation4 + $0x100] sm:$0xff]  ;;  %v2276_v62 = vrot.slane %v13430_v16, 4  ;;  %v2272_v20 = vrot.slane %v2160_v21, 4  ;;  %vm3433_vm7 = vcmask 252928  }
  0xb6   :  { %10193 = vmatpush1.bf16.msra.mxu0 %v10192_v51  ;;  %v13437_v36 = vld [vmem:[#allocation4 + $0x108] sm:$0xff]  ;;  %v13443_v15 = vld [vmem:[#allocation4 + $0x138] sm:$0xff]  ;;  %v13447_v51 = vld [vmem:[#allocation4 + $0x120] sm:$0xff]  ;;  %v2286_v27 = vrot.slane %v13432_v46, 4  ;;  %vm12249_vm8 = vmmov 1   ;;  %vm3148_vm10 = vcmask 123904  }
  0xb7   :  { %9220 = vmatprep.subr.msk.mxu0 %vm440_vm1, %v1703_v39  ;;  %v13439_v13 = vld [vmem:[#allocation4 + $0x128] sm:$0xff]  ;;  %v2163_v57 = vld [vmem:[#allocation4 + $0x338] sm:$0xf0]  ;;  %v10230_v39 = vpack.c.bf16 %v13410_v43, %v13407_v18  ;;  %v2164_v23 = vld [vmem:[#allocation4 + $0x340] sm:$0xff]  ;;  %v10258_v59 = vpack.c.bf16 %v13443_v15, %v13441_v8  ;;  %v10236_v50 = vpack.c.bf16 %v13447_v51, %v13445_v4  ;;  %vm12251_vm11 = vmmov 0  }
  0xb8   :  { %10217 = vmatpush1.bf16.msra.mxu1 %v10216_v29  ;;  %v2167_v54 = vld [vmem:[#allocation4 + $0x358] sm:$0xff]  ;;  %v10252_v29 = vpack.c.bf16 %v13405_v63, %v13403_v60  ;;  %v13456_v7 = vld [vmem:[#allocation4 + $0x360] sm:$0xff]  ;;  %v13462_v26 = vld [vmem:[#allocation4 + $0x110] sm:$0xff]  ;;  %v2281_v24 = vrot.slane %v2163_v57, 4  ;;  %v2273_v52 = vrot.slane %v2164_v23, 4  ;;  %v13521_v43 = vsel %vm945_vm3, %v2276_v62, %v2286_v27 }
  0xb9   :  { %9226 = vmatprep.subr.msk.mxu1 %vm440_vm1, %v1707_v22  ;;  %v13449_v35 = vld [vmem:[#allocation4 + $0x378] sm:$0xff]  ;;  %v13464_v22 = vld [vmem:[#allocation4 + $0x130] sm:$0xff]  ;;  %v2282_v55 = vrot.slane %v2167_v54, 4  ;;  %v2284_v19 = vrot.slane %v13456_v7, 4  ;;  %v2173_v63 = vld [vmem:[#allocation4 + $0x388] sm:$0xff]  ;;  %vm8380_vm12 = vcmask 1041409  }
  0xba   :  { %9221 = vmatpush1.msk.msra.mxu0 %vm440_vm1, %v1701_v1  ;;  %v1486_v38 = vld [vmem:[%s18831_s20 + $0x39] sm:$0xff]  ;;  %v13473_v1 = vld [vmem:[#allocation4 + $0x148] sm:$0xff]  ;;  %v13498_v0 = vld [vmem:[#allocation4 + $0x150] sm:$0xff]  ;;  %v10260_v47 = vpack.c.bf16 %v13464_v22, %v13462_v26  ;;  %vm9092_vm13 = vcmask 261120   ;;  %vm9166_vm14 = vcmask 74752  }
  0xbb   :  { %10219 = vmatprep.subr.bf16.mxu0 %v10218_v41  ;;  %9222 = vmatmul.mubr.msk.f32.vlgmr.msra.gmra.mrb[8].mxu0 %vm427_vm2, %v1484_v32  ;;  %v13475_v41 = vld [vmem:[#allocation4 + $0x168] sm:$0xff]  ;;  %v13482_v40 = vld [vmem:[#allocation4 + $0x158] sm:$0xff]  ;;  %v13500_v56 = vld [vmem:[#allocation4 + $0x370] sm:$0xff]  ;;  %v13524_v31 = vsel %vm945_vm3, %v2281_v24, %v2282_v55 }
  0xbc   :  { %9227 = vmatpush1.msk.msra.mxu1 %vm440_vm1, %v1705_v9  ;;  %10221 = vmatpush1.bf16.msra.mxu0 %v10220_v10  ;;  %v2290_v10 = vrot.slane %v13449_v35, 4  ;;  %v13484_v30 = vld [vmem:[#allocation4 + $0x178] sm:$0xff]  ;;  %v13486_v9 = vld [vmem:[#allocation4 + $0x140] sm:$0xff]  ;;  %v10238_v48 = vpack.c.bf16 %v13475_v41, %v13473_v1  ;;  %v13513_v18 = vld [vmem:[#allocation4 + $0x3a8] sm:$0xff]  ;;  %v2288_v58 = vrot.slane %v13500_v56, 4 }
  0xbd   :  { %10243 = vmatprep.subr.bf16.mxu1 %v10242_v14  ;;  %9228 = vmatmul.mubr.msk.f32.vlgmr.msra.gmra.mrb[8].mxu1 %vm427_vm2, %v1484_v32  ;;  %v2275_v32 = vrot.slane %v13428_v3, 4  ;;  %v13488_v14 = vld [vmem:[#allocation4 + $0x160] sm:$0xff]  ;;  %v2175_v6 = vld [vmem:[#allocation4 + $0x398] sm:$0xff]  ;;  %v2302_v8 = vrot.slane %v13513_v18, 4  ;;  %v2174_v15 = vld [vmem:[#allocation4 + $0x390] sm:$0xff] }
  0xbe   :  { %10245 = vmatpush1.bf16.msra.mxu1 %v10244_v5  ;;  %10223 = vmatprep.subr.bf16.mxu0 %v10222_v49  ;;  %v2162_v5 = vld [vmem:[#allocation4 + $0x330] sm:$0xf0]  ;;  %v10234_v49 = vpack.c.bf16 %v13439_v13, %v13437_v36  ;;  %v13529_v11 = vsel %vm945_vm3, %v2282_v55, %v2290_v10  ;;  %v13531_v17 = vld [vmem:[#allocation4 + $0x3b8] sm:$0xff]  ;;  %v2172_v3 = vld [vmem:[#allocation4 + $0x380] sm:$0xff]  ;;  %v10240_v36 = vpack.c.bf16 %v13488_v14, %v13486_v9  ;;  %v2294_v13 = vrot.slane %v2173_v63, 4 }
  0xbf   :  { %10247 = vmatprep.subr.bf16.mxu1 %v10246_v37  ;;  %1846 = vmatprep.mubr.f32.mxu0 %v12972_v42  ;;  %v2166_v37 = vld [vmem:[#allocation4 + $0x350] sm:$0xff]  ;;  %v13511_v60 = vsel %vm945_vm3, %v2275_v32, %v2276_v62  ;;  %v13543_v16 = vld [vmem:[#allocation4 + $0x3a0] sm:$0xff]  ;;  %v2298_v54 = vrot.slane %v2175_v6, 4  ;;  %v13559_v21 = vld [vmem:[#allocation4 + $0x3e8] sm:$0xff]  ;;  %v10290_v23 = vpack.c.bf16 %v13529_v11, %v13524_v31  ;;  %v2296_v1 = vrot.slane %v2174_v15, 4 }
  0xc0   :  { %10225 = vmatpush1.bf16.msra.mxu0 %v10224_v44  ;;  %1935 = vmatprep.mubr.f32.mxu1 %v12972_v42  ;;  %v1487_v44 = vld [vmem:[%s18831_s20 + $0x41] sm:$0xff]  ;;  %v2279_v12 = vrot.slane %v2166_v37, 4  ;;  %v13551_v4 = vld [vmem:[#allocation4 + $0x3b0] sm:$0xff]  ;;  %v10266_v57 = vpack.c.bf16 %v13521_v43, %v13511_v60  ;;  %v2300_v26 = vrot.slane %v13543_v16, 4  ;;  %v2183_v22 = vld [vmem:[#allocation4 + $0x3d8] sm:$0xff] }
  0xc1   :  { %10227 = vmatprep.subr.bf16.mxu0 %v10226_v45  ;;  %9223 = vmatmul.mubr.msk.f32.gmra.mrb[10].mxu0 %vm427_vm2, %v1485_v28  ;;  %v13516_v45 = vld [vmem:[#allocation4 + $0x170] sm:$0xff]  ;;  %v2304_v41 = vrot.slane %v13551_v4, 4  ;;  %v2180_v24 = vld [vmem:[#allocation4 + $0x3c0] sm:$0xff]  ;;  %v1481_v9 = vld [vmem:[#allocation4 + $0x188] sm:$0x3f]  ;;  %v13591_v14 = vsel %vm945_vm3, %v2290_v10, %v2298_v54  ;;  %v2314_v46 = vrot.slane %v2183_v22, 4  ;;  %v13613_v56 = vsel %vm945_vm3, %v2288_v58, %v2296_v1 }
  0xc2   :  { %10249 = vmatpush1.bf16.msra.mxu1 %v10248_v33  ;;  %1852 = vmatprep.mubr.f32.mxu0 %v12972_v42  ;;  %v2278_v33 = vrot.slane %v2162_v5, 4  ;;  %v10264_v51 = vpack.c.bf16 %v13516_v45, %v13498_v0  ;;  %v13574_v62 = vsel %vm945_vm3, %v2279_v12, %v2288_v58  ;;  %v13577_v55 = vld [vmem:[#allocation4 + $0x3e0] sm:$0xff]  ;;  %v13597_v5 = vld [vmem:[#allocation4 + $0x3f0] sm:$0xff]  ;;  %v2308_v10 = vrot.slane %v2180_v24, 4  ;;  %v13632_v6 = vld [vmem:[#allocation4 + $0x438] sm:$0xff] }
  0xc3   :  { %10251 = vmatprep.subr.bf16.mxu1 %v10250_v53  ;;  %9229 = vmatmul.mubr.msk.f32.gmra.mrb[10].mxu1 %vm427_vm2, %v1485_v28  ;;  %v13535_v28 = vsel %vm945_vm3, %v2272_v20, %v2273_v52  ;;  %v13540_v53 = vsel %vm945_vm3, %v2273_v52, %v2284_v19  ;;  %v2182_v52 = vld [vmem:[#allocation4 + $0x3d0] sm:$0xff]  ;;  %v13618_v7 = vsel %vm945_vm3, %v2296_v1, %v2304_v41  ;;  %v2320_v45 = vrot.slane %v13597_v5, 4  ;;  %v13669_v1 = vld [vmem:[#allocation4 + $0x468] sm:$0xff]  ;;  %vm14560_vm9 = vmpackc.low %vm3372_vm6, %vm12249_vm8 }
  0xc4   :  { %10229 = vmatpush1.bf16.msra.mxu0 %v10228_v25  ;;  %1941 = vmatprep.mubr.f32.mxu1 %v12972_v42  ;;  %v10262_v25 = vpack.c.bf16 %v13484_v30, %v13482_v40  ;;  %v13571_v32 = vsel %vm945_vm3, %v2278_v33, %v2279_v12  ;;  %v2318_v30 = vrot.slane %v13559_v21, 4  ;;  %v2312_v18 = vrot.slane %v2182_v52, 4  ;;  %v2191_v33 = vld [vmem:[#allocation4 + $0x418] sm:$0xff] }
  0xc5   :  { %10231 = vmatprep.subr.bf16.mxu0 %v10230_v39  ;;  %9224 = vmatmul.mubr.msk.f32.gmra.mrb[12].mxu0 %vm427_vm2, %v1486_v38  ;;  %v2181_v39 = vld [vmem:[#allocation4 + $0x3c8] sm:$0xff]  ;;  %v10292_v0 = vpack.c.bf16 %v13574_v62, %v13571_v32  ;;  %v2330_v22 = vrot.slane %v2191_v33, 4  ;;  %v2338_v32 = vrot.slane %v13632_v6, 4  ;;  %v1429_v21 = vld [vmem:[%s18831_s20 + $0x18] sm:$0xff]  ;;  %v2206_v6 = vld [vmem:[#allocation4 + $0x490] sm:$0xff] }
  0xc6   :  { %10253 = vmatpush1.bf16.msra.mxu1 %v10252_v29  ;;  %1858 = vmatprep.mubr.f32.mxu0 %v12972_v42  ;;  %v2306_v29 = vrot.slane %v13531_v17, 4  ;;  %v2310_v40 = vrot.slane %v2181_v39, 4  ;;  %v1428_v17 = vld [vmem:[%s18831_s20 + $0x10] sm:$0xff]  ;;  %v2197_v62 = vld [vmem:[#allocation4 + $0x448] sm:$0xff]  ;;  %v13678_v24 = vsel %vm945_vm3, %v2304_v41, %v2312_v18  ;;  %v2199_v41 = vld [vmem:[#allocation4 + $0x458] sm:$0xff] }
  0xc7   :  { %10255 = vmatprep.subr.bf16.mxu1 %v10254_v34  ;;  %9230 = vmatmul.mubr.msk.f32.gmra.mrb[12].mxu1 %vm427_vm2, %v1486_v38  ;;  %v10268_v34 = vpack.c.bf16 %v13540_v53, %v13535_v28  ;;  %v13567_v38 = vld [vmem:[#allocation4 + $0x3f8] sm:$0xff]  ;;  %v13661_v39 = vld [vmem:[#allocation4 + $0x430] sm:$0xff]  ;;  %v13716_v11 = vsel %vm945_vm3, %v2330_v22, %v2338_v32  ;;  %v2346_v52 = vrot.slane %v2199_v41, 4 }
  0xc8   :  { %10233 = vmatpush1.bf16.msra.mxu0 %v10232_v2  ;;  %1947 = vmatprep.mubr.f32.mxu1 %v12972_v42  ;;  %v2292_v2 = vrot.slane %v2172_v3, 4  ;;  %v13594_v20 = vsel %vm945_vm3, %v2298_v54, %v2306_v29  ;;  %v13629_v63 = vsel %vm945_vm3, %v2310_v40, %v2318_v30  ;;  %v13642_v3 = vsel %vm945_vm3, %v2306_v29, %v2314_v46  ;;  %v2190_v29 = vld [vmem:[#allocation4 + $0x410] sm:$0xff] }
  0xc9   :  { %10235 = vmatprep.subr.bf16.mxu0 %v10234_v49  ;;  %9225 = vmatmul.mubr.msk.f32.gmra.mrb[14].mxu0 %vm427_vm2, %v1487_v44  ;;  %v10294_v12 = vpack.c.bf16 %v13594_v20, %v13591_v14  ;;  %v2328_v4 = vrot.slane %v2190_v29, 4  ;;  %v2350_v14 = vrot.slane %v13669_v1, 4  ;;  %v2360_v1 = vrot.slane %v2206_v6, 4  ;;  %v2788_v6 = vld [vmem:[%s18673_s5 + $0x110] sm:$0xff] }
  0xca   :  { %10257 = vmatpush1.bf16.msra.mxu1 %v10256_v61  ;;  %2042 = vmatprep.mubr.f32.mxu0 %v12972_v42  ;;  %v13582_v61 = vsel %vm945_vm3, %v2286_v27, %v2294_v13  ;;  %v2322_v27 = vrot.slane %v13567_v38, 4  ;;  %v13602_v49 = vsel %vm945_vm3, %v2284_v19, %v2292_v2  ;;  %v13605_v35 = vsel %vm945_vm3, %v2292_v2, %v2300_v26  ;;  %v2189_v19 = vld [vmem:[#allocation4 + $0x408] sm:$0xff] }
  0xcb   :  { %10259 = vmatprep.subr.bf16.mxu1 %v10258_v59  ;;  %9231 = vmatmul.mubr.msk.f32.gmra.mrb[14].mxu1 %vm427_vm2, %v1487_v44  ;;  %v2316_v59 = vrot.slane %v13577_v55, 4  ;;  %v13624_v44 = vsel %vm945_vm3, %v2302_v8, %v2310_v40  ;;  %v10272_v58 = vpack.c.bf16 %v13605_v35, %v13602_v49  ;;  %v10296_v2 = vpack.c.bf16 %v13618_v7, %v13613_v56  ;;  %v2205_v35 = vld [vmem:[#allocation4 + $0x488] sm:$0xff] }
  0xcc   :  { %10237 = vmatpush1.bf16.msra.mxu0 %v10236_v50  ;;  %2131 = vmatprep.mubr.f32.mxu1 %v12972_v42  ;;  %v13585_v42 = vsel %vm945_vm3, %v2294_v13, %v2302_v8  ;;  %v1483_v50 = vld [vmem:[#allocation4 + $0x198] sm:$0x3f]  ;;  %v13647_v16 = vsel %vm945_vm3, %v2314_v46, %v2322_v27  ;;  %v1482_v13 = vld [vmem:[#allocation4 + $0x190] sm:$0x3f]  ;;  %v13653_v8 = vsel %vm945_vm3, %v2300_v26, %v2308_v10  ;;  %v13723_v46 = vld [vmem:[#allocation3] sm:$0xff] }
  0xcd   :  { %10239 = vmatprep.subr.bf16.mxu0 %v10238_v48  ;;  %v10270_v37 = vpack.c.bf16 %v13585_v42, %v13582_v61  ;;  %v1480_v48 = vld [vmem:[#allocation4 + $0x180] sm:$0x3f]  ;;  %v13658_v15 = vsel %vm945_vm3, %v2308_v10, %v2316_v59  ;;  %v10274_v26 = vpack.c.bf16 %v13629_v63, %v13624_v44  ;;  %v13683_v61 = vsel %vm945_vm3, %v2312_v18, %v2320_v45  ;;  %v13735_v10 = vld [vmem:[#allocation4 + $0x4a8] sm:$0xff]  ;;  %v1430_v18 = vld [vmem:[%s18831_s20 + $0x38] sm:$0xff] }
  0xce   :  { %10261 = vmatpush1.bf16.msra.mxu1 %v10260_v47  ;;  %v13620_v47 = vld [vmem:[#allocation4 + $0x428] sm:$0xff]  ;;  %v10298_v60 = vpack.c.bf16 %v13647_v16, %v13642_v3  ;;  %v10276_v43 = vpack.c.bf16 %v13658_v15, %v13653_v8  ;;  %v10300_v20 = vpack.c.bf16 %v13683_v61, %v13678_v24  ;;  %v13711_v31 = vsel %vm945_vm3, %v2322_v27, %v2330_v22 }
  0xcf   :  { %10263 = vmatprep.subr.bf16.mxu1 %v10262_v25  ;;  %v2188_v25 = vld [vmem:[#allocation4 + $0x400] sm:$0xff]  ;;  %v2334_v54 = vrot.slane %v13620_v47, 4  ;;  %v13741_v55 = vsel %vm945_vm3, %v2320_v45, %v2328_v4  ;;  %v2207_v47 = vld [vmem:[#allocation4 + $0x498] sm:$0xff]  ;;  %v10302_v44 = vpack.c.bf16 %v13716_v11, %v13711_v31  ;;  %v2358_v45 = vrot.slane %v2205_v35, 4  ;;  %3140 = vst.msk [vmem:[#allocation3 + $0x18] sm:$0xff] %vm2991_vm5, %v13723_v46  ;;  %3144 = vst.msk [vmem:[#allocation3 + $0x38] sm:$0xff] %vm2991_vm5, %v13723_v46 }
  0xd0   :  { %10241 = vmatpush1.bf16.msra.mxu0 %v10240_v36  ;;  %v13649_v36 = vld [vmem:[#allocation4 + $0x420] sm:$0xff]  ;;  %v2324_v42 = vrot.slane %v2188_v25, 4  ;;  %v2366_v33 = vrot.slane %v13735_v10, 4  ;;  %v2362_v15 = vrot.slane %v2207_v47, 4  ;;  %v2803_v47 = vld [vmem:[%s18673_s5 + $0x188] sm:$0xff]  ;;  %3153 = vst.msk [vmem:[#allocation3 + $0x78] sm:$0xff] %vm2991_vm5, %v13723_v46 }
  0xd1   :  { %9232 = vmatprep.subr.msk.mxu0 %vm440_vm1, %v1481_v9  ;;  %v2332_v40 = vrot.slane %v13649_v36, 4  ;;  %v13695_v9 = vld [vmem:[#allocation4 + $0x478] sm:$0xff]  ;;  %v1431_v36 = vld [vmem:[%s18831_s20 + $0x40] sm:$0xff]  ;;  %3157 = vst.msk [vmem:[#allocation3 + $0x98] sm:$0xff] %vm2991_vm5, %v13723_v46 }
  0xd2   :  { %10265 = vmatpush1.bf16.msra.mxu1 %v10264_v51  ;;  %v2326_v51 = vrot.slane %v2189_v19, 4  ;;  %v13729_v38 = vsel %vm945_vm3, %v2316_v59, %v2324_v42  ;;  %v2354_v49 = vrot.slane %v13695_v9, 4  ;;  %v2367_v24 = vsel %vm945_vm3, %v2358_v45, %v2366_v33 }
  0xd3   :  { %9238 = vmatprep.subr.msk.mxu1 %vm440_vm1, %v1483_v50  ;;  %v2333_v27 = vsel %vm945_vm3, %v2324_v42, %v2332_v40 }
  0xd4   :  { %9233 = vmatpush1.msk.msra.mxu0 %vm440_vm1, %v1480_v48  ;;  %v2327_v28 = vsel %vm945_vm3, %v2318_v30, %v2326_v51  ;;  %v2335_v53 = vsel %vm945_vm3, %v2326_v51, %v2334_v54  ;;  %v13721_v30 = vld [vmem:[#allocation4 + $0x460] sm:$0xff]  ;;  %v13756_v48 = vld [vmem:[#allocation4 + $0x4b8] sm:$0xff]  ;;  %v10280_v63 = vpack.c.bf16 %v2333_v27, %v13729_v38  ;;  %v2355_v3 = vsel %vm945_vm3, %v2346_v52, %v2354_v49 }
  0xd5   :  { %10267 = vmatprep.subr.bf16.mxu0 %v10266_v57  ;;  %9234 = vmatmul.mubr.msk.f32.vlgmr.msra.gmra.mrb[8].mxu0 %vm427_vm2, %v1428_v17  ;;  %v2336_v57 = vrot.slane %v13661_v39, 4  ;;  %v10278_v50 = vpack.c.bf16 %v2335_v53, %v2327_v28  ;;  %v2348_v19 = vrot.slane %v13721_v30, 4  ;;  %v2370_v51 = vrot.slane %v13756_v48, 4  ;;  %v2215_v53 = vld [vmem:[#allocation4 + $0x4d8] sm:$0x3]  ;;  %v2754_v48 = vld [vmem:[%s18673_s5] sm:$0xff] }
  0xd6   :  { %9239 = vmatpush1.msk.msra.mxu1 %vm440_vm1, %v1482_v13  ;;  %10269 = vmatpush1.bf16.msra.mxu0 %v10268_v34  ;;  %v2342_v34 = vrot.slane %v2197_v62, 4  ;;  %v2359_v62 = vsel %vm945_vm3, %v2350_v14, %v2358_v45  ;;  %v2214_v30 = vld [vmem:[#allocation4 + $0x4d0] sm:$0x3]  ;;  %v2786_v45 = vld [vmem:[%s18673_s5 + $0x100] sm:$0xff] }
  0xd7   :  { %10291 = vmatprep.subr.bf16.mxu1 %v10290_v23  ;;  %9240 = vmatmul.mubr.msk.f32.vlgmr.msra.gmra.mrb[8].mxu1 %vm427_vm2, %v1428_v17  ;;  %v2196_v23 = vld [vmem:[#allocation4 + $0x440] sm:$0xff]  ;;  %v13746_v59 = vsel %vm945_vm3, %v2328_v4, %v2336_v57  ;;  %v2363_v4 = vsel %vm945_vm3, %v2354_v49, %v2362_v15  ;;  %v2371_v41 = vsel %vm945_vm3, %v2362_v15, %v2370_v51  ;;  %v2376_v49 = vrot.slane %v2214_v30, 4 }
  0xd8   :  { %10293 = vmatpush1.bf16.msra.mxu1 %v10292_v0  ;;  %10271 = vmatprep.subr.bf16.mxu0 %v10270_v37  ;;  %v2198_v0 = vld [vmem:[#allocation4 + $0x450] sm:$0xff]  ;;  %v2343_v56 = vsel %vm945_vm3, %v2334_v54, %v2342_v34  ;;  %v2351_v5 = vsel %vm945_vm3, %v2342_v34, %v2350_v14  ;;  %v2340_v7 = vrot.slane %v2196_v23, 4  ;;  %v2204_v17 = vld [vmem:[#allocation4 + $0x480] sm:$0xff]  ;;  %v10304_v13 = vpack.c.bf16 %v13746_v59, %v13741_v55 }
  0xd9   :  { %10295 = vmatprep.subr.bf16.mxu1 %v10294_v12  ;;  %2048 = vmatprep.mubr.f32.mxu0 %v13723_v46  ;;  %v13748_v37 = vld [vmem:[#allocation4 + $0x470] sm:$0xff]  ;;  %v13766_v12 = vld [vmem:[#allocation4 + $0x4a0] sm:$0xff]  ;;  %v2344_v16 = vrot.slane %v2198_v0, 4  ;;  %v10282_v8 = vpack.c.bf16 %v2351_v5, %v2343_v56  ;;  %v10286_v39 = vpack.c.bf16 %v2367_v24, %v2359_v62  ;;  %v10310_v9 = vpack.c.bf16 %v2371_v41, %v2363_v4  ;;  %v2771_v5 = vld [vmem:[%s18673_s5 + $0x88] sm:$0xff] }
  0xda   :  { %10273 = vmatpush1.bf16.msra.mxu0 %v10272_v58  ;;  %2137 = vmatprep.mubr.f32.mxu1 %v13723_v46  ;;  %v2347_v58 = vsel %vm945_vm3, %v2338_v32, %v2346_v52  ;;  %v2352_v25 = vrot.slane %v13748_v37, 4  ;;  %v2210_v54 = vld [vmem:[#allocation4 + $0x4b0] sm:$0xff]  ;;  %v2341_v29 = vsel %vm945_vm3, %v2332_v40, %v2340_v7  ;;  %v2364_v22 = vrot.slane %v13766_v12, 4  ;;  %v2157_v59 = vld [vmem:[%s18831_s20 + $0x1a] sm:$0xff]  ;;  %v2159_v37 = vld [vmem:[%s18831_s20 + $0x42] sm:$0xff] }
  0xdb   :  { %10275 = vmatprep.subr.bf16.mxu0 %v10274_v26  ;;  %9235 = vmatmul.mubr.msk.f32.gmra.mrb[10].mxu0 %vm427_vm2, %v1429_v21  ;;  %v2356_v26 = vrot.slane %v2204_v17, 4  ;;  %v10306_v32 = vpack.c.bf16 %v2355_v3, %v2347_v58  ;;  %v2345_v61 = vsel %vm945_vm3, %v2336_v57, %v2344_v16  ;;  %v2368_v40 = vrot.slane %v2210_v54, 4  ;;  %v2156_v55 = vld [vmem:[%s18831_s20 + $0x12] sm:$0xff]  ;;  %v2158_v0 = vld [vmem:[%s18831_s20 + $0x3a] sm:$0xff]  ;;  %v2807_v62 = vld [vmem:[%s18673_s5 + $0x1a8] sm:$0xff] }
  0xdc   :  { %10297 = vmatpush1.bf16.msra.mxu1 %v10296_v2  ;;  %2054 = vmatprep.mubr.f32.mxu0 %v13723_v46  ;;  %v2349_v2 = vsel %vm945_vm3, %v2340_v7, %v2348_v19  ;;  %v2353_v42 = vsel %vm945_vm3, %v2344_v16, %v2352_v25  ;;  %v2361_v31 = vsel %vm945_vm3, %v2352_v25, %v2360_v1  ;;  %v2378_v23 = vrot.slane %v2215_v53, 4  ;;  %v2770_v56 = vld [vmem:[%s18673_s5 + $0x80] sm:$0xff]  ;;  %v2772_v12 = vld [vmem:[%s18673_s5 + $0x90] sm:$0xff]  ;;  %v2773_v58 = vld [vmem:[%s18673_s5 + $0x98] sm:$0xff] }
  0xdd   :  { %10299 = vmatprep.subr.bf16.mxu1 %v10298_v60  ;;  %9241 = vmatmul.mubr.msk.f32.gmra.mrb[10].mxu1 %vm427_vm2, %v1429_v21  ;;  %v2213_v60 = vld [vmem:[#allocation4 + $0x4c8] sm:$0x3]  ;;  %v2357_v57 = vsel %vm945_vm3, %v2348_v19, %v2356_v26  ;;  %v2365_v28 = vsel %vm945_vm3, %v2356_v26, %v2364_v22  ;;  %v10308_v34 = vpack.c.bf16 %v2353_v42, %v2345_v61  ;;  %v2802_v7 = vld [vmem:[%s18673_s5 + $0x180] sm:$0xff]  ;;  %v2804_v3 = vld [vmem:[%s18673_s5 + $0x190] sm:$0xff] }
  0xde   :  { %10277 = vmatpush1.bf16.msra.mxu0 %v10276_v43  ;;  %2143 = vmatprep.mubr.f32.mxu1 %v13723_v46  ;;  %v10284_v43 = vpack.c.bf16 %v2349_v2, %v2341_v29  ;;  %v2374_v14 = vrot.slane %v2213_v60, 4  ;;  %v2369_v11 = vsel %vm945_vm3, %v2360_v1, %v2368_v40  ;;  %v10288_v21 = vpack.c.bf16 %v2365_v28, %v2357_v57  ;;  %v2805_v25 = vld [vmem:[%s18673_s5 + $0x198] sm:$0xff]  ;;  %v2774_v2 = vld [vmem:[%s18673_s5 + $0xa0] sm:$0xff]  ;;  %v2775_v26 = vld [vmem:[%s18673_s5 + $0xa8] sm:$0xff] }
  0xdf   :  { %10279 = vmatprep.subr.bf16.mxu0 %v10278_v50  ;;  %9236 = vmatmul.mubr.msk.f32.gmra.mrb[12].mxu0 %vm427_vm2, %v1430_v18  ;;  %v10312_v27 = vpack.c.bf16 %v2369_v11, %v2361_v31  ;;  %v2379_v35 = vsel %vm945_vm3, %v2370_v51, %v2378_v23  ;;  %v2377_v10 = vsel %vm945_vm3, %v2368_v40, %v2376_v49  ;;  %v2789_v54 = vld [vmem:[%s18673_s5 + $0x118] sm:$0xff]  ;;  %v2758_v24 = vld [vmem:[%s18673_s5 + $0x20] sm:$0xff]  ;;  %v2791_v40 = vld [vmem:[%s18673_s5 + $0x128] sm:$0xff] }
  0xe0   :  { %10301 = vmatpush1.bf16.msra.mxu1 %v10300_v20  ;;  %2060 = vmatprep.mubr.f32.mxu0 %v13723_v46  ;;  %v2212_v20 = vld [vmem:[#allocation4 + $0x4c0] sm:$0x3]  ;;  %v2375_v52 = vsel %vm945_vm3, %v2366_v33, %v2374_v14  ;;  %v10314_v19 = vpack.c.bf16 %v2771_v5, %v2770_v56  ;;  %v2787_v33 = vld [vmem:[%s18673_s5 + $0x108] sm:$0xff]  ;;  %v10318_v16 = vpack.c.bf16 %v2773_v58, %v2772_v12  ;;  %v2777_v4 = vld [vmem:[%s18673_s5 + $0xb8] sm:$0xff] }
  0xe1   :  { %10303 = vmatprep.subr.bf16.mxu1 %v10302_v44  ;;  %9242 = vmatmul.mubr.msk.f32.gmra.mrb[12].mxu1 %vm427_vm2, %v1430_v18  ;;  %v2372_v38 = vrot.slane %v2212_v20, 4  ;;  %v2755_v44 = vld [vmem:[%s18673_s5 + $0x8] sm:$0xff]  ;;  %v10348_v17 = vpack.c.bf16 %v2787_v33, %v2786_v45  ;;  %v10350_v15 = vpack.c.bf16 %v2805_v25, %v2804_v3  ;;  %v10352_v29 = vpack.c.bf16 %v2789_v54, %v2788_v6  ;;  %v2790_v1 = vld [vmem:[%s18673_s5 + $0x120] sm:$0xff]  ;;  %v2808_v41 = vld [vmem:[%s18673_s5 + $0x1b0] sm:$0xff] }
  0xe2   :  { %10281 = vmatpush1.bf16.msra.mxu0 %v10280_v63  ;;  %2149 = vmatprep.mubr.f32.mxu1 %v13723_v46  ;;  %v10346_v63 = vpack.c.bf16 %v2803_v47, %v2802_v7  ;;  %v10316_v18 = vpack.c.bf16 %v2755_v44, %v2754_v48  ;;  %v10356_v60 = vpack.c.bf16 %v2791_v40, %v2790_v1  ;;  %v2809_v57 = vld [vmem:[%s18673_s5 + $0x1b8] sm:$0xff]  ;;  %v2760_v28 = vld [vmem:[%s18673_s5 + $0x30] sm:$0xff]  ;;  %v2778_v11 = vld [vmem:[%s18673_s5 + $0xc0] sm:$0xff] }
  0xe3   :  { %10283 = vmatprep.subr.bf16.mxu0 %v10282_v8  ;;  %9237 = vmatmul.mubr.msk.f32.gmra.mrb[14].mxu0 %vm427_vm2, %v1431_v36  ;;  %v2373_v50 = vsel %vm945_vm3, %v2364_v22, %v2372_v38  ;;  %v2757_v8 = vld [vmem:[%s18673_s5 + $0x18] sm:$0xff]  ;;  %v2806_v22 = vld [vmem:[%s18673_s5 + $0x1a0] sm:$0xff]  ;;  %v2792_v20 = vld [vmem:[%s18673_s5 + $0x130] sm:$0xff] }
  0xe4   :  { %10305 = vmatpush1.bf16.msra.mxu1 %v10304_v13  ;;  %2512 = vmatprep.mubr.f32.mxu0 %v13723_v46  ;;  %v2756_v13 = vld [vmem:[%s18673_s5 + $0x10] sm:$0xff]  ;;  %v10354_v61 = vpack.c.bf16 %v2807_v62, %v2806_v22  ;;  %v2761_v53 = vld [vmem:[%s18673_s5 + $0x38] sm:$0xff]  ;;  %v2810_v23 = vld [vmem:[%s18673_s5 + $0x1c0] sm:$0xff] }
  0xe5   :  { %10307 = vmatprep.subr.bf16.mxu1 %v10306_v32  ;;  %9243 = vmatmul.mubr.msk.f32.gmra.mrb[14].mxu1 %vm427_vm2, %v1431_v36  ;;  %v10320_v51 = vpack.c.bf16 %v2757_v8, %v2756_v13  ;;  %v10322_v32 = vpack.c.bf16 %v2775_v26, %v2774_v2  ;;  %v2759_v36 = vld [vmem:[%s18673_s5 + $0x28] sm:$0xff]  ;;  %v10328_v14 = vpack.c.bf16 %v2761_v53, %v2760_v28  ;;  %v2813_v5 = vld [vmem:[%s18673_s5 + $0x1d8] sm:$0xff]  ;;  %v2764_v7 = vld [vmem:[%s18673_s5 + $0x50] sm:$0xff] }
  0xe6   :  { %10285 = vmatpush1.bf16.msra.mxu0 %v10284_v43  ;;  %2601 = vmatprep.mubr.f32.mxu1 %v13723_v46  ;;  %v10324_v42 = vpack.c.bf16 %v2759_v36, %v2758_v24  ;;  %v2776_v43 = vld [vmem:[%s18673_s5 + $0xb0] sm:$0xff]  ;;  %v2811_v38 = vld [vmem:[%s18673_s5 + $0x1c8] sm:$0xff]  ;;  %v2782_v45 = vld [vmem:[%s18673_s5 + $0xe0] sm:$0xff] }
  0xe7   :  { %10287 = vmatprep.subr.bf16.mxu0 %v10286_v39  ;;  %v10326_v39 = vpack.c.bf16 %v2777_v4, %v2776_v43  ;;  %v10362_v49 = vpack.c.bf16 %v2811_v38, %v2810_v23  ;;  %v2796_v44 = vld [vmem:[%s18673_s5 + $0x150] sm:$0xff]  ;;  %v2783_v33 = vld [vmem:[%s18673_s5 + $0xe8] sm:$0xff]  ;;  %v2766_v3 = vld [vmem:[%s18673_s5 + $0x60] sm:$0xff] }
  0xe8   :  { %10309 = vmatpush1.bf16.msra.mxu1 %v10308_v34  ;;  %v10358_v34 = vpack.c.bf16 %v2809_v57, %v2808_v41  ;;  %v10338_v12 = vpack.c.bf16 %v2783_v33, %v2782_v45  ;;  %v2815_v58 = vld [vmem:[%s18673_s5 + $0x1e8] sm:$0xff]  ;;  %v2798_v8 = vld [vmem:[%s18673_s5 + $0x160] sm:$0xff]  ;;  %v2784_v6 = vld [vmem:[%s18673_s5 + $0xf0] sm:$0xff] }
  0xe9   :  { %10311 = vmatprep.subr.bf16.mxu1 %v10310_v9  ;;  %v2793_v9 = vld [vmem:[%s18673_s5 + $0x138] sm:$0xff]  ;;  %v2768_v22 = vld [vmem:[%s18673_s5 + $0x70] sm:$0xff] }
  0xea   :  { %10289 = vmatpush1.bf16.msra.mxu0 %v10288_v21  ;;  %v10360_v31 = vpack.c.bf16 %v2793_v9, %v2792_v20  ;;  %v2779_v21 = vld [vmem:[%s18673_s5 + $0xc8] sm:$0xff]  ;;  %v2785_v54 = vld [vmem:[%s18673_s5 + $0xf8] sm:$0xff]  ;;  %v2800_v36 = vld [vmem:[%s18673_s5 + $0x170] sm:$0xff] }
  0xeb   :  { %9244 = vmatprep.subr.msk.mxu0 %vm440_vm1, %v2375_v52  ;;  %v10330_v30 = vpack.c.bf16 %v2779_v21, %v2778_v11  ;;  %v2763_v52 = vld [vmem:[%s18673_s5 + $0x48] sm:$0xff]  ;;  %v10342_v2 = vpack.c.bf16 %v2785_v54, %v2784_v6  ;;  %v2817_v26 = vld [vmem:[%s18673_s5 + $0x1f8] sm:$0xff] }
  0xec   :  { %10313 = vmatpush1.bf16.msra.mxu1 %v10312_v27  ;;  %v2762_v27 = vld [vmem:[%s18673_s5 + $0x40] sm:$0xff] }
  0xed   :  { %9250 = vmatprep.subr.msk.mxu1 %vm440_vm1, %v2379_v35  ;;  %v10332_v35 = vpack.c.bf16 %v2763_v52, %v2762_v27 }
  0xee   :  { %9245 = vmatpush1.msk.msra.mxu0 %vm440_vm1, %v2373_v50  ;;  %v2794_v50 = vld [vmem:[%s18673_s5 + $0x140] sm:$0xff] }
  0xef   :  { %9246 = vmatmul.mubr.msk.f32.vlgmr.msra.gmra.mrb[8].mxu0 %vm427_vm2, %v2156_v55  ;;  %10315 = vmatprep.subr.bf16.mxu0 %v10314_v19  ;;  %v2765_v19 = vld [vmem:[%s18673_s5 + $0x58] sm:$0xff] }
  0xf0   :  { %9251 = vmatpush1.msk.msra.mxu1 %vm440_vm1, %v2377_v10  ;;  %2518 = vmatprep.mubr.f32.mxu0 %v13723_v46  ;;  %v10336_v48 = vpack.c.bf16 %v2765_v19, %v2764_v7 }
  0xf1   :  { %9252 = vmatmul.mubr.msk.f32.vlgmr.msra.gmra.mrb[8].mxu1 %vm427_vm2, %v2156_v55  ;;  %10347 = vmatprep.subr.bf16.mxu1 %v10346_v63  ;;  %v2795_v55 = vld [vmem:[%s18673_s5 + $0x148] sm:$0xff]  ;;  %v2797_v63 = vld [vmem:[%s18673_s5 + $0x158] sm:$0xff] }
  0xf2   :  { %2607 = vmatprep.mubr.f32.mxu1 %v13723_v46  ;;  %10317 = vmatpush3.bf16.msra.mxu0 %v10316_v18  ;;  %v10364_v10 = vpack.c.bf16 %v2795_v55, %v2794_v50  ;;  %v10368_v18 = vpack.c.bf16 %v2797_v63, %v2796_v44 }
  0xf3   :  { %9247 = vmatmul.mubr.msk.f32.gmra.mrb[10].mxu0 %vm427_vm2, %v2157_v59  ;;  %10349 = vmatpush3.bf16.msra.mxu1 %v10348_v17  ;;  %v2814_v17 = vld [vmem:[%s18673_s5 + $0x1e0] sm:$0xff] }
  0xf4   :  { %2524 = vmatprep.mubr.f32.mxu0 %v13723_v46  ;;  %10319 = vmatprep.subr.bf16.mxu0 %v10318_v16  ;;  %v2767_v16 = vld [vmem:[%s18673_s5 + $0x68] sm:$0xff]  ;;  %v10370_v25 = vpack.c.bf16 %v2815_v58, %v2814_v17 }
  0xf5   :  { %9253 = vmatmul.mubr.msk.f32.gmra.mrb[10].mxu1 %vm427_vm2, %v2157_v59  ;;  %10351 = vmatprep.subr.bf16.mxu1 %v10350_v15  ;;  %v2780_v59 = vld [vmem:[%s18673_s5 + $0xd0] sm:$0xff]  ;;  %v10340_v13 = vpack.c.bf16 %v2767_v16, %v2766_v3  ;;  %v2799_v15 = vld [vmem:[%s18673_s5 + $0x168] sm:$0xff] }
  0xf6   :  { %2613 = vmatprep.mubr.f32.mxu1 %v13723_v46  ;;  %10321 = vmatpush3.bf16.msra.mxu0 %v10320_v51  ;;  %v10372_v51 = vpack.c.bf16 %v2799_v15, %v2798_v8 }
  0xf7   :  { %9248 = vmatmul.mubr.msk.f32.gmra.mrb[12].mxu0 %vm427_vm2, %v2158_v0  ;;  %10353 = vmatpush3.bf16.msra.mxu1 %v10352_v29  ;;  %v2816_v29 = vld [vmem:[%s18673_s5 + $0x1f0] sm:$0xff] }
  0xf8   :  { %2530 = vmatprep.mubr.f32.mxu0 %v13723_v46  ;;  %10323 = vmatprep.subr.bf16.mxu0 %v10322_v32  ;;  %v2769_v32 = vld [vmem:[%s18673_s5 + $0x78] sm:$0xff]  ;;  %v10374_v62 = vpack.c.bf16 %v2817_v26, %v2816_v29 }
  0xf9   :  { %9254 = vmatmul.mubr.msk.f32.gmra.mrb[12].mxu1 %vm427_vm2, %v2158_v0  ;;  %10355 = vmatprep.subr.bf16.mxu1 %v10354_v61  ;;  %v2781_v0 = vld [vmem:[%s18673_s5 + $0xd8] sm:$0xff]  ;;  %v10344_v24 = vpack.c.bf16 %v2769_v32, %v2768_v22 }
  0xfa   :  { %2619 = vmatprep.mubr.f32.mxu1 %v13723_v46  ;;  %10325 = vmatpush3.bf16.msra.mxu0 %v10324_v42  ;;  %v10334_v56 = vpack.c.bf16 %v2781_v0, %v2780_v59  ;;  %v2801_v61 = vld [vmem:[%s18673_s5 + $0x178] sm:$0xff] }
  0xfb   :  { %9249 = vmatmul.mubr.msk.f32.gmra.mrb[14].mxu0 %vm427_vm2, %v2159_v37  ;;  %10357 = vmatpush3.bf16.msra.mxu1 %v10356_v60  ;;  %v10376_v42 = vpack.c.bf16 %v2801_v61, %v2800_v36 }
  0xfc   :  { %10327 = vmatprep.subr.bf16.mxu0 %v10326_v39  ;;  %10359 = vmatprep.subr.bf16.mxu1 %v10358_v34 }
  0xfd   :  { %9255 = vmatmul.mubr.msk.f32.gmra.mrb[14].mxu1 %vm427_vm2, %v2159_v37  ;;  %v2812_v37 = vld [vmem:[%s18673_s5 + $0x1d0] sm:$0xff] }
  0xfe   :  { %10329 = vmatpush3.bf16.msra.mxu0 %v10328_v14  ;;  %v10366_v47 = vpack.c.bf16 %v2813_v5, %v2812_v37 }
  0xff   :  { %10361 = vmatpush3.bf16.msra.mxu1 %v10360_v31  ;;  %10331 = vmatprep.subr.bf16.mxu0 %v10330_v30 }
 0x100   :  { %10363 = vmatprep.subr.bf16.mxu1 %v10362_v49 }
 0x102   :  { %10333 = vmatpush3.bf16.msra.mxu0 %v10332_v35 }
 0x103   :  { %10365 = vmatpush3.bf16.msra.mxu1 %v10364_v10  ;;  %10335 = vmatprep.subr.bf16.mxu0 %v10334_v56 }
 0x104   :  { %10367 = vmatprep.subr.bf16.mxu1 %v10366_v47 }
 0x106   :  { %10337 = vmatpush3.bf16.msra.mxu0 %v10336_v48 }
 0x107   :  { %10369 = vmatpush3.bf16.msra.mxu1 %v10368_v18  ;;  %10339 = vmatprep.subr.bf16.mxu0 %v10338_v12 }
 0x108   :  { %10371 = vmatprep.subr.bf16.mxu1 %v10370_v25 }
 0x10a   :  { %10341 = vmatpush3.bf16.msra.mxu0 %v10340_v13 }
 0x10b   :  { %10373 = vmatpush3.bf16.msra.mxu1 %v10372_v51  ;;  %10343 = vmatprep.subr.bf16.mxu0 %v10342_v2 }
 0x10c   :  { %10375 = vmatprep.subr.bf16.mxu1 %v10374_v62 }
 0x10e   :  { %10345 = vmatpush3.bf16.msra.mxu0 %v10344_v24 }
 0x10f   :  { %10377 = vmatpush3.bf16.msra.mxu1 %v10376_v42 }
 0x173   :  { %v14042_v1 = vpop.f32.mrb[0].mxu0 }
 0x174   :  { %v14044_v40 = vpop.f32.mrb[1].mxu0  ;;  %v1372_v41 = vmul.f32 %v14042_v1, %v14042_v1 }
 0x175   :  { %v1373_v53 = vmul.f32 %v14044_v40, %v14044_v40 }
 0x176   :  { %v14046_v60 = vpop.f32.mrb[0].mxu1 }
 0x177   :  { %v14048_v43 = vpop.f32.mrb[1].mxu1  ;;  %v1374_v9 = vmul.f32 %v14046_v60, %v14046_v60 }
 0x178   :  { %v14050_v4 = vpop.f32.mrb[2].mxu0  ;;  %v1375_v30 = vmul.f32 %v14048_v43, %v14048_v43 }
 0x179   :  { %v1332_v39 = vadd.f32 %v14050_v4, %v14042_v1  ;;  %v1376_v57 = vmul.f32 %v14050_v4, %v14050_v4  ;;  %v14058_v28 = vpop.f32.mrb[3].mxu0 }
 0x17a   :  { %v14062_v34 = vpop.f32.mrb[2].mxu1  ;;  %v1341_v14 = vadd.f32 %v14058_v28, %v14044_v40  ;;  %v1377_v20 = vmul.f32 %v14058_v28, %v14058_v28 }
 0x17b   :  { %18847 = vst [vmem:[#allocation14_spill] sm:$0xff] %v14062_v34  ;;  %v1388_v31 = vadd.f32 %v1376_v57, %v1372_v41  ;;  %v1350_v11 = vadd.f32 %v14062_v34, %v14046_v60  ;;  %v1378_v21 = vmul.f32 %v14062_v34, %v14062_v34  ;;  %v14074_v23 = vpop.f32.mrb[3].mxu1  ;;  %v3915_v34 = vld [vmem:[#allocation9 + $0xd8] sm:$0xff] }
 0x17c   :  { %18848 = vst [vmem:[#allocation15_spill] sm:$0xff] %v14074_v23  ;;  %v1397_v38 = vadd.f32 %v1377_v20, %v1373_v53  ;;  %v1359_v27 = vadd.f32 %v14074_v23, %v14048_v43  ;;  %v1379_v52 = vmul.f32 %v14074_v23, %v14074_v23  ;;  %v14082_v49 = vpop.f32.mrb[4].mxu0 }
 0x17d   :  { %v1406_v35 = vadd.f32 %v1378_v21, %v1374_v9  ;;  %v1333_v50 = vadd.f32 %v1332_v39, %v14082_v49  ;;  %v1380_v55 = vmul.f32 %v14082_v49, %v14082_v49  ;;  %v14087_v10 = vpop.f32.mrb[5].mxu0 }
 0x17e   :  { %v1415_v59 = vadd.f32 %v1379_v52, %v1375_v30  ;;  %v14089_v0 = vpop.f32.mrb[4].mxu1  ;;  %v1342_v37 = vadd.f32 %v1341_v14, %v14087_v10  ;;  %v1381_v56 = vmul.f32 %v14087_v10, %v14087_v10 }
 0x17f   :  { %18849 = vst [vmem:[#allocation16_spill] sm:$0xff] %v14089_v0  ;;  %v1389_v5 = vadd.f32 %v1388_v31, %v1380_v55  ;;  %v1351_v7 = vadd.f32 %v1350_v11, %v14089_v0  ;;  %v1382_v19 = vmul.f32 %v14089_v0, %v14089_v0  ;;  %v14097_v47 = vpop.f32.mrb[5].mxu1  ;;  %v3913_v0 = vld [vmem:[#allocation9 + $0xc8] sm:$0xff] }
 0x180   :  { %18850 = vst [vmem:[#allocation17_spill] sm:$0xff] %v14097_v47  ;;  %v1398_v48 = vadd.f32 %v1397_v38, %v1381_v56  ;;  %v1360_v44 = vadd.f32 %v1359_v27, %v14097_v47  ;;  %v1383_v63 = vmul.f32 %v14097_v47, %v14097_v47  ;;  %v14102_v18 = vpop.f32.mrb[6].mxu0 }
 0x181   :  { %18851 = vst [vmem:[#allocation18_spill] sm:$0xff] %v14102_v18  ;;  %v1407_v45 = vadd.f32 %v1406_v35, %v1382_v19  ;;  %v1334_v33 = vadd.f32 %v1333_v50, %v14102_v18  ;;  %v1384_v17 = vmul.f32 %v14102_v18, %v14102_v18  ;;  %v14107_v12 = vpop.f32.mrb[7].mxu0 }
 0x182   :  { %18852 = vst [vmem:[#allocation19_spill] sm:$0xff] %v14107_v12  ;;  %v1416_v58 = vadd.f32 %v1415_v59, %v1383_v63  ;;  %v14109_v3 = vpop.f32.mrb[6].mxu1  ;;  %v1343_v16 = vadd.f32 %v1342_v37, %v14107_v12  ;;  %v1385_v25 = vmul.f32 %v14107_v12, %v14107_v12 }
 0x183   :  { %18853 = vst [vmem:[#allocation20_spill] sm:$0xff] %v14109_v3  ;;  %v1390_v13 = vadd.f32 %v1389_v5, %v1384_v17  ;;  %v1352_v8 = vadd.f32 %v1351_v7, %v14109_v3  ;;  %v1386_v15 = vmul.f32 %v14109_v3, %v14109_v3  ;;  %v14117_v51 = vpop.f32.mrb[7].mxu1  ;;  %v1335_v22 = vrot.slane %v1334_v33, 4  ;;  %v3911_v3 = vld [vmem:[#allocation9 + $0xb8] sm:$0xff] }
 0x184   :  { %18854 = vst [vmem:[#allocation21_spill] sm:$0xff] %v14117_v51  ;;  %v1399_v6 = vadd.f32 %v1398_v48, %v1385_v25  ;;  %v1361_v54 = vadd.f32 %v1360_v44, %v14117_v51  ;;  %v1387_v29 = vmul.f32 %v14117_v51, %v14117_v51  ;;  %v1344_v32 = vrot.slane %v1343_v16, 4 }
 0x185   :  { %v1408_v2 = vadd.f32 %v1407_v45, %v1386_v15  ;;  %v1336_v62 = vadd.f32 %v1335_v22, %v1334_v33  ;;  %v1391_v24 = vrot.slane %v1390_v13, 4  ;;  %v1353_v36 = vrot.slane %v1352_v8, 4 }
 0x186   :  { %v1417_v26 = vadd.f32 %v1416_v58, %v1387_v29  ;;  %v1362_v61 = vrot.slane %v1361_v54, 4  ;;  %v1345_v42 = vadd.f32 %v1344_v32, %v1343_v16  ;;  %v1400_v41 = vrot.slane %v1399_v6, 4 }
 0x187   :  { %v1337_v39 = vrot.slane %v1336_v62, 2  ;;  %v1392_v57 = vadd.f32 %v1391_v24, %v1390_v13  ;;  %v1354_v53 = vadd.f32 %v1353_v36, %v1352_v8  ;;  %v1409_v14 = vrot.slane %v1408_v2, 4 }
 0x188   :  { %v1363_v20 = vadd.f32 %v1362_v61, %v1361_v54  ;;  %v1418_v9 = vrot.slane %v1417_v26, 4  ;;  %v1346_v31 = vrot.slane %v1345_v42, 2  ;;  %v1401_v11 = vadd.f32 %v1400_v41, %v1399_v6 }
 0x189   :  { %v1338_v21 = vadd.f32 %v1337_v39, %v1336_v62  ;;  %v1393_v30 = vrot.slane %v1392_v57, 2  ;;  %v1355_v38 = vrot.slane %v1354_v53, 2  ;;  %v1410_v27 = vadd.f32 %v1409_v14, %v1408_v2 }
 0x18a   :  { %v1364_v52 = vrot.slane %v1363_v20, 2  ;;  %v1419_v35 = vadd.f32 %v1418_v9, %v1417_v26  ;;  %v1347_v50 = vadd.f32 %v1346_v31, %v1345_v42  ;;  %v1402_v55 = vrot.slane %v1401_v11, 2 }
 0x18b   :  { %v1339_v59 = vrot.slane %v1338_v21, 1  ;;  %v1394_v37 = vadd.f32 %v1393_v30, %v1392_v57  ;;  %v1356_v56 = vadd.f32 %v1355_v38, %v1354_v53  ;;  %v1411_v5 = vrot.slane %v1410_v27, 2 }
 0x18c   :  { %v1365_v7 = vadd.f32 %v1364_v52, %v1363_v20  ;;  %v1420_v19 = vrot.slane %v1419_v35, 2  ;;  %v1348_v44 = vrot.slane %v1347_v50, 1  ;;  %v1403_v45 = vadd.f32 %v1402_v55, %v1401_v11 }
 0x18d   :  { %v14128_v17 = vadd.f32 %v1339_v59, %v1338_v21  ;;  %v1395_v58 = vrot.slane %v1394_v37, 1  ;;  %v1357_v25 = vrot.slane %v1356_v56, 1  ;;  %v14132_v13 = vadd.f32 %v1411_v5, %v1410_v27 }
 0x18e   :  { %v1366_v8 = vrot.slane %v1365_v7, 1  ;;  %v14134_v15 = vadd.f32 %v1420_v19, %v1419_v35  ;;  %v14146_v22 = vadd.f32 %v1348_v44, %v1347_v50  ;;  %v1404_v61 = vrot.slane %v1403_v45, 1 }
 0x18f   :  { %v14172_v21 = vadd.f32 %v1395_v58, %v1394_v37  ;;  %v14179_v35 = vadd.f32 %v1357_v25, %v1356_v56 }
 0x1c2   :  { %v14122_v48 = vpop.f32.mrb[8].mxu0 }
 0x1c3   :  { %18855 = vst [vmem:[#allocation22_spill] sm:$0xff] %v14122_v48  ;;  %v14124_v63 = vpop.f32.mrb[9].mxu0  ;;  %v2698_v54 = vmul.f32 %v14122_v48, %v14122_v48 }
 0x1c4   :  { %18856 = vst [vmem:[#allocation23_spill] sm:$0xff] %v14124_v63  ;;  %v14126_v33 = vpop.f32.mrb[8].mxu1  ;;  %v2699_v32 = vmul.f32 %v14124_v63, %v14124_v63 }
 0x1c5   :  { %18857 = vst [vmem:[#allocation24_spill] sm:$0xff] %v14126_v33  ;;  %v14130_v16 = vpop.f32.mrb[9].mxu1  ;;  %v2700_v42 = vmul.f32 %v14126_v33, %v14126_v33 }
 0x1c6   :  { %18858 = vst [vmem:[#allocation25_spill] sm:$0xff] %v14130_v16  ;;  %v14136_v6 = vpop.f32.mrb[10].mxu0  ;;  %v2701_v14 = vmul.f32 %v14130_v16, %v14130_v16 }
 0x1c7   :  { %18859 = vst [vmem:[#allocation26_spill] sm:$0xff] %v14136_v6  ;;  %v2658_v29 = vadd.f32 %v14136_v6, %v14122_v48  ;;  %v2702_v2 = vmul.f32 %v14136_v6, %v14136_v6  ;;  %v14144_v26 = vpop.f32.mrb[11].mxu0 }
 0x1c8   :  { %18860 = vst [vmem:[#allocation27_spill] sm:$0xff] %v14144_v26  ;;  %v14150_v62 = vpop.f32.mrb[10].mxu1  ;;  %v2667_v24 = vadd.f32 %v14144_v26, %v14124_v63  ;;  %v2703_v36 = vmul.f32 %v14144_v26, %v14144_v26  ;;  %v3629_v26 = vld [vmem:[#allocation7 + $0xb8] sm:$0xff]  ;;  %v3909_v63 = vld [vmem:[#allocation9 + $0xa8] sm:$0xff] }
 0x1c9   :  { %18861 = vst [vmem:[#allocation28_spill] sm:$0xff] %v14150_v62  ;;  %v2714_v41 = vadd.f32 %v2702_v2, %v2698_v54  ;;  %v2676_v39 = vadd.f32 %v14150_v62, %v14126_v33  ;;  %v2704_v57 = vmul.f32 %v14150_v62, %v14150_v62  ;;  %v14162_v53 = vpop.f32.mrb[11].mxu1 }
 0x1ca   :  { %18862 = vst [vmem:[#allocation29_spill] sm:$0xff] %v14162_v53  ;;  %v2723_v20 = vadd.f32 %v2703_v36, %v2699_v32  ;;  %v2685_v9 = vadd.f32 %v14162_v53, %v14130_v16  ;;  %v2705_v31 = vmul.f32 %v14162_v53, %v14162_v53  ;;  %v14170_v11 = vpop.f32.mrb[12].mxu0  ;;  %v14197_v32 = vadd.f32 %v1404_v61, %v1403_v45  ;;  %v3904_v53 = vld [vmem:[#allocation9 + $0x80] sm:$0xff]  ;;  %v3906_v16 = vld [vmem:[#allocation9 + $0x90] sm:$0xff] }
 0x1cb   :  { %18863 = vst [vmem:[#allocation30_spill] sm:$0xff] %v14170_v11  ;;  %v2732_v30 = vadd.f32 %v2704_v57, %v2700_v42  ;;  %v2659_v38 = vadd.f32 %v2658_v29, %v14170_v11  ;;  %v2706_v27 = vmul.f32 %v14170_v11, %v14170_v11  ;;  %v14177_v52 = vpop.f32.mrb[13].mxu0 }
 0x1cc   :  { %18864 = vst [vmem:[#allocation31_spill] sm:$0xff] %v14177_v52  ;;  %v2741_v50 = vadd.f32 %v2705_v31, %v2701_v14  ;;  %v14181_v55 = vpop.f32.mrb[12].mxu1  ;;  %v2668_v59 = vadd.f32 %v2667_v24, %v14177_v52  ;;  %v2707_v5 = vmul.f32 %v14177_v52, %v14177_v52  ;;  %v3627_v52 = vld [vmem:[#allocation7 + $0xa8] sm:$0xff] }
 0x1cd   :  { %18865 = vst [vmem:[#allocation32_spill] sm:$0xff] %v14181_v55  ;;  %v2715_v19 = vadd.f32 %v2714_v41, %v2706_v27  ;;  %v2677_v44 = vadd.f32 %v2676_v39, %v14181_v55  ;;  %v2708_v58 = vmul.f32 %v14181_v55, %v14181_v55  ;;  %v14190_v54 = vpop.f32.mrb[13].mxu1  ;;  %v14204_v39 = vadd.f32 %v1366_v8, %v1365_v7 }
 0x1ce   :  { %18866 = vst [vmem:[#allocation33_spill] sm:$0xff] %v14190_v54  ;;  %v2724_v56 = vadd.f32 %v2723_v20, %v2707_v5  ;;  %v2686_v25 = vadd.f32 %v2685_v9, %v14190_v54  ;;  %v2709_v29 = vmul.f32 %v14190_v54, %v14190_v54  ;;  %v14195_v2 = vpop.f32.mrb[14].mxu0  ;;  %v3624_v54 = vld [vmem:[#allocation7 + $0x90] sm:$0xff] }
 0x1cf   :  { %18867 = vst [vmem:[#allocation34_spill] sm:$0xff] %v14195_v2  ;;  %v2733_v24 = vadd.f32 %v2732_v30, %v2708_v58  ;;  %v2660_v36 = vadd.f32 %v2659_v38, %v14195_v2  ;;  %v2710_v42 = vmul.f32 %v14195_v2, %v14195_v2  ;;  %v14202_v41 = vpop.f32.mrb[15].mxu0 }
 0x1d0   :  { %18868 = vst [vmem:[#allocation35_spill] sm:$0xff] %v14202_v41  ;;  %v2742_v57 = vadd.f32 %v2741_v50, %v2709_v29  ;;  %v14206_v14 = vpop.f32.mrb[14].mxu1  ;;  %v2669_v20 = vadd.f32 %v2668_v59, %v14202_v41  ;;  %v2711_v9 = vmul.f32 %v14202_v41, %v14202_v41 }
 0x1d1   :  { %18869 = vst [vmem:[#allocation36_spill] sm:$0xff] %v14206_v14  ;;  %v2661_v61 = vrot.slane %v2660_v36, 4  ;;  %v2716_v31 = vadd.f32 %v2715_v19, %v2710_v42  ;;  %v2678_v30 = vadd.f32 %v2677_v44, %v14206_v14  ;;  %v2712_v38 = vmul.f32 %v14206_v14, %v14206_v14  ;;  %v14215_v27 = vpop.f32.mrb[15].mxu1 }
 0x1d2   :  { %18870 = vst [vmem:[#allocation37_spill] sm:$0xff] %v14215_v27  ;;  %v2670_v7 = vrot.slane %v2669_v20, 4  ;;  %v2725_v8 = vadd.f32 %v2724_v56, %v2711_v9  ;;  %v2687_v50 = vadd.f32 %v2686_v25, %v14215_v27  ;;  %v2713_v59 = vmul.f32 %v14215_v27, %v14215_v27 }
 0x1d3   :  { %v2662_v5 = vadd.f32 %v2661_v61, %v2660_v36  ;;  %v2717_v58 = vrot.slane %v2716_v31, 4  ;;  %v2679_v29 = vrot.slane %v2678_v30, 4  ;;  %v2734_v45 = vadd.f32 %v2733_v24, %v2712_v38 }
 0x1d4   :  { %v2671_v37 = vadd.f32 %v2670_v7, %v2669_v20  ;;  %v2726_v19 = vrot.slane %v2725_v8, 4  ;;  %v2688_v42 = vrot.slane %v2687_v50, 4  ;;  %v2743_v44 = vadd.f32 %v2742_v57, %v2713_v59 }
 0x1d5   :  { %v2663_v2 = vrot.slane %v2662_v5, 2  ;;  %v2718_v41 = vadd.f32 %v2717_v58, %v2716_v31  ;;  %v2680_v14 = vadd.f32 %v2679_v29, %v2678_v30  ;;  %v2735_v55 = vrot.slane %v2734_v45, 4 }
 0x1d6   :  { %v2672_v62 = vrot.slane %v2671_v37, 2  ;;  %v2727_v33 = vadd.f32 %v2726_v19, %v2725_v8  ;;  %v2689_v56 = vadd.f32 %v2688_v42, %v2687_v50  ;;  %v2744_v9 = vrot.slane %v2743_v44, 4 }
 0x1d7   :  { %v2664_v25 = vadd.f32 %v2663_v2, %v2662_v5  ;;  %v2719_v11 = vrot.slane %v2718_v41, 2  ;;  %v2681_v27 = vrot.slane %v2680_v14, 2  ;;  %v2736_v36 = vadd.f32 %v2735_v55, %v2734_v45 }
 0x1d8   :  { %v2673_v61 = vadd.f32 %v2672_v62, %v2671_v37  ;;  %v2728_v6 = vrot.slane %v2727_v33, 2  ;;  %v2690_v24 = vrot.slane %v2689_v56, 2  ;;  %v2745_v20 = vadd.f32 %v2744_v9, %v2743_v44 }
 0x1d9   :  { %v2665_v38 = vrot.slane %v2664_v25, 1  ;;  %v2720_v7 = vadd.f32 %v2719_v11, %v2718_v41  ;;  %v2682_v57 = vadd.f32 %v2681_v27, %v2680_v14  ;;  %v2737_v59 = vrot.slane %v2736_v36, 2 }
 0x1da   :  { %v2674_v31 = vrot.slane %v2673_v61, 1  ;;  %v2729_v30 = vadd.f32 %v2728_v6, %v2727_v33  ;;  %v2691_v58 = vadd.f32 %v2690_v24, %v2689_v56  ;;  %v2746_v29 = vrot.slane %v2745_v20, 2 }
 0x1db   :  { %v2666_v8 = vadd.f32 %v2665_v38, %v2664_v25  ;;  %v2721_v50 = vrot.slane %v2720_v7, 1  ;;  %v2683_v19 = vrot.slane %v2682_v57, 1  ;;  %v2738_v42 = vadd.f32 %v2737_v59, %v2736_v36  ;;  %v2818_v59 = vld [vmem:[%s18672_s4] sm:$0xff] }
 0x1dc   :  { %v2692_v2 = vrot.slane %v2691_v58, 1  ;;  %v2747_v5 = vadd.f32 %v2746_v29, %v2745_v20  ;;  %v2675_v48 = vadd.f32 %v2674_v31, %v2673_v61  ;;  %v2730_v55 = vrot.slane %v2729_v30, 1  ;;  %v2822_v31 = vld [vmem:[%s18672_s4 + $0x20] sm:$0xff]  ;;  %v2820_v29 = vld [vmem:[%s18672_s4 + $0x10] sm:$0xff] }
 0x1dd   :  { %v2722_v62 = vadd.f32 %v2721_v50, %v2720_v7  ;;  %v2684_v37 = vadd.f32 %v2683_v19, %v2682_v57  ;;  %v2739_v45 = vrot.slane %v2738_v42, 1  ;;  %v2694_v44 = vadd.f32 %v2666_v8, %v14128_v17  ;;  %v2825_v57 = vld [vmem:[%s18672_s4 + $0x38] sm:$0xff]  ;;  %v2824_v8 = vld [vmem:[%s18672_s4 + $0x30] sm:$0xff] }
 0x1de   :  { %v2695_v11 = vadd.f32 %v2675_v48, %v14146_v22  ;;  %v2731_v41 = vadd.f32 %v2730_v55, %v2729_v30  ;;  %v2693_v14 = vadd.f32 %v2692_v2, %v2691_v58  ;;  %v2748_v33 = vrot.slane %v2747_v5, 1 }
 0x1df   :  { %v18871_v6 = vrot.slane %v14132_v13, 1  ;;  %v2740_v56 = vadd.f32 %v2739_v45, %v2738_v42  ;;  %v2750_v9 = vadd.f32 %v2722_v62, %v14172_v21  ;;  %v2696_v25 = vadd.f32 %v2684_v37, %v14179_v35 }
 0x1e0   :  { %v2751_v36 = vadd.f32 %v2731_v41, %v14197_v32  ;;  %v18872_v61 = vrot.slane %v14134_v15, 1  ;;  %v2697_v48 = vadd.f32 %v2693_v14, %v14204_v39  ;;  %v2749_v22 = vadd.f32 %v2748_v33, %v2747_v5  ;;  %v2823_v32 = vld [vmem:[%s18672_s4 + $0x28] sm:$0xff]  ;;  %v2821_v39 = vld [vmem:[%s18672_s4 + $0x18] sm:$0xff] }
 0x1e1   :  { %v1414_v27 = vadd.f32 %v18871_v6, %v14132_v13  ;;  %v2829_v24 = vsel %vm2828_vm4, %v2694_v44, %v2750_v9  ;;  %v10382_v30 = vpack.c.bf16 %v2825_v57, %v2821_v39  ;;  %v10380_v58 = vpack.c.bf16 %v2822_v31, %v2818_v59  ;;  %v2826_v6 = vld [vmem:[%s18671_s3] sm:$0x1]  ;;  %v3611_v39 = vld [vmem:[#allocation7 + $0x28] sm:$0xff]  ;;  %v3895_v59 = vld [vmem:[#allocation9 + $0x38] sm:$0xff] }
 0x1e2   :  { %v1423_v17 = vadd.f32 %v18872_v61, %v14134_v15  ;;  %v2830_v38 = vsel %vm2828_vm4, %v2695_v11, %v2751_v36  ;;  %v2819_v15 = vld [vmem:[%s18672_s4 + $0x8] sm:$0xff]  ;;  %v10384_v50 = vpack.c.bf16 %v2824_v8, %v2820_v29  ;;  %v3610_v31 = vld [vmem:[#allocation7 + $0x20] sm:$0xff]  ;;  %v3894_v29 = vld [vmem:[#allocation9 + $0x30] sm:$0xff] }
 0x1e3   :  { %v2752_v20 = vadd.f32 %v2740_v56, %v1414_v27  ;;  %2897 = vmatprep.mubr.f32.mxu0 %v2830_v38  ;;  %v10378_v7 = vpack.c.bf16 %v2823_v32, %v2819_v15  ;;  %10383 = vmatprep.subr.bf16.mxu1 %v10382_v30  ;;  %v2827_v56 = vld [vmem:[%s18671_s3 + $0x1] sm:$0x1]  ;;  %v3891_v38 = vld [vmem:[#allocation9 + $0x18] sm:$0xff]  ;;  %v3890_v32 = vld [vmem:[#allocation9 + $0x10] sm:$0xff] }
 0x1e4   :  { %v2753_v13 = vadd.f32 %v2749_v22, %v1423_v17  ;;  %2898 = vmatmul.mubr.f32.vlgmr.msra.gmra.mrb[16].mxu0 %v2829_v24  ;;  %v14279_v17 = vld [vmem:[#allocation3] sm:$0xff]  ;;  %v3607_v22 = vld [vmem:[#allocation7 + $0x8] sm:$0xff]  ;;  %v3609_v24 = vld [vmem:[#allocation7 + $0x18] sm:$0xff] }
 0x1e5   :  { %v2831_v21 = vsel %vm2828_vm4, %v2696_v25, %v2752_v20  ;;  %3059 = vmatprep.mubr.f32.mxu0 %v13723_v46  ;;  %10379 = vmatprep.subr.bf16.mxu0 %v10378_v7  ;;  %18873 = vst [vmem:[#allocation38_spill] sm:$0xff] %v14279_v17  ;;  %v3889_v20 = vld [vmem:[#allocation9 + $0x8] sm:$0xff]  ;;  %v3888_v15 = vld [vmem:[#allocation9] sm:$0xff]  ;;  %v3613_v7 = vld [vmem:[#allocation7 + $0x38] sm:$0xff] }
 0x1e6   :  { %v2832_v35 = vsel %vm2828_vm4, %v2697_v48, %v2753_v13  ;;  %10381 = vmatpush1.bf16.msra.mxu0 %v10380_v58  ;;  %v3180_v48 = vlaneseq  ;;  %v3893_v57 = vld [vmem:[#allocation9 + $0x28] sm:$0xff]  ;;  %v3612_v30 = vld [vmem:[#allocation7 + $0x30] sm:$0xff]  ;;  %v3892_v58 = vld [vmem:[#allocation9 + $0x20] sm:$0xff]  ;;  %v14293_v51 = vpack.c.bf16 %v3890_v32, %v3888_v15  ;;  %v14295_v12 = vpack.c.bf16 %v3613_v7, %v3611_v39 }
 0x1e7   :  { %2967 = vmatprep.mubr.f32.mxu1 %v2832_v35  ;;  %v3608_v35 = vld [vmem:[#allocation7 + $0x10] sm:$0xff]  ;;  %v3615_v8 = vld [vmem:[#allocation7 + $0x48] sm:$0xff]  ;;  %v14299_v47 = vpack.c.bf16 %v3612_v30, %v3610_v31  ;;  %v14301_v23 = vpack.c.bf16 %v3894_v29, %v3892_v58  ;;  %v3630_v15 = vld [vmem:[#allocation7 + $0xc0] sm:$0xff] }
 0x1e8   :  { %2968 = vmatmul.mubr.f32.vlgmr.msra.gmra.mrb[16].mxu1 %v2831_v21  ;;  %v3181_v13 = vshrl.u32 %v3180_v48, 7  ;;  %v3606_v21 = vld [vmem:[#allocation7] sm:$0xff]  ;;  %v14289_v48 = vpack.c.bf16 %v3891_v38, %v3889_v20  ;;  %18879 = vst [vmem:[#allocation44_spill] sm:$0xff] %v14293_v51  ;;  %18880 = vst [vmem:[#allocation45_spill] sm:$0xff] %v14295_v12  ;;  %v3910_v38 = vld [vmem:[#allocation9 + $0xb0] sm:$0xff] }
 0x1e9   :  { %3130 = vmatprep.mubr.f32.mxu1 %v13723_v46  ;;  %10385 = vmatpush1.bf16.msra.mxu1 %v10384_v50  ;;  %v3617_v50 = vld [vmem:[#allocation7 + $0x58] sm:$0xff]  ;;  %v14291_v18 = vpack.c.bf16 %v3608_v35, %v3606_v21  ;;  %v3908_v20 = vld [vmem:[#allocation9 + $0xa0] sm:$0xff]  ;;  %18882 = vst [vmem:[#allocation47_spill] sm:$0xff] %v14299_v47  ;;  %18883 = vst [vmem:[#allocation48_spill] sm:$0xff] %v14301_v23 }
 0x1ea   :  { %18877 = vst [vmem:[#allocation42_spill] sm:$0xff] %v14289_v48  ;;  %v3631_v48 = vld [vmem:[#allocation7 + $0xc8] sm:$0xff]  ;;  %v14303_v21 = vpack.c.bf16 %v3617_v50, %v3615_v8  ;;  %v3632_v32 = vld [vmem:[#allocation7 + $0xd0] sm:$0xff]  ;;  %v3912_v39 = vld [vmem:[#allocation9 + $0xc0] sm:$0xff] }
 0x1eb   :  { %18878 = vst [vmem:[#allocation43_spill] sm:$0xff] %v14291_v18  ;;  %v3914_v7 = vld [vmem:[#allocation9 + $0xd0] sm:$0xff]  ;;  %v3919_v51 = vld [vmem:[#allocation9 + $0xf8] sm:$0xff]  ;;  %v3634_v58 = vld [vmem:[#allocation7 + $0xe0] sm:$0xff] }
 0x1ec   :  { %18884 = vst [vmem:[#allocation49_spill] sm:$0xff] %v14303_v21  ;;  %v3636_v29 = vld [vmem:[#allocation7 + $0xf0] sm:$0xff]  ;;  %v3916_v8 = vld [vmem:[#allocation9 + $0xe0] sm:$0xff]  ;;  %v3923_v23 = vld [vmem:[#allocation9 + $0x118] sm:$0xff] }
 0x1ed   :  { %v3918_v50 = vld [vmem:[#allocation9 + $0xf0] sm:$0xff] }
 0x2b7   :  { %v9340_v19 = vpop.f32.mrb[16].mxu0 }
 0x2b8   :  { %v9341_v42 = vpop.f32.mrb[17].mxu0 }
 0x2b9   :  { %v9342_v5 = vadd.f32 %v9341_v42, %v9340_v19  ;;  %v3897_v19 = vld [vmem:[#allocation9 + $0x48] sm:$0xff]  ;;  %v3899_v42 = vld [vmem:[#allocation9 + $0x58] sm:$0xff] }
 0x2ba   :  { %v14305_v35 = vpack.c.bf16 %v3899_v42, %v3897_v19  ;;  %v3639_v19 = vld [vmem:[#allocation7 + $0x108] sm:$0xff]  ;;  %v3641_v42 = vld [vmem:[#allocation7 + $0x118] sm:$0xff] }
 0x2bb   :  { %v9375_v2 = vpop.f32.mrb[16].mxu1 }
 0x2bc   :  { %v9376_v55 = vpop.f32.mrb[17].mxu1  ;;  %18885 = vst [vmem:[#allocation50_spill] sm:$0xff] %v14305_v35  ;;  %v3921_v35 = vld [vmem:[#allocation9 + $0x108] sm:$0xff] }
 0x2bd   :  { %v9377_v62 = vadd.f32 %v9376_v55, %v9375_v2  ;;  %v3614_v2 = vld [vmem:[#allocation7 + $0x40] sm:$0xff] }
 0x2be   :  { %v3896_v55 = vld [vmem:[#allocation9 + $0x40] sm:$0xff] }
 0x2bf   :  { %v2970_v37 = vadd.f32 %v9377_v62, %v9342_v5  ;;  %v3616_v5 = vld [vmem:[#allocation7 + $0x50] sm:$0xff] }
 0x2c0   :  { %v3898_v62 = vld [vmem:[#allocation9 + $0x50] sm:$0xff]  ;;  %v14307_v12 = vpack.c.bf16 %v3616_v5, %v3614_v2 }
 0x2c1   :  { %v2973_v45 = vmul.f32 0.00048828125, %v2970_v37  ;;  %v3619_v37 = vld [vmem:[#allocation7 + $0x68] sm:$0xff]  ;;  %v14309_v18 = vpack.c.bf16 %v3898_v62, %v3896_v55  ;;  %v3638_v55 = vld [vmem:[#allocation7 + $0x100] sm:$0xff]  ;;  %v3640_v62 = vld [vmem:[#allocation7 + $0x110] sm:$0xff] }
 0x2c2   :  { %18886 = vst [vmem:[#allocation51_spill] sm:$0xff] %v14307_v12  ;;  %v14325_v12 = vpack.c.bf16 %v3906_v16, %v3904_v53  ;;  %v14337_v16 = vpack.c.bf16 %v3915_v34, %v3913_v0  ;;  %v3648_v53 = vld [vmem:[#allocation7 + $0x150] sm:$0xff]  ;;  %v3932_v34 = vld [vmem:[#allocation9 + $0x160] sm:$0xff] }
 0x2c3   :  { %v2974_v44 = vmul.f32 %v2973_v45, %v2973_v45  ;;  %18887 = vst [vmem:[#allocation52_spill] sm:$0xff] %v14309_v18  ;;  %v3927_v18 = vld [vmem:[#allocation9 + $0x138] sm:$0xff]  ;;  %v3934_v0 = vld [vmem:[#allocation9 + $0x170] sm:$0xff] }
 0x2c4   :  { %18895 = vst [vmem:[#allocation60_spill] sm:$0xff] %v14325_v12  ;;  %18901 = vst [vmem:[#allocation66_spill] sm:$0xff] %v14337_v16  ;;  %v3935_v12 = vld [vmem:[#allocation9 + $0x178] sm:$0xff]  ;;  %v3937_v16 = vld [vmem:[#allocation9 + $0x188] sm:$0xff] }
 0x2c5   :  { %v2976_v11 = vrot.slane %v2974_v44, 7  ;;  %v3901_v44 = vld [vmem:[#allocation9 + $0x68] sm:$0xff] }
 0x2c7   :  { %v2978_v41 = vsub.f32 %v2973_v45, %v2976_v11  ;;  %v3903_v11 = vld [vmem:[#allocation9 + $0x78] sm:$0xff] }
 0x2c8   :  { %v14313_v30 = vpack.c.bf16 %v3903_v11, %v3901_v44  ;;  %v3643_v44 = vld [vmem:[#allocation7 + $0x128] sm:$0xff]  ;;  %v3645_v11 = vld [vmem:[#allocation7 + $0x138] sm:$0xff] }
 0x2c9   :  { %v2979_v14 = vadd.f32 1e-05, %v2978_v41  ;;  %v3618_v41 = vld [vmem:[#allocation7 + $0x60] sm:$0xff] }
 0x2ca   :  { %18889 = vst [vmem:[#allocation54_spill] sm:$0xff] %v14313_v30  ;;  %v3925_v30 = vld [vmem:[#allocation9 + $0x128] sm:$0xff] }
 0x2cb   :  { %12122 = vrsqrt.f32 %v2979_v14  ;;  %v3620_v14 = vld [vmem:[#allocation7 + $0x70] sm:$0xff] }
 0x2cc   :  { %v14315_v21 = vpack.c.bf16 %v3620_v14, %v3618_v41  ;;  %v14327_v41 = vpack.c.bf16 %v3629_v26, %v3627_v52  ;;  %v14329_v14 = vpack.c.bf16 %v3911_v3, %v3909_v63  ;;  %v3646_v26 = vld [vmem:[#allocation7 + $0x140] sm:$0xff]  ;;  %v3930_v63 = vld [vmem:[#allocation9 + $0x150] sm:$0xff]  ;;  %v3651_v52 = vld [vmem:[#allocation7 + $0x168] sm:$0xff] }
 0x2cd   :  { %v3928_v3 = vld [vmem:[#allocation9 + $0x140] sm:$0xff] }
 0x2ce   :  { %18890 = vst [vmem:[#allocation55_spill] sm:$0xff] %v14315_v21  ;;  %18896 = vst [vmem:[#allocation61_spill] sm:$0xff] %v14327_v41  ;;  %v14333_v21 = vpack.c.bf16 %v3910_v38, %v3908_v20  ;;  %v14339_v41 = vpack.c.bf16 %v3632_v32, %v3630_v15  ;;  %v3655_v20 = vld [vmem:[#allocation7 + $0x188] sm:$0xff]  ;;  %v3657_v38 = vld [vmem:[#allocation7 + $0x198] sm:$0xff]  ;;  %v14351_v15 = vpack.c.bf16 %v3641_v42, %v3639_v19 }
 0x2cf   :  { %18897 = vst [vmem:[#allocation62_spill] sm:$0xff] %v14329_v14  ;;  %v3933_v14 = vld [vmem:[#allocation9 + $0x168] sm:$0xff]  ;;  %v14353_v32 = vpack.c.bf16 %v3923_v23, %v3921_v35  ;;  %v3940_v23 = vld [vmem:[#allocation9 + $0x1a0] sm:$0xff]  ;;  %v3942_v35 = vld [vmem:[#allocation9 + $0x1b0] sm:$0xff] }
 0x2d0   :  { %18899 = vst [vmem:[#allocation64_spill] sm:$0xff] %v14333_v21  ;;  %18902 = vst [vmem:[#allocation67_spill] sm:$0xff] %v14339_v41  ;;  %v3939_v21 = vld [vmem:[#allocation9 + $0x198] sm:$0xff]  ;;  %v3663_v19 = vld [vmem:[#allocation7 + $0x1c8] sm:$0xff] }
 0x2d1   :  { %18908 = vst [vmem:[#allocation73_spill] sm:$0xff] %v14351_v15  ;;  %18909 = vst [vmem:[#allocation74_spill] sm:$0xff] %v14353_v32  ;;  %v3665_v42 = vld [vmem:[#allocation7 + $0x1d8] sm:$0xff]  ;;  %v3945_v32 = vld [vmem:[#allocation9 + $0x1c8] sm:$0xff] }
 0x2d5   :  { %v12123_v33 = vpop.eup %12122 }
 0x2d6   :  { %v2982_v27 = vrot.slane %v12123_v33, 1  ;;  %v3900_v33 = vld [vmem:[#allocation9 + $0x60] sm:$0xff] }
 0x2d8   :  { %v2984_v46 = vmul.f32 %v2982_v27, %v2826_v6  ;;  %v3902_v6 = vld [vmem:[#allocation9 + $0x70] sm:$0xff]  ;;  %v3623_v27 = vld [vmem:[#allocation7 + $0x88] sm:$0xff] }
 0x2d9   :  { %v14317_v47 = vpack.c.bf16 %v3902_v6, %v3900_v33  ;;  %v3642_v33 = vld [vmem:[#allocation7 + $0x120] sm:$0xff]  ;;  %v3644_v6 = vld [vmem:[#allocation7 + $0x130] sm:$0xff] }
 0x2da   :  { %v2985_v9 = vmul.f32 %v2984_v46, %v2973_v45  ;;  %v3621_v45 = vld [vmem:[#allocation7 + $0x78] sm:$0xff] }
 0x2db   :  { %v14311_v31 = vpack.c.bf16 %v3621_v45, %v3619_v37  ;;  %18891 = vst [vmem:[#allocation56_spill] sm:$0xff] %v14317_v47  ;;  %v3920_v37 = vld [vmem:[#allocation9 + $0x100] sm:$0xff]  ;;  %v3922_v45 = vld [vmem:[#allocation9 + $0x110] sm:$0xff]  ;;  %v3931_v47 = vld [vmem:[#allocation9 + $0x158] sm:$0xff] }
 0x2dc   :  { %v2986_v25 = vsub.f32 %v2827_v56, %v2985_v9  ;;  %v3905_v56 = vld [vmem:[#allocation9 + $0x88] sm:$0xff]  ;;  %v3907_v9 = vld [vmem:[#allocation9 + $0x98] sm:$0xff]  ;;  %v14357_v41 = vpack.c.bf16 %v3922_v45, %v3920_v37  ;;  %v3662_v37 = vld [vmem:[#allocation7 + $0x1c0] sm:$0xff] }
 0x2dd   :  { %18888 = vst [vmem:[#allocation53_spill] sm:$0xff] %v14311_v31  ;;  %v14321_v5 = vpack.c.bf16 %v3907_v9, %v3905_v56  ;;  %v3647_v56 = vld [vmem:[#allocation7 + $0x148] sm:$0xff]  ;;  %v3649_v9 = vld [vmem:[#allocation7 + $0x158] sm:$0xff]  ;;  %v3664_v45 = vld [vmem:[#allocation7 + $0x1d0] sm:$0xff] }
 0x2de   :  { %v2988_v36 = vrot.slane %v2986_v25, 7  ;;  %v14283_v25 = vsub.s32 0, %v3181_v13  ;;  %18911 = vst [vmem:[#allocation76_spill] sm:$0xff] %v14357_v41 }
 0x2df   :  { %18893 = vst [vmem:[#allocation58_spill] sm:$0xff] %v14321_v5  ;;  %v3929_v5 = vld [vmem:[#allocation9 + $0x148] sm:$0xff] }
 0x2e0   :  { %v2990_v61 = vsel %vm2828_vm4, %v2984_v46, %v2988_v36  ;;  %v3625_v46 = vld [vmem:[#allocation7 + $0x98] sm:$0xff]  ;;  %18874 = vst [vmem:[#allocation39_spill] sm:$0xff] %v14283_v25  ;;  %v14285_v36 = vsub.s32 1, %v3181_v13  ;;  %v14297_v13 = vpack.c.bf16 %v3895_v59, %v3893_v57  ;;  %v3635_v57 = vld [vmem:[#allocation7 + $0xe8] sm:$0xff] }
 0x2e1   :  { %9256 = vmatmul.mubr.msk.f32.vlgmr.msra.gmra.mrb[18].mxu0 %vm2991_vm5, %v2990_v61  ;;  %9257 = vmatmul.mubr.msk.f32.vlgmr.msra.gmra.mrb[18].mxu1 %vm2991_vm5, %v2990_v61  ;;  %v14287_v61 = vpack.c.bf16 %v3609_v24, %v3607_v22  ;;  %v3626_v22 = vld [vmem:[#allocation7 + $0xa0] sm:$0xff]  ;;  %v3628_v24 = vld [vmem:[#allocation7 + $0xb0] sm:$0xff]  ;;  %v3637_v59 = vld [vmem:[#allocation7 + $0xf8] sm:$0xff]  ;;  %v14319_v2 = vpack.c.bf16 %v3625_v46, %v3623_v27 }
 0x2e2   :  { %3516 = vmatprep.mubr.f32.mxu0 %v14279_v17  ;;  %3593 = vmatprep.mubr.f32.mxu1 %v14279_v17  ;;  %18875 = vst [vmem:[#allocation40_spill] sm:$0xff] %v14285_v36  ;;  %v3622_v17 = vld [vmem:[#allocation7 + $0x80] sm:$0xff]  ;;  %18881 = vst [vmem:[#allocation46_spill] sm:$0xff] %v14297_v13  ;;  %v3917_v13 = vld [vmem:[#allocation9 + $0xe8] sm:$0xff] }
 0x2e3   :  { %18876 = vst [vmem:[#allocation41_spill] sm:$0xff] %v14287_v61  ;;  %v3633_v61 = vld [vmem:[#allocation7 + $0xd8] sm:$0xff]  ;;  %18892 = vst [vmem:[#allocation57_spill] sm:$0xff] %v14319_v2  ;;  %v14323_v31 = vpack.c.bf16 %v3624_v54, %v3622_v17  ;;  %v3924_v27 = vld [vmem:[#allocation9 + $0x120] sm:$0xff]  ;;  %v14331_v2 = vpack.c.bf16 %v3628_v24, %v3626_v22  ;;  %v14343_v22 = vpack.c.bf16 %v3637_v59, %v3635_v57 }
 0x2e4   :  { %v3926_v46 = vld [vmem:[#allocation9 + $0x130] sm:$0xff]  ;;  %v14335_v54 = vpack.c.bf16 %v3633_v61, %v3631_v48  ;;  %v3653_v17 = vld [vmem:[#allocation7 + $0x178] sm:$0xff]  ;;  %v14345_v24 = vpack.c.bf16 %v3919_v51, %v3917_v13  ;;  %v3650_v61 = vld [vmem:[#allocation7 + $0x160] sm:$0xff] }
 0x2e5   :  { %18894 = vst [vmem:[#allocation59_spill] sm:$0xff] %v14323_v31  ;;  %18898 = vst [vmem:[#allocation63_spill] sm:$0xff] %v14331_v2  ;;  %v14341_v31 = vpack.c.bf16 %v3914_v7, %v3912_v39  ;;  %v3652_v48 = vld [vmem:[#allocation7 + $0x170] sm:$0xff]  ;;  %v14349_v2 = vpack.c.bf16 %v3918_v50, %v3916_v8  ;;  %v3654_v39 = vld [vmem:[#allocation7 + $0x180] sm:$0xff]  ;;  %v14365_v15 = vpack.c.bf16 %v3926_v46, %v3924_v27 }
 0x2e6   :  { %18900 = vst [vmem:[#allocation65_spill] sm:$0xff] %v14335_v54  ;;  %18904 = vst [vmem:[#allocation69_spill] sm:$0xff] %v14343_v22  ;;  %v14347_v54 = vpack.c.bf16 %v3636_v29, %v3634_v58  ;;  %v3656_v7 = vld [vmem:[#allocation7 + $0x190] sm:$0xff]  ;;  %v3936_v51 = vld [vmem:[#allocation9 + $0x180] sm:$0xff]  ;;  %v14355_v22 = vpack.c.bf16 %v3640_v62, %v3638_v55  ;;  %v14359_v58 = vpack.c.bf16 %v3645_v11, %v3643_v44 }
 0x2e7   :  { %18903 = vst [vmem:[#allocation68_spill] sm:$0xff] %v14341_v31  ;;  %18905 = vst [vmem:[#allocation70_spill] sm:$0xff] %v14345_v24  ;;  %v3938_v13 = vld [vmem:[#allocation9 + $0x190] sm:$0xff]  ;;  %v3659_v57 = vld [vmem:[#allocation7 + $0x1a8] sm:$0xff]  ;;  %v14361_v29 = vpack.c.bf16 %v3927_v18, %v3925_v30  ;;  %v14369_v55 = vpack.c.bf16 %v3931_v47, %v3929_v5  ;;  %v14371_v18 = vpack.c.bf16 %v3648_v53, %v3646_v26 }
 0x2e8   :  { %18906 = vst [vmem:[#allocation71_spill] sm:$0xff] %v14347_v54  ;;  %18907 = vst [vmem:[#allocation72_spill] sm:$0xff] %v14349_v2  ;;  %v3661_v59 = vld [vmem:[#allocation7 + $0x1b8] sm:$0xff]  ;;  %v3941_v24 = vld [vmem:[#allocation9 + $0x1a8] sm:$0xff]  ;;  %v14363_v2 = vpack.c.bf16 %v3644_v6, %v3642_v33  ;;  %v14367_v54 = vpack.c.bf16 %v3649_v9, %v3647_v56  ;;  %v14373_v30 = vpack.c.bf16 %v3930_v63, %v3928_v3 }
 0x2e9   :  { %v3943_v31 = vld [vmem:[#allocation9 + $0x1b8] sm:$0xff]  ;;  %18910 = vst [vmem:[#allocation75_spill] sm:$0xff] %v14355_v22  ;;  %18912 = vst [vmem:[#allocation77_spill] sm:$0xff] %v14359_v58  ;;  %v3658_v8 = vld [vmem:[#allocation7 + $0x1a0] sm:$0xff]  ;;  %v14375_v44 = vpack.c.bf16 %v3653_v17, %v3651_v52  ;;  %v14377_v11 = vpack.c.bf16 %v3935_v12, %v3933_v14  ;;  %v14379_v27 = vpack.c.bf16 %v3652_v48, %v3650_v61 }
 0x2ea   :  { %18913 = vst [vmem:[#allocation78_spill] sm:$0xff] %v14361_v29  ;;  %v3660_v50 = vld [vmem:[#allocation7 + $0x1b0] sm:$0xff]  ;;  %v3947_v62 = vld [vmem:[#allocation9 + $0x1d8] sm:$0xff]  ;;  %v3944_v29 = vld [vmem:[#allocation9 + $0x1c0] sm:$0xff]  ;;  %v14381_v46 = vpack.c.bf16 %v3934_v0, %v3932_v34  ;;  %v14383_v47 = vpack.c.bf16 %v3657_v38, %v3655_v20  ;;  %v14385_v5 = vpack.c.bf16 %v3939_v21, %v3937_v16  ;;  %v14387_v53 = vpack.c.bf16 %v3656_v7, %v3654_v39 }
 0x2eb   :  { %v3946_v33 = vld [vmem:[#allocation9 + $0x1d0] sm:$0xff]  ;;  %v3667_v6 = vld [vmem:[#allocation7 + $0x1e8] sm:$0xff]  ;;  %v3669_v56 = vld [vmem:[#allocation7 + $0x1f8] sm:$0xff]  ;;  %v14389_v3 = vpack.c.bf16 %v3938_v13, %v3936_v51  ;;  %v14391_v12 = vpack.c.bf16 %v3661_v59, %v3659_v57  ;;  %v14393_v14 = vpack.c.bf16 %v3943_v31, %v3941_v24  ;;  %v14395_v63 = vpack.c.bf16 %v3660_v50, %v3658_v8 }
 0x2ec   :  { %v3949_v9 = vld [vmem:[#allocation9 + $0x1e8] sm:$0xff]  ;;  %v3951_v26 = vld [vmem:[#allocation9 + $0x1f8] sm:$0xff]  ;;  %18914 = vst [vmem:[#allocation79_spill] sm:$0xff] %v14387_v53  ;;  %v14397_v52 = vpack.c.bf16 %v3942_v35, %v3940_v23  ;;  %v14399_v17 = vpack.c.bf16 %v3665_v42, %v3663_v19  ;;  %v14401_v61 = vpack.c.bf16 %v3947_v62, %v3945_v32  ;;  %v14403_v48 = vpack.c.bf16 %v3664_v45, %v3662_v37 }
 0x2ed   :  { %18915 = vst [vmem:[#allocation80_spill] sm:$0xff] %v14389_v3  ;;  %18916 = vst [vmem:[#allocation81_spill] sm:$0xff] %v14391_v12  ;;  %v14405_v34 = vpack.c.bf16 %v3946_v33, %v3944_v29  ;;  %v14407_v0 = vpack.c.bf16 %v3669_v56, %v3667_v6  ;;  %v14409_v20 = vpack.c.bf16 %v3951_v26, %v3949_v9  ;;  %v18926_v62 = vld [vmem:[#allocation15_spill] sm:$0xff]  ;;  %v18927_v37 = vld [vmem:[#allocation17_spill] sm:$0xff] }
 0x2ee   :  { %18917 = vst [vmem:[#allocation82_spill] sm:$0xff] %v14393_v14  ;;  %18918 = vst [vmem:[#allocation83_spill] sm:$0xff] %v14395_v63  ;;  %v18940_v14 = vmov 0 }
 0x2ef   :  { %18919 = vst [vmem:[#allocation84_spill] sm:$0xff] %v14397_v52  ;;  %18920 = vst [vmem:[#allocation85_spill] sm:$0xff] %v14399_v17  ;;  %v18941_v14 = vsel %vm14560_vm9, 4294967295, %v18940_v14 }
 0x2f0   :  { %18921 = vst [vmem:[#allocation86_spill] sm:$0xff] %v14401_v61  ;;  %18922 = vst [vmem:[#allocation87_spill] sm:$0xff] %v14403_v48 }
 0x2f1   :  { %18923 = vst [vmem:[#allocation88_spill] sm:$0xff] %v14405_v34  ;;  %18924 = vst [vmem:[#allocation89_spill] sm:$0xff] %v14407_v0 }
 0x2f2   :  { %18925 = vst [vmem:[#allocation90_spill] sm:$0xff] %v14409_v20 }
 0x3b4   :  { %v3061_v21 = vpop.f32.mrb[18].mxu0  ;;  %v3132_v16 = vpop.f32.mrb[18].mxu1 }
 0x3b5   :  { %v14412_v31 = vrot.slane %v3061_v21, %v14283_v25  ;;  %v14415_v24 = vrot.slane %v3061_v21, %v14285_v36  ;;  %v14418_v38 = vrot.slane %v3132_v16, %v14283_v25  ;;  %v14421_v32 = vrot.slane %v3132_v16, %v14285_v36  ;;  %v3063_v39 = vpop.f32.mrb[19].mxu0  ;;  %v3134_v7 = vpop.f32.mrb[19].mxu1 }
 0x3b6   :  { %v14424_v51 = vrot.slane %v3063_v39, %v14283_v25  ;;  %v14427_v13 = vrot.slane %v3063_v39, %v14285_v36  ;;  %v14430_v57 = vrot.slane %v3134_v7, %v14283_v25  ;;  %v14433_v59 = vrot.slane %v3134_v7, %v14285_v36 }
 0x3b7   :  { %v3196_v29 = vmul.f32 %v14412_v31, %v14042_v1  ;;  %v3200_v8 = vmul.f32 %v14412_v31, %v14050_v4  ;;  %v3204_v50 = vmul.f32 %v14412_v31, %v14082_v49  ;;  %v3198_v23 = vmul.f32 %v14418_v38, %v14046_v60 }
 0x3b8   :  { %v3197_v35 = vmul.f32 %v14424_v51, %v14044_v40  ;;  %v3201_v19 = vmul.f32 %v14424_v51, %v14058_v28  ;;  %v3205_v42 = vmul.f32 %v14424_v51, %v14087_v10  ;;  %v3199_v1 = vmul.f32 %v14430_v57, %v14048_v43 }
 0x3b9   :  { %v3203_v4 = vmul.f32 %v14430_v57, %v18926_v62  ;;  %v3207_v49 = vmul.f32 %v14430_v57, %v18927_v37  ;;  %v3228_v60 = vadd.f32 %v14415_v24, %v3196_v29  ;;  %v3232_v45 = vadd.f32 %v14415_v24, %v3200_v8 }
 0x3ba   :  { %v3229_v40 = vadd.f32 %v14427_v13, %v3197_v35  ;;  %v3233_v28 = vadd.f32 %v14427_v13, %v3201_v19  ;;  %v3237_v33 = vadd.f32 %v14427_v13, %v3205_v42  ;;  %v3231_v10 = vadd.f32 %v14433_v59, %v3199_v1 }
 0x3bb   :  { %v3235_v43 = vadd.f32 %v14433_v59, %v3203_v4  ;;  %v3239_v6 = vadd.f32 %v14433_v59, %v3207_v49  ;;  %v3236_v56 = vadd.f32 %v14415_v24, %v3204_v50  ;;  %v14464_v9 = vmax.f32 %v3228_v60, 0.0 }
 0x3bc   :  { %v14466_v26 = vmax.f32 %v3229_v40, 0.0  ;;  %v14468_v21 = vmax.f32 %v3233_v28, 0.0  ;;  %v14470_v16 = vmax.f32 %v3237_v33, 0.0  ;;  %v14472_v39 = vmax.f32 %v3231_v10, 0.0  ;;  %v18928_v28 = vld [vmem:[#allocation14_spill] sm:$0xff] }
 0x3bd   :  { %v14474_v7 = vmax.f32 %v3235_v43, 0.0  ;;  %v14476_v29 = vmax.f32 %v3239_v6, 0.0  ;;  %v14478_v8 = vmax.f32 %v3232_v45, 0.0  ;;  %v14480_v35 = vmax.f32 %v3236_v56, 0.0 }
 0x3be   :  { %v3376_v50 = vrot.slane %v14466_v26, 1  ;;  %v3377_v19 = vrot.slane %v14468_v21, 1  ;;  %v3387_v42 = vrot.slane %v14470_v16, 1  ;;  %v3382_v1 = vrot.slane %v14472_v39, 1 }
 0x3bf   :  { %v3383_v62 = vrot.slane %v14474_v7, 1  ;;  %v3391_v4 = vrot.slane %v14476_v29, 1  ;;  %v3373_v37 = vrot.slane %v14464_v9, 1  ;;  %v3374_v49 = vrot.slane %v14478_v8, 1 }
 0x3c0   :  { %v3378_v60 = vsel %vm3372_vm6, %v3376_v50, %v3377_v19  ;;  %v3388_v45 = vsel %vm3372_vm6, %v3377_v19, %v3387_v42  ;;  %v3385_v40 = vrot.slane %v14480_v35, 1  ;;  %v3202_v33 = vmul.f32 %v14418_v38, %v18928_v28 }
 0x3c1   :  { %v3418_v10 = vmax.f32 %v14466_v26, %v3378_v60  ;;  %v3422_v43 = vmax.f32 %v14468_v21, %v3388_v45  ;;  %v3384_v6 = vsel %vm3372_vm6, %v3382_v1, %v3383_v62  ;;  %v3392_v56 = vsel %vm3372_vm6, %v3383_v62, %v3391_v4  ;;  %v18929_v60 = vld [vmem:[#allocation16_spill] sm:$0xff] }
 0x3c2   :  { %v3420_v36 = vmax.f32 %v14472_v39, %v3384_v6  ;;  %v3424_v25 = vmax.f32 %v14474_v7, %v3392_v56  ;;  %v3375_v50 = vsel %vm3372_vm6, %v3373_v37, %v3374_v49  ;;  %v3386_v19 = vsel %vm3372_vm6, %v3374_v49, %v3385_v40  ;;  %v18930_v6 = vld [vmem:[#allocation19_spill] sm:$0xff]  ;;  %18942 = vst [vmem:[#allocation16_spill] sm:$0xff] %v18941_v14  ;;  %v18957_v14 = vld [vmem:[#allocation24_spill] sm:$0xff] }
 0x3c3   :  { %v10386_v20 = vpack.c.bf16 %v3422_v43, %v3418_v10  ;;  %v3417_v34 = vmax.f32 %v14464_v9, %v3375_v50  ;;  %v3421_v28 = vmax.f32 %v14478_v8, %v3386_v19  ;;  %v3206_v45 = vmul.f32 %v14418_v38, %v18929_v60  ;;  %v18931_v10 = vld [vmem:[#allocation21_spill] sm:$0xff]  ;;  %v18932_v50 = vld [vmem:[#allocation18_spill] sm:$0xff] }
 0x3c4   :  { %v10396_v0 = vpack.c.bf16 %v3424_v25, %v3420_v36  ;;  %v3230_v1 = vadd.f32 %v14421_v32, %v3198_v23  ;;  %v3234_v62 = vadd.f32 %v14421_v32, %v3202_v33  ;;  %v3209_v56 = vmul.f32 %v14424_v51, %v18930_v6  ;;  %v18934_v23 = vld [vmem:[#allocation20_spill] sm:$0xff] }
 0x3c5   :  { %10387 = vmatprep.subr.bf16.mxu0 %v10386_v20  ;;  %v10388_v37 = vpack.c.bf16 %v3421_v28, %v3417_v34  ;;  %v3238_v49 = vadd.f32 %v14421_v32, %v3206_v45  ;;  %v3211_v43 = vmul.f32 %v14430_v57, %v18931_v10  ;;  %v3208_v19 = vmul.f32 %v14412_v31, %v18932_v50  ;;  %v18936_v45 = vld [vmem:[#allocation23_spill] sm:$0xff] }
 0x3c6   :  { %10397 = vmatprep.subr.bf16.mxu1 %v10396_v0  ;;  %v14516_v60 = vmax.f32 %v3230_v1, 0.0  ;;  %v14518_v25 = vmax.f32 %v3234_v62, 0.0  ;;  %v3241_v36 = vadd.f32 %v14427_v13, %v3209_v56  ;;  %v3210_v33 = vmul.f32 %v14418_v38, %v18934_v23 }
 0x3c7   :  { %10389 = vmatpush1.bf16.msra.mxu0 %v10388_v37  ;;  %v14523_v34 = vmax.f32 %v3238_v49, 0.0  ;;  %v3243_v20 = vadd.f32 %v14433_v59, %v3211_v43  ;;  %v3240_v28 = vadd.f32 %v14415_v24, %v3208_v19  ;;  %v4191_v6 = vmul.f32 %v14424_v51, %v18936_v45  ;;  %v18937_v43 = vld [vmem:[#allocation27_spill] sm:$0xff] }
 0x3c8   :  { %18933 = vst [vmem:[#allocation15_spill] sm:$0xff] %v14518_v25  ;;  %v3379_v0 = vrot.slane %v14516_v60, 1  ;;  %v3380_v1 = vrot.slane %v14518_v25, 1  ;;  %v14531_v62 = vmax.f32 %v3241_v36, 0.0  ;;  %v3242_v56 = vadd.f32 %v14421_v32, %v3210_v33  ;;  %v18939_v36 = vld [vmem:[#allocation31_spill] sm:$0xff] }
 0x3c9   :  { %18935 = vst [vmem:[#allocation17_spill] sm:$0xff] %v14523_v34  ;;  %v3389_v10 = vrot.slane %v14523_v34, 1  ;;  %v14535_v37 = vmax.f32 %v3243_v20, 0.0  ;;  %v14537_v49 = vmax.f32 %v3240_v28, 0.0  ;;  %v4195_v50 = vmul.f32 %v14424_v51, %v18937_v43 }
 0x3ca   :  { %v3381_v19 = vsel %vm3372_vm6, %v3379_v0, %v3380_v1  ;;  %v3395_v23 = vrot.slane %v14531_v62, 1  ;;  %v14543_v45 = vmax.f32 %v3242_v56, 0.0  ;;  %v4199_v48 = vmul.f32 %v14424_v51, %v18939_v36 }
 0x3cb   :  { %v3390_v33 = vsel %vm3372_vm6, %v3380_v1, %v3389_v10  ;;  %v3419_v20 = vmax.f32 %v14516_v60, %v3381_v19  ;;  %v3399_v28 = vrot.slane %v14535_v37, 1  ;;  %v3393_v61 = vrot.slane %v14537_v49, 1 }
 0x3cc   :  { %18938 = vst [vmem:[#allocation14_spill] sm:$0xff] %v14543_v45  ;;  %v3423_v43 = vmax.f32 %v14518_v25, %v3390_v33  ;;  %v3396_v0 = vsel %vm3372_vm6, %v3387_v42, %v3395_v23  ;;  %v3430_v52 = vmax.f32 %v14531_v62, %v3395_v23  ;;  %v3397_v56 = vrot.slane %v14543_v45, 1  ;;  %v18968_v25 = vld [vmem:[#allocation51_spill] sm:$0xff] }
 0x3cd   :  { %v3426_v17 = vmax.f32 %v14470_v16, %v3396_v0  ;;  %v3400_v36 = vsel %vm3372_vm6, %v3391_v4, %v3399_v28  ;;  %v3432_v1 = vmax.f32 %v14535_v37, %v3399_v28  ;;  %v3394_v19 = vsel %vm3372_vm6, %v3385_v40, %v3393_v61 }
 0x3ce   :  { %v10398_v63 = vpack.c.bf16 %v3423_v43, %v3419_v20  ;;  %v3428_v42 = vmax.f32 %v14476_v29, %v3400_v36  ;;  %v3425_v23 = vmax.f32 %v14480_v35, %v3394_v19  ;;  %v3429_v33 = vmax.f32 %v14537_v49, %v3393_v61  ;;  %v18946_v19 = vld [vmem:[#allocation22_spill] sm:$0xff] }
 0x3cf   :  { %v10390_v0 = vpack.c.bf16 %v3430_v52, %v3426_v17  ;;  %v3398_v4 = vsel %vm3372_vm6, %v3389_v10, %v3397_v56  ;;  %v3431_v28 = vmax.f32 %v14543_v45, %v3397_v56  ;;  %v4207_v40 = vadd.f32 %v4191_v6, %v14427_v13  ;;  %v18943_v52 = vld [vmem:[#allocation25_spill] sm:$0xff]  ;;  %v18959_v45 = vld [vmem:[#allocation47_spill] sm:$0xff] }
 0x3d0   :  { %10399 = vmatpush1.bf16.msra.mxu1 %v10398_v63  ;;  %v10400_v20 = vpack.c.bf16 %v3432_v1, %v3428_v42  ;;  %v10393_v43 = vpack.c.bf16 %v3429_v33, %v3425_v23  ;;  %v3427_v3 = vmax.f32 %v14523_v34, %v3398_v4  ;;  %v4211_v12 = vadd.f32 %v4195_v50, %v14427_v13  ;;  %v18944_v10 = vld [vmem:[#allocation29_spill] sm:$0xff] }
 0x3d1   :  { %10392 = vmatprep.subr.msk.bf16.mxu0 %vm14560_vm9, %v10390_v0  ;;  %v4215_v36 = vadd.f32 %v4199_v48, %v14427_v13  ;;  %v14575_v61 = vmax.f32 %v4207_v40, 0.0  ;;  %v4193_v17 = vmul.f32 %v14430_v57, %v18943_v52  ;;  %v4197_v6 = vmul.f32 %v14430_v57, %v18944_v10  ;;  %v3162_v50 = vld [vmem:[%s18676_s8] sm:$0xff] }
 0x3d2   :  { %10402 = vmatprep.subr.msk.bf16.mxu1 %vm14560_vm9, %v10400_v20  ;;  %10395 = vmatpush1.bf16.msk.msra.mxu0 %vm14560_vm9, %v10393_v43  ;;  %v10403_v63 = vpack.c.bf16 %v3431_v28, %v3427_v3  ;;  %v14588_v48 = vmax.f32 %v4211_v12, 0.0  ;;  %v18945_v56 = vld [vmem:[#allocation33_spill] sm:$0xff]  ;;  %v4190_v42 = vmul.f32 %v14412_v31, %v18946_v19  ;;  %v18948_v40 = vld [vmem:[#allocation26_spill] sm:$0xff]  ;;  %v18952_v19 = vld [vmem:[#allocation43_spill] sm:$0xff] }
 0x3d3   :  { %v4201_v1 = vmul.f32 %v14430_v57, %v18945_v56  ;;  %v18947_v23 = vld [vmem:[#allocation41_spill] sm:$0xff]  ;;  %v14595_v33 = vmax.f32 %v4215_v36, 0.0  ;;  %v4353_v0 = vrot.slane %v14575_v61, 1  ;;  %v4209_v3 = vadd.f32 %v4193_v17, %v14433_v59  ;;  %v18949_v43 = vld [vmem:[#allocation30_spill] sm:$0xff] }
 0x3d4   :  { %10407 = vmatprep.subr.bf16.mxu0 %v18947_v23  ;;  %v4213_v4 = vadd.f32 %v4197_v6, %v14433_v59  ;;  %10405 = vmatpush1.bf16.msk.msra.mxu1 %vm14560_vm9, %v10403_v63  ;;  %v4354_v12 = vrot.slane %v14588_v48, 1  ;;  %v4194_v20 = vmul.f32 %v14412_v31, %v18948_v40  ;;  %v4198_v36 = vmul.f32 %v14412_v31, %v18949_v43  ;;  %v18950_v52 = vld [vmem:[#allocation42_spill] sm:$0xff]  ;;  %v18965_v34 = vld [vmem:[#allocation37_spill] sm:$0xff] }
 0x3d5   :  { %v4217_v28 = vadd.f32 %v4201_v1, %v14433_v59  ;;  %9260 = vmatmul.mubr.msk.f32.vlgmr.msra.gmra.mrb[20].mxu0 %vm3433_vm7, %v3162_v50  ;;  %10535 = vmatprep.subr.bf16.mxu1 %v18950_v52  ;;  %v14611_v10 = vmax.f32 %v4209_v3, 0.0  ;;  %v4206_v63 = vadd.f32 %v4190_v42, %v14415_v24  ;;  %v18951_v56 = vld [vmem:[#allocation38_spill] sm:$0xff]  ;;  %v18954_v42 = vrot.slane %v14595_v33, 1 }
 0x3d6   :  { %v14613_v6 = vmax.f32 %v4213_v4, 0.0  ;;  %3522 = vmatprep.mubr.f32.mxu0 %v18951_v56  ;;  %v3163_v1 = vld [vmem:[%s18676_s8 + $0x8] sm:$0xff]  ;;  %10409 = vmatpush1.bf16.msra.mxu0 %v18952_v19  ;;  %v4355_v40 = vsel %vm3372_vm6, %v4353_v0, %v4354_v12  ;;  %v4210_v17 = vadd.f32 %v4194_v20, %v14415_v24  ;;  %v4214_v3 = vadd.f32 %v4198_v36, %v14415_v24  ;;  %v18953_v4 = vld [vmem:[#allocation45_spill] sm:$0xff] }
 0x3d7   :  { %v14622_v43 = vmax.f32 %v4217_v28, 0.0  ;;  %9264 = vmatmul.mubr.msk.f32.vlgmr.msra.gmra.mrb[20].mxu1 %vm3433_vm7, %v3162_v50  ;;  %10411 = vmatprep.subr.bf16.mxu0 %v18953_v4  ;;  %v4365_v52 = vsel %vm3372_vm6, %v4354_v12, %v18954_v42  ;;  %v4395_v23 = vmax.f32 %v14575_v61, %v4355_v40  ;;  %v4359_v19 = vrot.slane %v14611_v10, 1  ;;  %v18955_v28 = vld [vmem:[#allocation44_spill] sm:$0xff]  ;;  %v18956_v12 = vld [vmem:[#allocation46_spill] sm:$0xff] }
 0x3d8   :  { %v4360_v0 = vrot.slane %v14613_v6, 1  ;;  %3599 = vmatprep.mubr.f32.mxu1 %v18951_v56  ;;  %10537 = vmatpush1.bf16.msra.mxu1 %v18955_v28  ;;  %v4399_v20 = vmax.f32 %v14588_v48, %v4365_v52  ;;  %v14638_v36 = vmax.f32 %v4206_v63, 0.0  ;;  %v14640_v4 = vmax.f32 %v4210_v17, 0.0  ;;  %v18958_v28 = vld [vmem:[#allocation28_spill] sm:$0xff] }
 0x3d9   :  { %v18770_v50 = vrot.slane %v14622_v43, 1  ;;  %9261 = vmatmul.mubr.msk.f32.gmra.mrb[22].mxu0 %vm3433_vm7, %v3163_v1  ;;  %10539 = vmatprep.subr.bf16.mxu1 %v18956_v12  ;;  %v14645_v42 = vmax.f32 %v4214_v3, 0.0  ;;  %v4192_v56 = vmul.f32 %v14418_v38, %v18957_v14  ;;  %v4196_v52 = vmul.f32 %v14418_v38, %v18958_v28  ;;  %v18961_v3 = vld [vmem:[#allocation49_spill] sm:$0xff] }
 0x3da   :  { %v4361_v40 = vsel %vm3372_vm6, %v4359_v19, %v4360_v0  ;;  %10413 = vmatpush1.bf16.msra.mxu0 %v18959_v45  ;;  %v14652_v63 = vpack.c.bf16 %v4399_v20, %v4395_v23  ;;  %v4350_v19 = vrot.slane %v14638_v36, 1  ;;  %v4351_v28 = vrot.slane %v14640_v4, 1  ;;  %v18962_v23 = vld [vmem:[#allocation32_spill] sm:$0xff] }
 0x3db   :  { %v4369_v17 = vsel %vm3372_vm6, %v4360_v0, %v18770_v50  ;;  %v4397_v12 = vmax.f32 %v14611_v10, %v4361_v40  ;;  %9265 = vmatmul.mubr.msk.f32.gmra.mrb[22].mxu1 %vm3433_vm7, %v3163_v1  ;;  %10415 = vmatprep.subr.bf16.mxu0 %v18961_v3  ;;  %v4200_v20 = vmul.f32 %v14418_v38, %v18962_v23  ;;  %v18964_v50 = vld [vmem:[#allocation35_spill] sm:$0xff]  ;;  %v18967_v23 = vrot.slane %v14645_v42, 1 }
 0x3dc   :  { %18960 = vst [vmem:[#allocation19_spill] sm:$0xff] %v14652_v63  ;;  %v4401_v14 = vmax.f32 %v14613_v6, %v4369_v17  ;;  %v18963_v63 = vld [vmem:[#allocation48_spill] sm:$0xff]  ;;  %v4208_v0 = vadd.f32 %v4192_v56, %v14421_v32  ;;  %v4212_v40 = vadd.f32 %v4196_v52, %v14421_v32  ;;  %v4203_v1 = vmul.f32 %v14424_v51, %v18964_v50  ;;  %v18966_v17 = vld [vmem:[#allocation50_spill] sm:$0xff] }
 0x3dd   :  { %10541 = vmatpush1.bf16.msra.mxu1 %v18963_v63  ;;  %v4205_v3 = vmul.f32 %v14430_v57, %v18965_v34  ;;  %v4352_v45 = vsel %vm3372_vm6, %v4350_v19, %v4351_v28  ;;  %v4363_v63 = vsel %vm3372_vm6, %v4351_v28, %v18967_v23  ;;  %v4216_v56 = vadd.f32 %v4200_v20, %v14421_v32  ;;  %v18969_v34 = vld [vmem:[#allocation53_spill] sm:$0xff]  ;;  %v18970_v28 = vld [vmem:[#allocation34_spill] sm:$0xff]  ;;  %v18971_v23 = vld [vmem:[#allocation52_spill] sm:$0xff] }
 0x3de   :  { %10543 = vmatprep.subr.bf16.mxu1 %v18966_v17  ;;  %v14674_v53 = vpack.c.bf16 %v4401_v14, %v4397_v12  ;;  %10417 = vmatpush1.bf16.msra.mxu0 %v18968_v25  ;;  %v4394_v52 = vmax.f32 %v14638_v36, %v4352_v45  ;;  %v4398_v51 = vmax.f32 %v14640_v4, %v4363_v63  ;;  %v14684_v50 = vmax.f32 %v4208_v0, 0.0  ;;  %v18983_v17 = vld [vmem:[#allocation61_spill] sm:$0xff] }
 0x3df   :  { %v14686_v57 = vmax.f32 %v4212_v40, 0.0  ;;  %10419 = vmatprep.subr.bf16.mxu0 %v18969_v34  ;;  %v14689_v12 = vmax.f32 %v4216_v56, 0.0  ;;  %v4219_v19 = vadd.f32 %v4203_v1, %v14427_v13  ;;  %v4221_v14 = vadd.f32 %v4205_v3, %v14433_v59  ;;  %v18973_v40 = vld [vmem:[#allocation36_spill] sm:$0xff]  ;;  %v18974_v56 = vld [vmem:[#allocation54_spill] sm:$0xff]  ;;  %v18975_v3 = vld [vmem:[#allocation55_spill] sm:$0xff] }
 0x3e0   :  { %v4202_v20 = vmul.f32 %v14412_v31, %v18970_v28  ;;  %v14696_v45 = vpack.c.bf16 %v4398_v51, %v4394_v52  ;;  %v4356_v63 = vrot.slane %v14684_v50, 1  ;;  %v4204_v34 = vmul.f32 %v14418_v38, %v18973_v40  ;;  %v18976_v40 = vld [vmem:[#allocation57_spill] sm:$0xff] }
 0x3e1   :  { %10545 = vmatpush1.bf16.msra.mxu1 %v18971_v23  ;;  %v4357_v0 = vrot.slane %v14686_v57, 1  ;;  %v4366_v13 = vrot.slane %v14689_v12, 1  ;;  %v14704_v1 = vmax.f32 %v4219_v19, 0.0  ;;  %v14706_v59 = vmax.f32 %v4221_v14, 0.0 }
 0x3e2   :  { %18972 = vst [vmem:[#allocation21_spill] sm:$0xff] %v14696_v45  ;;  %10547 = vmatprep.subr.bf16.mxu1 %v18974_v56  ;;  %v4218_v31 = vadd.f32 %v4202_v20, %v14415_v24  ;;  %10421 = vmatpush1.bf16.msra.mxu0 %v18975_v3  ;;  %v4220_v51 = vadd.f32 %v4204_v34, %v14421_v32  ;;  %v18977_v3 = vld [vmem:[#allocation56_spill] sm:$0xff]  ;;  %v18978_v56 = vld [vmem:[#allocation58_spill] sm:$0xff]  ;;  %v18980_v23 = vrot.slane %v14622_v43, 1 }
 0x3e3   :  { %v4358_v52 = vsel %vm3372_vm6, %v4356_v63, %v4357_v0  ;;  %v3269_v28 = vadd.f32 %v14468_v21, %v14466_v26  ;;  %v3301_v38 = vmul.f32 %v14466_v26, %v14466_v26  ;;  %10423 = vmatprep.subr.bf16.mxu0 %v18976_v40  ;;  %v4367_v19 = vsel %vm3372_vm6, %v4357_v0, %v4366_v13 }
 0x3e4   :  { %v4396_v14 = vmax.f32 %v14684_v50, %v4358_v52  ;;  %v4372_v24 = vrot.slane %v14704_v1, 1  ;;  %v4376_v20 = vrot.slane %v14706_v59, 1  ;;  %v4400_v32 = vmax.f32 %v14686_v57, %v4367_v19 }
 0x3e5   :  { %10549 = vmatpush1.bf16.msra.mxu1 %v18977_v3  ;;  %v14723_v34 = vmax.f32 %v4218_v31, 0.0  ;;  %v14725_v63 = vmax.f32 %v4220_v51, 0.0  ;;  %v3270_v26 = vadd.f32 %v3269_v28, %v14470_v16  ;;  %v18979_v0 = vrot.slane %v14595_v33, 1  ;;  %v18981_v31 = vld [vmem:[#allocation59_spill] sm:$0xff] }
 0x3e6   :  { %10551 = vmatprep.subr.bf16.mxu1 %v18978_v56  ;;  %v4407_v40 = vmax.f32 %v14704_v1, %v4372_v24  ;;  %v4377_v3 = vsel %vm3372_vm6, %v18980_v23, %v4376_v20  ;;  %v4409_v19 = vmax.f32 %v14706_v59, %v4376_v20  ;;  %10425 = vmatpush1.bf16.msra.mxu0 %v18981_v31 }
 0x3e7   :  { %v4373_v52 = vsel %vm3372_vm6, %v18979_v0, %v4372_v24  ;;  %v14738_v51 = vpack.c.bf16 %v4400_v32, %v4396_v14  ;;  %v4405_v56 = vmax.f32 %v14622_v43, %v4377_v3  ;;  %v4370_v25 = vrot.slane %v14723_v34, 1  ;;  %10427 = vmatprep.subr.bf16.mxu0 %v18983_v17  ;;  %v18984_v14 = vld [vmem:[#allocation60_spill] sm:$0xff] }
 0x3e8   :  { %v4403_v28 = vmax.f32 %v14595_v33, %v4373_v52  ;;  %v4374_v24 = vrot.slane %v14725_v63, 1  ;;  %v3271_v0 = vadd.f32 %v3270_v26, %v14531_v62  ;;  %v3305_v23 = vmul.f32 %v14468_v21, %v14468_v21 }
 0x3e9   :  { %18982 = vst [vmem:[#allocation18_spill] sm:$0xff] %v14738_v51  ;;  %v3309_v20 = vmul.f32 %v14470_v16, %v14470_v16  ;;  %10553 = vmatpush1.bf16.msra.mxu1 %v18984_v14  ;;  %v14753_v52 = vpack.c.bf16 %v4409_v19, %v4405_v56  ;;  %v18985_v3 = vrot.slane %v14645_v42, 1  ;;  %v4406_v31 = vmax.f32 %v14723_v34, %v4370_v25  ;;  %v18986_v51 = vld [vmem:[#allocation62_spill] sm:$0xff]  ;;  %v18987_v14 = vld [vmem:[#allocation63_spill] sm:$0xff] }
 0x3ea   :  { %v14751_v32 = vpack.c.bf16 %v4407_v40, %v4403_v28  ;;  %10555 = vmatprep.subr.bf16.mxu1 %v18986_v51  ;;  %v4375_v21 = vsel %vm3372_vm6, %v4366_v13, %v4374_v24  ;;  %v4408_v16 = vmax.f32 %v14725_v63, %v4374_v24  ;;  %v3272_v45 = vrot.slane %v3271_v0, 4  ;;  %10429 = vmatpush1.bf16.msra.mxu0 %v18987_v14  ;;  %v18988_v28 = vld [vmem:[#allocation65_spill] sm:$0xff]  ;;  %v18989_v14 = vld [vmem:[#allocation64_spill] sm:$0xff] }
 0x3eb   :  { %v4371_v17 = vsel %vm3372_vm6, %v18985_v3, %v4370_v25  ;;  %v4404_v56 = vmax.f32 %v14689_v12, %v4375_v21  ;;  %v3313_v40 = vmul.f32 %v14531_v62, %v14531_v62  ;;  %v3325_v19 = vadd.f32 %v3305_v23, %v3301_v38  ;;  %10431 = vmatprep.subr.bf16.mxu0 %v18988_v28  ;;  %v18990_v28 = vld [vmem:[#allocation66_spill] sm:$0xff] }
 0x3ec   :  { %v4402_v26 = vmax.f32 %v14645_v42, %v4371_v17  ;;  %v4247_v25 = vadd.f32 %v14588_v48, %v14575_v61  ;;  %v3273_v17 = vadd.f32 %v3272_v45, %v3271_v0  ;;  %v4279_v13 = vmul.f32 %v14575_v61, %v14575_v61  ;;  %v18991_v0 = vld [vmem:[#allocation67_spill] sm:$0xff] }
 0x3ed   :  { %v4283_v24 = vmul.f32 %v14588_v48, %v14588_v48  ;;  %10557 = vmatpush1.bf16.msra.mxu1 %v18989_v14  ;;  %v14777_v21 = vpack.c.bf16 %v4408_v16, %v4404_v56  ;;  %v3326_v62 = vadd.f32 %v3325_v19, %v3309_v20  ;;  %v4287_v23 = vmul.f32 %v14595_v33, %v14595_v33  ;;  %v18992_v56 = vld [vmem:[#allocation69_spill] sm:$0xff] }
 0x3ee   :  { %v14770_v3 = vpack.c.bf16 %v4406_v31, %v4402_v26  ;;  %v4248_v38 = vadd.f32 %v4247_v25, %v14595_v33  ;;  %10559 = vmatprep.subr.bf16.mxu1 %v18990_v28  ;;  %v3274_v31 = vrot.slane %v3273_v17, 2  ;;  %v4291_v45 = vmul.f32 %v14704_v1, %v14704_v1  ;;  %10433 = vmatpush1.bf16.msra.mxu0 %v18991_v0  ;;  %v18993_v28 = vld [vmem:[#allocation68_spill] sm:$0xff] }
 0x3ef   :  { %v4303_v61 = vadd.f32 %v4283_v24, %v4279_v13  ;;  %v3287_v48 = vadd.f32 %v14474_v7, %v14472_v39  ;;  %v3327_v26 = vadd.f32 %v3326_v62, %v3313_v40  ;;  %v3303_v16 = vmul.f32 %v14472_v39, %v14472_v39  ;;  %10435 = vmatprep.subr.bf16.mxu0 %v18992_v56 }
 0x3f0   :  { %v4249_v20 = vadd.f32 %v4248_v38, %v14704_v1  ;;  %v3307_v33 = vmul.f32 %v14474_v7, %v14474_v7  ;;  %v3275_v19 = vadd.f32 %v3274_v31, %v3273_v17  ;;  %v3311_v24 = vmul.f32 %v14476_v29, %v14476_v29  ;;  %v18994_v38 = vld [vmem:[#allocation70_spill] sm:$0xff]  ;;  %v18995_v31 = vld [vmem:[#allocation71_spill] sm:$0xff] }
 0x3f1   :  { %v4304_v25 = vadd.f32 %v4303_v61, %v4287_v23  ;;  %v3288_v13 = vadd.f32 %v3287_v48, %v14476_v29  ;;  %10561 = vmatpush1.bf16.msra.mxu1 %v18993_v28  ;;  %v3328_v40 = vrot.slane %v3327_v26, 4  ;;  %v3315_v1 = vmul.f32 %v14535_v37, %v14535_v37  ;;  %v18996_v28 = vld [vmem:[#allocation73_spill] sm:$0xff] }
 0x3f2   :  { %v4250_v62 = vrot.slane %v4249_v20, 4  ;;  %v3343_v39 = vadd.f32 %v3307_v33, %v3303_v16  ;;  %10563 = vmatprep.subr.bf16.mxu1 %v18994_v38  ;;  %v3276_v7 = vrot.slane %v3275_v19, 1  ;;  %v4265_v23 = vadd.f32 %v14613_v6, %v14611_v10  ;;  %10437 = vmatpush1.bf16.msra.mxu0 %v18995_v31 }
 0x3f3   :  { %v4305_v0 = vadd.f32 %v4304_v25, %v4291_v45  ;;  %v3289_v17 = vadd.f32 %v3288_v13, %v14535_v37  ;;  %v3329_v29 = vadd.f32 %v3328_v40, %v3327_v26  ;;  %v4281_v56 = vmul.f32 %v14611_v10, %v14611_v10  ;;  %10439 = vmatprep.subr.bf16.mxu0 %v18996_v28  ;;  %v18997_v25 = vld [vmem:[#allocation72_spill] sm:$0xff] }
 0x3f4   :  { %v4251_v61 = vadd.f32 %v4250_v62, %v4249_v20  ;;  %v3344_v48 = vadd.f32 %v3343_v39, %v3311_v24  ;;  %v3277_v16 = vadd.f32 %v3276_v7, %v3275_v19  ;;  %v4266_v45 = vadd.f32 %v4265_v23, %v14622_v43  ;;  %v18998_v20 = vld [vmem:[#allocation74_spill] sm:$0xff] }
 0x3f5   :  { %v4306_v33 = vrot.slane %v4305_v0, 4  ;;  %v3290_v38 = vrot.slane %v3289_v17, 4  ;;  %10565 = vmatpush1.bf16.msra.mxu1 %v18997_v25  ;;  %v3330_v37 = vrot.slane %v3329_v29, 2  ;;  %v4285_v26 = vmul.f32 %v14613_v6, %v14613_v6 }
 0x3f6   :  { %v4252_v13 = vrot.slane %v4251_v61, 2  ;;  %v3345_v14 = vadd.f32 %v3344_v48, %v3315_v1  ;;  %10567 = vmatprep.subr.bf16.mxu1 %v18998_v20  ;;  %v4267_v10 = vadd.f32 %v4266_v45, %v14706_v59  ;;  %v4289_v19 = vmul.f32 %v14622_v43, %v14622_v43  ;;  %10441 = vmatpush1.bf16.msra.mxu0 %v14355_v22 }
 0x3f7   :  { %v4307_v24 = vadd.f32 %v4306_v33, %v4305_v0  ;;  %v3291_v40 = vadd.f32 %v3290_v38, %v3289_v17  ;;  %v3331_v62 = vadd.f32 %v3330_v37, %v3329_v29  ;;  %v4293_v1 = vmul.f32 %v14706_v59, %v14706_v59  ;;  %10443 = vmatprep.subr.bf16.mxu0 %v14359_v58  ;;  %v18999_v29 = vld [vmem:[#allocation78_spill] sm:$0xff]  ;;  %v3668_v58 = vld [vmem:[#allocation7 + $0x1f0] sm:$0xff] }
 0x3f8   :  { %v4253_v39 = vadd.f32 %v4252_v13, %v4251_v61  ;;  %v3346_v7 = vrot.slane %v3345_v14, 4  ;;  %v4268_v48 = vrot.slane %v4267_v10, 4  ;;  %v4321_v0 = vadd.f32 %v4285_v26, %v4281_v56  ;;  %v3666_v13 = vld [vmem:[#allocation7 + $0x1e0] sm:$0xff] }
 0x3f9   :  { %v4308_v6 = vrot.slane %v4307_v24, 2  ;;  %v3292_v23 = vrot.slane %v3291_v40, 2  ;;  %10569 = vmatpush1.bf16.msra.mxu1 %v14357_v41  ;;  %v3332_v38 = vrot.slane %v3331_v62, 1  ;;  %v3260_v43 = vadd.f32 %v14478_v8, %v14464_v9 }
 0x3fa   :  { %v4254_v17 = vrot.slane %v4253_v39, 1  ;;  %v3347_v33 = vadd.f32 %v3346_v7, %v3345_v14  ;;  %10571 = vmatprep.subr.bf16.mxu1 %v18999_v29  ;;  %v4269_v37 = vadd.f32 %v4268_v48, %v4267_v10  ;;  %v4322_v59 = vadd.f32 %v4321_v0, %v4289_v19  ;;  %10445 = vmatpush1.bf16.msra.mxu0 %v14363_v2 }
 0x3fb   :  { %v4309_v61 = vadd.f32 %v4308_v6, %v4307_v24  ;;  %v3293_v45 = vadd.f32 %v3292_v23, %v3291_v40  ;;  %v3333_v22 = vadd.f32 %v3332_v38, %v3331_v62  ;;  %v3261_v41 = vadd.f32 %v3260_v43, %v14480_v35  ;;  %10447 = vmatprep.subr.bf16.mxu0 %v14367_v54 }
 0x3fc   :  { %v4255_v56 = vadd.f32 %v4254_v17, %v4253_v39  ;;  %v3348_v26 = vrot.slane %v3347_v33, 2  ;;  %v4270_v20 = vrot.slane %v4269_v37, 2  ;;  %v4323_v28 = vadd.f32 %v4322_v59, %v4293_v1 }
 0x3fd   :  { %v4310_v14 = vrot.slane %v4309_v61, 1  ;;  %v3294_v7 = vrot.slane %v3293_v45, 1  ;;  %10573 = vmatpush1.bf16.msra.mxu1 %v14365_v15  ;;  %v3262_v10 = vadd.f32 %v3261_v41, %v14537_v49  ;;  %v3300_v19 = vmul.f32 %v14464_v9, %v14464_v9 }
 0x3fe   :  { %v4275_v24 = vadd.f32 %v4255_v56, %v3277_v16  ;;  %v3349_v40 = vadd.f32 %v3348_v26, %v3347_v33  ;;  %10575 = vmatprep.subr.bf16.mxu1 %v14369_v55  ;;  %v14832_v62 = vpack.c.bf16 %v3668_v58, %v3666_v13  ;;  %v4271_v6 = vadd.f32 %v4270_v20, %v4269_v37 }
 0x3ff   :  { %v4311_v39 = vadd.f32 %v4310_v14, %v4309_v61  ;;  %v4324_v23 = vrot.slane %v4323_v28, 4  ;;  %10449 = vmatpush1.bf16.msra.mxu0 %v14371_v18  ;;  %v3295_v48 = vadd.f32 %v3294_v7, %v3293_v45  ;;  %v3263_v0 = vrot.slane %v3262_v10, 4 }
 0x400   :  { %v3350_v1 = vrot.slane %v3349_v40, 1  ;;  %v3304_v16 = vmul.f32 %v14478_v8, %v14478_v8  ;;  %10451 = vmatprep.subr.bf16.mxu0 %v14375_v44  ;;  %v4272_v38 = vrot.slane %v4271_v6, 1  ;;  %v3308_v58 = vmul.f32 %v14480_v35, %v14480_v35 }
 0x401   :  { %v4331_v41 = vadd.f32 %v4311_v39, %v3333_v22  ;;  %v4325_v9 = vadd.f32 %v4324_v23, %v4323_v28  ;;  %10577 = vmatpush1.bf16.msra.mxu1 %v14373_v30  ;;  %v3264_v20 = vadd.f32 %v3263_v0, %v3262_v10  ;;  %v3312_v17 = vmul.f32 %v14537_v49, %v14537_v49  ;;  %v19003_v0 = vld [vmem:[#allocation81_spill] sm:$0xff] }
 0x402   :  { %v3316_v33 = vadd.f32 %v3304_v16, %v3300_v19  ;;  %v4238_v43 = vadd.f32 %v14640_v4, %v14638_v36  ;;  %10579 = vmatprep.subr.bf16.mxu1 %v14377_v11  ;;  %v4273_v22 = vadd.f32 %v4272_v38, %v4271_v6  ;;  %v4278_v35 = vmul.f32 %v14638_v36, %v14638_v36  ;;  %v19004_v38 = vld [vmem:[#allocation17_spill] sm:$0xff] }
 0x403   :  { %v14847_v8 = vsel %vm2828_vm4, %v4275_v24, %v4331_v41  ;;  %v4326_v28 = vrot.slane %v4325_v9, 2  ;;  %10453 = vmatpush1.bf16.msra.mxu0 %v14379_v27  ;;  %v3265_v61 = vrot.slane %v3264_v20, 2  ;;  %v4282_v37 = vmul.f32 %v14640_v4, %v14640_v4  ;;  %v19001_v4 = vld [vmem:[#allocation15_spill] sm:$0xff] }
 0x404   :  { %19000 = vst [vmem:[#allocation20_spill] sm:$0xff] %v14847_v8  ;;  %v3317_v45 = vadd.f32 %v3316_v33, %v3308_v58  ;;  %v4239_v49 = vadd.f32 %v4238_v43, %v14645_v42  ;;  %10455 = vmatprep.subr.bf16.mxu0 %v14383_v47  ;;  %v3351_v59 = vadd.f32 %v3350_v1, %v3349_v40  ;;  %v19005_v58 = vld [vmem:[#allocation80_spill] sm:$0xff]  ;;  %v19006_v43 = vld [vmem:[#allocation14_spill] sm:$0xff] }
 0x405   :  { %v4277_v13 = vadd.f32 %v4273_v22, %v3295_v48  ;;  %v4327_v56 = vadd.f32 %v4326_v28, %v4325_v9  ;;  %v4286_v26 = vmul.f32 %v14645_v42, %v14645_v42  ;;  %10581 = vmatpush1.bf16.msra.mxu1 %v14381_v46  ;;  %v3266_v36 = vadd.f32 %v3265_v61, %v3264_v20  ;;  %v19002_v42 = vld [vmem:[#allocation79_spill] sm:$0xff]  ;;  %v19007_v28 = vld [vmem:[#allocation82_spill] sm:$0xff] }
 0x406   :  { %v3318_v14 = vadd.f32 %v3317_v45, %v3312_v17  ;;  %v4240_v7 = vadd.f32 %v4239_v49, %v14723_v34  ;;  %v4294_v24 = vadd.f32 %v4282_v37, %v4278_v35  ;;  %10583 = vmatprep.subr.bf16.mxu1 %v14385_v5  ;;  %v3278_v19 = vadd.f32 %v19001_v4, %v14516_v60  ;;  %v19008_v49 = vld [vmem:[#allocation83_spill] sm:$0xff] }
 0x407   :  { %v4328_v10 = vrot.slane %v4327_v56, 1  ;;  %v3302_v40 = vmul.f32 %v14516_v60, %v14516_v60  ;;  %v3306_v39 = vmul.f32 %v19001_v4, %v19001_v4  ;;  %10457 = vmatpush1.bf16.msra.mxu0 %v19002_v42  ;;  %v4290_v48 = vmul.f32 %v14723_v34, %v14723_v34 }
 0x408   :  { %v3319_v6 = vrot.slane %v3318_v14, 4  ;;  %v4241_v23 = vrot.slane %v4240_v7, 4  ;;  %v4295_v1 = vadd.f32 %v4294_v24, %v4286_v26  ;;  %10459 = vmatprep.subr.bf16.mxu0 %v19003_v0  ;;  %v3267_v41 = vrot.slane %v3266_v36, 1 }
 0x409   :  { %v4329_v16 = vadd.f32 %v4328_v10, %v4327_v56  ;;  %v3279_v9 = vadd.f32 %v3278_v19, %v19004_v38  ;;  %v3310_v60 = vmul.f32 %v19004_v38, %v19004_v38  ;;  %10585 = vmatpush1.bf16.msra.mxu1 %v19005_v58  ;;  %v3314_v22 = vmul.f32 %v19006_v43, %v19006_v43  ;;  %v19011_v19 = vld [vmem:[#allocation84_spill] sm:$0xff] }
 0x40a   :  { %v3320_v20 = vadd.f32 %v3319_v6, %v3318_v14  ;;  %v4242_v17 = vadd.f32 %v4241_v23, %v4240_v7  ;;  %v4296_v33 = vadd.f32 %v4295_v1, %v4290_v48  ;;  %10587 = vmatprep.subr.bf16.mxu1 %v19007_v28  ;;  %v3334_v61 = vadd.f32 %v3306_v39, %v3302_v40  ;;  %v19009_v7 = vld [vmem:[#allocation85_spill] sm:$0xff]  ;;  %v19012_v48 = vld [vmem:[#allocation86_spill] sm:$0xff]  ;;  %v3950_v1 = vld [vmem:[#allocation9 + $0x1f0] sm:$0xff] }
 0x40b   :  { %v4333_v34 = vadd.f32 %v4329_v16, %v3351_v59  ;;  %v3280_v35 = vadd.f32 %v3279_v9, %v19006_v43  ;;  %v4256_v45 = vadd.f32 %v14686_v57, %v14684_v50  ;;  %10461 = vmatpush1.bf16.msra.mxu0 %v19008_v49  ;;  %v4280_v14 = vmul.f32 %v14684_v50, %v14684_v50  ;;  %v3948_v50 = vld [vmem:[#allocation9 + $0x1e0] sm:$0xff] }
 0x40c   :  { %v3321_v37 = vrot.slane %v3320_v20, 2  ;;  %v4243_v56 = vrot.slane %v4242_v17, 2  ;;  %v4297_v26 = vrot.slane %v4296_v33, 4  ;;  %10463 = vmatprep.subr.bf16.mxu0 %v19009_v7  ;;  %v3335_v10 = vadd.f32 %v3334_v61, %v3310_v60  ;;  %v19013_v60 = vld [vmem:[#allocation87_spill] sm:$0xff] }
 0x40d   :  { %v14886_v24 = vsel %vm2828_vm4, %v4277_v13, %v4333_v34  ;;  %v3281_v59 = vrot.slane %v3280_v35, 4  ;;  %v4257_v4 = vadd.f32 %v4256_v45, %v14689_v12  ;;  %10589 = vmatpush1.bf16.msra.mxu1 %v19011_v19  ;;  %v4284_v23 = vmul.f32 %v14686_v57, %v14686_v57 }
 0x40e   :  { %19010 = vst [vmem:[#allocation23_spill] sm:$0xff] %v14886_v24  ;;  %v3322_v40 = vadd.f32 %v3321_v37, %v3320_v20  ;;  %v4244_v39 = vadd.f32 %v4243_v56, %v4242_v17  ;;  %v4298_v6 = vadd.f32 %v4297_v26, %v4296_v33  ;;  %10591 = vmatprep.subr.bf16.mxu1 %v19012_v48  ;;  %v19014_v17 = vld [vmem:[#allocation89_spill] sm:$0xff]  ;;  %v19015_v56 = vld [vmem:[#allocation88_spill] sm:$0xff]  ;;  %v19016_v26 = vld [vmem:[#allocation90_spill] sm:$0xff] }
 0x40f   :  { %v3268_v16 = vadd.f32 %v3267_v41, %v3266_v36  ;;  %v3282_v38 = vadd.f32 %v3281_v59, %v3280_v35  ;;  %v3336_v13 = vadd.f32 %v3335_v10, %v3314_v22  ;;  %v4258_v9 = vadd.f32 %v4257_v4, %v14725_v63  ;;  %10465 = vmatpush1.bf16.msra.mxu0 %v19013_v60 }
 0x410   :  { %v3323_v43 = vrot.slane %v3322_v40, 1  ;;  %v4245_v34 = vrot.slane %v4244_v39, 1  ;;  %v4299_v61 = vrot.slane %v4298_v6, 2  ;;  %v4288_v20 = vmul.f32 %v14689_v12, %v14689_v12  ;;  %10467 = vmatprep.subr.bf16.mxu0 %v19014_v17 }
 0x411   :  { %v3283_v57 = vrot.slane %v3282_v38, 2  ;;  %v3337_v33 = vrot.slane %v3336_v13, 4  ;;  %v4259_v45 = vrot.slane %v4258_v9, 4  ;;  %v4312_v37 = vadd.f32 %v4284_v23, %v4280_v14  ;;  %10593 = vmatpush1.bf16.msra.mxu1 %v19015_v56 }
 0x412   :  { %v14899_v36 = vpack.c.bf16 %v3950_v1, %v3948_v50  ;;  %v4246_v41 = vadd.f32 %v4245_v34, %v4244_v39  ;;  %v4300_v22 = vadd.f32 %v4299_v61, %v4298_v6  ;;  %v4292_v35 = vmul.f32 %v14725_v63, %v14725_v63  ;;  %10595 = vmatprep.subr.bf16.mxu1 %v19016_v26 }
 0x413   :  { %v3284_v59 = vadd.f32 %v3283_v57, %v3282_v38  ;;  %v3338_v10 = vadd.f32 %v3337_v33, %v3336_v13  ;;  %v4260_v12 = vadd.f32 %v4259_v45, %v4258_v9  ;;  %v4313_v4 = vadd.f32 %v4312_v37, %v4288_v20  ;;  %10469 = vmatpush1.bf16.msra.mxu0 %v14832_v62 }
 0x414   :  { %v3324_v24 = vadd.f32 %v3323_v43, %v3322_v40  ;;  %v4274_v8 = vadd.f32 %v4246_v41, %v3268_v16  ;;  %v4301_v14 = vrot.slane %v4300_v22, 1 }
 0x415   :  { %v3285_v23 = vrot.slane %v3284_v59, 1  ;;  %v3339_v17 = vrot.slane %v3338_v10, 2  ;;  %v4261_v50 = vrot.slane %v4260_v12, 2  ;;  %v4314_v1 = vadd.f32 %v4313_v4, %v4292_v35  ;;  %10597 = vmatpush1.bf16.msra.mxu1 %v14899_v36  ;;  %v3670_v4 = vld [vmem:[#allocation7 + $0x200] sm:$0xff] }
 0x416   :  { %v4302_v39 = vadd.f32 %v4301_v14, %v4300_v22  ;;  %v3671_v22 = vld [vmem:[#allocation7 + $0x208] sm:$0xff]  ;;  %v3672_v14 = vld [vmem:[#allocation7 + $0x210] sm:$0xff] }
 0x417   :  { %v3340_v6 = vadd.f32 %v3339_v17, %v3338_v10  ;;  %v4262_v63 = vadd.f32 %v4261_v50, %v4260_v12  ;;  %v4315_v34 = vrot.slane %v4314_v1, 4  ;;  %v3286_v38 = vadd.f32 %v3285_v23, %v3284_v59  ;;  %v3953_v59 = vld [vmem:[#allocation9 + $0x208] sm:$0xff]  ;;  %v3955_v12 = vld [vmem:[#allocation9 + $0x218] sm:$0xff]  ;;  %v3952_v23 = vld [vmem:[#allocation9 + $0x200] sm:$0xff] }
 0x418   :  { %v4330_v61 = vadd.f32 %v4302_v39, %v3324_v24  ;;  %v3673_v24 = vld [vmem:[#allocation7 + $0x218] sm:$0xff]  ;;  %v3954_v50 = vld [vmem:[#allocation9 + $0x210] sm:$0xff] }
 0x419   :  { %v4263_v13 = vrot.slane %v4262_v63, 1  ;;  %v4316_v9 = vadd.f32 %v4315_v34, %v4314_v1  ;;  %v3341_v40 = vrot.slane %v3340_v6, 1  ;;  %v14912_v10 = vpack.c.bf16 %v3673_v24, %v3671_v22  ;;  %v3675_v1 = vld [vmem:[#allocation7 + $0x228] sm:$0xff]  ;;  %v3677_v39 = vld [vmem:[#allocation7 + $0x238] sm:$0xff] }
 0x41a   :  { %v14907_v20 = vsel %vm2828_vm4, %v4274_v8, %v4330_v61  ;;  %v14914_v8 = vpack.c.bf16 %v3955_v12, %v3953_v59  ;;  %v14918_v61 = vpack.c.bf16 %v3672_v14, %v3670_v4  ;;  %v3678_v4 = vld [vmem:[#allocation7 + $0x240] sm:$0xff]  ;;  %v3680_v14 = vld [vmem:[#allocation7 + $0x250] sm:$0xff] }
 0x41b   :  { %19017 = vst [vmem:[#allocation27_spill] sm:$0xff] %v14907_v20  ;;  %v4264_v16 = vadd.f32 %v4263_v13, %v4262_v63  ;;  %v4317_v43 = vrot.slane %v4316_v9, 2  ;;  %v3342_v45 = vadd.f32 %v3341_v40, %v3340_v6  ;;  %10471 = vmatprep.subr.bf16.mxu0 %v14912_v10  ;;  %v3957_v6 = vld [vmem:[#allocation9 + $0x228] sm:$0xff]  ;;  %v3959_v63 = vld [vmem:[#allocation9 + $0x238] sm:$0xff]  ;;  %v3674_v13 = vld [vmem:[#allocation7 + $0x220] sm:$0xff] }
 0x41c   :  { %10599 = vmatprep.subr.bf16.mxu1 %v14914_v8  ;;  %v3966_v20 = vld [vmem:[#allocation9 + $0x270] sm:$0xff] }
 0x41d   :  { %v4276_v57 = vadd.f32 %v4264_v16, %v3286_v38  ;;  %v4318_v33 = vadd.f32 %v4317_v43, %v4316_v9  ;;  %v14920_v38 = vpack.c.bf16 %v3954_v50, %v3952_v23  ;;  %v3676_v9 = vld [vmem:[#allocation7 + $0x230] sm:$0xff]  ;;  %v14922_v16 = vpack.c.bf16 %v3677_v39, %v3675_v1  ;;  %v3960_v39 = vld [vmem:[#allocation9 + $0x240] sm:$0xff] }
 0x41e   :  { %v14924_v43 = vpack.c.bf16 %v3959_v63, %v3957_v6  ;;  %v14930_v59 = vpack.c.bf16 %v3676_v9, %v3674_v13  ;;  %v3962_v6 = vld [vmem:[#allocation9 + $0x250] sm:$0xff]  ;;  %v3683_v63 = vld [vmem:[#allocation7 + $0x268] sm:$0xff]  ;;  %v3967_v9 = vld [vmem:[#allocation9 + $0x278] sm:$0xff] }
 0x41f   :  { %v4319_v37 = vrot.slane %v4318_v33, 1  ;;  %19019 = vst [vmem:[#allocation25_spill] sm:$0xff] %v14922_v16  ;;  %v3965_v13 = vld [vmem:[#allocation9 + $0x268] sm:$0xff] }
 0x420   :  { %19020 = vst [vmem:[#allocation29_spill] sm:$0xff] %v14924_v43  ;;  %19021 = vst [vmem:[#allocation33_spill] sm:$0xff] %v14930_v59 }
 0x421   :  { %v4320_v41 = vadd.f32 %v4319_v37, %v4318_v33  ;;  %v3958_v33 = vld [vmem:[#allocation9 + $0x230] sm:$0xff]  ;;  %v3681_v37 = vld [vmem:[#allocation7 + $0x258] sm:$0xff] }
 0x423   :  { %v4332_v35 = vadd.f32 %v4320_v41, %v3342_v45  ;;  %v3679_v45 = vld [vmem:[#allocation7 + $0x248] sm:$0xff] }
 0x424   :  { %v3961_v41 = vld [vmem:[#allocation9 + $0x248] sm:$0xff]  ;;  %v14936_v50 = vpack.c.bf16 %v3681_v37, %v3679_v45  ;;  %v14946_v45 = vpack.c.bf16 %v3680_v14, %v3678_v4  ;;  %v14948_v37 = vpack.c.bf16 %v3962_v6, %v3960_v39  ;;  %v3686_v39 = vld [vmem:[#allocation7 + $0x280] sm:$0xff]  ;;  %v3688_v6 = vld [vmem:[#allocation7 + $0x290] sm:$0xff] }
 0x425   :  { %v14910_v17 = vsel %vm2828_vm4, %v4276_v57, %v4332_v35  ;;  %v3956_v57 = vld [vmem:[#allocation9 + $0x220] sm:$0xff]  ;;  %v3963_v35 = vld [vmem:[#allocation9 + $0x258] sm:$0xff] }
 0x426   :  { %19018 = vst [vmem:[#allocation31_spill] sm:$0xff] %v14910_v17  ;;  %v14932_v12 = vpack.c.bf16 %v3958_v33, %v3956_v57  ;;  %v14938_v1 = vpack.c.bf16 %v3963_v35, %v3961_v41  ;;  %19024 = vst [vmem:[#allocation30_spill] sm:$0xff] %v14946_v45  ;;  %v3682_v41 = vld [vmem:[#allocation7 + $0x260] sm:$0xff]  ;;  %v3684_v35 = vld [vmem:[#allocation7 + $0x270] sm:$0xff]  ;;  %v14954_v17 = vpack.c.bf16 %v3967_v9, %v3965_v13 }
 0x427   :  { %19025 = vst [vmem:[#allocation38_spill] sm:$0xff] %v14948_v37  ;;  %v14958_v4 = vpack.c.bf16 %v3684_v35, %v3682_v41  ;;  %v3968_v13 = vld [vmem:[#allocation9 + $0x280] sm:$0xff]  ;;  %v3691_v9 = vld [vmem:[#allocation7 + $0x2a8] sm:$0xff] }
 0x428   :  { %19022 = vst [vmem:[#allocation22_spill] sm:$0xff] %v14932_v12  ;;  %19023 = vst [vmem:[#allocation26_spill] sm:$0xff] %v14938_v1  ;;  %v3690_v35 = vld [vmem:[#allocation7 + $0x2a0] sm:$0xff] }
 0x429   :  { %19027 = vst [vmem:[#allocation28_spill] sm:$0xff] %v14954_v17  ;;  %19028 = vst [vmem:[#allocation32_spill] sm:$0xff] %v14958_v4 }
 0x4a8   :  { %v3518_v34 = vpop.f32.mrb[20].mxu0 }
 0x4a9   :  { %v3520_v40 = vpop.f32.mrb[21].mxu0 }
 0x4aa   :  { %3798 = vmatprep.mubr.f32.mxu0 %v3520_v40  ;;  %4080 = vmatprep.mubr.f32.mxu1 %v3520_v40  ;;  %v14926_v22 = vpop.f32.mrb[20].mxu1  ;;  %v3685_v40 = vld [vmem:[#allocation7 + $0x278] sm:$0xff] }
 0x4ab   :  { %3799 = vmatmul.mubr.f32.vlgmr.msra.gmra.mrb[24].mxu0 %v3518_v34  ;;  %4081 = vmatmul.mubr.f32.vlgmr.msra.gmra.mrb[24].mxu1 %v3518_v34  ;;  %v3597_v24 = vpop.f32.mrb[21].mxu1 }
 0x4ac   :  { %10473 = vmatpush1.bf16.msra.mxu0 %v14918_v61  ;;  %10601 = vmatpush1.bf16.msra.mxu1 %v14920_v38  ;;  %v3524_v23 = vpop.f32.mrb[22].mxu0 }
 0x4ad   :  { %10475 = vmatprep.subr.bf16.mxu0 %v14922_v16  ;;  %10603 = vmatprep.subr.bf16.mxu1 %v14924_v43  ;;  %v3526_v34 = vpop.f32.mrb[23].mxu0  ;;  %v3687_v43 = vld [vmem:[#allocation7 + $0x288] sm:$0xff] }
 0x4ae   :  { %3804 = vmatprep.mubr.f32.mxu0 %v3526_v34  ;;  %4086 = vmatprep.mubr.f32.mxu1 %v3526_v34  ;;  %v14940_v57 = vpop.f32.mrb[22].mxu1  ;;  %v14952_v34 = vpack.c.bf16 %v3685_v40, %v3683_v63  ;;  %v3969_v16 = vld [vmem:[#allocation9 + $0x288] sm:$0xff] }
 0x4af   :  { %3805 = vmatmul.mubr.f32.gmra.mrb[26].mxu0 %v3524_v23  ;;  %4087 = vmatmul.mubr.f32.gmra.mrb[26].mxu1 %v3524_v23  ;;  %v14942_v33 = vpop.f32.mrb[23].mxu1  ;;  %v3964_v23 = vld [vmem:[#allocation9 + $0x260] sm:$0xff] }
 0x4b0   :  { %10477 = vmatpush1.bf16.msra.mxu0 %v14930_v59  ;;  %10605 = vmatpush1.bf16.msra.mxu1 %v14932_v12  ;;  %19026 = vst [vmem:[#allocation24_spill] sm:$0xff] %v14952_v34  ;;  %v3689_v59 = vld [vmem:[#allocation7 + $0x298] sm:$0xff]  ;;  %v14960_v14 = vpack.c.bf16 %v3966_v20, %v3964_v23  ;;  %v14970_v20 = vpack.c.bf16 %v3688_v6, %v3686_v39  ;;  %v3692_v23 = vld [vmem:[#allocation7 + $0x2b0] sm:$0xff] }
 0x4b1   :  { %10479 = vmatprep.subr.bf16.mxu0 %v14936_v50  ;;  %10607 = vmatprep.subr.bf16.mxu1 %v14938_v1  ;;  %v3971_v12 = vld [vmem:[#allocation9 + $0x298] sm:$0xff]  ;;  %v14964_v63 = vpack.c.bf16 %v3689_v59, %v3687_v43  ;;  %v3973_v1 = vld [vmem:[#allocation9 + $0x2a8] sm:$0xff]  ;;  %v3972_v59 = vld [vmem:[#allocation9 + $0x2a0] sm:$0xff]  ;;  %v14982_v39 = vpack.c.bf16 %v3692_v23, %v3690_v35 }
 0x4b2   :  { %3875 = vmatprep.mubr.f32.mxu0 %v3597_v24  ;;  %4157 = vmatprep.mubr.f32.mxu1 %v3597_v24  ;;  %19029 = vst [vmem:[#allocation35_spill] sm:$0xff] %v14960_v14  ;;  %v14966_v40 = vpack.c.bf16 %v3971_v12, %v3969_v16  ;;  %v3970_v24 = vld [vmem:[#allocation9 + $0x290] sm:$0xff]  ;;  %19032 = vst [vmem:[#allocation36_spill] sm:$0xff] %v14970_v20 }
 0x4b3   :  { %19030 = vst [vmem:[#allocation37_spill] sm:$0xff] %v14964_v63  ;;  %v14972_v41 = vpack.c.bf16 %v3970_v24, %v3968_v13  ;;  %v3974_v12 = vld [vmem:[#allocation9 + $0x2b0] sm:$0xff]  ;;  %19036 = vst [vmem:[#allocation78_spill] sm:$0xff] %v14982_v39  ;;  %v3694_v13 = vld [vmem:[#allocation7 + $0x2c0] sm:$0xff] }
 0x4b4   :  { %10481 = vmatpush1.bf16.msra.mxu0 %v14946_v45  ;;  %10609 = vmatpush1.bf16.msra.mxu1 %v14948_v37  ;;  %19031 = vst [vmem:[#allocation34_spill] sm:$0xff] %v14966_v40  ;;  %v3693_v45 = vld [vmem:[#allocation7 + $0x2b8] sm:$0xff]  ;;  %v14984_v6 = vpack.c.bf16 %v3974_v12, %v3972_v59  ;;  %v3696_v24 = vld [vmem:[#allocation7 + $0x2d0] sm:$0xff]  ;;  %v3698_v59 = vld [vmem:[#allocation7 + $0x2e0] sm:$0xff] }
 0x4b5   :  { %10483 = vmatprep.subr.bf16.mxu0 %v14952_v34  ;;  %10611 = vmatprep.subr.bf16.mxu1 %v14954_v17  ;;  %v3975_v37 = vld [vmem:[#allocation9 + $0x2b8] sm:$0xff]  ;;  %19033 = vst [vmem:[#allocation62_spill] sm:$0xff] %v14972_v41  ;;  %v14976_v16 = vpack.c.bf16 %v3693_v45, %v3691_v9  ;;  %v3695_v17 = vld [vmem:[#allocation7 + $0x2c8] sm:$0xff]  ;;  %v3978_v9 = vld [vmem:[#allocation9 + $0x2d0] sm:$0xff]  ;;  %v14994_v35 = vpack.c.bf16 %v3696_v24, %v3694_v13 }
 0x4b6   :  { %v14978_v43 = vpack.c.bf16 %v3975_v37, %v3973_v1  ;;  %v3977_v34 = vld [vmem:[#allocation9 + $0x2c8] sm:$0xff]  ;;  %19037 = vst [vmem:[#allocation15_spill] sm:$0xff] %v14984_v6  ;;  %v3976_v37 = vld [vmem:[#allocation9 + $0x2c0] sm:$0xff]  ;;  %v3700_v12 = vld [vmem:[#allocation7 + $0x2f0] sm:$0xff] }
 0x4b7   :  { %19034 = vst [vmem:[#allocation71_spill] sm:$0xff] %v14976_v16  ;;  %19040 = vst [vmem:[#allocation17_spill] sm:$0xff] %v14994_v35  ;;  %v14996_v23 = vpack.c.bf16 %v3978_v9, %v3976_v37  ;;  %v15006_v13 = vpack.c.bf16 %v3700_v12, %v3698_v59  ;;  %v3702_v37 = vld [vmem:[#allocation7 + $0x300] sm:$0xff]  ;;  %v3704_v9 = vld [vmem:[#allocation7 + $0x310] sm:$0xff] }
 0x4b8   :  { %10485 = vmatpush1.bf16.msra.mxu0 %v14958_v4  ;;  %10613 = vmatpush1.bf16.msra.mxu1 %v14960_v14  ;;  %19035 = vst [vmem:[#allocation72_spill] sm:$0xff] %v14978_v43  ;;  %v3697_v4 = vld [vmem:[#allocation7 + $0x2d8] sm:$0xff]  ;;  %v15018_v59 = vpack.c.bf16 %v3704_v9, %v3702_v37 }
 0x4b9   :  { %10487 = vmatprep.subr.bf16.mxu0 %v14964_v63  ;;  %10615 = vmatprep.subr.bf16.mxu1 %v14966_v40  ;;  %v3979_v14 = vld [vmem:[#allocation9 + $0x2d8] sm:$0xff]  ;;  %v14988_v1 = vpack.c.bf16 %v3697_v4, %v3695_v17  ;;  %v3699_v40 = vld [vmem:[#allocation7 + $0x2e8] sm:$0xff]  ;;  %19041 = vst [vmem:[#allocation80_spill] sm:$0xff] %v14996_v23  ;;  %v3980_v4 = vld [vmem:[#allocation9 + $0x2e0] sm:$0xff] }
 0x4ba   :  { %v14990_v45 = vpack.c.bf16 %v3979_v14, %v3977_v34  ;;  %v3981_v63 = vld [vmem:[#allocation9 + $0x2e8] sm:$0xff]  ;;  %v3982_v14 = vld [vmem:[#allocation9 + $0x2f0] sm:$0xff]  ;;  %19044 = vst [vmem:[#allocation83_spill] sm:$0xff] %v15006_v13  ;;  %19048 = vst [vmem:[#allocation87_spill] sm:$0xff] %v15018_v59 }
 0x4bb   :  { %19038 = vst [vmem:[#allocation79_spill] sm:$0xff] %v14988_v1  ;;  %v15008_v24 = vpack.c.bf16 %v3982_v14, %v3980_v4  ;;  %v3706_v4 = vld [vmem:[#allocation7 + $0x320] sm:$0xff]  ;;  %v3708_v14 = vld [vmem:[#allocation7 + $0x330] sm:$0xff] }
 0x4bc   :  { %10489 = vmatpush1.bf16.msra.mxu0 %v14970_v20  ;;  %10617 = vmatpush1.bf16.msra.mxu1 %v14972_v41  ;;  %19039 = vst [vmem:[#allocation81_spill] sm:$0xff] %v14990_v45  ;;  %v3701_v20 = vld [vmem:[#allocation7 + $0x2f8] sm:$0xff]  ;;  %v15030_v37 = vpack.c.bf16 %v3708_v14, %v3706_v4 }
 0x4bd   :  { %10491 = vmatprep.subr.bf16.mxu0 %v14976_v16  ;;  %10619 = vmatprep.subr.bf16.mxu1 %v14978_v43  ;;  %v3983_v41 = vld [vmem:[#allocation9 + $0x2f8] sm:$0xff]  ;;  %v15000_v17 = vpack.c.bf16 %v3701_v20, %v3699_v40  ;;  %v3703_v43 = vld [vmem:[#allocation7 + $0x308] sm:$0xff]  ;;  %19045 = vst [vmem:[#allocation85_spill] sm:$0xff] %v15008_v24  ;;  %v3984_v20 = vld [vmem:[#allocation9 + $0x300] sm:$0xff] }
 0x4be   :  { %v15002_v34 = vpack.c.bf16 %v3983_v41, %v3981_v63  ;;  %v3985_v16 = vld [vmem:[#allocation9 + $0x308] sm:$0xff]  ;;  %v3986_v41 = vld [vmem:[#allocation9 + $0x310] sm:$0xff]  ;;  %19052 = vst [vmem:[#allocation92_spill] sm:$0xff] %v15030_v37 }
 0x4bf   :  { %19042 = vst [vmem:[#allocation14_spill] sm:$0xff] %v15000_v17  ;;  %v15020_v12 = vpack.c.bf16 %v3986_v41, %v3984_v20  ;;  %v3710_v20 = vld [vmem:[#allocation7 + $0x340] sm:$0xff]  ;;  %v3712_v41 = vld [vmem:[#allocation7 + $0x350] sm:$0xff] }
 0x4c0   :  { %10493 = vmatpush1.bf16.msra.mxu0 %v14982_v39  ;;  %10621 = vmatpush1.bf16.msra.mxu1 %v14984_v6  ;;  %19043 = vst [vmem:[#allocation82_spill] sm:$0xff] %v15002_v34  ;;  %v3705_v39 = vld [vmem:[#allocation7 + $0x318] sm:$0xff]  ;;  %v15042_v4 = vpack.c.bf16 %v3712_v41, %v3710_v20 }
 0x4c1   :  { %10495 = vmatprep.subr.bf16.mxu0 %v14988_v1  ;;  %10623 = vmatprep.subr.bf16.mxu1 %v14990_v45  ;;  %v3987_v6 = vld [vmem:[#allocation9 + $0x318] sm:$0xff]  ;;  %v15012_v63 = vpack.c.bf16 %v3705_v39, %v3703_v43  ;;  %v3707_v45 = vld [vmem:[#allocation7 + $0x328] sm:$0xff]  ;;  %19049 = vst [vmem:[#allocation88_spill] sm:$0xff] %v15020_v12  ;;  %v3988_v39 = vld [vmem:[#allocation9 + $0x320] sm:$0xff] }
 0x4c2   :  { %v15014_v40 = vpack.c.bf16 %v3987_v6, %v3985_v16  ;;  %v3989_v1 = vld [vmem:[#allocation9 + $0x328] sm:$0xff]  ;;  %v3990_v6 = vld [vmem:[#allocation9 + $0x330] sm:$0xff]  ;;  %19056 = vst [vmem:[#allocation96_spill] sm:$0xff] %v15042_v4 }
 0x4c3   :  { %19046 = vst [vmem:[#allocation84_spill] sm:$0xff] %v15012_v63  ;;  %v15032_v9 = vpack.c.bf16 %v3990_v6, %v3988_v39  ;;  %v3714_v39 = vld [vmem:[#allocation7 + $0x360] sm:$0xff]  ;;  %v3716_v6 = vld [vmem:[#allocation7 + $0x370] sm:$0xff] }
 0x4c4   :  { %10497 = vmatpush1.bf16.msra.mxu0 %v14994_v35  ;;  %10625 = vmatpush1.bf16.msra.mxu1 %v14996_v23  ;;  %19047 = vst [vmem:[#allocation86_spill] sm:$0xff] %v15014_v40  ;;  %v3709_v35 = vld [vmem:[#allocation7 + $0x338] sm:$0xff]  ;;  %v15054_v20 = vpack.c.bf16 %v3716_v6, %v3714_v39 }
 0x4c5   :  { %10499 = vmatprep.subr.bf16.mxu0 %v15000_v17  ;;  %10627 = vmatprep.subr.bf16.mxu1 %v15002_v34  ;;  %v3991_v23 = vld [vmem:[#allocation9 + $0x338] sm:$0xff]  ;;  %v15024_v16 = vpack.c.bf16 %v3709_v35, %v3707_v45  ;;  %v3711_v34 = vld [vmem:[#allocation7 + $0x348] sm:$0xff]  ;;  %19053 = vst [vmem:[#allocation93_spill] sm:$0xff] %v15032_v9  ;;  %v3992_v35 = vld [vmem:[#allocation9 + $0x340] sm:$0xff] }
 0x4c6   :  { %v15026_v43 = vpack.c.bf16 %v3991_v23, %v3989_v1  ;;  %v3993_v17 = vld [vmem:[#allocation9 + $0x348] sm:$0xff]  ;;  %v3994_v23 = vld [vmem:[#allocation9 + $0x350] sm:$0xff]  ;;  %19060 = vst [vmem:[#allocation100_spill] sm:$0xff] %v15054_v20 }
 0x4c7   :  { %19050 = vst [vmem:[#allocation90_spill] sm:$0xff] %v15024_v16  ;;  %v15044_v14 = vpack.c.bf16 %v3994_v23, %v3992_v35  ;;  %v3718_v35 = vld [vmem:[#allocation7 + $0x380] sm:$0xff]  ;;  %v3720_v23 = vld [vmem:[#allocation7 + $0x390] sm:$0xff] }
 0x4c8   :  { %10501 = vmatpush1.bf16.msra.mxu0 %v15006_v13  ;;  %10629 = vmatpush1.bf16.msra.mxu1 %v15008_v24  ;;  %19051 = vst [vmem:[#allocation91_spill] sm:$0xff] %v15026_v43  ;;  %v3713_v13 = vld [vmem:[#allocation7 + $0x358] sm:$0xff]  ;;  %v15066_v39 = vpack.c.bf16 %v3720_v23, %v3718_v35 }
 0x4c9   :  { %10503 = vmatprep.subr.bf16.mxu0 %v15012_v63  ;;  %10631 = vmatprep.subr.bf16.mxu1 %v15014_v40  ;;  %v3995_v24 = vld [vmem:[#allocation9 + $0x358] sm:$0xff]  ;;  %v15036_v1 = vpack.c.bf16 %v3713_v13, %v3711_v34  ;;  %v3715_v40 = vld [vmem:[#allocation7 + $0x368] sm:$0xff]  ;;  %19057 = vst [vmem:[#allocation97_spill] sm:$0xff] %v15044_v14  ;;  %v3996_v13 = vld [vmem:[#allocation9 + $0x360] sm:$0xff] }
 0x4ca   :  { %v15038_v45 = vpack.c.bf16 %v3995_v24, %v3993_v17  ;;  %v3997_v63 = vld [vmem:[#allocation9 + $0x368] sm:$0xff]  ;;  %v3998_v24 = vld [vmem:[#allocation9 + $0x370] sm:$0xff]  ;;  %19064 = vst [vmem:[#allocation104_spill] sm:$0xff] %v15066_v39 }
 0x4cb   :  { %19054 = vst [vmem:[#allocation94_spill] sm:$0xff] %v15036_v1  ;;  %v15056_v41 = vpack.c.bf16 %v3998_v24, %v3996_v13  ;;  %v3722_v13 = vld [vmem:[#allocation7 + $0x3a0] sm:$0xff]  ;;  %v3724_v24 = vld [vmem:[#allocation7 + $0x3b0] sm:$0xff] }
 0x4cc   :  { %10505 = vmatpush1.bf16.msra.mxu0 %v15018_v59  ;;  %10633 = vmatpush1.bf16.msra.mxu1 %v15020_v12  ;;  %19055 = vst [vmem:[#allocation95_spill] sm:$0xff] %v15038_v45  ;;  %v3717_v59 = vld [vmem:[#allocation7 + $0x378] sm:$0xff]  ;;  %v15078_v35 = vpack.c.bf16 %v3724_v24, %v3722_v13 }
 0x4cd   :  { %10507 = vmatprep.subr.bf16.mxu0 %v15024_v16  ;;  %10635 = vmatprep.subr.bf16.mxu1 %v15026_v43  ;;  %v3999_v12 = vld [vmem:[#allocation9 + $0x378] sm:$0xff]  ;;  %v15048_v17 = vpack.c.bf16 %v3717_v59, %v3715_v40  ;;  %v3719_v43 = vld [vmem:[#allocation7 + $0x388] sm:$0xff]  ;;  %19061 = vst [vmem:[#allocation101_spill] sm:$0xff] %v15056_v41  ;;  %v4000_v59 = vld [vmem:[#allocation9 + $0x380] sm:$0xff] }
 0x4ce   :  { %v15050_v34 = vpack.c.bf16 %v3999_v12, %v3997_v63  ;;  %v4001_v16 = vld [vmem:[#allocation9 + $0x388] sm:$0xff]  ;;  %v4002_v12 = vld [vmem:[#allocation9 + $0x390] sm:$0xff] }
 0x4cf   :  { %19058 = vst [vmem:[#allocation98_spill] sm:$0xff] %v15048_v17  ;;  %v15068_v6 = vpack.c.bf16 %v4002_v12, %v4000_v59  ;;  %v3726_v59 = vld [vmem:[#allocation7 + $0x3c0] sm:$0xff]  ;;  %v3728_v12 = vld [vmem:[#allocation7 + $0x3d0] sm:$0xff] }
 0x4d0   :  { %10509 = vmatpush1.bf16.msra.mxu0 %v15030_v37  ;;  %10637 = vmatpush1.bf16.msra.mxu1 %v15032_v9  ;;  %19059 = vst [vmem:[#allocation99_spill] sm:$0xff] %v15050_v34  ;;  %v3721_v37 = vld [vmem:[#allocation7 + $0x398] sm:$0xff]  ;;  %v15090_v13 = vpack.c.bf16 %v3728_v12, %v3726_v59 }
 0x4d1   :  { %10511 = vmatprep.subr.bf16.mxu0 %v15036_v1  ;;  %10639 = vmatprep.subr.bf16.mxu1 %v15038_v45  ;;  %v4003_v9 = vld [vmem:[#allocation9 + $0x398] sm:$0xff]  ;;  %v15060_v63 = vpack.c.bf16 %v3721_v37, %v3719_v43  ;;  %v3723_v45 = vld [vmem:[#allocation7 + $0x3a8] sm:$0xff]  ;;  %19065 = vst [vmem:[#allocation105_spill] sm:$0xff] %v15068_v6  ;;  %v4004_v37 = vld [vmem:[#allocation9 + $0x3a0] sm:$0xff] }
 0x4d2   :  { %v15062_v40 = vpack.c.bf16 %v4003_v9, %v4001_v16  ;;  %v4005_v1 = vld [vmem:[#allocation9 + $0x3a8] sm:$0xff]  ;;  %v4006_v9 = vld [vmem:[#allocation9 + $0x3b0] sm:$0xff] }
 0x4d3   :  { %19062 = vst [vmem:[#allocation102_spill] sm:$0xff] %v15060_v63  ;;  %v15080_v23 = vpack.c.bf16 %v4006_v9, %v4004_v37  ;;  %v3730_v37 = vld [vmem:[#allocation7 + $0x3e0] sm:$0xff]  ;;  %v4014_v9 = vld [vmem:[#allocation9 + $0x3f0] sm:$0xff] }
 0x4d4   :  { %10513 = vmatpush1.bf16.msra.mxu0 %v15042_v4  ;;  %10641 = vmatpush1.bf16.msra.mxu1 %v15044_v14  ;;  %19063 = vst [vmem:[#allocation103_spill] sm:$0xff] %v15062_v40  ;;  %v3725_v4 = vld [vmem:[#allocation7 + $0x3b8] sm:$0xff] }
 0x4d5   :  { %10515 = vmatprep.subr.bf16.mxu0 %v15048_v17  ;;  %10643 = vmatprep.subr.bf16.mxu1 %v15050_v34  ;;  %v4007_v14 = vld [vmem:[#allocation9 + $0x3b8] sm:$0xff]  ;;  %v15072_v16 = vpack.c.bf16 %v3725_v4, %v3723_v45  ;;  %v3727_v34 = vld [vmem:[#allocation7 + $0x3c8] sm:$0xff]  ;;  %v4008_v4 = vld [vmem:[#allocation9 + $0x3c0] sm:$0xff] }
 0x4d6   :  { %v15074_v43 = vpack.c.bf16 %v4007_v14, %v4005_v1  ;;  %v4009_v17 = vld [vmem:[#allocation9 + $0x3c8] sm:$0xff]  ;;  %v4010_v14 = vld [vmem:[#allocation9 + $0x3d0] sm:$0xff] }
 0x4d7   :  { %v15092_v24 = vpack.c.bf16 %v4010_v14, %v4008_v4  ;;  %v12135_v4 = vld [vmem:[%s18676_s8 + $0x8] sm:$0xff] }
 0x4d8   :  { %10517 = vmatpush1.bf16.msra.mxu0 %v15054_v20  ;;  %10645 = vmatpush1.bf16.msra.mxu1 %v15056_v41  ;;  %v3729_v20 = vld [vmem:[#allocation7 + $0x3d8] sm:$0xff]  ;;  %v19076_v14 = vld [vmem:[#allocation47_spill] sm:$0xff] }
 0x4d9   :  { %10519 = vmatprep.subr.bf16.mxu0 %v15060_v63  ;;  %10647 = vmatprep.subr.bf16.mxu1 %v15062_v40  ;;  %v4011_v41 = vld [vmem:[#allocation9 + $0x3d8] sm:$0xff]  ;;  %v15084_v1 = vpack.c.bf16 %v3729_v20, %v3727_v34  ;;  %v3731_v40 = vld [vmem:[#allocation7 + $0x3e8] sm:$0xff]  ;;  %v3732_v20 = vld [vmem:[#allocation7 + $0x3f0] sm:$0xff] }
 0x4da   :  { %v15086_v45 = vpack.c.bf16 %v4011_v41, %v4009_v17  ;;  %v4013_v63 = vld [vmem:[#allocation9 + $0x3e8] sm:$0xff]  ;;  %v4012_v41 = vld [vmem:[#allocation9 + $0x3e0] sm:$0xff]  ;;  %v15102_v59 = vpack.c.bf16 %v3732_v20, %v3730_v37  ;;  %v19077_v37 = vld [vmem:[#allocation48_spill] sm:$0xff] }
 0x4db   :  { %v15104_v12 = vpack.c.bf16 %v4014_v9, %v4012_v41  ;;  %v19078_v20 = vld [vmem:[#allocation49_spill] sm:$0xff]  ;;  %v19079_v41 = vld [vmem:[#allocation50_spill] sm:$0xff]  ;;  %v19080_v9 = vld [vmem:[#allocation51_spill] sm:$0xff] }
 0x4dc   :  { %10521 = vmatpush1.bf16.msra.mxu0 %v15066_v39  ;;  %10649 = vmatpush1.bf16.msra.mxu1 %v15068_v6  ;;  %v3733_v39 = vld [vmem:[#allocation7 + $0x3f8] sm:$0xff] }
 0x4dd   :  { %10523 = vmatprep.subr.bf16.mxu0 %v15072_v16  ;;  %10651 = vmatprep.subr.bf16.mxu1 %v15074_v43  ;;  %v4015_v6 = vld [vmem:[#allocation9 + $0x3f8] sm:$0xff]  ;;  %v15096_v17 = vpack.c.bf16 %v3733_v39, %v3731_v40  ;;  %v19068_v39 = vld [vmem:[#allocation18_spill] sm:$0xff] }
 0x4de   :  { %v15098_v34 = vpack.c.bf16 %v4015_v6, %v4013_v63  ;;  %v19066_v63 = vld [vmem:[#allocation19_spill] sm:$0xff]  ;;  %v19067_v40 = vld [vmem:[#allocation21_spill] sm:$0xff] }
 0x4df   :  { %v8257_v6 = vld [vmem:[%s18680_s12 + $0xa8] sm:$0xff] }
 0x4e0   :  { %10525 = vmatpush1.bf16.msra.mxu0 %v15078_v35  ;;  %10653 = vmatpush1.bf16.msra.mxu1 %v15080_v23 }
 0x4e1   :  { %10527 = vmatprep.subr.bf16.mxu0 %v15084_v1  ;;  %10655 = vmatprep.subr.bf16.mxu1 %v15086_v45 }
 0x4e4   :  { %10529 = vmatpush1.bf16.msra.mxu0 %v15090_v13  ;;  %10657 = vmatpush1.bf16.msra.mxu1 %v15092_v24 }
 0x4e5   :  { %10531 = vmatprep.subr.bf16.mxu0 %v15096_v17  ;;  %10659 = vmatprep.subr.bf16.mxu1 %v15098_v34 }
 0x4e8   :  { %10533 = vmatpush1.bf16.msra.mxu0 %v15102_v59  ;;  %10661 = vmatpush1.bf16.msra.mxu1 %v15104_v12 }
 0x4e9   :  { %10663 = vmatprep.subr.bf16.mxu0 %v19066_v63  ;;  %10673 = vmatprep.subr.bf16.mxu1 %v14674_v53  ;;  %v15132_v53 = vld [vmem:[#allocation3] sm:$0xff]  ;;  %v19081_v63 = vld [vmem:[#allocation52_spill] sm:$0xff] }
 0x4ea   :  { %3149 = vst.msk [vmem:[#allocation3 + $0x58] sm:$0x3] %vm3148_vm10, %v15132_v53  ;;  %3161 = vst.msk [vmem:[#allocation3 + $0xb8] sm:$0x3] %vm3148_vm10, %v15132_v53 }
 0x4eb   :  { %3876 = vmatmul.mubr.f32.vlgmr.msra.gmra.mrb[24].mxu0 %v14926_v22  ;;  %4158 = vmatmul.mubr.f32.vlgmr.msra.gmra.mrb[24].mxu1 %v14926_v22  ;;  %v12134_v22 = vld [vmem:[%s18676_s8] sm:$0xff] }
 0x4ec   :  { %10665 = vmatpush1.bf16.msra.mxu0 %v19067_v40  ;;  %10675 = vmatpush1.bf16.msra.mxu1 %v19068_v39  ;;  %v19082_v40 = vld [vmem:[#allocation53_spill] sm:$0xff]  ;;  %v19083_v39 = vld [vmem:[#allocation54_spill] sm:$0xff] }
 0x4ed   :  { %10668 = vmatprep.subr.msk.bf16.mxu0 %vm14560_vm9, %v14751_v32  ;;  %10678 = vmatprep.subr.msk.bf16.mxu1 %vm14560_vm9, %v14753_v52  ;;  %v19070_v32 = vld [vmem:[#allocation41_spill] sm:$0xff]  ;;  %v19071_v52 = vld [vmem:[#allocation42_spill] sm:$0xff] }
 0x4ee   :  { %3881 = vmatprep.mubr.f32.mxu0 %v14942_v33  ;;  %4163 = vmatprep.mubr.f32.mxu1 %v14942_v33  ;;  %v19075_v33 = vld [vmem:[#allocation46_spill] sm:$0xff] }
 0x4ef   :  { %3882 = vmatmul.mubr.f32.gmra.mrb[26].mxu0 %v14940_v57  ;;  %4164 = vmatmul.mubr.f32.gmra.mrb[26].mxu1 %v14940_v57  ;;  %v19074_v57 = vld [vmem:[#allocation45_spill] sm:$0xff] }
 0x4f0   :  { %10671 = vmatpush1.bf16.msk.msra.mxu0 %vm14560_vm9, %v14770_v3  ;;  %10681 = vmatpush1.bf16.msk.msra.mxu1 %vm14560_vm9, %v14777_v21  ;;  %v19072_v3 = vld [vmem:[#allocation43_spill] sm:$0xff]  ;;  %v19073_v21 = vld [vmem:[#allocation44_spill] sm:$0xff] }
 0x4f1   :  { %4486 = vmatprep.mubr.f32.mxu0 %v15132_v53  ;;  %4563 = vmatprep.mubr.f32.mxu1 %v15132_v53 }
 0x4f2   :  { %10683 = vmatprep.subr.bf16.mxu0 %v19070_v32  ;;  %10811 = vmatprep.subr.bf16.mxu1 %v19071_v52  ;;  %v19084_v32 = vld [vmem:[#allocation55_spill] sm:$0xff]  ;;  %v19085_v52 = vld [vmem:[#allocation56_spill] sm:$0xff] }
 0x4f3   :  { %9268 = vmatmul.mubr.msk.f32.vlgmr.msra.gmra.mrb[28].mxu0 %vm3433_vm7, %v12134_v22  ;;  %9272 = vmatmul.mubr.msk.f32.vlgmr.msra.gmra.mrb[28].mxu1 %vm3433_vm7, %v12134_v22  ;;  %v19086_v22 = vld [vmem:[#allocation57_spill] sm:$0xff] }
 0x4f4   :  { %4492 = vmatprep.mubr.f32.mxu0 %v15132_v53  ;;  %4569 = vmatprep.mubr.f32.mxu1 %v15132_v53 }
 0x4f5   :  { %10685 = vmatpush1.bf16.msra.mxu0 %v19072_v3  ;;  %10813 = vmatpush1.bf16.msra.mxu1 %v19073_v21  ;;  %v19087_v3 = vld [vmem:[#allocation58_spill] sm:$0xff]  ;;  %v19088_v21 = vld [vmem:[#allocation59_spill] sm:$0xff] }
 0x4f6   :  { %10687 = vmatprep.subr.bf16.mxu0 %v19074_v57  ;;  %10815 = vmatprep.subr.bf16.mxu1 %v19075_v33  ;;  %v19089_v57 = vld [vmem:[#allocation60_spill] sm:$0xff]  ;;  %v19090_v33 = vld [vmem:[#allocation61_spill] sm:$0xff] }
 0x4f7   :  { %9269 = vmatmul.mubr.msk.f32.gmra.mrb[30].mxu0 %vm3433_vm7, %v12135_v4  ;;  %9273 = vmatmul.mubr.msk.f32.gmra.mrb[30].mxu1 %vm3433_vm7, %v12135_v4  ;;  %v19091_v4 = vld [vmem:[#allocation63_spill] sm:$0xff] }
 0x4f9   :  { %10689 = vmatpush1.bf16.msra.mxu0 %v19076_v14  ;;  %10817 = vmatpush1.bf16.msra.mxu1 %v19077_v37  ;;  %v19092_v14 = vld [vmem:[#allocation64_spill] sm:$0xff]  ;;  %v19093_v37 = vld [vmem:[#allocation65_spill] sm:$0xff] }
 0x4fa   :  { %10691 = vmatprep.subr.bf16.mxu0 %v19078_v20  ;;  %10819 = vmatprep.subr.bf16.mxu1 %v19079_v41  ;;  %v19094_v20 = vld [vmem:[#allocation66_spill] sm:$0xff]  ;;  %v19095_v41 = vld [vmem:[#allocation67_spill] sm:$0xff] }
 0x4fd   :  { %10693 = vmatpush1.bf16.msra.mxu0 %v19080_v9  ;;  %10821 = vmatpush1.bf16.msra.mxu1 %v19081_v63  ;;  %v19096_v9 = vld [vmem:[#allocation68_spill] sm:$0xff]  ;;  %v19097_v63 = vld [vmem:[#allocation69_spill] sm:$0xff] }
 0x4fe   :  { %10695 = vmatprep.subr.bf16.mxu0 %v19082_v40  ;;  %10823 = vmatprep.subr.bf16.mxu1 %v19083_v39  ;;  %v19098_v40 = vld [vmem:[#allocation70_spill] sm:$0xff] }
 0x4ff   :  { %v19100_v39 = vld [vmem:[#allocation74_spill] sm:$0xff] }
 0x501   :  { %10697 = vmatpush1.bf16.msra.mxu0 %v19084_v32  ;;  %10825 = vmatpush1.bf16.msra.mxu1 %v19085_v52  ;;  %v19101_v32 = vld [vmem:[#allocation75_spill] sm:$0xff]  ;;  %v19102_v52 = vld [vmem:[#allocation76_spill] sm:$0xff] }
 0x502   :  { %10699 = vmatprep.subr.bf16.mxu0 %v19086_v22  ;;  %10827 = vmatprep.subr.bf16.mxu1 %v19087_v3  ;;  %v19103_v22 = vld [vmem:[#allocation77_spill] sm:$0xff] }
 0x503   :  { %v19116_v3 = vld [vmem:[#allocation37_spill] sm:$0xff] }
 0x505   :  { %10701 = vmatpush1.bf16.msra.mxu0 %v19088_v21  ;;  %10829 = vmatpush1.bf16.msra.mxu1 %v19089_v57  ;;  %v19117_v21 = vld [vmem:[#allocation34_spill] sm:$0xff] }
 0x506   :  { %10703 = vmatprep.subr.bf16.mxu0 %v19090_v33  ;;  %10831 = vmatprep.subr.bf16.mxu1 %v18986_v51  ;;  %v19099_v51 = vld [vmem:[#allocation73_spill] sm:$0xff]  ;;  %v19119_v57 = vld [vmem:[#allocation62_spill] sm:$0xff]  ;;  %v19120_v33 = vld [vmem:[#allocation71_spill] sm:$0xff] }
 0x509   :  { %10705 = vmatpush1.bf16.msra.mxu0 %v19091_v4  ;;  %10833 = vmatpush1.bf16.msra.mxu1 %v19092_v14  ;;  %v19121_v4 = vld [vmem:[#allocation72_spill] sm:$0xff]  ;;  %v19122_v14 = vld [vmem:[#allocation78_spill] sm:$0xff] }
 0x50a   :  { %10707 = vmatprep.subr.bf16.mxu0 %v19093_v37  ;;  %10835 = vmatprep.subr.bf16.mxu1 %v19094_v20  ;;  %v19123_v37 = vld [vmem:[#allocation15_spill] sm:$0xff] }
 0x50b   :  { %v19124_v20 = vld [vmem:[#allocation79_spill] sm:$0xff] }
 0x50d   :  { %10709 = vmatpush1.bf16.msra.mxu0 %v19095_v41  ;;  %10837 = vmatpush1.bf16.msra.mxu1 %v19096_v9  ;;  %v19125_v41 = vld [vmem:[#allocation81_spill] sm:$0xff] }
 0x50e   :  { %10711 = vmatprep.subr.bf16.mxu0 %v19097_v63  ;;  %10839 = vmatprep.subr.bf16.mxu1 %v19098_v40  ;;  %v19126_v9 = vld [vmem:[#allocation17_spill] sm:$0xff]  ;;  %v19127_v63 = vld [vmem:[#allocation80_spill] sm:$0xff]  ;;  %v19128_v40 = vld [vmem:[#allocation14_spill] sm:$0xff] }
 0x511   :  { %10713 = vmatpush1.bf16.msra.mxu0 %v18995_v31  ;;  %10841 = vmatpush1.bf16.msra.mxu1 %v18997_v25 }
 0x512   :  { %10715 = vmatprep.subr.bf16.mxu0 %v19099_v51  ;;  %10843 = vmatprep.subr.bf16.mxu1 %v19100_v39  ;;  %v19129_v51 = vld [vmem:[#allocation82_spill] sm:$0xff]  ;;  %v19130_v39 = vld [vmem:[#allocation83_spill] sm:$0xff] }
 0x515   :  { %10717 = vmatpush1.bf16.msra.mxu0 %v19101_v32  ;;  %10845 = vmatpush1.bf16.msra.mxu1 %v19102_v52  ;;  %v19131_v32 = vld [vmem:[#allocation85_spill] sm:$0xff]  ;;  %v19132_v52 = vld [vmem:[#allocation84_spill] sm:$0xff] }
 0x516   :  { %10719 = vmatprep.subr.bf16.mxu0 %v19103_v22  ;;  %10847 = vmatprep.subr.bf16.mxu1 %v18999_v29  ;;  %v19133_v22 = vld [vmem:[#allocation86_spill] sm:$0xff] }
 0x519   :  { %10721 = vmatpush1.bf16.msra.mxu0 %v14363_v2  ;;  %10849 = vmatpush1.bf16.msra.mxu1 %v14365_v15  ;;  %v19104_v2 = vld [vmem:[#allocation89_spill] sm:$0xff] }
 0x51a   :  { %10723 = vmatprep.subr.bf16.mxu0 %v14367_v54  ;;  %10851 = vmatprep.subr.bf16.mxu1 %v14369_v55 }
 0x51d   :  { %10725 = vmatpush1.bf16.msra.mxu0 %v14371_v18  ;;  %10853 = vmatpush1.bf16.msra.mxu1 %v14373_v30 }
 0x51e   :  { %10727 = vmatprep.subr.bf16.mxu0 %v14375_v44  ;;  %10855 = vmatprep.subr.bf16.mxu1 %v14377_v11 }
 0x521   :  { %10729 = vmatpush1.bf16.msra.mxu0 %v14379_v27  ;;  %10857 = vmatpush1.bf16.msra.mxu1 %v14381_v46 }
 0x522   :  { %10731 = vmatprep.subr.bf16.mxu0 %v14383_v47  ;;  %10859 = vmatprep.subr.bf16.mxu1 %v14385_v5 }
 0x525   :  { %10733 = vmatpush1.bf16.msra.mxu0 %v19002_v42  ;;  %10861 = vmatpush1.bf16.msra.mxu1 %v19005_v58 }
 0x526   :  { %10735 = vmatprep.subr.bf16.mxu0 %v19003_v0  ;;  %10863 = vmatprep.subr.bf16.mxu1 %v19007_v28  ;;  %v19105_v28 = vld [vmem:[#allocation25_spill] sm:$0xff] }
 0x529   :  { %10737 = vmatpush1.bf16.msra.mxu0 %v19008_v49  ;;  %10865 = vmatpush1.bf16.msra.mxu1 %v19011_v19  ;;  %v19106_v49 = vld [vmem:[#allocation29_spill] sm:$0xff] }
 0x52a   :  { %10739 = vmatprep.subr.bf16.mxu0 %v19009_v7  ;;  %10867 = vmatprep.subr.bf16.mxu1 %v19012_v48  ;;  %v19107_v48 = vld [vmem:[#allocation33_spill] sm:$0xff] }
 0x52d   :  { %10741 = vmatpush1.bf16.msra.mxu0 %v19013_v60  ;;  %10869 = vmatpush1.bf16.msra.mxu1 %v19015_v56  ;;  %v19108_v60 = vld [vmem:[#allocation22_spill] sm:$0xff] }
 0x52e   :  { %10743 = vmatprep.subr.bf16.mxu0 %v19104_v2  ;;  %10871 = vmatprep.subr.bf16.mxu1 %v19016_v26  ;;  %v19109_v56 = vld [vmem:[#allocation26_spill] sm:$0xff]  ;;  %v19134_v2 = vld [vmem:[#allocation87_spill] sm:$0xff] }
 0x52f   :  { %v19111_v26 = vld [vmem:[#allocation38_spill] sm:$0xff] }
 0x531   :  { %10745 = vmatpush1.bf16.msra.mxu0 %v14832_v62  ;;  %10873 = vmatpush1.bf16.msra.mxu1 %v14899_v36  ;;  %v19110_v36 = vld [vmem:[#allocation30_spill] sm:$0xff] }
 0x532   :  { %10747 = vmatprep.subr.bf16.mxu0 %v14912_v10  ;;  %10875 = vmatprep.subr.bf16.mxu1 %v14914_v8  ;;  %v19112_v10 = vld [vmem:[#allocation24_spill] sm:$0xff] }
 0x533   :  { %v19113_v8 = vld [vmem:[#allocation28_spill] sm:$0xff] }
 0x5be   :  { %v15214_v54 = vpop.f32.mrb[24].mxu0  ;;  %v15216_v15 = vpop.f32.mrb[24].mxu1 }
 0x5bf   :  { %v4170_v55 = vmax.f32 %v15214_v54, %v15216_v15  ;;  %v15220_v18 = vpop.f32.mrb[25].mxu0  ;;  %v15222_v30 = vpop.f32.mrb[25].mxu1 }
 0x5c0   :  { %v4171_v44 = vmax.f32 %v15220_v18, %v15222_v30 }
 0x5c2   :  { %v15226_v11 = vpop.f32.mrb[26].mxu0  ;;  %v15228_v27 = vpop.f32.mrb[26].mxu1 }
 0x5c3   :  { %v4172_v46 = vmax.f32 %v15226_v11, %v15228_v27  ;;  %v15232_v47 = vpop.f32.mrb[27].mxu0  ;;  %v15234_v5 = vpop.f32.mrb[27].mxu1 }
 0x5c4   :  { %v4173_v31 = vmax.f32 %v15232_v47, %v15234_v5 }
 0x5c6   :  { %v4488_v25 = vpop.f32.mrb[28].mxu0  ;;  %v15238_v29 = vpop.f32.mrb[28].mxu1 }
 0x5c7   :  { %v4490_v62 = vpop.f32.mrb[29].mxu0  ;;  %v4567_v42 = vpop.f32.mrb[29].mxu1 }
 0x5c8   :  { %4640 = vmatprep.mubr.f32.mxu0 %v4490_v62  ;;  %4794 = vmatprep.mubr.f32.mxu1 %v4490_v62  ;;  %v19136_v62 = vld [vmem:[#allocation90_spill] sm:$0xff] }
 0x5c9   :  { %4641 = vmatmul.mubr.f32.vlgmr.msra.gmra.mrb[32].mxu0 %v4488_v25  ;;  %4795 = vmatmul.mubr.f32.vlgmr.msra.gmra.mrb[32].mxu1 %v4488_v25  ;;  %v19135_v25 = vld [vmem:[#allocation88_spill] sm:$0xff] }
 0x5ca   :  { %10749 = vmatpush1.bf16.msra.mxu0 %v14918_v61  ;;  %10877 = vmatpush1.bf16.msra.mxu1 %v14920_v38  ;;  %v4494_v0 = vpop.f32.mrb[30].mxu0  ;;  %v15242_v58 = vpop.f32.mrb[30].mxu1  ;;  %v19114_v61 = vld [vmem:[#allocation32_spill] sm:$0xff]  ;;  %v19115_v38 = vld [vmem:[#allocation35_spill] sm:$0xff] }
 0x5cb   :  { %10751 = vmatprep.subr.bf16.mxu0 %v19105_v28  ;;  %10879 = vmatprep.subr.bf16.mxu1 %v19106_v49  ;;  %v4496_v7 = vpop.f32.mrb[31].mxu0  ;;  %v15246_v19 = vpop.f32.mrb[31].mxu1  ;;  %v19139_v28 = vld [vmem:[#allocation93_spill] sm:$0xff]  ;;  %v19140_v49 = vld [vmem:[#allocation94_spill] sm:$0xff] }
 0x5cc   :  { %4646 = vmatprep.mubr.f32.mxu0 %v4496_v7  ;;  %4800 = vmatprep.mubr.f32.mxu1 %v4496_v7  ;;  %v19141_v7 = vld [vmem:[#allocation95_spill] sm:$0xff] }
 0x5cd   :  { %4647 = vmatmul.mubr.f32.gmra.mrb[34].mxu0 %v4494_v0  ;;  %4801 = vmatmul.mubr.f32.gmra.mrb[34].mxu1 %v4494_v0  ;;  %v19138_v0 = vld [vmem:[#allocation92_spill] sm:$0xff] }
 0x5ce   :  { %10753 = vmatpush1.bf16.msra.mxu0 %v19107_v48  ;;  %10881 = vmatpush1.bf16.msra.mxu1 %v19108_v60  ;;  %v19142_v48 = vld [vmem:[#allocation96_spill] sm:$0xff]  ;;  %v19143_v60 = vld [vmem:[#allocation97_spill] sm:$0xff] }
 0x5cf   :  { %10755 = vmatprep.subr.bf16.mxu0 %v14936_v50  ;;  %10883 = vmatprep.subr.bf16.mxu1 %v19109_v56  ;;  %v19118_v50 = vld [vmem:[#allocation36_spill] sm:$0xff]  ;;  %v19144_v56 = vld [vmem:[#allocation98_spill] sm:$0xff] }
 0x5d0   :  { %4717 = vmatprep.mubr.f32.mxu0 %v4567_v42  ;;  %4871 = vmatprep.mubr.f32.mxu1 %v4567_v42  ;;  %v19137_v42 = vld [vmem:[#allocation91_spill] sm:$0xff] }
 0x5d2   :  { %10757 = vmatpush1.bf16.msra.mxu0 %v19110_v36  ;;  %10885 = vmatpush1.bf16.msra.mxu1 %v19111_v26  ;;  %v19145_v36 = vld [vmem:[#allocation99_spill] sm:$0xff]  ;;  %v19146_v26 = vld [vmem:[#allocation100_spill] sm:$0xff] }
 0x5d3   :  { %10759 = vmatprep.subr.bf16.mxu0 %v19112_v10  ;;  %10887 = vmatprep.subr.bf16.mxu1 %v19113_v8  ;;  %v19147_v10 = vld [vmem:[#allocation101_spill] sm:$0xff]  ;;  %v19148_v8 = vld [vmem:[#allocation102_spill] sm:$0xff] }
 0x5d6   :  { %10761 = vmatpush1.bf16.msra.mxu0 %v19114_v61  ;;  %10889 = vmatpush1.bf16.msra.mxu1 %v19115_v38  ;;  %v19149_v61 = vld [vmem:[#allocation103_spill] sm:$0xff]  ;;  %v19150_v38 = vld [vmem:[#allocation104_spill] sm:$0xff] }
 0x5d7   :  { %10763 = vmatprep.subr.bf16.mxu0 %v19116_v3  ;;  %10891 = vmatprep.subr.bf16.mxu1 %v19117_v21  ;;  %v19151_v3 = vld [vmem:[#allocation105_spill] sm:$0xff] }
 0x5d8   :  { %v4904_v21 = vld [vmem:[%s18673_s5 + $0x80] sm:$0xff] }
 0x5da   :  { %10765 = vmatpush1.bf16.msra.mxu0 %v19118_v50  ;;  %10893 = vmatpush1.bf16.msra.mxu1 %v19119_v57  ;;  %v4905_v50 = vld [vmem:[%s18673_s5 + $0x88] sm:$0xff]  ;;  %v4938_v57 = vld [vmem:[%s18673_s5 + $0x190] sm:$0xff] }
 0x5db   :  { %10767 = vmatprep.subr.bf16.mxu0 %v19120_v33  ;;  %10895 = vmatprep.subr.bf16.mxu1 %v19121_v4  ;;  %v4939_v33 = vld [vmem:[%s18673_s5 + $0x198] sm:$0xff] }
 0x5de   :  { %10769 = vmatpush1.bf16.msra.mxu0 %v19122_v14  ;;  %10897 = vmatpush1.bf16.msra.mxu1 %v19123_v37  ;;  %v4890_v37 = vld [vmem:[%s18673_s5 + $0x10] sm:$0xff] }
 0x5df   :  { %10771 = vmatprep.subr.bf16.mxu0 %v19124_v20  ;;  %10899 = vmatprep.subr.bf16.mxu1 %v19125_v41  ;;  %v4891_v20 = vld [vmem:[%s18673_s5 + $0x18] sm:$0xff] }
 0x5e2   :  { %10773 = vmatpush1.bf16.msra.mxu0 %v19126_v9  ;;  %10901 = vmatpush1.bf16.msra.mxu1 %v19127_v63  ;;  %v10974_v9 = vpack.c.bf16 %v4939_v33, %v4938_v57  ;;  %v4908_v63 = vld [vmem:[%s18673_s5 + $0xa0] sm:$0xff]  ;;  %v4946_v57 = vld [vmem:[%s18673_s5 + $0x1d0] sm:$0xff]  ;;  %v4947_v33 = vld [vmem:[%s18673_s5 + $0x1d8] sm:$0xff] }
 0x5e3   :  { %10775 = vmatprep.subr.bf16.mxu0 %v19128_v40  ;;  %10903 = vmatprep.subr.bf16.mxu1 %v19129_v51  ;;  %v4909_v40 = vld [vmem:[%s18673_s5 + $0xa8] sm:$0xff]  ;;  %v4940_v51 = vld [vmem:[%s18673_s5 + $0x1a0] sm:$0xff] }
 0x5e6   :  { %10777 = vmatpush1.bf16.msra.mxu0 %v19130_v39  ;;  %10905 = vmatpush1.bf16.msra.mxu1 %v19131_v32  ;;  %v4941_v39 = vld [vmem:[%s18673_s5 + $0x1a8] sm:$0xff]  ;;  %v10944_v32 = vpack.c.bf16 %v4891_v20, %v4890_v37  ;;  %v4898_v20 = vld [vmem:[%s18673_s5 + $0x50] sm:$0xff] }
 0x5e7   :  { %10779 = vmatprep.subr.bf16.mxu0 %v19132_v52  ;;  %10907 = vmatprep.subr.bf16.mxu1 %v19133_v22  ;;  %v4892_v52 = vld [vmem:[%s18673_s5 + $0x20] sm:$0xff]  ;;  %v4893_v22 = vld [vmem:[%s18673_s5 + $0x28] sm:$0xff] }
 0x5ea   :  { %10781 = vmatpush1.bf16.msra.mxu0 %v19134_v2  ;;  %10909 = vmatpush1.bf16.msra.mxu1 %v19135_v25  ;;  %v4924_v2 = vld [vmem:[%s18673_s5 + $0x120] sm:$0xff]  ;;  %v10946_v25 = vpack.c.bf16 %v4909_v40, %v4908_v63  ;;  %v4917_v40 = vld [vmem:[%s18673_s5 + $0xe8] sm:$0xff] }
 0x5eb   :  { %10783 = vmatprep.subr.bf16.mxu0 %v19136_v62  ;;  %10911 = vmatprep.subr.bf16.mxu1 %v19137_v42  ;;  %v10978_v62 = vpack.c.bf16 %v4941_v39, %v4940_v51  ;;  %v4910_v42 = vld [vmem:[%s18673_s5 + $0xb0] sm:$0xff]  ;;  %v4916_v63 = vld [vmem:[%s18673_s5 + $0xe0] sm:$0xff]  ;;  %v4949_v39 = vld [vmem:[%s18673_s5 + $0x1e8] sm:$0xff] }
 0x5ec   :  { %v4948_v51 = vld [vmem:[%s18673_s5 + $0x1e0] sm:$0xff] }
 0x5ee   :  { %10785 = vmatpush1.bf16.msra.mxu0 %v19138_v0  ;;  %10913 = vmatpush1.bf16.msra.mxu1 %v19139_v28  ;;  %v4911_v0 = vld [vmem:[%s18673_s5 + $0xb8] sm:$0xff]  ;;  %v4942_v28 = vld [vmem:[%s18673_s5 + $0x1b0] sm:$0xff] }
 0x5ef   :  { %10787 = vmatprep.subr.bf16.mxu0 %v19140_v49  ;;  %10915 = vmatprep.subr.bf16.mxu1 %v19141_v7  ;;  %v4943_v49 = vld [vmem:[%s18673_s5 + $0x1b8] sm:$0xff] }
 0x5f0   :  { %v19152_v7 = vld [vmem:[#allocation20_spill] sm:$0xff] }
 0x5f2   :  { %10789 = vmatpush1.bf16.msra.mxu0 %v19142_v48  ;;  %10917 = vmatpush1.bf16.msra.mxu1 %v19143_v60  ;;  %v10948_v48 = vpack.c.bf16 %v4893_v22, %v4892_v52  ;;  %v19153_v60 = vld [vmem:[#allocation23_spill] sm:$0xff]  ;;  %v10962_v52 = vpack.c.bf16 %v4917_v40, %v4916_v63  ;;  %v4900_v22 = vld [vmem:[%s18673_s5 + $0x60] sm:$0xff] }
 0x5f3   :  { %10791 = vmatprep.subr.bf16.mxu0 %v19144_v56  ;;  %10919 = vmatprep.subr.bf16.mxu1 %v19145_v36  ;;  %v10950_v36 = vpack.c.bf16 %v4911_v0, %v4910_v42  ;;  %v4918_v42 = vld [vmem:[%s18673_s5 + $0xf0] sm:$0xff]  ;;  %v4919_v0 = vld [vmem:[%s18673_s5 + $0xf8] sm:$0xff]  ;;  %v5497_v40 = vld [vmem:[%s18670_s2 + $0x388] sm:$0xff] }
 0x5f4   :  { %v5494_v63 = vld [vmem:[%s18670_s2 + $0x370] sm:$0xff] }
 0x5f6   :  { %10793 = vmatpush1.bf16.msra.mxu0 %v19146_v26  ;;  %10921 = vmatpush1.bf16.msra.mxu1 %v19147_v10  ;;  %v4895_v26 = vld [vmem:[%s18673_s5 + $0x38] sm:$0xff]  ;;  %v4926_v10 = vld [vmem:[%s18673_s5 + $0x130] sm:$0xff] }
 0x5f7   :  { %10795 = vmatprep.subr.bf16.mxu0 %v19148_v8  ;;  %10923 = vmatprep.subr.bf16.mxu1 %v19149_v61  ;;  %v10982_v8 = vpack.c.bf16 %v4943_v49, %v4942_v28  ;;  %v4927_v61 = vld [vmem:[%s18673_s5 + $0x138] sm:$0xff]  ;;  %v4950_v28 = vld [vmem:[%s18673_s5 + $0x1f0] sm:$0xff] }
 0x5f8   :  { %v4951_v49 = vld [vmem:[%s18673_s5 + $0x1f8] sm:$0xff] }
 0x5fa   :  { %10797 = vmatpush1.bf16.msra.mxu0 %v19150_v38  ;;  %10925 = vmatpush1.bf16.msra.mxu1 %v19151_v3  ;;  %v4912_v38 = vld [vmem:[%s18673_s5 + $0xc0] sm:$0xff]  ;;  %v4913_v3 = vld [vmem:[%s18673_s5 + $0xc8] sm:$0xff] }
 0x5fb   :  { %10799 = vmatprep.subr.bf16.mxu0 %v15072_v16  ;;  %10927 = vmatprep.subr.bf16.mxu1 %v15074_v43  ;;  %v4936_v16 = vld [vmem:[%s18673_s5 + $0x180] sm:$0xff]  ;;  %v4937_v43 = vld [vmem:[%s18673_s5 + $0x188] sm:$0xff] }
 0x5fe   :  { %10801 = vmatpush1.bf16.msra.mxu0 %v15078_v35  ;;  %10929 = vmatpush1.bf16.msra.mxu1 %v15080_v23  ;;  %v4888_v35 = vld [vmem:[%s18673_s5] sm:$0xff]  ;;  %v10938_v23 = vpack.c.bf16 %v4905_v50, %v4904_v21  ;;  %v4945_v50 = vld [vmem:[%s18673_s5 + $0x1c8] sm:$0xff] }
 0x5ff   :  { %10803 = vmatprep.subr.bf16.mxu0 %v15084_v1  ;;  %10931 = vmatprep.subr.bf16.mxu1 %v15086_v45  ;;  %v10970_v1 = vpack.c.bf16 %v4937_v43, %v4936_v16  ;;  %v4889_v45 = vld [vmem:[%s18673_s5 + $0x8] sm:$0xff]  ;;  %v4944_v21 = vld [vmem:[%s18673_s5 + $0x1c0] sm:$0xff]  ;;  %v10984_v43 = vpack.c.bf16 %v4927_v61, %v4926_v10  ;;  %v4935_v10 = vld [vmem:[%s18673_s5 + $0x178] sm:$0xff] }
 0x600   :  { %v10940_v4 = vpack.c.bf16 %v4889_v45, %v4888_v35  ;;  %v10954_v35 = vpack.c.bf16 %v4913_v3, %v4912_v38  ;;  %v4928_v45 = vld [vmem:[%s18673_s5 + $0x140] sm:$0xff]  ;;  %v19154_v38 = vld [vmem:[#allocation27_spill] sm:$0xff] }
 0x601   :  { %v19155_v3 = vld [vmem:[#allocation31_spill] sm:$0xff] }
 0x602   :  { %10805 = vmatpush1.bf16.msra.mxu0 %v15090_v13  ;;  %10933 = vmatpush1.bf16.msra.mxu1 %v15092_v24  ;;  %v4920_v13 = vld [vmem:[%s18673_s5 + $0x100] sm:$0xff]  ;;  %v4921_v24 = vld [vmem:[%s18673_s5 + $0x108] sm:$0xff] }
 0x603   :  { %10807 = vmatprep.subr.bf16.mxu0 %v15096_v17  ;;  %10935 = vmatprep.subr.bf16.mxu1 %v15098_v34  ;;  %v4906_v17 = vld [vmem:[%s18673_s5 + $0x90] sm:$0xff]  ;;  %v4907_v34 = vld [vmem:[%s18673_s5 + $0x98] sm:$0xff]  ;;  %v10972_v14 = vpack.c.bf16 %v4921_v24, %v4920_v13  ;;  %v10986_v13 = vpack.c.bf16 %v4945_v50, %v4944_v21  ;;  %v4929_v24 = vld [vmem:[%s18673_s5 + $0x148] sm:$0xff] }
 0x604   :  { %v10942_v41 = vpack.c.bf16 %v4907_v34, %v4906_v17  ;;  %v4914_v17 = vld [vmem:[%s18673_s5 + $0xd0] sm:$0xff]  ;;  %v4915_v34 = vld [vmem:[%s18673_s5 + $0xd8] sm:$0xff]  ;;  %v4953_v21 = vld [vmem:[%s18674_s6 + $0x8] sm:$0xff] }
 0x605   :  { %v10958_v37 = vpack.c.bf16 %v4915_v34, %v4914_v17  ;;  %v4955_v50 = vld [vmem:[%s18674_s6 + $0x18] sm:$0xff]  ;;  %v5486_v17 = vld [vmem:[%s18670_s2 + $0x330] sm:$0xff]  ;;  %v5489_v34 = vld [vmem:[%s18670_s2 + $0x348] sm:$0xff] }
 0x606   :  { %10809 = vmatpush1.bf16.msra.mxu0 %v15102_v59  ;;  %10937 = vmatpush1.bf16.msra.mxu1 %v15104_v12  ;;  %v4922_v59 = vld [vmem:[%s18673_s5 + $0x110] sm:$0xff]  ;;  %v4923_v12 = vld [vmem:[%s18673_s5 + $0x118] sm:$0xff] }
 0x607   :  { %10939 = vmatprep.subr.bf16.mxu0 %v10938_v23  ;;  %10971 = vmatprep.subr.bf16.mxu1 %v10970_v1  ;;  %v4896_v23 = vld [vmem:[%s18673_s5 + $0x40] sm:$0xff]  ;;  %v4897_v1 = vld [vmem:[%s18673_s5 + $0x48] sm:$0xff] }
 0x609   :  { %4718 = vmatmul.mubr.f32.vlgmr.msra.gmra.mrb[32].mxu0 %v15238_v29  ;;  %4872 = vmatmul.mubr.f32.vlgmr.msra.gmra.mrb[32].mxu1 %v15238_v29  ;;  %v10976_v29 = vpack.c.bf16 %v4923_v12, %v4922_v59  ;;  %v10990_v59 = vpack.c.bf16 %v4947_v33, %v4946_v57  ;;  %v4931_v12 = vld [vmem:[%s18673_s5 + $0x158] sm:$0xff] }
 0x60a   :  { %10941 = vmatpush3.bf16.msra.mxu0 %v10940_v4  ;;  %10973 = vmatpush3.bf16.msra.mxu1 %v10972_v14  ;;  %v10956_v4 = vpack.c.bf16 %v4897_v1, %v4896_v23  ;;  %v10988_v14 = vpack.c.bf16 %v4929_v24, %v4928_v45  ;;  %v5485_v1 = vld [vmem:[%s18670_s2 + $0x328] sm:$0xff]  ;;  %v5487_v45 = vld [vmem:[%s18670_s2 + $0x338] sm:$0xff] }
 0x60b   :  { %4723 = vmatprep.mubr.f32.mxu0 %v15246_v19  ;;  %4877 = vmatprep.mubr.f32.mxu1 %v15246_v19  ;;  %v4925_v19 = vld [vmem:[%s18673_s5 + $0x128] sm:$0xff]  ;;  %v11006_v24 = vpack.c.bf16 %v5487_v45, %v5485_v1  ;;  %v5491_v57 = vld [vmem:[%s18670_s2 + $0x358] sm:$0xff]  ;;  %v5516_v45 = vld [vmem:[%s18670_s2 + $0x420] sm:$0xff] }
 0x60c   :  { %10943 = vmatprep.subr.bf16.mxu0 %v10942_v41  ;;  %10975 = vmatprep.subr.bf16.mxu1 %v10974_v9  ;;  %v10980_v56 = vpack.c.bf16 %v4925_v19, %v4924_v2  ;;  %v4899_v41 = vld [vmem:[%s18673_s5 + $0x58] sm:$0xff]  ;;  %v4930_v9 = vld [vmem:[%s18673_s5 + $0x150] sm:$0xff]  ;;  %v4901_v2 = vld [vmem:[%s18673_s5 + $0x68] sm:$0xff] }
 0x60d   :  { %4724 = vmatmul.mubr.f32.gmra.mrb[34].mxu0 %v15242_v58  ;;  %4878 = vmatmul.mubr.f32.gmra.mrb[34].mxu1 %v15242_v58  ;;  %v4894_v58 = vld [vmem:[%s18673_s5 + $0x30] sm:$0xff]  ;;  %v4933_v19 = vld [vmem:[%s18673_s5 + $0x168] sm:$0xff] }
 0x60e   :  { %10945 = vmatpush3.bf16.msra.mxu0 %v10944_v32  ;;  %5026 = vmatprep.mubr.f32.mxu0 %v19152_v7  ;;  %v10952_v16 = vpack.c.bf16 %v4895_v26, %v4894_v58  ;;  %v10960_v32 = vpack.c.bf16 %v4899_v41, %v4898_v20  ;;  %v10964_v7 = vpack.c.bf16 %v4901_v2, %v4900_v22  ;;  %v4934_v26 = vld [vmem:[%s18673_s5 + $0x170] sm:$0xff]  ;;  %v5493_v20 = vld [vmem:[%s18670_s2 + $0x368] sm:$0xff]  ;;  %v5495_v41 = vld [vmem:[%s18670_s2 + $0x378] sm:$0xff] }
 0x60f   :  { %10977 = vmatpush3.bf16.msra.mxu1 %v10976_v29  ;;  %5096 = vmatprep.mubr.f32.mxu1 %v19153_v60  ;;  %v10992_v29 = vpack.c.bf16 %v4931_v12, %v4930_v9  ;;  %v10966_v60 = vpack.c.bf16 %v4919_v0, %v4918_v42  ;;  %v10998_v58 = vpack.c.bf16 %v4951_v49, %v4950_v28  ;;  %v5492_v12 = vld [vmem:[%s18670_s2 + $0x360] sm:$0xff]  ;;  %v5501_v22 = vld [vmem:[%s18670_s2 + $0x3a8] sm:$0xff]  ;;  %v5503_v2 = vld [vmem:[%s18670_s2 + $0x3b8] sm:$0xff] }
 0x610   :  { %10947 = vmatprep.subr.bf16.mxu0 %v10946_v25  ;;  %10979 = vmatprep.subr.bf16.mxu1 %v10978_v62  ;;  %v4932_v25 = vld [vmem:[%s18673_s5 + $0x160] sm:$0xff]  ;;  %v10994_v62 = vpack.c.bf16 %v4949_v39, %v4948_v51  ;;  %v11000_v61 = vpack.c.bf16 %v4935_v10, %v4934_v26  ;;  %v5499_v51 = vld [vmem:[%s18670_s2 + $0x398] sm:$0xff]  ;;  %v11016_v39 = vpack.c.bf16 %v5494_v63, %v5492_v12  ;;  %v5502_v42 = vld [vmem:[%s18670_s2 + $0x3b0] sm:$0xff] }
 0x611   :  { %v5505_v0 = vld [vmem:[%s18670_s2 + $0x3c8] sm:$0xff]  ;;  %v5507_v28 = vld [vmem:[%s18670_s2 + $0x3d8] sm:$0xff]  ;;  %v5508_v10 = vld [vmem:[%s18670_s2 + $0x3e0] sm:$0xff] }
 0x612   :  { %10949 = vmatpush3.bf16.msra.mxu0 %v10948_v48  ;;  %v10996_v48 = vpack.c.bf16 %v4933_v19, %v4932_v25  ;;  %v5500_v19 = vld [vmem:[%s18670_s2 + $0x3a0] sm:$0xff] }
 0x613   :  { %10981 = vmatpush3.bf16.msra.mxu1 %v10980_v56  ;;  %10951 = vmatprep.subr.bf16.mxu0 %v10950_v36  ;;  %v4902_v56 = vld [vmem:[%s18673_s5 + $0x70] sm:$0xff]  ;;  %v4903_v36 = vld [vmem:[%s18673_s5 + $0x78] sm:$0xff]  ;;  %v11024_v49 = vpack.c.bf16 %v5502_v42, %v5500_v19 }
 0x614   :  { %10983 = vmatprep.subr.bf16.mxu1 %v10982_v8  ;;  %v10968_v8 = vpack.c.bf16 %v4903_v36, %v4902_v56  ;;  %v5509_v56 = vld [vmem:[%s18670_s2 + $0x3e8] sm:$0xff]  ;;  %v5511_v36 = vld [vmem:[%s18670_s2 + $0x3f8] sm:$0xff] }
 0x615   :  { %v11030_v26 = vpack.c.bf16 %v5511_v36, %v5509_v56 }
 0x616   :  { %10953 = vmatpush3.bf16.msra.mxu0 %v10952_v16  ;;  %v4952_v16 = vld [vmem:[%s18674_s6] sm:$0xff] }
 0x617   :  { %10985 = vmatpush3.bf16.msra.mxu1 %v10984_v43  ;;  %10955 = vmatprep.subr.bf16.mxu0 %v10954_v35  ;;  %v11002_v43 = vpack.c.bf16 %v4955_v50, %v4953_v21  ;;  %v4954_v35 = vld [vmem:[%s18674_s6 + $0x10] sm:$0xff]  ;;  %v5512_v50 = vld [vmem:[%s18670_s2 + $0x400] sm:$0xff] }
 0x618   :  { %10987 = vmatprep.subr.bf16.mxu1 %v10986_v13  ;;  %v11004_v23 = vpack.c.bf16 %v4954_v35, %v4952_v16  ;;  %v5484_v13 = vld [vmem:[%s18670_s2 + $0x320] sm:$0xff]  ;;  %v5514_v16 = vld [vmem:[%s18670_s2 + $0x410] sm:$0xff]  ;;  %v5519_v35 = vld [vmem:[%s18670_s2 + $0x438] sm:$0xff] }
 0x619   :  { %v11008_v33 = vpack.c.bf16 %v5486_v17, %v5484_v13  ;;  %v5518_v13 = vld [vmem:[%s18670_s2 + $0x430] sm:$0xff]  ;;  %v5523_v17 = vld [vmem:[%s18670_s2 + $0x458] sm:$0xff] }
 0x61a   :  { %10957 = vmatpush3.bf16.msra.mxu0 %v10956_v4  ;;  %v11010_v4 = vpack.c.bf16 %v5491_v57, %v5489_v34  ;;  %v11040_v34 = vpack.c.bf16 %v5518_v13, %v5516_v45  ;;  %v5528_v45 = vld [vmem:[%s18670_s2 + $0x480] sm:$0xff] }
 0x61b   :  { %10989 = vmatpush3.bf16.msra.mxu1 %v10988_v14  ;;  %10959 = vmatprep.subr.bf16.mxu0 %v10958_v37  ;;  %v5488_v14 = vld [vmem:[%s18670_s2 + $0x340] sm:$0xff]  ;;  %v5490_v37 = vld [vmem:[%s18670_s2 + $0x350] sm:$0xff] }
 0x61c   :  { %10991 = vmatprep.subr.bf16.mxu1 %v10990_v59  ;;  %v11012_v9 = vpack.c.bf16 %v5490_v37, %v5488_v14  ;;  %v11014_v59 = vpack.c.bf16 %v5495_v41, %v5493_v20  ;;  %v5525_v14 = vld [vmem:[%s18670_s2 + $0x468] sm:$0xff]  ;;  %v5527_v37 = vld [vmem:[%s18670_s2 + $0x478] sm:$0xff] }
 0x61d   :  { %v11046_v41 = vpack.c.bf16 %v5527_v37, %v5525_v14  ;;  %v5534_v14 = vld [vmem:[%s18670_s2 + $0x4b0] sm:$0xff]  ;;  %v5537_v37 = vld [vmem:[%s18670_s2 + $0x4c8] sm:$0xff] }
 0x61e   :  { %10961 = vmatpush3.bf16.msra.mxu0 %v10960_v32  ;;  %v11018_v32 = vpack.c.bf16 %v5499_v51, %v5497_v40 }
 0x61f   :  { %10993 = vmatpush3.bf16.msra.mxu1 %v10992_v29  ;;  %10963 = vmatprep.subr.bf16.mxu0 %v10962_v52  ;;  %v5496_v29 = vld [vmem:[%s18670_s2 + $0x380] sm:$0xff]  ;;  %v5498_v52 = vld [vmem:[%s18670_s2 + $0x390] sm:$0xff] }
 0x620   :  { %10995 = vmatprep.subr.bf16.mxu1 %v10994_v62  ;;  %v11020_v25 = vpack.c.bf16 %v5498_v52, %v5496_v29  ;;  %v11022_v62 = vpack.c.bf16 %v5503_v2, %v5501_v22 }
 0x622   :  { %10965 = vmatpush3.bf16.msra.mxu0 %v10964_v7  ;;  %v11026_v7 = vpack.c.bf16 %v5507_v28, %v5505_v0 }
 0x623   :  { %10997 = vmatpush3.bf16.msra.mxu1 %v10996_v48  ;;  %10967 = vmatprep.subr.bf16.mxu0 %v10966_v60  ;;  %v5504_v48 = vld [vmem:[%s18670_s2 + $0x3c0] sm:$0xff]  ;;  %v5506_v60 = vld [vmem:[%s18670_s2 + $0x3d0] sm:$0xff] }
 0x624   :  { %10999 = vmatprep.subr.bf16.mxu1 %v10998_v58  ;;  %v11028_v58 = vpack.c.bf16 %v5506_v60, %v5504_v48 }
 0x626   :  { %10969 = vmatpush3.bf16.msra.mxu0 %v10968_v8  ;;  %v5510_v8 = vld [vmem:[%s18670_s2 + $0x3f0] sm:$0xff] }
 0x627   :  { %11001 = vmatpush3.bf16.msra.mxu1 %v11000_v61  ;;  %11003 = vmatprep.subr.bf16.mxu0 %v11002_v43  ;;  %v5513_v61 = vld [vmem:[%s18670_s2 + $0x408] sm:$0xff] }
 0x628   :  { %11007 = vmatprep.subr.bf16.mxu1 %v11006_v24  ;;  %v5517_v43 = vld [vmem:[%s18670_s2 + $0x428] sm:$0xff] }
 0x629   :  { %5027 = vmatmul.mubr.f32.vlgmr.msra.gmra.mrb[36].mxu0 %v19154_v38  ;;  %v5515_v38 = vld [vmem:[%s18670_s2 + $0x418] sm:$0xff]  ;;  %v11038_v1 = vpack.c.bf16 %v5519_v35, %v5517_v43  ;;  %v5521_v24 = vld [vmem:[%s18670_s2 + $0x448] sm:$0xff] }
 0x62a   :  { %5097 = vmatmul.mubr.f32.vlgmr.msra.gmra.mrb[36].mxu1 %v19155_v3  ;;  %5187 = vmatprep.mubr.f32.mxu0 %v15132_v53  ;;  %v11032_v3 = vpack.c.bf16 %v5510_v8, %v5508_v10  ;;  %v11034_v21 = vpack.c.bf16 %v5515_v38, %v5513_v61  ;;  %v11042_v57 = vpack.c.bf16 %v5523_v17, %v5521_v24  ;;  %v4956_v61 = vld [vmem:[%s18671_s3 + $0x2] sm:$0x1]  ;;  %v5530_v24 = vld [vmem:[%s18670_s2 + $0x490] sm:$0xff]  ;;  %v5533_v17 = vld [vmem:[%s18670_s2 + $0x4a8] sm:$0xff] }
 0x62b   :  { %11005 = vmatpush1.bf16.msra.mxu0 %v11004_v23  ;;  %11009 = vmatpush1.bf16.msra.mxu1 %v11008_v33  ;;  %v11036_v23 = vpack.c.bf16 %v5514_v16, %v5512_v50  ;;  %v5520_v33 = vld [vmem:[%s18670_s2 + $0x440] sm:$0xff] }
 0x62c   :  { %11011 = vmatprep.subr.bf16.mxu1 %v11010_v4  ;;  %v5522_v4 = vld [vmem:[%s18670_s2 + $0x450] sm:$0xff] }
 0x62d   :  { %v11044_v20 = vpack.c.bf16 %v5522_v4, %v5520_v33  ;;  %v5532_v4 = vld [vmem:[%s18670_s2 + $0x4a0] sm:$0xff] }
 0x62f   :  { %11013 = vmatpush1.bf16.msra.mxu1 %v11012_v9  ;;  %v5524_v9 = vld [vmem:[%s18670_s2 + $0x460] sm:$0xff] }
 0x630   :  { %11015 = vmatprep.subr.bf16.mxu1 %v11014_v59  ;;  %v5526_v59 = vld [vmem:[%s18670_s2 + $0x470] sm:$0xff] }
 0x631   :  { %v11048_v12 = vpack.c.bf16 %v5526_v59, %v5524_v9  ;;  %v5536_v59 = vld [vmem:[%s18670_s2 + $0x4c0] sm:$0xff] }
 0x633   :  { %11017 = vmatpush1.bf16.msra.mxu1 %v11016_v39 }
 0x634   :  { %11019 = vmatprep.subr.bf16.mxu1 %v11018_v32 }
 0x637   :  { %11021 = vmatpush1.bf16.msra.mxu1 %v11020_v25 }
 0x638   :  { %11023 = vmatprep.subr.bf16.mxu1 %v11022_v62 }
 0x63b   :  { %11025 = vmatpush1.bf16.msra.mxu1 %v11024_v49 }
 0x63c   :  { %11027 = vmatprep.subr.bf16.mxu1 %v11026_v7 }
 0x63f   :  { %11029 = vmatpush1.bf16.msra.mxu1 %v11028_v58 }
 0x640   :  { %11031 = vmatprep.subr.bf16.mxu1 %v11030_v26 }
 0x643   :  { %11033 = vmatpush1.bf16.msra.mxu1 %v11032_v3 }
 0x644   :  { %11035 = vmatprep.subr.bf16.mxu1 %v11034_v21  ;;  %v4957_v21 = vld [vmem:[%s18671_s3 + $0x3] sm:$0x1] }
 0x647   :  { %11037 = vmatpush1.bf16.msra.mxu1 %v11036_v23  ;;  %v5529_v23 = vld [vmem:[%s18670_s2 + $0x488] sm:$0xff] }
 0x648   :  { %11039 = vmatprep.subr.bf16.mxu1 %v11038_v1  ;;  %v5531_v1 = vld [vmem:[%s18670_s2 + $0x498] sm:$0xff] }
 0x649   :  { %v11050_v13 = vpack.c.bf16 %v5531_v1, %v5529_v23 }
 0x64b   :  { %11041 = vmatpush1.bf16.msra.mxu1 %v11040_v34  ;;  %v5535_v34 = vld [vmem:[%s18670_s2 + $0x4b8] sm:$0xff] }
 0x64c   :  { %11043 = vmatprep.subr.bf16.mxu1 %v11042_v57  ;;  %v11052_v57 = vpack.c.bf16 %v5530_v24, %v5528_v45  ;;  %v11054_v33 = vpack.c.bf16 %v5535_v34, %v5533_v17 }
 0x64f   :  { %11045 = vmatpush1.bf16.msra.mxu1 %v11044_v20  ;;  %v5539_v20 = vld [vmem:[%s18670_s2 + $0x4d8] sm:$0xff] }
 0x650   :  { %11047 = vmatprep.subr.bf16.mxu1 %v11046_v41  ;;  %v11056_v41 = vpack.c.bf16 %v5534_v14, %v5532_v4  ;;  %v11058_v9 = vpack.c.bf16 %v5539_v20, %v5537_v37  ;;  %v5392_v14 = vld [vmem:[#allocation3] sm:$0xfe] }
 0x651   :  { %v5432_v37 = vrot.slane %v5392_v14, 1  ;;  %v15781_v20 = vld [vmem:[#allocation3] sm:$0xff]  ;;  %v5569_v14 = vld [vmem:[%s18670_s2 + $0x5c8] sm:$0xff] }
 0x653   :  { %11049 = vmatpush1.bf16.msra.mxu1 %v11048_v12  ;;  %v5538_v12 = vld [vmem:[%s18670_s2 + $0x4d0] sm:$0xff] }
 0x654   :  { %11051 = vmatprep.subr.bf16.mxu1 %v11050_v13 }
 0x657   :  { %11053 = vmatpush1.bf16.msra.mxu1 %v11052_v57 }
 0x658   :  { %11055 = vmatprep.subr.bf16.mxu1 %v11054_v33 }
 0x65b   :  { %11057 = vmatpush1.bf16.msra.mxu1 %v11056_v41  ;;  %v15784_v41 = vrot.slane %v15781_v20, 1 }
 0x65c   :  { %11059 = vmatprep.subr.bf16.mxu1 %v11058_v9  ;;  %v5548_v9 = vld [vmem:[%s18670_s2 + $0x520] sm:$0xff] }
 0x6dc   :  { %v15653_v63 = vpop.f32.mrb[32].mxu0  ;;  %v15655_v40 = vpop.f32.mrb[32].mxu1 }
 0x6dd   :  { %v4884_v51 = vmax.f32 %v15653_v63, %v15655_v40  ;;  %v15659_v39 = vpop.f32.mrb[33].mxu0  ;;  %v15661_v32 = vpop.f32.mrb[33].mxu1 }
 0x6de   :  { %v4885_v29 = vmax.f32 %v15659_v39, %v15661_v32 }
 0x6e0   :  { %v15665_v52 = vpop.f32.mrb[34].mxu0  ;;  %v15667_v22 = vpop.f32.mrb[34].mxu1 }
 0x6e1   :  { %v4886_v2 = vmax.f32 %v15665_v52, %v15667_v22  ;;  %v15671_v25 = vpop.f32.mrb[35].mxu0  ;;  %v15673_v62 = vpop.f32.mrb[35].mxu1 }
 0x6e2   :  { %v4887_v19 = vmax.f32 %v15671_v25, %v15673_v62 }
 0x6fc   :  { %v9410_v42 = vpop.f32.mrb[36].mxu0 }
 0x6fd   :  { %v9445_v0 = vpop.f32.mrb[36].mxu1  ;;  %v9411_v28 = vpop.f32.mrb[37].mxu0 }
 0x6fe   :  { %v9412_v49 = vadd.f32 %v9411_v28, %v9410_v42  ;;  %v9446_v7 = vpop.f32.mrb[37].mxu1  ;;  %v5541_v42 = vld [vmem:[%s18670_s2 + $0x4e8] sm:$0xff]  ;;  %v11060_v28 = vpack.c.bf16 %v5538_v12, %v5536_v59  ;;  %v5550_v59 = vld [vmem:[%s18670_s2 + $0x530] sm:$0xff] }
 0x6ff   :  { %v9447_v48 = vadd.f32 %v9446_v7, %v9445_v0  ;;  %v5543_v0 = vld [vmem:[%s18670_s2 + $0x4f8] sm:$0xff]  ;;  %v5540_v7 = vld [vmem:[%s18670_s2 + $0x4e0] sm:$0xff]  ;;  %v5553_v12 = vld [vmem:[%s18670_s2 + $0x548] sm:$0xff] }
 0x700   :  { %11061 = vmatpush1.bf16.msra.mxu1 %v11060_v28 }
 0x701   :  { %v5099_v60 = vadd.f32 %v9447_v48, %v9412_v49  ;;  %v11062_v49 = vpack.c.bf16 %v5543_v0, %v5541_v42  ;;  %v5542_v48 = vld [vmem:[%s18670_s2 + $0x4f0] sm:$0xff]  ;;  %v5555_v42 = vld [vmem:[%s18670_s2 + $0x558] sm:$0xff]  ;;  %v5396_v0 = vld [vmem:[#allocation3 + $0x40] sm:$0x1] }
 0x703   :  { %v5102_v56 = vmul.f32 0.00048828125, %v5099_v60  ;;  %v5545_v60 = vld [vmem:[%s18670_s2 + $0x508] sm:$0xff]  ;;  %11063 = vmatprep.subr.bf16.mxu1 %v11062_v49 }
 0x705   :  { %v5103_v36 = vmul.f32 %v5102_v56, %v5102_v56 }
 0x707   :  { %v5105_v58 = vrot.slane %v5103_v36, 7  ;;  %v11064_v36 = vpack.c.bf16 %v5542_v48, %v5540_v7 }
 0x709   :  { %v5107_v26 = vsub.f32 %v5102_v56, %v5105_v58  ;;  %11065 = vmatpush1.bf16.msra.mxu1 %v11064_v36  ;;  %v5434_v36 = vsel %vm3372_vm6, %v5432_v37, %v15784_v41  ;;  %v5571_v37 = vld [vmem:[%s18670_s2 + $0x5d8] sm:$0xff] }
 0x70b   :  { %v5108_v10 = vadd.f32 1e-05, %v5107_v26  ;;  %v5544_v26 = vld [vmem:[%s18670_s2 + $0x500] sm:$0xff] }
 0x70d   :  { %12124 = vrsqrt.f32 %v5108_v10  ;;  %v5546_v10 = vld [vmem:[%s18670_s2 + $0x510] sm:$0xff] }
 0x717   :  { %v12125_v8 = vpop.eup %12124 }
 0x718   :  { %v5111_v38 = vrot.slane %v12125_v8, 1  ;;  %v5549_v8 = vld [vmem:[%s18670_s2 + $0x528] sm:$0xff] }
 0x71a   :  { %v5113_v3 = vmul.f32 %v5111_v38, %v4956_v61  ;;  %v5551_v61 = vld [vmem:[%s18670_s2 + $0x538] sm:$0xff]  ;;  %v11068_v38 = vpack.c.bf16 %v5546_v10, %v5544_v26  ;;  %v5444_v26 = vrot.slane %v5396_v0, 1 }
 0x71b   :  { %v5575_v0 = vld [vmem:[%s18670_s2 + $0x5f8] sm:$0xff] }
 0x71c   :  { %v5114_v50 = vmul.f32 %v5113_v3, %v5102_v56  ;;  %v5547_v56 = vld [vmem:[%s18670_s2 + $0x518] sm:$0xff] }
 0x71d   :  { %v11066_v58 = vpack.c.bf16 %v5547_v56, %v5545_v60 }
 0x71e   :  { %v5115_v16 = vsub.f32 %v4957_v21, %v5114_v50  ;;  %v19156_v50 = vld [vmem:[#allocation39_spill] sm:$0xff] }
 0x71f   :  { %11067 = vmatprep.subr.bf16.mxu1 %v11066_v58  ;;  %v11072_v58 = vpack.c.bf16 %v5550_v59, %v5548_v9  ;;  %v11090_v9 = vpack.c.bf16 %v5571_v37, %v5569_v14  ;;  %v5568_v59 = vld [vmem:[%s18670_s2 + $0x5c0] sm:$0xff] }
 0x720   :  { %v5117_v43 = vrot.slane %v5115_v16, 7  ;;  %11069 = vmatpush1.bf16.msra.mxu1 %v11068_v38  ;;  %v11074_v38 = vpack.c.bf16 %v5555_v42, %v5553_v12  ;;  %v5570_v12 = vld [vmem:[%s18670_s2 + $0x5d0] sm:$0xff]  ;;  %v5573_v42 = vld [vmem:[%s18670_s2 + $0x5e8] sm:$0xff]  ;;  %v5300_v37 = vld [vmem:[%s18670_s2 + $0x40] sm:$0xff] }
 0x722   :  { %v5119_v35 = vsel %vm2828_vm4, %v5113_v3, %v5117_v43  ;;  %v11070_v3 = vpack.c.bf16 %v5551_v61, %v5549_v8 }
 0x723   :  { %9274 = vmatmul.mubr.msk.f32.vlgmr.msra.gmra.mrb[38].mxu0 %vm2991_vm5, %v5119_v35  ;;  %v19157_v35 = vld [vmem:[#allocation40_spill] sm:$0xff] }
 0x724   :  { %11071 = vmatprep.subr.bf16.mxu1 %v11070_v3  ;;  %v5552_v3 = vld [vmem:[%s18670_s2 + $0x540] sm:$0xff] }
 0x7f6   :  { %v5189_v21 = vpop.f32.mrb[38].mxu0 }
 0x7f7   :  { %v5197_v16 = vrot.slane %v5189_v21, %v19156_v50  ;;  %v5191_v43 = vpop.f32.mrb[39].mxu0  ;;  %v5209_v23 = vrot.slane %v5189_v21, %v19157_v35  ;;  %v5554_v21 = vld [vmem:[%s18670_s2 + $0x550] sm:$0xff] }
 0x7f8   :  { %v5201_v1 = vrot.slane %v5191_v43, %v19156_v50  ;;  %v5213_v45 = vrot.slane %v5191_v43, %v19157_v35  ;;  %v5557_v43 = vld [vmem:[%s18670_s2 + $0x568] sm:$0xff] }
 0x7f9   :  { %v5202_v13 = vmul.f32 %v5197_v16, %v4170_v55  ;;  %v5204_v24 = vmul.f32 %v5197_v16, %v4172_v46  ;;  %v5242_v53 = vmul.f32 %v5197_v16, %v4884_v51  ;;  %v5244_v17 = vmul.f32 %v5197_v16, %v4886_v2  ;;  %v5400_v16 = vld [vmem:[#allocation3 + $0x60] sm:$0xfe] }
 0x7fa   :  { %v5203_v34 = vmul.f32 %v5201_v1, %v4171_v44  ;;  %v5205_v54 = vmul.f32 %v5201_v1, %v4173_v31  ;;  %v5243_v15 = vmul.f32 %v5201_v1, %v4885_v29  ;;  %v5245_v55 = vmul.f32 %v5201_v1, %v4887_v19 }
 0x7fb   :  { %v5214_v11 = vadd.f32 %v5209_v23, %v5202_v13  ;;  %v5216_v27 = vadd.f32 %v5209_v23, %v5204_v24  ;;  %v5246_v46 = vadd.f32 %v5242_v53, %v5209_v23  ;;  %v5248_v63 = vadd.f32 %v5244_v17, %v5209_v23  ;;  %v5559_v23 = vld [vmem:[%s18670_s2 + $0x578] sm:$0xff] }
 0x7fc   :  { %v5215_v40 = vadd.f32 %v5213_v45, %v5203_v34  ;;  %v5217_v51 = vadd.f32 %v5213_v45, %v5205_v54  ;;  %v5247_v18 = vadd.f32 %v5243_v15, %v5213_v45  ;;  %v5249_v30 = vadd.f32 %v5245_v55, %v5213_v45  ;;  %v5556_v34 = vld [vmem:[%s18670_s2 + $0x560] sm:$0xff]  ;;  %v5558_v55 = vld [vmem:[%s18670_s2 + $0x570] sm:$0xff] }
 0x7fd   :  { %v5218_v44 = vmax.f32 %v5214_v11, 0.0  ;;  %v5220_v52 = vmax.f32 %v5216_v27, 0.0  ;;  %v5250_v47 = vmax.f32 %v5246_v46, 0.0  ;;  %v5252_v5 = vmax.f32 %v5248_v63, 0.0  ;;  %v5561_v11 = vld [vmem:[%s18670_s2 + $0x588] sm:$0xff]  ;;  %v5563_v46 = vld [vmem:[%s18670_s2 + $0x598] sm:$0xff] }
 0x7fe   :  { %v5219_v31 = vmax.f32 %v5215_v40, 0.0  ;;  %v5221_v22 = vmax.f32 %v5217_v51, 0.0  ;;  %v5251_v39 = vmax.f32 %v5247_v18, 0.0  ;;  %v5253_v32 = vmax.f32 %v5249_v30, 0.0  ;;  %v5404_v27 = vld [vmem:[#allocation3 + $0xa0] sm:$0x1] }
 0x7ff   :  { %v5226_v29 = vrot.slane %v5218_v44, 7  ;;  %v5228_v2 = vrot.slane %v5220_v52, 7  ;;  %v5258_v25 = vrot.slane %v5250_v47, 7  ;;  %v5260_v62 = vrot.slane %v5252_v5, 7  ;;  %v15834_v63 = vld [vmem:[#allocation3 + $0x38] sm:$0xff]  ;;  %v5560_v5 = vld [vmem:[%s18670_s2 + $0x580] sm:$0xff] }
 0x800   :  { %v5227_v19 = vrot.slane %v5219_v31, 7  ;;  %v5229_v57 = vrot.slane %v5221_v22, 7  ;;  %v5259_v33 = vrot.slane %v5251_v39, 7  ;;  %v5261_v4 = vrot.slane %v5253_v32, 7  ;;  %v5395_v40 = vld [vmem:[#allocation3 + $0x18] sm:$0xfe] }
 0x801   :  { %5234 = vst [vmem:[#allocation3 + $0x8] sm:$0xfe] %v5226_v29  ;;  %5236 = vst [vmem:[#allocation3 + $0x28] sm:$0x1] %v5226_v29  ;;  %v5445_v24 = vsel %vm3372_vm6, %v15784_v41, %v5444_v26  ;;  %v11076_v53 = vpack.c.bf16 %v5554_v21, %v5552_v3  ;;  %v5452_v17 = vrot.slane %v5400_v16, 1  ;;  %v11078_v15 = vpack.c.bf16 %v5559_v23, %v5557_v43  ;;  %v5562_v31 = vld [vmem:[%s18670_s2 + $0x590] sm:$0xff] }
 0x802   :  { %5238 = vst [vmem:[#allocation3 + $0x68] sm:$0xfe] %v5228_v2  ;;  %5240 = vst [vmem:[#allocation3 + $0x88] sm:$0x1] %v5228_v2  ;;  %v11080_v44 = vpack.c.bf16 %v5558_v55, %v5556_v34  ;;  %v5464_v52 = vrot.slane %v5404_v27, 1  ;;  %v11082_v47 = vpack.c.bf16 %v5563_v46, %v5561_v11  ;;  %v5441_v22 = vrot.slane %v5395_v40, 1 }
 0x803   :  { %5266 = vst [vmem:[#allocation3 + $0x28] sm:$0xfe] %v5258_v25  ;;  %5268 = vst [vmem:[#allocation3 + $0x48] sm:$0x1] %v5258_v25  ;;  %v5454_v30 = vsel %vm3372_vm6, %v5452_v17, %v15784_v41  ;;  %v5442_v39 = vrot.slane %v15834_v63, 1  ;;  %v5565_v32 = vld [vmem:[%s18670_s2 + $0x5a8] sm:$0xff]  ;;  %v11084_v25 = vpack.c.bf16 %v5562_v31, %v5560_v5 }
 0x804   :  { %5270 = vst [vmem:[#allocation3 + $0x88] sm:$0xfe] %v5260_v62  ;;  %5272 = vst [vmem:[#allocation3 + $0xa8] sm:$0x1] %v5260_v62  ;;  %v5567_v29 = vld [vmem:[%s18670_s2 + $0x5b8] sm:$0xff]  ;;  %v5465_v62 = vsel %vm3372_vm6, %v15784_v41, %v5464_v52  ;;  %v5580_v43 = vld [vmem:[%s18670_s2 + $0x620] sm:$0xff] }
 0x805   :  { %5235 = vst [vmem:[#allocation3 + $0x10] sm:$0xfe] %v5227_v19  ;;  %5237 = vst [vmem:[#allocation3 + $0x30] sm:$0x1] %v5227_v19  ;;  %v11086_v19 = vpack.c.bf16 %v5567_v29, %v5565_v32  ;;  %v5583_v3 = vld [vmem:[%s18670_s2 + $0x638] sm:$0xff]  ;;  %v5582_v23 = vld [vmem:[%s18670_s2 + $0x630] sm:$0xff] }
 0x806   :  { %5239 = vst [vmem:[#allocation3 + $0x70] sm:$0xfe] %v5229_v57  ;;  %5241 = vst [vmem:[#allocation3 + $0x90] sm:$0x1] %v5229_v57  ;;  %v5564_v57 = vld [vmem:[%s18670_s2 + $0x5a0] sm:$0xff]  ;;  %v11104_v17 = vpack.c.bf16 %v5582_v23, %v5580_v43  ;;  %v5297_v11 = vld [vmem:[%s18670_s2 + $0x28] sm:$0xff] }
 0x807   :  { %5267 = vst [vmem:[#allocation3 + $0x30] sm:$0xfe] %v5259_v33  ;;  %5269 = vst [vmem:[#allocation3 + $0x50] sm:$0x1] %v5259_v33  ;;  %v5566_v33 = vld [vmem:[%s18670_s2 + $0x5b0] sm:$0xff]  ;;  %v5299_v40 = vld [vmem:[%s18670_s2 + $0x38] sm:$0xff] }
 0x808   :  { %5271 = vst [vmem:[#allocation3 + $0x90] sm:$0xfe] %v5261_v4  ;;  %5273 = vst [vmem:[#allocation3 + $0xb0] sm:$0x1] %v5261_v4  ;;  %v5393_v49 = vld [vmem:[#allocation3 + $0x8] sm:$0xfe]  ;;  %v5443_v4 = vsel %vm3372_vm6, %v5441_v22, %v5442_v39  ;;  %v11088_v41 = vpack.c.bf16 %v5566_v33, %v5564_v57 }
 0x809   :  { %v5435_v48 = vrot.slane %v5393_v49, 1  ;;  %v5401_v8 = vld [vmem:[#allocation3 + $0x68] sm:$0xfe]  ;;  %v11092_v49 = vpack.c.bf16 %v5570_v12, %v5568_v59  ;;  %v5296_v5 = vld [vmem:[%s18670_s2 + $0x20] sm:$0xff]  ;;  %v5298_v31 = vld [vmem:[%s18670_s2 + $0x30] sm:$0xff] }
 0x80a   :  { %v15798_v28 = vld [vmem:[#allocation3 + $0x28] sm:$0xff]  ;;  %v5455_v45 = vrot.slane %v5401_v8, 1  ;;  %v5576_v8 = vld [vmem:[%s18670_s2 + $0x600] sm:$0xff]  ;;  %v11112_v33 = vpack.c.bf16 %v5298_v31, %v5296_v5  ;;  %v5310_v43 = vld [vmem:[%s18670_s2 + $0x90] sm:$0xff] }
 0x80b   :  { %v5397_v7 = vld [vmem:[#allocation3 + $0x48] sm:$0x1]  ;;  %v5436_v60 = vrot.slane %v15798_v28, 1  ;;  %v5322_v5 = vld [vmem:[%s18670_s2 + $0xf0] sm:$0xff] }
 0x80c   :  { %v5446_v56 = vrot.slane %v5397_v7, 1  ;;  %v15803_v10 = vld [vmem:[#allocation3 + $0x88] sm:$0xff]  ;;  %v11094_v7 = vpack.c.bf16 %v5575_v0, %v5573_v42 }
 0x80d   :  { %v5437_v61 = vsel %vm3372_vm6, %v5435_v48, %v5436_v60  ;;  %v5456_v13 = vrot.slane %v15803_v10, 1  ;;  %v5405_v54 = vld [vmem:[#allocation3 + $0xa8] sm:$0x1]  ;;  %v5572_v48 = vld [vmem:[%s18670_s2 + $0x5e0] sm:$0xff]  ;;  %v5402_v57 = vld [vmem:[#allocation3 + $0x70] sm:$0xfe] }
 0x80e   :  { %5656 = vmatprep.mubr.f32.mxu1 %v5437_v61  ;;  %v5447_v1 = vsel %vm3372_vm6, %v5436_v60, %v5446_v56  ;;  %v5466_v18 = vrot.slane %v5405_v54, 1  ;;  %v5574_v60 = vld [vmem:[%s18670_s2 + $0x5f0] sm:$0xff]  ;;  %v5577_v56 = vld [vmem:[%s18670_s2 + $0x608] sm:$0xff]  ;;  %v5292_v54 = vld [vmem:[%s18670_s2] sm:$0xff]  ;;  %v5458_v12 = vrot.slane %v5402_v57, 1 }
 0x80f   :  { %5657 = vmatmul.mubr.f32.vlgmr.msra.gmra.mrb[38].mxu1 %v5434_v36  ;;  %v5457_v51 = vsel %vm3372_vm6, %v5455_v45, %v5456_v13  ;;  %v5579_v36 = vld [vmem:[%s18670_s2 + $0x618] sm:$0xff]  ;;  %v5578_v61 = vld [vmem:[%s18670_s2 + $0x610] sm:$0xff]  ;;  %v5305_v0 = vld [vmem:[%s18670_s2 + $0x68] sm:$0xff] }
 0x810   :  { %11073 = vmatpush1.bf16.msra.mxu1 %v11072_v58  ;;  %5662 = vmatprep.mubr.f32.mxu1 %v5447_v1  ;;  %v5467_v2 = vsel %vm3372_vm6, %v5456_v13, %v5466_v18  ;;  %v11096_v58 = vpack.c.bf16 %v5574_v60, %v5572_v48  ;;  %v11098_v26 = vpack.c.bf16 %v5579_v36, %v5577_v56  ;;  %v5293_v1 = vld [vmem:[%s18670_s2 + $0x8] sm:$0xff]  ;;  %v5295_v45 = vld [vmem:[%s18670_s2 + $0x18] sm:$0xff]  ;;  %v5304_v36 = vld [vmem:[%s18670_s2 + $0x60] sm:$0xff] }
 0x811   :  { %11075 = vmatprep.subr.bf16.mxu1 %v11074_v38  ;;  %v5581_v38 = vld [vmem:[%s18670_s2 + $0x628] sm:$0xff]  ;;  %v11100_v21 = vpack.c.bf16 %v5578_v61, %v5576_v8  ;;  %v5399_v13 = vld [vmem:[#allocation3 + $0x58] sm:$0x1]  ;;  %v11106_v34 = vpack.c.bf16 %v5295_v45, %v5293_v1  ;;  %v5403_v18 = vld [vmem:[#allocation3 + $0x78] sm:$0xfe] }
 0x812   :  { %v11102_v16 = vpack.c.bf16 %v5583_v3, %v5581_v38  ;;  %v5450_v55 = vrot.slane %v5399_v13, 1  ;;  %v5461_v22 = vrot.slane %v5403_v18, 1  ;;  %v5309_v61 = vld [vmem:[%s18670_s2 + $0x88] sm:$0xff]  ;;  %v5311_v38 = vld [vmem:[%s18670_s2 + $0x98] sm:$0xff] }
 0x813   :  { %5663 = vmatmul.mubr.f32.gmra.mrb[40].mxu1 %v5445_v24  ;;  %v15919_v24 = vld [vmem:[#allocation3 + $0x30] sm:$0xff]  ;;  %v5313_v1 = vld [vmem:[%s18670_s2 + $0xa8] sm:$0xff]  ;;  %v5315_v45 = vld [vmem:[%s18670_s2 + $0xb8] sm:$0xff] }
 0x814   :  { %11077 = vmatpush1.bf16.msra.mxu1 %v11076_v53  ;;  %5668 = vmatprep.mubr.f32.mxu1 %v5457_v51  ;;  %v5394_v53 = vld [vmem:[#allocation3 + $0x10] sm:$0xfe]  ;;  %v5439_v46 = vrot.slane %v15919_v24, 1  ;;  %v15934_v51 = vld [vmem:[#allocation3 + $0x98] sm:$0xff]  ;;  %v5451_v52 = vsel %vm3372_vm6, %v5442_v39, %v5450_v55  ;;  %v5277_v13 = vld [vmem:[#allocation3 + $0x8] sm:$0xff] }
 0x815   :  { %11079 = vmatprep.subr.bf16.mxu1 %v11078_v15  ;;  %v5294_v15 = vld [vmem:[%s18670_s2 + $0x10] sm:$0xff]  ;;  %v5438_v27 = vrot.slane %v5394_v53, 1  ;;  %v5462_v32 = vrot.slane %v15934_v51, 1  ;;  %v5303_v39 = vld [vmem:[%s18670_s2 + $0x58] sm:$0xff]  ;;  %v5321_v18 = vld [vmem:[%s18670_s2 + $0xe8] sm:$0xff] }
 0x816   :  { %v5319_v55 = vld [vmem:[%s18670_s2 + $0xd8] sm:$0xff]  ;;  %v5325_v31 = vld [vmem:[%s18670_s2 + $0x108] sm:$0xff] }
 0x817   :  { %5669 = vmatmul.mubr.f32.gmra.mrb[42].mxu1 %v5454_v30  ;;  %v5398_v30 = vld [vmem:[#allocation3 + $0x50] sm:$0x1]  ;;  %v5440_v29 = vsel %vm3372_vm6, %v5438_v27, %v5439_v46 }
 0x818   :  { %11081 = vmatpush1.bf16.msra.mxu1 %v11080_v44  ;;  %5674 = vmatprep.mubr.f32.mxu1 %v5467_v2  ;;  %v11108_v44 = vpack.c.bf16 %v5294_v15, %v5292_v54  ;;  %v5448_v2 = vrot.slane %v5398_v30, 1  ;;  %v5314_v54 = vld [vmem:[%s18670_s2 + $0xb0] sm:$0xff]  ;;  %v5317_v15 = vld [vmem:[%s18670_s2 + $0xc8] sm:$0xff]  ;;  %v5323_v30 = vld [vmem:[%s18670_s2 + $0xf8] sm:$0xff] }
 0x819   :  { %11083 = vmatprep.subr.bf16.mxu1 %v11082_v47  ;;  %v11110_v47 = vpack.c.bf16 %v5299_v40, %v5297_v11  ;;  %v11130_v27 = vpack.c.bf16 %v5319_v55, %v5317_v15  ;;  %v5318_v40 = vld [vmem:[%s18670_s2 + $0xd0] sm:$0xff]  ;;  %v5353_v15 = vld [vmem:[%s18670_s2 + $0x1e8] sm:$0xff]  ;;  %v5355_v55 = vld [vmem:[%s18670_s2 + $0x1f8] sm:$0xff] }
 0x81a   :  { %v5449_v59 = vsel %vm3372_vm6, %v5439_v46, %v5448_v2  ;;  %v5316_v46 = vld [vmem:[%s18670_s2 + $0xc0] sm:$0xff] }
 0x81b   :  { %5675 = vmatmul.mubr.f32.gmra.mrb[44].mxu1 %v5465_v62  ;;  %v5407_v62 = vld [vmem:[#allocation3 + $0xb8] sm:$0x1]  ;;  %v5324_v2 = vld [vmem:[%s18670_s2 + $0x100] sm:$0xff] }
 0x81c   :  { %11085 = vmatpush1.bf16.msra.mxu1 %v11084_v25  ;;  %9275 = vmatprep.mubr.msk.f32.mxu1 %vm2991_vm5, %v5443_v4  ;;  %v5301_v25 = vld [vmem:[%s18670_s2 + $0x48] sm:$0xff]  ;;  %v5463_v4 = vsel %vm3372_vm6, %v5461_v22, %v5462_v32  ;;  %v5327_v22 = vld [vmem:[%s18670_s2 + $0x118] sm:$0xff] }
 0x81d   :  { %11087 = vmatprep.subr.bf16.mxu1 %v11086_v19  ;;  %v15953_v19 = vld [vmem:[#allocation3 + $0x90] sm:$0xff]  ;;  %v11114_v14 = vpack.c.bf16 %v5303_v39, %v5301_v25  ;;  %v5329_v39 = vld [vmem:[%s18670_s2 + $0x128] sm:$0xff] }
 0x81e   :  { %v5459_v42 = vrot.slane %v15953_v19, 1  ;;  %v5326_v25 = vld [vmem:[%s18670_s2 + $0x110] sm:$0xff] }
 0x81f   :  { %v11140_v57 = vpack.c.bf16 %v5326_v25, %v5324_v2  ;;  %v5360_v2 = vld [vmem:[%s18670_s2 + $0x220] sm:$0xff]  ;;  %v5362_v25 = vld [vmem:[%s18670_s2 + $0x230] sm:$0xff] }
 0x820   :  { %11089 = vmatpush1.bf16.msra.mxu1 %v11088_v41  ;;  %v5302_v41 = vld [vmem:[%s18670_s2 + $0x50] sm:$0xff] }
 0x821   :  { %11091 = vmatprep.subr.bf16.mxu1 %v11090_v9  ;;  %v5470_v9 = vrot.slane %v5407_v62, 1  ;;  %v11116_v48 = vpack.c.bf16 %v5302_v41, %v5300_v37  ;;  %v5331_v62 = vld [vmem:[%s18670_s2 + $0x138] sm:$0xff]  ;;  %v5333_v37 = vld [vmem:[%s18670_s2 + $0x148] sm:$0xff] }
 0x822   :  { %v5335_v41 = vld [vmem:[%s18670_s2 + $0x158] sm:$0xff] }
 0x823   :  { %v5471_v60 = vsel %vm3372_vm6, %v5462_v32, %v5470_v9 }
 0x824   :  { %11093 = vmatpush1.bf16.msra.mxu1 %v11092_v49  ;;  %v5307_v49 = vld [vmem:[%s18670_s2 + $0x78] sm:$0xff] }
 0x825   :  { %11095 = vmatprep.subr.bf16.mxu1 %v11094_v7  ;;  %v5406_v7 = vld [vmem:[#allocation3 + $0xb0] sm:$0x1]  ;;  %v11118_v56 = vpack.c.bf16 %v5307_v49, %v5305_v0  ;;  %v5337_v0 = vld [vmem:[%s18670_s2 + $0x168] sm:$0xff]  ;;  %v5339_v49 = vld [vmem:[%s18670_s2 + $0x178] sm:$0xff] }
 0x826   :  { %v5468_v8 = vrot.slane %v5406_v7, 1 }
 0x828   :  { %11097 = vmatpush1.bf16.msra.mxu1 %v11096_v58  ;;  %v5306_v58 = vld [vmem:[%s18670_s2 + $0x70] sm:$0xff]  ;;  %v5469_v23 = vsel %vm3372_vm6, %v5459_v42, %v5468_v8 }
 0x829   :  { %11099 = vmatprep.subr.bf16.mxu1 %v11098_v26  ;;  %v5460_v26 = vsel %vm3372_vm6, %v5458_v12, %v5459_v42  ;;  %v11120_v3 = vpack.c.bf16 %v5306_v58, %v5304_v36  ;;  %v5332_v12 = vld [vmem:[%s18670_s2 + $0x140] sm:$0xff]  ;;  %v5334_v42 = vld [vmem:[%s18670_s2 + $0x150] sm:$0xff]  ;;  %v5341_v36 = vld [vmem:[%s18670_s2 + $0x188] sm:$0xff] }
 0x82a   :  { %v11148_v7 = vpack.c.bf16 %v5334_v42, %v5332_v12  ;;  %v5343_v58 = vld [vmem:[%s18670_s2 + $0x198] sm:$0xff]  ;;  %v5368_v42 = vld [vmem:[%s18670_s2 + $0x260] sm:$0xff] }
 0x82b   :  { %v11154_v8 = vpack.c.bf16 %v5343_v58, %v5341_v36  ;;  %v5374_v36 = vld [vmem:[%s18670_s2 + $0x290] sm:$0xff]  ;;  %v5279_v58 = vld [vmem:[#allocation3 + $0x18] sm:$0xff] }
 0x82c   :  { %11101 = vmatpush1.bf16.msra.mxu1 %v11100_v21  ;;  %v11122_v21 = vpack.c.bf16 %v5311_v38, %v5309_v61  ;;  %v5340_v61 = vld [vmem:[%s18670_s2 + $0x180] sm:$0xff]  ;;  %v5342_v38 = vld [vmem:[%s18670_s2 + $0x190] sm:$0xff] }
 0x82d   :  { %11103 = vmatprep.subr.bf16.mxu1 %v11102_v16  ;;  %v5308_v16 = vld [vmem:[%s18670_s2 + $0x80] sm:$0xff] }
 0x82e   :  { %v11124_v53 = vpack.c.bf16 %v5310_v43, %v5308_v16  ;;  %v11156_v16 = vpack.c.bf16 %v5342_v38, %v5340_v61 }
 0x830   :  { %11105 = vmatpush1.bf16.msra.mxu1 %v11104_v17  ;;  %v11126_v17 = vpack.c.bf16 %v5315_v45, %v5313_v1  ;;  %v5346_v1 = vld [vmem:[%s18670_s2 + $0x1b0] sm:$0xff]  ;;  %v5349_v45 = vld [vmem:[%s18670_s2 + $0x1c8] sm:$0xff] }
 0x831   :  { %11107 = vmatprep.subr.bf16.mxu1 %v11106_v34  ;;  %v5312_v34 = vld [vmem:[%s18670_s2 + $0xa0] sm:$0xff] }
 0x832   :  { %v11128_v11 = vpack.c.bf16 %v5314_v54, %v5312_v34  ;;  %v5348_v34 = vld [vmem:[%s18670_s2 + $0x1c0] sm:$0xff]  ;;  %v5350_v54 = vld [vmem:[%s18670_s2 + $0x1d0] sm:$0xff] }
 0x833   :  { %5746 = vmatmul.mubr.f32.vlgmr.msra.gmra.mrb[38].mxu1 %v5440_v29  ;;  %v11138_v29 = vpack.c.bf16 %v5327_v22, %v5325_v31  ;;  %v5361_v31 = vld [vmem:[%s18670_s2 + $0x228] sm:$0xff]  ;;  %v5363_v22 = vld [vmem:[%s18670_s2 + $0x238] sm:$0xff] }
 0x834   :  { %11109 = vmatpush1.bf16.msra.mxu1 %v11108_v44  ;;  %9276 = vmatprep.mubr.msk.f32.mxu1 %vm2991_vm5, %v5451_v52  ;;  %v11132_v44 = vpack.c.bf16 %v5318_v40, %v5316_v46  ;;  %v11134_v52 = vpack.c.bf16 %v5323_v30, %v5321_v18  ;;  %v5352_v46 = vld [vmem:[%s18670_s2 + $0x1e0] sm:$0xff]  ;;  %v5354_v40 = vld [vmem:[%s18670_s2 + $0x1f0] sm:$0xff]  ;;  %v5357_v18 = vld [vmem:[%s18670_s2 + $0x208] sm:$0xff] }
 0x835   :  { %11111 = vmatprep.subr.bf16.mxu1 %v11110_v47  ;;  %v5320_v47 = vld [vmem:[%s18670_s2 + $0xe0] sm:$0xff]  ;;  %v5359_v30 = vld [vmem:[%s18670_s2 + $0x218] sm:$0xff] }
 0x836   :  { %v11136_v32 = vpack.c.bf16 %v5322_v5, %v5320_v47  ;;  %v5356_v47 = vld [vmem:[%s18670_s2 + $0x200] sm:$0xff]  ;;  %v5358_v5 = vld [vmem:[%s18670_s2 + $0x210] sm:$0xff] }
 0x837   :  { %5752 = vmatmul.mubr.f32.gmra.mrb[40].mxu1 %v5449_v59  ;;  %v11146_v59 = vpack.c.bf16 %v5335_v41, %v5333_v37  ;;  %v5369_v37 = vld [vmem:[%s18670_s2 + $0x268] sm:$0xff]  ;;  %v5371_v41 = vld [vmem:[%s18670_s2 + $0x278] sm:$0xff] }
 0x838   :  { %11113 = vmatpush1.bf16.msra.mxu1 %v11112_v33  ;;  %9277 = vmatprep.mubr.msk.f32.mxu1 %vm2991_vm5, %v5463_v4  ;;  %v11142_v33 = vpack.c.bf16 %v5331_v62, %v5329_v39  ;;  %v5328_v4 = vld [vmem:[%s18670_s2 + $0x120] sm:$0xff]  ;;  %v5365_v39 = vld [vmem:[%s18670_s2 + $0x248] sm:$0xff]  ;;  %v5367_v62 = vld [vmem:[%s18670_s2 + $0x258] sm:$0xff]  ;;  %v11182_v12 = vpack.c.bf16 %v5371_v41, %v5369_v37 }
 0x839   :  { %11115 = vmatprep.subr.bf16.mxu1 %v11114_v14  ;;  %v5330_v14 = vld [vmem:[%s18670_s2 + $0x130] sm:$0xff]  ;;  %v5287_v37 = vld [vmem:[#allocation3 + $0x78] sm:$0xff] }
 0x83a   :  { %v11144_v9 = vpack.c.bf16 %v5330_v14, %v5328_v4  ;;  %v5364_v4 = vld [vmem:[%s18670_s2 + $0x240] sm:$0xff]  ;;  %v5366_v14 = vld [vmem:[%s18670_s2 + $0x250] sm:$0xff] }
 0x83b   :  { %5758 = vmatmul.mubr.f32.gmra.mrb[42].mxu1 %v5460_v26 }
 0x83c   :  { %11117 = vmatpush1.bf16.msra.mxu1 %v11116_v48  ;;  %9278 = vmatprep.mubr.msk.f32.mxu1 %vm2991_vm5, %v5471_v60  ;;  %v11150_v48 = vpack.c.bf16 %v5339_v49, %v5337_v0  ;;  %v5336_v60 = vld [vmem:[%s18670_s2 + $0x160] sm:$0xff]  ;;  %v5370_v0 = vld [vmem:[%s18670_s2 + $0x270] sm:$0xff]  ;;  %v5373_v49 = vld [vmem:[%s18670_s2 + $0x288] sm:$0xff] }
 0x83d   :  { %11119 = vmatprep.subr.bf16.mxu1 %v11118_v56  ;;  %v5338_v56 = vld [vmem:[%s18670_s2 + $0x170] sm:$0xff] }
 0x83e   :  { %v11152_v26 = vpack.c.bf16 %v5338_v56, %v5336_v60  ;;  %v5372_v56 = vld [vmem:[%s18670_s2 + $0x280] sm:$0xff] }
 0x83f   :  { %5764 = vmatmul.mubr.f32.gmra.mrb[44].mxu1 %v5469_v23  ;;  %v5344_v23 = vld [vmem:[%s18670_s2 + $0x1a0] sm:$0xff]  ;;  %v11188_v61 = vpack.c.bf16 %v5374_v36, %v5372_v56  ;;  %v5286_v56 = vld [vmem:[#allocation3 + $0x70] sm:$0xff]  ;;  %v6059_v36 = vld [vmem:[%s18670_s2 + $0x6c8] sm:$0xff] }
 0x840   :  { %11121 = vmatpush1.bf16.msra.mxu1 %v11120_v3  ;;  %5844 = vmatprep.mubr.f32.mxu1 %v5277_v13  ;;  %v5345_v3 = vld [vmem:[%s18670_s2 + $0x1a8] sm:$0xff]  ;;  %v5351_v13 = vld [vmem:[%s18670_s2 + $0x1d8] sm:$0xff] }
 0x841   :  { %11123 = vmatprep.subr.bf16.mxu1 %v11122_v21  ;;  %v5347_v21 = vld [vmem:[%s18670_s2 + $0x1b8] sm:$0xff] }
 0x842   :  { %v11158_v43 = vpack.c.bf16 %v5347_v21, %v5345_v3  ;;  %v5376_v3 = vld [vmem:[%s18670_s2 + $0x2a0] sm:$0xff]  ;;  %v5378_v21 = vld [vmem:[%s18670_s2 + $0x2b0] sm:$0xff] }
 0x844   :  { %11125 = vmatpush1.bf16.msra.mxu1 %v11124_v53  ;;  %v11160_v53 = vpack.c.bf16 %v5346_v1, %v5344_v23  ;;  %v11192_v23 = vpack.c.bf16 %v5378_v21, %v5376_v3  ;;  %v6058_v3 = vld [vmem:[%s18670_s2 + $0x6c0] sm:$0xff]  ;;  %v6060_v21 = vld [vmem:[%s18670_s2 + $0x6d0] sm:$0xff] }
 0x845   :  { %11127 = vmatprep.subr.bf16.mxu1 %v11126_v17  ;;  %v11162_v17 = vpack.c.bf16 %v5351_v13, %v5349_v45  ;;  %v5380_v45 = vld [vmem:[%s18670_s2 + $0x2c0] sm:$0xff]  ;;  %v5382_v13 = vld [vmem:[%s18670_s2 + $0x2d0] sm:$0xff] }
 0x848   :  { %11129 = vmatpush1.bf16.msra.mxu1 %v11128_v11  ;;  %v11164_v11 = vpack.c.bf16 %v5350_v54, %v5348_v34  ;;  %v11196_v34 = vpack.c.bf16 %v5382_v13, %v5380_v45  ;;  %v6062_v13 = vld [vmem:[%s18670_s2 + $0x6e0] sm:$0xff] }
 0x849   :  { %11131 = vmatprep.subr.bf16.mxu1 %v11130_v27  ;;  %v11166_v27 = vpack.c.bf16 %v5355_v55, %v5353_v15  ;;  %v5384_v15 = vld [vmem:[%s18670_s2 + $0x2e0] sm:$0xff]  ;;  %v5386_v55 = vld [vmem:[%s18670_s2 + $0x2f0] sm:$0xff] }
 0x84c   :  { %11133 = vmatpush1.bf16.msra.mxu1 %v11132_v44  ;;  %v11168_v44 = vpack.c.bf16 %v5354_v40, %v5352_v46  ;;  %v11200_v46 = vpack.c.bf16 %v5386_v55, %v5384_v15  ;;  %v6066_v55 = vld [vmem:[%s18670_s2 + $0x700] sm:$0xff] }
 0x84d   :  { %11135 = vmatprep.subr.bf16.mxu1 %v11134_v52  ;;  %v11170_v52 = vpack.c.bf16 %v5359_v30, %v5357_v18  ;;  %v5388_v18 = vld [vmem:[%s18670_s2 + $0x300] sm:$0xff]  ;;  %v5390_v30 = vld [vmem:[%s18670_s2 + $0x310] sm:$0xff] }
 0x850   :  { %11137 = vmatpush1.bf16.msra.mxu1 %v11136_v32  ;;  %v11172_v32 = vpack.c.bf16 %v5358_v5, %v5356_v47  ;;  %v11204_v47 = vpack.c.bf16 %v5390_v30, %v5388_v18  ;;  %v6070_v30 = vld [vmem:[%s18670_s2 + $0x720] sm:$0xff] }
 0x851   :  { %11139 = vmatprep.subr.bf16.mxu1 %v11138_v29  ;;  %v11174_v29 = vpack.c.bf16 %v5363_v22, %v5361_v31  ;;  %v6042_v31 = vld [vmem:[%s18670_s2 + $0x640] sm:$0xff]  ;;  %v6044_v22 = vld [vmem:[%s18670_s2 + $0x650] sm:$0xff] }
 0x854   :  { %11141 = vmatpush1.bf16.msra.mxu1 %v11140_v57  ;;  %v11176_v57 = vpack.c.bf16 %v5362_v25, %v5360_v2  ;;  %v11208_v2 = vpack.c.bf16 %v6044_v22, %v6042_v31  ;;  %v6074_v22 = vld [vmem:[%s18670_s2 + $0x740] sm:$0xff] }
 0x855   :  { %11143 = vmatprep.subr.bf16.mxu1 %v11142_v33  ;;  %v11178_v33 = vpack.c.bf16 %v5367_v62, %v5365_v39  ;;  %v6046_v39 = vld [vmem:[%s18670_s2 + $0x660] sm:$0xff]  ;;  %v6048_v62 = vld [vmem:[%s18670_s2 + $0x670] sm:$0xff] }
 0x858   :  { %11145 = vmatpush1.bf16.msra.mxu1 %v11144_v9  ;;  %v5285_v9 = vld [vmem:[#allocation3 + $0x68] sm:$0xff] }
 0x859   :  { %11147 = vmatprep.subr.bf16.mxu1 %v11146_v59  ;;  %v11180_v59 = vpack.c.bf16 %v5366_v14, %v5364_v4  ;;  %v6053_v4 = vld [vmem:[%s18670_s2 + $0x698] sm:$0xff]  ;;  %v11212_v14 = vpack.c.bf16 %v6048_v62, %v6046_v39  ;;  %v6078_v62 = vld [vmem:[%s18670_s2 + $0x760] sm:$0xff] }
 0x85c   :  { %11149 = vmatpush1.bf16.msra.mxu1 %v11148_v7  ;;  %v5375_v7 = vld [vmem:[%s18670_s2 + $0x298] sm:$0xff] }
 0x85d   :  { %11151 = vmatprep.subr.bf16.mxu1 %v11150_v48  ;;  %v11184_v48 = vpack.c.bf16 %v5370_v0, %v5368_v42  ;;  %v11186_v60 = vpack.c.bf16 %v5375_v7, %v5373_v49  ;;  %v6057_v42 = vld [vmem:[%s18670_s2 + $0x6b8] sm:$0xff]  ;;  %v5959_v49 = vld [vmem:[#allocation3 + $0x8] sm:$0xfc] }
 0x860   :  { %11153 = vmatpush1.bf16.msra.mxu1 %v11152_v26  ;;  %v5377_v26 = vld [vmem:[%s18670_s2 + $0x2a8] sm:$0xff] }
 0x861   :  { %11155 = vmatprep.subr.bf16.mxu1 %v11154_v8  ;;  %v5379_v8 = vld [vmem:[%s18670_s2 + $0x2b8] sm:$0xff] }
 0x862   :  { %v11190_v38 = vpack.c.bf16 %v5379_v8, %v5377_v26  ;;  %v5993_v26 = vrot.slane %v5959_v49, 2  ;;  %v5994_v8 = vrot.slane %v15798_v28, 2  ;;  %v6086_v49 = vld [vmem:[%s18670_s2 + $0x7a0] sm:$0xff] }
 0x864   :  { %11157 = vmatpush1.bf16.msra.mxu1 %v11156_v16  ;;  %v5381_v16 = vld [vmem:[%s18670_s2 + $0x2c8] sm:$0xff] }
 0x865   :  { %11159 = vmatprep.subr.bf16.mxu1 %v11158_v43  ;;  %v5383_v43 = vld [vmem:[%s18670_s2 + $0x2d8] sm:$0xff] }
 0x866   :  { %v11194_v1 = vpack.c.bf16 %v5383_v43, %v5381_v16  ;;  %v6063_v16 = vld [vmem:[%s18670_s2 + $0x6e8] sm:$0xff]  ;;  %v6065_v43 = vld [vmem:[%s18670_s2 + $0x6f8] sm:$0xff] }
 0x867   :  { %v11226_v45 = vpack.c.bf16 %v6065_v43, %v6063_v16  ;;  %v6094_v16 = vld [vmem:[%s18670_s2 + $0x7e0] sm:$0xff]  ;;  %v6096_v43 = vld [vmem:[%s18670_s2 + $0x7f0] sm:$0xff] }
 0x868   :  { %11161 = vmatpush1.bf16.msra.mxu1 %v11160_v53  ;;  %v5385_v53 = vld [vmem:[%s18670_s2 + $0x2e8] sm:$0xff] }
 0x869   :  { %11163 = vmatprep.subr.bf16.mxu1 %v11162_v17  ;;  %v5387_v17 = vld [vmem:[%s18670_s2 + $0x2f8] sm:$0xff] }
 0x86a   :  { %v11198_v54 = vpack.c.bf16 %v5387_v17, %v5385_v53  ;;  %v6064_v53 = vld [vmem:[%s18670_s2 + $0x6f0] sm:$0xff]  ;;  %v6067_v17 = vld [vmem:[%s18670_s2 + $0x708] sm:$0xff] }
 0x86c   :  { %11165 = vmatpush1.bf16.msra.mxu1 %v11164_v11  ;;  %v5389_v11 = vld [vmem:[%s18670_s2 + $0x308] sm:$0xff] }
 0x86d   :  { %11167 = vmatprep.subr.bf16.mxu1 %v11166_v27  ;;  %v5391_v27 = vld [vmem:[%s18670_s2 + $0x318] sm:$0xff] }
 0x86e   :  { %v11202_v40 = vpack.c.bf16 %v5391_v27, %v5389_v11  ;;  %v6068_v11 = vld [vmem:[%s18670_s2 + $0x710] sm:$0xff]  ;;  %v6071_v27 = vld [vmem:[%s18670_s2 + $0x728] sm:$0xff] }
 0x870   :  { %11169 = vmatpush1.bf16.msra.mxu1 %v11168_v44  ;;  %v6043_v44 = vld [vmem:[%s18670_s2 + $0x648] sm:$0xff] }
 0x871   :  { %11171 = vmatprep.subr.bf16.mxu1 %v11170_v52  ;;  %v6045_v52 = vld [vmem:[%s18670_s2 + $0x658] sm:$0xff] }
 0x872   :  { %v11206_v5 = vpack.c.bf16 %v6045_v52, %v6043_v44  ;;  %v6072_v44 = vld [vmem:[%s18670_s2 + $0x730] sm:$0xff]  ;;  %v6075_v52 = vld [vmem:[%s18670_s2 + $0x748] sm:$0xff] }
 0x873   :  { %5845 = vmatmul.mubr.f32.vlgmr.msra.gmra.mrb[38].mxu1 %v15781_v20 }
 0x874   :  { %5850 = vmatprep.mubr.f32.mxu1 %v15798_v28  ;;  %11173 = vmatpush1.bf16.msra.mxu1 %v11172_v32  ;;  %v6047_v32 = vld [vmem:[%s18670_s2 + $0x668] sm:$0xff]  ;;  %v6116_v28 = vld [vmem:[%s18670_s2 + $0x890] sm:$0xff] }
 0x875   :  { %11175 = vmatprep.subr.bf16.mxu1 %v11174_v29  ;;  %v6049_v29 = vld [vmem:[%s18670_s2 + $0x678] sm:$0xff] }
 0x876   :  { %v11210_v25 = vpack.c.bf16 %v6049_v29, %v6047_v32  ;;  %v6076_v32 = vld [vmem:[%s18670_s2 + $0x750] sm:$0xff]  ;;  %v6079_v29 = vld [vmem:[%s18670_s2 + $0x768] sm:$0xff] }
 0x877   :  { %5851 = vmatmul.mubr.f32.gmra.mrb[40].mxu1 %v15781_v20 }
 0x878   :  { %5856 = vmatprep.mubr.f32.mxu1 %v5285_v9  ;;  %11177 = vmatpush1.bf16.msra.mxu1 %v11176_v57  ;;  %v5278_v57 = vld [vmem:[#allocation3 + $0x10] sm:$0xff]  ;;  %v6050_v9 = vld [vmem:[%s18670_s2 + $0x680] sm:$0xff] }
 0x879   :  { %11179 = vmatprep.subr.bf16.mxu1 %v11178_v33  ;;  %v6051_v33 = vld [vmem:[%s18670_s2 + $0x688] sm:$0xff] }
 0x87a   :  { %v11214_v41 = vpack.c.bf16 %v6053_v4, %v6051_v33  ;;  %v6083_v33 = vld [vmem:[%s18670_s2 + $0x788] sm:$0xff]  ;;  %v6085_v4 = vld [vmem:[%s18670_s2 + $0x798] sm:$0xff] }
 0x87b   :  { %5857 = vmatmul.mubr.f32.gmra.mrb[42].mxu1 %v15781_v20 }
 0x87c   :  { %5862 = vmatprep.mubr.f32.mxu1 %v15803_v10  ;;  %11181 = vmatpush1.bf16.msra.mxu1 %v11180_v59  ;;  %v6052_v59 = vld [vmem:[%s18670_s2 + $0x690] sm:$0xff] }
 0x87d   :  { %11183 = vmatprep.subr.bf16.mxu1 %v11182_v12  ;;  %v6055_v12 = vld [vmem:[%s18670_s2 + $0x6a8] sm:$0xff]  ;;  %v11216_v0 = vpack.c.bf16 %v6052_v59, %v6050_v9  ;;  %v6084_v9 = vld [vmem:[%s18670_s2 + $0x790] sm:$0xff] }
 0x87e   :  { %v11218_v7 = vpack.c.bf16 %v6057_v42, %v6055_v12  ;;  %v6087_v59 = vld [vmem:[%s18670_s2 + $0x7a8] sm:$0xff]  ;;  %v6089_v12 = vld [vmem:[%s18670_s2 + $0x7b8] sm:$0xff] }
 0x87f   :  { %5863 = vmatmul.mubr.f32.gmra.mrb[44].mxu1 %v15781_v20 }
 0x880   :  { %11185 = vmatpush1.bf16.msra.mxu1 %v11184_v48  ;;  %9279 = vmatprep.mubr.msk.f32.mxu1 %vm2991_vm5, %v5279_v58  ;;  %v6054_v48 = vld [vmem:[%s18670_s2 + $0x6a0] sm:$0xff]  ;;  %v6061_v58 = vld [vmem:[%s18670_s2 + $0x6d8] sm:$0xff] }
 0x881   :  { %11187 = vmatprep.subr.bf16.mxu1 %v11186_v60  ;;  %v6056_v60 = vld [vmem:[%s18670_s2 + $0x6b0] sm:$0xff] }
 0x884   :  { %11189 = vmatpush1.bf16.msra.mxu1 %v11188_v61  ;;  %v11220_v61 = vpack.c.bf16 %v6056_v60, %v6054_v48  ;;  %v6091_v48 = vld [vmem:[%s18670_s2 + $0x7c8] sm:$0xff]  ;;  %v6093_v60 = vld [vmem:[%s18670_s2 + $0x7d8] sm:$0xff] }
 0x885   :  { %11191 = vmatprep.subr.bf16.mxu1 %v11190_v38  ;;  %v11222_v38 = vpack.c.bf16 %v6061_v58, %v6059_v36  ;;  %v11254_v36 = vpack.c.bf16 %v6093_v60, %v6091_v48  ;;  %v6090_v58 = vld [vmem:[%s18670_s2 + $0x7c0] sm:$0xff]  ;;  %v5971_v48 = vld [vmem:[#allocation3 + $0xa8] sm:$0x3] }
 0x888   :  { %11193 = vmatpush1.bf16.msra.mxu1 %v11192_v23  ;;  %v5995_v23 = vsel %vm440_vm1, %v5993_v26, %v5994_v8  ;;  %v6092_v26 = vld [vmem:[%s18670_s2 + $0x7d0] sm:$0xff] }
 0x889   :  { %11195 = vmatprep.subr.bf16.mxu1 %v11194_v1  ;;  %v11224_v1 = vpack.c.bf16 %v6060_v21, %v6058_v3  ;;  %v11256_v3 = vpack.c.bf16 %v6092_v26, %v6090_v58  ;;  %v5961_v58 = vld [vmem:[#allocation3 + $0x18] sm:$0xfc] }
 0x88c   :  { %11197 = vmatpush1.bf16.msra.mxu1 %v11196_v34  ;;  %v6069_v34 = vld [vmem:[%s18670_s2 + $0x718] sm:$0xff] }
 0x88d   :  { %11199 = vmatprep.subr.bf16.mxu1 %v11198_v54  ;;  %v11228_v54 = vpack.c.bf16 %v6064_v53, %v6062_v13  ;;  %v11230_v15 = vpack.c.bf16 %v6069_v34, %v6067_v17  ;;  %v6098_v53 = vld [vmem:[%s18670_s2 + $0x800] sm:$0xff]  ;;  %v6100_v17 = vld [vmem:[%s18670_s2 + $0x810] sm:$0xff]  ;;  %v6103_v34 = vld [vmem:[%s18670_s2 + $0x828] sm:$0xff] }
 0x890   :  { %11201 = vmatpush1.bf16.msra.mxu1 %v11200_v46  ;;  %v6073_v46 = vld [vmem:[%s18670_s2 + $0x738] sm:$0xff] }
 0x891   :  { %11203 = vmatprep.subr.bf16.mxu1 %v11202_v40  ;;  %v11232_v40 = vpack.c.bf16 %v6068_v11, %v6066_v55  ;;  %v11234_v18 = vpack.c.bf16 %v6073_v46, %v6071_v27  ;;  %v6102_v11 = vld [vmem:[%s18670_s2 + $0x820] sm:$0xff]  ;;  %v6104_v27 = vld [vmem:[%s18670_s2 + $0x830] sm:$0xff] }
 0x892   :  { %v5958_v46 = vld [vmem:[#allocation3] sm:$0xfc] }
 0x894   :  { %11205 = vmatpush1.bf16.msra.mxu1 %v11204_v47  ;;  %v6077_v47 = vld [vmem:[%s18670_s2 + $0x758] sm:$0xff] }
 0x895   :  { %11207 = vmatprep.subr.bf16.mxu1 %v11206_v5  ;;  %v11236_v5 = vpack.c.bf16 %v6072_v44, %v6070_v30  ;;  %v11238_v31 = vpack.c.bf16 %v6077_v47, %v6075_v52  ;;  %v11268_v30 = vpack.c.bf16 %v6104_v27, %v6102_v11  ;;  %v5990_v44 = vrot.slane %v5958_v46, 2  ;;  %v5963_v47 = vld [vmem:[#allocation3 + $0x48] sm:$0x3]  ;;  %v6129_v46 = vld [vmem:[%s18670_s2 + $0x8f8] sm:$0xff] }
 0x896   :  { %v5991_v52 = vrot.slane %v15781_v20, 2  ;;  %v6113_v20 = vld [vmem:[%s18670_s2 + $0x878] sm:$0xff]  ;;  %v6127_v27 = vld [vmem:[%s18670_s2 + $0x8e8] sm:$0xff] }
 0x897   :  { %5934 = vmatmul.mubr.f32.vlgmr.msra.gmra.mrb[38].mxu1 %v5278_v57  ;;  %v6080_v57 = vld [vmem:[%s18670_s2 + $0x770] sm:$0xff] }
 0x898   :  { %11209 = vmatpush1.bf16.msra.mxu1 %v11208_v2  ;;  %9280 = vmatprep.mubr.msk.f32.mxu1 %vm2991_vm5, %v15834_v63  ;;  %v6081_v2 = vld [vmem:[%s18670_s2 + $0x778] sm:$0xff] }
 0x899   :  { %11211 = vmatprep.subr.bf16.mxu1 %v11210_v25  ;;  %v11240_v25 = vpack.c.bf16 %v6076_v32, %v6074_v22  ;;  %v11242_v39 = vpack.c.bf16 %v6081_v2, %v6079_v29  ;;  %v6108_v22 = vld [vmem:[%s18670_s2 + $0x850] sm:$0xff]  ;;  %v5962_v32 = vld [vmem:[#allocation3 + $0x40] sm:$0x3]  ;;  %v6111_v29 = vld [vmem:[%s18670_s2 + $0x868] sm:$0xff]  ;;  %v6004_v2 = vrot.slane %v5963_v47, 2 }
 0x89a   :  { %v6133_v47 = vld [vmem:[%s18670_s2 + $0x918] sm:$0xff] }
 0x89b   :  { %5940 = vmatmul.mubr.f32.gmra.mrb[40].mxu1 %v15919_v24 }
 0x89c   :  { %11213 = vmatpush1.bf16.msra.mxu1 %v11212_v14  ;;  %9281 = vmatprep.mubr.msk.f32.mxu1 %vm2991_vm5, %v5287_v37  ;;  %v11244_v14 = vpack.c.bf16 %v6080_v57, %v6078_v62  ;;  %v11246_v37 = vpack.c.bf16 %v6085_v4, %v6083_v33  ;;  %v6002_v62 = vrot.slane %v5962_v32, 2  ;;  %v5967_v57 = vld [vmem:[#allocation3 + $0x68] sm:$0xfc]  ;;  %v11274_v33 = vpack.c.bf16 %v6113_v20, %v6111_v29  ;;  %v6110_v4 = vld [vmem:[%s18670_s2 + $0x860] sm:$0xff]  ;;  %v6132_v32 = vld [vmem:[%s18670_s2 + $0x910] sm:$0xff] }
 0x89d   :  { %11215 = vmatprep.subr.bf16.mxu1 %v11214_v41  ;;  %v6082_v41 = vld [vmem:[%s18670_s2 + $0x780] sm:$0xff]  ;;  %v6135_v29 = vld [vmem:[%s18670_s2 + $0x928] sm:$0xff]  ;;  %v6137_v20 = vld [vmem:[%s18670_s2 + $0x938] sm:$0xff] }
 0x89e   :  { %v11248_v42 = vpack.c.bf16 %v6084_v9, %v6082_v41  ;;  %v6115_v41 = vld [vmem:[%s18670_s2 + $0x888] sm:$0xff]  ;;  %v6117_v9 = vld [vmem:[%s18670_s2 + $0x898] sm:$0xff] }
 0x89f   :  { %5946 = vmatmul.mubr.f32.gmra.mrb[42].mxu1 %v5286_v56  ;;  %v11278_v60 = vpack.c.bf16 %v6117_v9, %v6115_v41  ;;  %v6140_v41 = vld [vmem:[%s18670_s2 + $0x950] sm:$0xff]  ;;  %v5965_v9 = vld [vmem:[#allocation3 + $0x58] sm:$0x3] }
 0x8a0   :  { %11217 = vmatpush1.bf16.msra.mxu1 %v11216_v0  ;;  %9282 = vmatprep.mubr.msk.f32.mxu1 %vm2991_vm5, %v15934_v51  ;;  %v11250_v0 = vpack.c.bf16 %v6089_v12, %v6087_v59  ;;  %v6005_v59 = vsel %vm440_vm1, %v5994_v8, %v6004_v2  ;;  %v6013_v12 = vrot.slane %v5967_v57, 2  ;;  %v5970_v8 = vld [vmem:[#allocation3 + $0xa0] sm:$0x3]  ;;  %v6139_v57 = vld [vmem:[%s18670_s2 + $0x948] sm:$0xff] }
 0x8a1   :  { %11219 = vmatprep.subr.bf16.mxu1 %v11218_v7  ;;  %v6088_v7 = vld [vmem:[%s18670_s2 + $0x7b0] sm:$0xff] }
 0x8a2   :  { %v11252_v56 = vpack.c.bf16 %v6088_v7, %v6086_v49 }
 0x8a3   :  { %5952 = vmatmul.mubr.f32.gmra.mrb[44].mxu1 %v15953_v19 }
 0x8a4   :  { %11221 = vmatpush1.bf16.msra.mxu1 %v11220_v61  ;;  %6214 = vmatprep.mubr.f32.mxu1 %v5995_v23  ;;  %v6095_v61 = vld [vmem:[%s18670_s2 + $0x7e8] sm:$0xff] }
 0x8a5   :  { %11223 = vmatprep.subr.bf16.mxu1 %v11222_v38  ;;  %v6097_v38 = vld [vmem:[%s18670_s2 + $0x7f8] sm:$0xff]  ;;  %v6099_v23 = vld [vmem:[%s18670_s2 + $0x808] sm:$0xff] }
 0x8a6   :  { %v11258_v21 = vpack.c.bf16 %v6097_v38, %v6095_v61  ;;  %v6024_v61 = vrot.slane %v5971_v48, 2  ;;  %v5964_v48 = vld [vmem:[#allocation3 + $0x50] sm:$0x3] }
 0x8a8   :  { %11225 = vmatpush1.bf16.msra.mxu1 %v11224_v1  ;;  %v6101_v1 = vld [vmem:[%s18670_s2 + $0x818] sm:$0xff] }
 0x8a9   :  { %11227 = vmatprep.subr.bf16.mxu1 %v11226_v45  ;;  %v11260_v45 = vpack.c.bf16 %v6096_v43, %v6094_v16  ;;  %v11262_v13 = vpack.c.bf16 %v6101_v1, %v6099_v23  ;;  %v6118_v43 = vld [vmem:[%s18670_s2 + $0x8a0] sm:$0xff]  ;;  %v6120_v23 = vld [vmem:[%s18670_s2 + $0x8b0] sm:$0xff]  ;;  %v5999_v1 = vrot.slane %v5961_v58, 2 }
 0x8aa   :  { %v5968_v58 = vld [vmem:[#allocation3 + $0x70] sm:$0xfc] }
 0x8ac   :  { %11229 = vmatpush1.bf16.msra.mxu1 %v11228_v54  ;;  %v6105_v54 = vld [vmem:[%s18670_s2 + $0x838] sm:$0xff] }
 0x8ad   :  { %11231 = vmatprep.subr.bf16.mxu1 %v11230_v15  ;;  %v11264_v15 = vpack.c.bf16 %v6100_v17, %v6098_v53  ;;  %v11266_v55 = vpack.c.bf16 %v6105_v54, %v6103_v34  ;;  %v6125_v53 = vld [vmem:[%s18670_s2 + $0x8d8] sm:$0xff]  ;;  %v11284_v34 = vpack.c.bf16 %v6120_v23, %v6118_v43 }
 0x8b0   :  { %11233 = vmatpush1.bf16.msra.mxu1 %v11232_v40  ;;  %v6107_v40 = vld [vmem:[%s18670_s2 + $0x848] sm:$0xff] }
 0x8b1   :  { %11235 = vmatprep.subr.bf16.mxu1 %v11234_v18  ;;  %v6109_v18 = vld [vmem:[%s18670_s2 + $0x858] sm:$0xff] }
 0x8b4   :  { %11237 = vmatpush1.bf16.msra.mxu1 %v11236_v5  ;;  %v11270_v5 = vpack.c.bf16 %v6109_v18, %v6107_v40  ;;  %v11290_v18 = vpack.c.bf16 %v6129_v46, %v6127_v27  ;;  %v6400_v27 = vld [vmem:[%s18675_s7 + $0xa0] sm:$0xff]  ;;  %v6401_v46 = vld [vmem:[%s18675_s7 + $0xa8] sm:$0xff] }
 0x8b5   :  { %11239 = vmatprep.subr.bf16.mxu1 %v11238_v31  ;;  %v6106_v31 = vld [vmem:[%s18670_s2 + $0x840] sm:$0xff] }
 0x8b8   :  { %11241 = vmatpush1.bf16.msra.mxu1 %v11240_v25  ;;  %v5992_v25 = vsel %vm440_vm1, %v5990_v44, %v5991_v52  ;;  %v6128_v44 = vld [vmem:[%s18670_s2 + $0x8f0] sm:$0xff] }
 0x8b9   :  { %11243 = vmatprep.subr.bf16.mxu1 %v11242_v39  ;;  %v11272_v39 = vpack.c.bf16 %v6108_v22, %v6106_v31  ;;  %v6130_v22 = vld [vmem:[%s18670_s2 + $0x900] sm:$0xff] }
 0x8ba   :  { %v11296_v2 = vpack.c.bf16 %v6132_v32, %v6130_v22  ;;  %v6387_v22 = vld [vmem:[%s18675_s7 + $0x38] sm:$0xff]  ;;  %v6404_v32 = vld [vmem:[%s18675_s7 + $0xc0] sm:$0xff] }
 0x8bc   :  { %11245 = vmatpush1.bf16.msra.mxu1 %v11244_v14  ;;  %v6112_v14 = vld [vmem:[%s18670_s2 + $0x870] sm:$0xff] }
 0x8bd   :  { %11247 = vmatprep.subr.bf16.mxu1 %v11246_v37  ;;  %v5966_v37 = vld [vmem:[#allocation3 + $0x60] sm:$0xfc]  ;;  %v11276_v49 = vpack.c.bf16 %v6112_v14, %v6110_v4 }
 0x8be   :  { %v6010_v7 = vrot.slane %v5966_v37, 2  ;;  %v6138_v37 = vld [vmem:[%s18670_s2 + $0x940] sm:$0xff] }
 0x8c0   :  { %11249 = vmatpush1.bf16.msra.mxu1 %v11248_v42  ;;  %v6014_v42 = vrot.slane %v15803_v10, 2  ;;  %v6119_v10 = vld [vmem:[%s18670_s2 + $0x8a8] sm:$0xff]  ;;  %v6012_v38 = vsel %vm440_vm1, %v6010_v7, %v5991_v52  ;;  %v5969_v7 = vld [vmem:[#allocation3 + $0x78] sm:$0xfc] }
 0x8c1   :  { %11251 = vmatprep.subr.bf16.mxu1 %v11250_v0  ;;  %v6003_v0 = vsel %vm440_vm1, %v5991_v52, %v6002_v62  ;;  %v6136_v62 = vld [vmem:[%s18670_s2 + $0x930] sm:$0xff] }
 0x8c2   :  { %v6015_v26 = vsel %vm440_vm1, %v6013_v12, %v6014_v42  ;;  %v6025_v17 = vsel %vm440_vm1, %v6014_v42, %v6024_v61  ;;  %v11304_v12 = vpack.c.bf16 %v6140_v41, %v6138_v37  ;;  %v6008_v42 = vrot.slane %v5965_v9, 2  ;;  %v6391_v37 = vld [vmem:[%s18675_s7 + $0x58] sm:$0xff]  ;;  %v6408_v41 = vld [vmem:[%s18675_s7 + $0xe0] sm:$0xff]  ;;  %v6409_v9 = vld [vmem:[%s18675_s7 + $0xe8] sm:$0xff] }
 0x8c4   :  { %11253 = vmatpush1.bf16.msra.mxu1 %v11252_v56  ;;  %v6114_v56 = vld [vmem:[%s18670_s2 + $0x880] sm:$0xff] }
 0x8c5   :  { %11255 = vmatprep.subr.bf16.mxu1 %v11254_v36  ;;  %v6121_v36 = vld [vmem:[%s18670_s2 + $0x8b8] sm:$0xff] }
 0x8c6   :  { %v11282_v16 = vpack.c.bf16 %v6121_v36, %v6119_v10  ;;  %v6006_v10 = vrot.slane %v5964_v48, 2  ;;  %v5973_v36 = vld [vmem:[#allocation3 + $0xb8] sm:$0x3] }
 0x8c7   :  { %v6028_v61 = vrot.slane %v5973_v36, 2 }
 0x8c8   :  { %11257 = vmatpush1.bf16.msra.mxu1 %v11256_v3  ;;  %v11280_v3 = vpack.c.bf16 %v6116_v28, %v6114_v56  ;;  %v6019_v56 = vrot.slane %v5969_v7, 2  ;;  %v6020_v28 = vrot.slane %v15934_v51, 2  ;;  %v6411_v7 = vld [vmem:[%s18675_s7 + $0xf8] sm:$0xff] }
 0x8c9   :  { %11259 = vmatprep.subr.bf16.mxu1 %v11258_v21  ;;  %v6022_v21 = vrot.slane %v5970_v8, 2 }
 0x8ca   :  { %v6029_v51 = vsel %vm440_vm1, %v6020_v28, %v6028_v61 }
 0x8cb   :  { %v6023_v54 = vsel %vm440_vm1, %v5991_v52, %v6022_v21  ;;  %v6131_v52 = vld [vmem:[%s18670_s2 + $0x908] sm:$0xff]  ;;  %v5972_v21 = vld [vmem:[#allocation3 + $0xb0] sm:$0x3] }
 0x8cc   :  { %11261 = vmatpush1.bf16.msra.mxu1 %v11260_v45  ;;  %v6000_v45 = vrot.slane %v15834_v63, 2  ;;  %v6122_v63 = vld [vmem:[%s18670_s2 + $0x8c0] sm:$0xff]  ;;  %v11294_v31 = vpack.c.bf16 %v6133_v47, %v6131_v52  ;;  %v6026_v43 = vrot.slane %v5972_v21, 2  ;;  %v6402_v52 = vld [vmem:[%s18675_s7 + $0xb0] sm:$0xff]  ;;  %v6403_v47 = vld [vmem:[%s18675_s7 + $0xb8] sm:$0xff] }
 0x8cd   :  { %11263 = vmatprep.subr.bf16.mxu1 %v11262_v13  ;;  %v6123_v13 = vld [vmem:[%s18670_s2 + $0x8c8] sm:$0xff] }
 0x8ce   :  { %v6001_v11 = vsel %vm440_vm1, %v5999_v1, %v6000_v45  ;;  %v6396_v1 = vld [vmem:[%s18675_s7 + $0x80] sm:$0xff] }
 0x8d0   :  { %11265 = vmatpush1.bf16.msra.mxu1 %v11264_v15  ;;  %v11286_v15 = vpack.c.bf16 %v6125_v53, %v6123_v13  ;;  %v6380_v13 = vld [vmem:[%s18675_s7] sm:$0xff]  ;;  %v6381_v53 = vld [vmem:[%s18675_s7 + $0x8] sm:$0xff] }
 0x8d1   :  { %11267 = vmatprep.subr.bf16.mxu1 %v11266_v55  ;;  %v6124_v55 = vld [vmem:[%s18670_s2 + $0x8d0] sm:$0xff] }
 0x8d2   :  { %v11288_v40 = vpack.c.bf16 %v6124_v55, %v6122_v63  ;;  %v6382_v63 = vld [vmem:[%s18675_s7 + $0x10] sm:$0xff]  ;;  %v6383_v55 = vld [vmem:[%s18675_s7 + $0x18] sm:$0xff] }
 0x8d4   :  { %11269 = vmatpush1.bf16.msra.mxu1 %v11268_v30  ;;  %v6126_v30 = vld [vmem:[%s18670_s2 + $0x8e0] sm:$0xff] }
 0x8d5   :  { %11271 = vmatprep.subr.bf16.mxu1 %v11270_v5  ;;  %v11292_v5 = vpack.c.bf16 %v6128_v44, %v6126_v30  ;;  %v6385_v30 = vld [vmem:[%s18675_s7 + $0x28] sm:$0xff] }
 0x8d7   :  { %6215 = vmatmul.mubr.f32.vlgmr.msra.gmra.mrb[38].mxu1 %v5992_v25  ;;  %v11298_v25 = vpack.c.bf16 %v6137_v20, %v6135_v29  ;;  %v6405_v29 = vld [vmem:[%s18675_s7 + $0xc8] sm:$0xff] }
 0x8d8   :  { %6220 = vmatprep.mubr.f32.mxu1 %v6005_v59  ;;  %11273 = vmatpush1.bf16.msra.mxu1 %v11272_v39  ;;  %v6134_v39 = vld [vmem:[%s18670_s2 + $0x920] sm:$0xff]  ;;  %v5960_v59 = vld [vmem:[#allocation3 + $0x10] sm:$0xfc] }
 0x8d9   :  { %11275 = vmatprep.subr.bf16.mxu1 %v11274_v33  ;;  %v6141_v33 = vld [vmem:[%s18670_s2 + $0x958] sm:$0xff]  ;;  %v11300_v4 = vpack.c.bf16 %v6136_v62, %v6134_v39  ;;  %v6389_v39 = vld [vmem:[%s18675_s7 + $0x48] sm:$0xff]  ;;  %v6406_v62 = vld [vmem:[%s18675_s7 + $0xd0] sm:$0xff] }
 0x8da   :  { %v11302_v14 = vpack.c.bf16 %v6141_v33, %v6139_v57  ;;  %v6407_v57 = vld [vmem:[%s18675_s7 + $0xd8] sm:$0xff] }
 0x8db   :  { %6221 = vmatmul.mubr.f32.gmra.mrb[40].mxu1 %v6003_v0  ;;  %v5996_v0 = vrot.slane %v5960_v59, 2 }
 0x8dc   :  { %6226 = vmatprep.mubr.f32.mxu1 %v6015_v26  ;;  %11277 = vmatpush1.bf16.msra.mxu1 %v11276_v49  ;;  %v5997_v49 = vrot.slane %v15919_v24, 2  ;;  %v6021_v26 = vsel %vm440_vm1, %v6019_v56, %v6020_v28  ;;  %v6394_v56 = vld [vmem:[%s18675_s7 + $0x70] sm:$0xff]  ;;  %v6395_v28 = vld [vmem:[%s18675_s7 + $0x78] sm:$0xff] }
 0x8dd   :  { %11279 = vmatprep.subr.bf16.mxu1 %v11278_v60  ;;  %v6009_v60 = vsel %vm440_vm1, %v6000_v45, %v6008_v42  ;;  %v6392_v42 = vld [vmem:[%s18675_s7 + $0x60] sm:$0xff] }
 0x8de   :  { %v5998_v8 = vsel %vm440_vm1, %v5996_v0, %v5997_v49  ;;  %v6007_v24 = vsel %vm440_vm1, %v5997_v49, %v6006_v10  ;;  %v6393_v0 = vld [vmem:[%s18675_s7 + $0x68] sm:$0xff]  ;;  %v6410_v49 = vld [vmem:[%s18675_s7 + $0xf0] sm:$0xff] }
 0x8df   :  { %6227 = vmatmul.mubr.f32.gmra.mrb[42].mxu1 %v6012_v38  ;;  %v6016_v38 = vrot.slane %v5968_v58, 2  ;;  %v11332_v48 = vpack.c.bf16 %v6393_v0, %v6392_v42 }
 0x8e0   :  { %6232 = vmatprep.mubr.f32.mxu1 %v6025_v17  ;;  %11281 = vmatpush1.bf16.msra.mxu1 %v11280_v3  ;;  %v6017_v3 = vrot.slane %v15953_v19, 2  ;;  %v6397_v19 = vld [vmem:[%s18675_s7 + $0x88] sm:$0xff]  ;;  %v11308_v17 = vpack.c.bf16 %v6381_v53, %v6380_v13 }
 0x8e1   :  { %11283 = vmatprep.subr.bf16.mxu1 %v11282_v16  ;;  %v11306_v45 = vpack.c.bf16 %v6397_v19, %v6396_v1 }
 0x8e2   :  { %v6018_v16 = vsel %vm440_vm1, %v6016_v38, %v6017_v3  ;;  %v6027_v23 = vsel %vm440_vm1, %v6017_v3, %v6026_v43 }
 0x8e3   :  { %6233 = vmatmul.mubr.f32.gmra.mrb[44].mxu1 %v6023_v54  ;;  %11307 = vmatprep.subr.bf16.mxu0 %v11306_v45  ;;  %v6399_v54 = vld [vmem:[%s18675_s7 + $0x98] sm:$0xff] }
 0x8e4   :  { %11285 = vmatpush1.bf16.msra.mxu1 %v11284_v34  ;;  %9283 = vmatprep.mubr.msk.f32.mxu1 %vm2991_vm5, %v6001_v11  ;;  %v6398_v34 = vld [vmem:[%s18675_s7 + $0x90] sm:$0xff]  ;;  %v11312_v11 = vpack.c.bf16 %v6383_v55, %v6382_v63 }
 0x8e5   :  { %11287 = vmatprep.subr.bf16.mxu1 %v11286_v15  ;;  %11309 = vmatpush3.bf16.msra.mxu0 %v11308_v17  ;;  %v11310_v15 = vpack.c.bf16 %v6399_v54, %v6398_v34 }
 0x8e7   :  { %11311 = vmatprep.subr.bf16.mxu0 %v11310_v15 }
 0x8e8   :  { %11289 = vmatpush1.bf16.msra.mxu1 %v11288_v40  ;;  %v11314_v40 = vpack.c.bf16 %v6401_v46, %v6400_v27 }
 0x8e9   :  { %11291 = vmatprep.subr.bf16.mxu1 %v11290_v18  ;;  %11313 = vmatpush3.bf16.msra.mxu0 %v11312_v11  ;;  %v6384_v18 = vld [vmem:[%s18675_s7 + $0x20] sm:$0xff] }
 0x8ea   :  { %v11316_v44 = vpack.c.bf16 %v6385_v30, %v6384_v18  ;;  %11315 = vmatprep.subr.bf16.mxu0 %v11314_v40 }
 0x8ec   :  { %11293 = vmatpush1.bf16.msra.mxu1 %v11292_v5  ;;  %v6386_v5 = vld [vmem:[%s18675_s7 + $0x30] sm:$0xff] }
 0x8ed   :  { %11295 = vmatprep.subr.bf16.mxu1 %v11294_v31  ;;  %11317 = vmatpush3.bf16.msra.mxu0 %v11316_v44  ;;  %v11318_v31 = vpack.c.bf16 %v6403_v47, %v6402_v52  ;;  %v11320_v20 = vpack.c.bf16 %v6387_v22, %v6386_v5 }
 0x8ef   :  { %11319 = vmatprep.subr.bf16.mxu0 %v11318_v31 }
 0x8f0   :  { %11297 = vmatpush1.bf16.msra.mxu1 %v11296_v2  ;;  %v11322_v2 = vpack.c.bf16 %v6405_v29, %v6404_v32 }
 0x8f1   :  { %11299 = vmatprep.subr.bf16.mxu1 %v11298_v25  ;;  %v6388_v25 = vld [vmem:[%s18675_s7 + $0x40] sm:$0xff]  ;;  %11321 = vmatpush3.bf16.msra.mxu0 %v11320_v20 }
 0x8f2   :  { %v11324_v33 = vpack.c.bf16 %v6389_v39, %v6388_v25  ;;  %11323 = vmatprep.subr.bf16.mxu0 %v11322_v2 }
 0x8f4   :  { %11301 = vmatpush1.bf16.msra.mxu1 %v11300_v4  ;;  %v11326_v4 = vpack.c.bf16 %v6407_v57, %v6406_v62 }
 0x8f5   :  { %11303 = vmatprep.subr.bf16.mxu1 %v11302_v14  ;;  %v6390_v14 = vld [vmem:[%s18675_s7 + $0x50] sm:$0xff]  ;;  %11325 = vmatpush3.bf16.msra.mxu0 %v11324_v33 }
 0x8f6   :  { %v11328_v59 = vpack.c.bf16 %v6391_v37, %v6390_v14  ;;  %11327 = vmatprep.subr.bf16.mxu0 %v11326_v4 }
 0x8f8   :  { %11305 = vmatpush1.bf16.msra.mxu1 %v11304_v12  ;;  %v11330_v12 = vpack.c.bf16 %v6409_v9, %v6408_v41 }
 0x8f9   :  { %11329 = vmatpush3.bf16.msra.mxu0 %v11328_v59 }
 0x8fa   :  { %11331 = vmatprep.subr.bf16.mxu0 %v11330_v12 }
 0x8fb   :  { %6304 = vmatmul.mubr.f32.vlgmr.msra.gmra.mrb[38].mxu1 %v5998_v8  ;;  %v11336_v8 = vpack.c.bf16 %v6395_v28, %v6394_v56  ;;  %v6414_v28 = vld [vmem:[%s18674_s6 + $0x10] sm:$0xff] }
 0x8fc   :  { %9284 = vmatprep.mubr.msk.f32.mxu1 %vm2991_vm5, %v6009_v60  ;;  %v11334_v60 = vpack.c.bf16 %v6411_v7, %v6410_v49  ;;  %v16717_v49 = vld [vmem:[#allocation3] sm:$0xff]  ;;  %v6413_v7 = vld [vmem:[%s18674_s6 + $0x8] sm:$0xff] }
 0x8fd   :  { %11333 = vmatpush3.bf16.msra.mxu0 %v11332_v48  ;;  %v6415_v48 = vld [vmem:[%s18674_s6 + $0x18] sm:$0xff] }
 0x8fe   :  { %11335 = vmatprep.subr.bf16.mxu0 %v11334_v60  ;;  %v6412_v60 = vld [vmem:[%s18674_s6] sm:$0xff]  ;;  %v11338_v56 = vpack.c.bf16 %v6415_v48, %v6413_v7  ;;  %v6893_v7 = vld [vmem:[%s18670_s2 + $0x3c8] sm:$0xff]  ;;  %v6895_v48 = vld [vmem:[%s18670_s2 + $0x3d8] sm:$0xff] }
 0x8ff   :  { %6310 = vmatmul.mubr.f32.gmra.mrb[40].mxu1 %v6007_v24 }
 0x900   :  { %9285 = vmatprep.mubr.msk.f32.mxu1 %vm2991_vm5, %v6021_v26 }
 0x901   :  { %11337 = vmatpush3.bf16.msra.mxu0 %v11336_v8  ;;  %v11340_v8 = vpack.c.bf16 %v6414_v28, %v6412_v60  ;;  %v6892_v28 = vld [vmem:[%s18670_s2 + $0x3c0] sm:$0xff] }
 0x902   :  { %11339 = vmatprep.subr.bf16.mxu0 %v11338_v56  ;;  %v11362_v56 = vpack.c.bf16 %v6895_v48, %v6893_v7  ;;  %v6924_v7 = vld [vmem:[%s18670_s2 + $0x4c0] sm:$0xff]  ;;  %v6926_v48 = vld [vmem:[%s18670_s2 + $0x4d0] sm:$0xff] }
 0x903   :  { %6316 = vmatmul.mubr.f32.gmra.mrb[42].mxu1 %v6018_v16 }
 0x904   :  { %9286 = vmatprep.mubr.msk.f32.mxu1 %vm2991_vm5, %v6029_v51 }
 0x907   :  { %6322 = vmatmul.mubr.f32.gmra.mrb[44].mxu1 %v6027_v23 }
 0x9ce   :  { %v16675_v10 = vpop.f32.mrb[38].mxu1 }
 0x9cf   :  { %v16677_v36 = vpop.f32.mrb[39].mxu1  ;;  %v6354_v26 = vmul.f32 %v16675_v10, %v16675_v10 }
 0x9d0   :  { %v6355_v3 = vmul.f32 %v16677_v36, %v16677_v36 }
 0x9d2   :  { %v16679_v58 = vpop.f32.mrb[40].mxu1 }
 0x9d3   :  { %v6336_v61 = vadd.f32 %v16679_v58, %v16675_v10  ;;  %v6356_v24 = vmul.f32 %v16679_v58, %v16679_v58  ;;  %v16687_v38 = vpop.f32.mrb[41].mxu1 }
 0x9d4   :  { %v6345_v21 = vadd.f32 %v16687_v38, %v16677_v36  ;;  %v6357_v51 = vmul.f32 %v16687_v38, %v16687_v38 }
 0x9d5   :  { %v6362_v16 = vadd.f32 %v6356_v24, %v6354_v26  ;;  %v6873_v26 = vld [vmem:[%s18670_s2 + $0x328] sm:$0xff] }
 0x9d6   :  { %v6371_v43 = vadd.f32 %v6357_v51, %v6355_v3  ;;  %v16695_v23 = vpop.f32.mrb[42].mxu1 }
 0x9d7   :  { %v6337_v1 = vadd.f32 %v6336_v61, %v16695_v23  ;;  %v6358_v19 = vmul.f32 %v16695_v23, %v16695_v23  ;;  %v16700_v45 = vpop.f32.mrb[43].mxu1  ;;  %v6875_v61 = vld [vmem:[%s18670_s2 + $0x338] sm:$0xff] }
 0x9d8   :  { %v6346_v13 = vadd.f32 %v6345_v21, %v16700_v45  ;;  %v6359_v53 = vmul.f32 %v16700_v45, %v16700_v45  ;;  %v11342_v24 = vpack.c.bf16 %v6875_v61, %v6873_v26  ;;  %v6897_v26 = vld [vmem:[%s18670_s2 + $0x3e8] sm:$0xff]  ;;  %v6899_v61 = vld [vmem:[%s18670_s2 + $0x3f8] sm:$0xff] }
 0x9d9   :  { %v6363_v17 = vadd.f32 %v6362_v16, %v6358_v19 }
 0x9da   :  { %v6372_v34 = vadd.f32 %v6371_v43, %v6359_v53  ;;  %v16705_v54 = vpop.f32.mrb[44].mxu1 }
 0x9db   :  { %v6338_v15 = vadd.f32 %v6337_v1, %v16705_v54  ;;  %v6360_v63 = vmul.f32 %v16705_v54, %v16705_v54  ;;  %v16710_v55 = vpop.f32.mrb[45].mxu1 }
 0x9dc   :  { %v6347_v11 = vadd.f32 %v6346_v13, %v16710_v55  ;;  %v6361_v27 = vmul.f32 %v16710_v55, %v16710_v55 }
 0x9dd   :  { %v6339_v46 = vrot.slane %v6338_v15, 4  ;;  %v6364_v40 = vadd.f32 %v6363_v17, %v6360_v63  ;;  %v5274_v17 = vld [vmem:[%s18671_s3 + $0x4] sm:$0x1]  ;;  %v5275_v63 = vld [vmem:[%s18671_s3 + $0x5] sm:$0x1] }
 0x9de   :  { %v6348_v18 = vrot.slane %v6347_v11, 4  ;;  %v6373_v30 = vadd.f32 %v6372_v34, %v6361_v27  ;;  %v6872_v27 = vld [vmem:[%s18670_s2 + $0x320] sm:$0xff] }
 0x9df   :  { %v6340_v44 = vadd.f32 %v6339_v46, %v6338_v15  ;;  %v6365_v52 = vrot.slane %v6364_v40, 4  ;;  %v6874_v46 = vld [vmem:[%s18670_s2 + $0x330] sm:$0xff] }
 0x9e0   :  { %v6349_v47 = vadd.f32 %v6348_v18, %v6347_v11  ;;  %v6374_v5 = vrot.slane %v6373_v30, 4  ;;  %v6877_v18 = vld [vmem:[%s18670_s2 + $0x348] sm:$0xff] }
 0x9e1   :  { %v6341_v31 = vrot.slane %v6340_v44, 2  ;;  %v6366_v22 = vadd.f32 %v6365_v52, %v6364_v40  ;;  %v11344_v52 = vpack.c.bf16 %v6874_v46, %v6872_v27  ;;  %v6906_v27 = vld [vmem:[%s18670_s2 + $0x430] sm:$0xff]  ;;  %v6909_v46 = vld [vmem:[%s18670_s2 + $0x448] sm:$0xff] }
 0x9e2   :  { %v6350_v32 = vrot.slane %v6349_v47, 2  ;;  %v6375_v29 = vadd.f32 %v6374_v5, %v6373_v30  ;;  %v6879_v30 = vld [vmem:[%s18670_s2 + $0x358] sm:$0xff]  ;;  %v6876_v5 = vld [vmem:[%s18670_s2 + $0x340] sm:$0xff] }
 0x9e3   :  { %v6342_v20 = vadd.f32 %v6341_v31, %v6340_v44  ;;  %v6367_v2 = vrot.slane %v6366_v22, 2  ;;  %v6878_v31 = vld [vmem:[%s18670_s2 + $0x350] sm:$0xff] }
 0x9e4   :  { %v6351_v25 = vadd.f32 %v6350_v32, %v6349_v47  ;;  %v6376_v39 = vrot.slane %v6375_v29, 2  ;;  %v11346_v47 = vpack.c.bf16 %v6879_v30, %v6877_v18  ;;  %v6881_v32 = vld [vmem:[%s18670_s2 + $0x368] sm:$0xff] }
 0x9e5   :  { %v6343_v62 = vrot.slane %v6342_v20, 1  ;;  %v6368_v57 = vadd.f32 %v6367_v2, %v6366_v22 }
 0x9e6   :  { %v6352_v33 = vrot.slane %v6351_v25, 1  ;;  %v6377_v4 = vadd.f32 %v6376_v39, %v6375_v29  ;;  %v6883_v29 = vld [vmem:[%s18670_s2 + $0x378] sm:$0xff]  ;;  %v6882_v39 = vld [vmem:[%s18670_s2 + $0x370] sm:$0xff] }
 0x9e7   :  { %v6369_v14 = vrot.slane %v6368_v57, 1  ;;  %v6344_v41 = vadd.f32 %v6343_v62, %v6342_v20  ;;  %v11348_v20 = vpack.c.bf16 %v6878_v31, %v6876_v5  ;;  %v11350_v2 = vpack.c.bf16 %v6883_v29, %v6881_v32  ;;  %v6885_v62 = vld [vmem:[%s18670_s2 + $0x388] sm:$0xff]  ;;  %v6915_v5 = vld [vmem:[%s18670_s2 + $0x478] sm:$0xff]  ;;  %v6912_v32 = vld [vmem:[%s18670_s2 + $0x460] sm:$0xff] }
 0x9e8   :  { %v6378_v37 = vrot.slane %v6377_v4, 1  ;;  %v6353_v59 = vadd.f32 %v6352_v33, %v6351_v25  ;;  %v6880_v25 = vld [vmem:[%s18670_s2 + $0x360] sm:$0xff]  ;;  %v6914_v29 = vld [vmem:[%s18670_s2 + $0x470] sm:$0xff] }
 0x9e9   :  { %v6370_v9 = vadd.f32 %v6369_v14, %v6368_v57  ;;  %v6887_v57 = vld [vmem:[%s18670_s2 + $0x398] sm:$0xff]  ;;  %v11352_v33 = vpack.c.bf16 %v6882_v39, %v6880_v25  ;;  %v6884_v14 = vld [vmem:[%s18670_s2 + $0x380] sm:$0xff] }
 0x9ea   :  { %v6379_v12 = vadd.f32 %v6378_v37, %v6377_v4  ;;  %v11354_v4 = vpack.c.bf16 %v6887_v57, %v6885_v62  ;;  %v6886_v37 = vld [vmem:[%s18670_s2 + $0x390] sm:$0xff]  ;;  %v6919_v25 = vld [vmem:[%s18670_s2 + $0x498] sm:$0xff]  ;;  %v6916_v39 = vld [vmem:[%s18670_s2 + $0x480] sm:$0xff] }
 0x9eb   :  { %v6416_v42 = vsel %vm2828_vm4, %v6344_v41, %v6370_v9  ;;  %v6889_v41 = vld [vmem:[%s18670_s2 + $0x3a8] sm:$0xff]  ;;  %v6891_v9 = vld [vmem:[%s18670_s2 + $0x3b8] sm:$0xff]  ;;  %v6918_v57 = vld [vmem:[%s18670_s2 + $0x490] sm:$0xff] }
 0x9ec   :  { %v6417_v0 = vsel %vm2828_vm4, %v6353_v59, %v6379_v12  ;;  %v11356_v59 = vpack.c.bf16 %v6886_v37, %v6884_v14  ;;  %v11358_v12 = vpack.c.bf16 %v6891_v9, %v6889_v41  ;;  %v11388_v14 = vpack.c.bf16 %v6918_v57, %v6916_v39  ;;  %v6920_v41 = vld [vmem:[%s18670_s2 + $0x4a0] sm:$0xff]  ;;  %v6922_v9 = vld [vmem:[%s18670_s2 + $0x4b0] sm:$0xff] }
 0x9ed   :  { %6482 = vmatprep.mubr.f32.mxu0 %v6417_v0  ;;  %v6890_v0 = vld [vmem:[%s18670_s2 + $0x3b0] sm:$0xff] }
 0x9ee   :  { %6483 = vmatmul.mubr.f32.vlgmr.msra.gmra.mrb[40].mxu0 %v6416_v42  ;;  %v6888_v42 = vld [vmem:[%s18670_s2 + $0x3a0] sm:$0xff] }
 0x9ef   :  { %6573 = vmatprep.mubr.f32.mxu0 %v16717_v49  ;;  %11341 = vmatpush1.bf16.msra.mxu0 %v11340_v8  ;;  %v11360_v60 = vpack.c.bf16 %v6890_v0, %v6888_v42  ;;  %v6894_v8 = vld [vmem:[%s18670_s2 + $0x3d0] sm:$0xff]  ;;  %v11392_v42 = vpack.c.bf16 %v6922_v9, %v6920_v41 }
 0x9f0   :  { %11343 = vmatprep.subr.bf16.mxu0 %v11342_v24  ;;  %v11364_v24 = vpack.c.bf16 %v6894_v8, %v6892_v28  ;;  %v11396_v28 = vpack.c.bf16 %v6926_v48, %v6924_v7  ;;  %v6780_v7 = vld [vmem:[#allocation3] sm:$0xfe] }
 0x9f1   :  { %v6820_v48 = vrot.slane %v6780_v7, 1  ;;  %v6954_v7 = vld [vmem:[%s18670_s2 + $0x5b0] sm:$0xff] }
 0xac1   :  { %v9480_v3 = vpop.f32.mrb[40].mxu0 }
 0xac2   :  { %v9481_v21 = vpop.f32.mrb[41].mxu0 }
 0xac3   :  { %v9482_v51 = vadd.f32 %v9481_v21, %v9480_v3  ;;  %v11366_v3 = vpack.c.bf16 %v6899_v61, %v6897_v26  ;;  %v6896_v21 = vld [vmem:[%s18670_s2 + $0x3e0] sm:$0xff]  ;;  %v6930_v61 = vld [vmem:[%s18670_s2 + $0x4f0] sm:$0xff] }
 0xac4   :  { %v6928_v26 = vld [vmem:[%s18670_s2 + $0x4e0] sm:$0xff] }
 0xac5   :  { %v6488_v16 = vmul.f32 0.001953125, %v9482_v51  ;;  %v6898_v51 = vld [vmem:[%s18670_s2 + $0x3f0] sm:$0xff] }
 0xac7   :  { %v6489_v43 = vmul.f32 %v6488_v16, %v6488_v16 }
 0xac9   :  { %v6491_v1 = vrot.slane %v6489_v43, 7  ;;  %v6903_v43 = vld [vmem:[%s18670_s2 + $0x418] sm:$0xff] }
 0xacb   :  { %v6493_v19 = vsub.f32 %v6488_v16, %v6491_v1  ;;  %v11368_v1 = vpack.c.bf16 %v6898_v51, %v6896_v21  ;;  %v11400_v21 = vpack.c.bf16 %v6930_v61, %v6928_v26  ;;  %v6784_v26 = vld [vmem:[#allocation3 + $0x40] sm:$0x1] }
 0xacd   :  { %v6494_v13 = vadd.f32 1e-05, %v6493_v19 }
 0xacf   :  { %12126 = vrsqrt.f32 %v6494_v13  ;;  %v6900_v13 = vld [vmem:[%s18670_s2 + $0x400] sm:$0xff] }
 0xad9   :  { %v12127_v53 = vpop.eup %12126 }
 0xada   :  { %v6497_v34 = vrot.slane %v12127_v53, 1  ;;  %v6902_v53 = vld [vmem:[%s18670_s2 + $0x410] sm:$0xff] }
 0xadc   :  { %v6499_v15 = vmul.f32 %v6497_v34, %v5274_v17  ;;  %v6905_v17 = vld [vmem:[%s18670_s2 + $0x428] sm:$0xff]  ;;  %v6907_v34 = vld [vmem:[%s18670_s2 + $0x438] sm:$0xff] }
 0xade   :  { %v6500_v11 = vmul.f32 %v6499_v15, %v6488_v16  ;;  %v6901_v16 = vld [vmem:[%s18670_s2 + $0x408] sm:$0xff] }
 0xadf   :  { %v11370_v19 = vpack.c.bf16 %v6903_v43, %v6901_v16  ;;  %v6932_v16 = vld [vmem:[%s18670_s2 + $0x500] sm:$0xff]  ;;  %v6934_v43 = vld [vmem:[%s18670_s2 + $0x510] sm:$0xff] }
 0xae0   :  { %v6501_v40 = vsub.f32 %v5275_v63, %v6500_v11  ;;  %v11374_v63 = vpack.c.bf16 %v6907_v34, %v6905_v17  ;;  %v6904_v11 = vld [vmem:[%s18670_s2 + $0x420] sm:$0xff] }
 0xae1   :  { %v11376_v18 = vpack.c.bf16 %v6906_v27, %v6904_v11 }
 0xae2   :  { %v6503_v44 = vrot.slane %v6501_v40, 7  ;;  %v6911_v40 = vld [vmem:[%s18670_s2 + $0x458] sm:$0xff] }
 0xae3   :  { %v11378_v30 = vpack.c.bf16 %v6911_v40, %v6909_v46 }
 0xae4   :  { %v6505_v22 = vsel %vm2828_vm4, %v6499_v15, %v6503_v44  ;;  %v11372_v15 = vpack.c.bf16 %v6902_v53, %v6900_v13  ;;  %v6908_v44 = vld [vmem:[%s18670_s2 + $0x440] sm:$0xff]  ;;  %v11404_v13 = vpack.c.bf16 %v6934_v43, %v6932_v16 }
 0xae5   :  { %9287 = vmatmul.mubr.msk.f32.vlgmr.msra.gmra.mrb[42].mxu0 %vm2991_vm5, %v6505_v22 }
 0xae6   :  { %11345 = vmatpush1.bf16.msra.mxu0 %v11344_v52  ;;  %v6910_v52 = vld [vmem:[%s18670_s2 + $0x450] sm:$0xff] }
 0xae7   :  { %11347 = vmatprep.subr.bf16.mxu0 %v11346_v47  ;;  %v6913_v47 = vld [vmem:[%s18670_s2 + $0x468] sm:$0xff]  ;;  %v11380_v31 = vpack.c.bf16 %v6910_v52, %v6908_v44 }
 0xae8   :  { %v11382_v22 = vpack.c.bf16 %v6915_v5, %v6913_v47 }
 0xaea   :  { %11349 = vmatpush1.bf16.msra.mxu0 %v11348_v20  ;;  %v11384_v20 = vpack.c.bf16 %v6914_v29, %v6912_v32 }
 0xaeb   :  { %11351 = vmatprep.subr.bf16.mxu0 %v11350_v2  ;;  %v6917_v2 = vld [vmem:[%s18670_s2 + $0x488] sm:$0xff] }
 0xaec   :  { %v11386_v62 = vpack.c.bf16 %v6919_v25, %v6917_v2 }
 0xaee   :  { %11353 = vmatpush1.bf16.msra.mxu0 %v11352_v33  ;;  %v6921_v33 = vld [vmem:[%s18670_s2 + $0x4a8] sm:$0xff] }
 0xaef   :  { %11355 = vmatprep.subr.bf16.mxu0 %v11354_v4  ;;  %v6923_v4 = vld [vmem:[%s18670_s2 + $0x4b8] sm:$0xff] }
 0xaf0   :  { %v11390_v37 = vpack.c.bf16 %v6923_v4, %v6921_v33 }
 0xaf2   :  { %11357 = vmatpush1.bf16.msra.mxu0 %v11356_v59  ;;  %v6925_v59 = vld [vmem:[%s18670_s2 + $0x4c8] sm:$0xff] }
 0xaf3   :  { %11359 = vmatprep.subr.bf16.mxu0 %v11358_v12  ;;  %v6927_v12 = vld [vmem:[%s18670_s2 + $0x4d8] sm:$0xff] }
 0xaf4   :  { %v11394_v0 = vpack.c.bf16 %v6927_v12, %v6925_v59 }
 0xaf6   :  { %11361 = vmatpush1.bf16.msra.mxu0 %v11360_v60  ;;  %v6929_v60 = vld [vmem:[%s18670_s2 + $0x4e8] sm:$0xff] }
 0xaf7   :  { %11363 = vmatprep.subr.bf16.mxu0 %v11362_v56  ;;  %v6931_v56 = vld [vmem:[%s18670_s2 + $0x4f8] sm:$0xff] }
 0xaf8   :  { %v11398_v8 = vpack.c.bf16 %v6931_v56, %v6929_v60  ;;  %v16967_v60 = vrot.slane %v16717_v49, 1  ;;  %v6936_v56 = vld [vmem:[%s18670_s2 + $0x520] sm:$0xff] }
 0xafa   :  { %11365 = vmatpush1.bf16.msra.mxu0 %v11364_v24  ;;  %v6933_v24 = vld [vmem:[%s18670_s2 + $0x508] sm:$0xff]  ;;  %v6822_v43 = vsel %vm3372_vm6, %v6820_v48, %v16967_v60 }
 0xafb   :  { %11367 = vmatprep.subr.bf16.mxu0 %v11366_v3  ;;  %v6935_v3 = vld [vmem:[%s18670_s2 + $0x518] sm:$0xff] }
 0xafc   :  { %v11402_v51 = vpack.c.bf16 %v6935_v3, %v6933_v24  ;;  %v6943_v3 = vld [vmem:[%s18670_s2 + $0x558] sm:$0xff] }
 0xafe   :  { %11369 = vmatpush1.bf16.msra.mxu0 %v11368_v1  ;;  %v6937_v1 = vld [vmem:[%s18670_s2 + $0x528] sm:$0xff] }
 0xaff   :  { %11371 = vmatprep.subr.bf16.mxu0 %v11370_v19  ;;  %v6939_v19 = vld [vmem:[%s18670_s2 + $0x538] sm:$0xff] }
 0xb00   :  { %v11406_v53 = vpack.c.bf16 %v6939_v19, %v6937_v1  ;;  %v6832_v19 = vrot.slane %v6784_v26, 1  ;;  %v6956_v26 = vld [vmem:[%s18670_s2 + $0x5c0] sm:$0xff] }
 0xb02   :  { %11373 = vmatpush1.bf16.msra.mxu0 %v11372_v15 }
 0xb03   :  { %11375 = vmatprep.subr.bf16.mxu0 %v11374_v63 }
 0xb06   :  { %11377 = vmatpush1.bf16.msra.mxu0 %v11376_v18 }
 0xb07   :  { %11379 = vmatprep.subr.bf16.mxu0 %v11378_v30 }
 0xb0a   :  { %11381 = vmatpush1.bf16.msra.mxu0 %v11380_v31 }
 0xb0b   :  { %11383 = vmatprep.subr.bf16.mxu0 %v11382_v22 }
 0xb0e   :  { %11385 = vmatpush1.bf16.msra.mxu0 %v11384_v20 }
 0xb0f   :  { %11387 = vmatprep.subr.bf16.mxu0 %v11386_v62 }
 0xb12   :  { %11389 = vmatpush1.bf16.msra.mxu0 %v11388_v14 }
 0xb13   :  { %11391 = vmatprep.subr.bf16.mxu0 %v11390_v37 }
 0xb16   :  { %11393 = vmatpush1.bf16.msra.mxu0 %v11392_v42 }
 0xb17   :  { %11395 = vmatprep.subr.bf16.mxu0 %v11394_v0 }
 0xb1a   :  { %11397 = vmatpush1.bf16.msra.mxu0 %v11396_v28  ;;  %v6938_v28 = vld [vmem:[%s18670_s2 + $0x530] sm:$0xff] }
 0xb1b   :  { %11399 = vmatprep.subr.bf16.mxu0 %v11398_v8  ;;  %v6941_v8 = vld [vmem:[%s18670_s2 + $0x548] sm:$0xff]  ;;  %v11408_v1 = vpack.c.bf16 %v6938_v28, %v6936_v56 }
 0xb1c   :  { %v6957_v56 = vld [vmem:[%s18670_s2 + $0x5c8] sm:$0xff] }
 0xb1e   :  { %11401 = vmatpush1.bf16.msra.mxu0 %v11400_v21 }
 0xb1f   :  { %11403 = vmatprep.subr.bf16.mxu0 %v11402_v51 }
 0xb22   :  { %11405 = vmatpush1.bf16.msra.mxu0 %v11404_v13 }
 0xb23   :  { %11407 = vmatprep.subr.bf16.mxu0 %v11406_v53 }
 0xbb8   :  { %v6575_v17 = vpop.f32.mrb[42].mxu0 }
 0xbb9   :  { %v6583_v34 = vrot.slane %v6575_v17, %v19156_v50  ;;  %v6577_v15 = vpop.f32.mrb[43].mxu0  ;;  %v6599_v63 = vrot.slane %v6575_v17, %v19157_v35  ;;  %v11410_v17 = vpack.c.bf16 %v6943_v3, %v6941_v8  ;;  %v6963_v3 = vld [vmem:[%s18670_s2 + $0x5f8] sm:$0xff] }
 0xbba   :  { %v6587_v11 = vrot.slane %v6577_v15, %v19156_v50  ;;  %v6603_v27 = vrot.slane %v6577_v15, %v19157_v35  ;;  %v6942_v15 = vld [vmem:[%s18670_s2 + $0x550] sm:$0xff] }
 0xbbb   :  { %v6588_v46 = vmul.f32 %v6583_v34, %v16675_v10  ;;  %v6590_v40 = vmul.f32 %v6583_v34, %v16679_v58  ;;  %v6592_v18 = vmul.f32 %v6583_v34, %v16695_v23  ;;  %v6594_v30 = vmul.f32 %v6583_v34, %v16705_v54  ;;  %v6940_v34 = vld [vmem:[%s18670_s2 + $0x540] sm:$0xff] }
 0xbbc   :  { %v6589_v44 = vmul.f32 %v6587_v11, %v16677_v36  ;;  %v6591_v52 = vmul.f32 %v6587_v11, %v16687_v38  ;;  %v6593_v47 = vmul.f32 %v6587_v11, %v16700_v45  ;;  %v6595_v5 = vmul.f32 %v6587_v11, %v16710_v55  ;;  %v6945_v11 = vld [vmem:[%s18670_s2 + $0x568] sm:$0xff] }
 0xbbd   :  { %v6604_v31 = vadd.f32 %v6599_v63, %v6588_v46  ;;  %v6606_v22 = vadd.f32 %v6599_v63, %v6590_v40  ;;  %v6608_v32 = vadd.f32 %v6599_v63, %v6592_v18  ;;  %v6610_v29 = vadd.f32 %v6599_v63, %v6594_v30  ;;  %v6788_v63 = vld [vmem:[#allocation3 + $0x60] sm:$0xfe] }
 0xbbe   :  { %v6605_v20 = vadd.f32 %v6603_v27, %v6589_v44  ;;  %v6607_v10 = vadd.f32 %v6603_v27, %v6591_v52  ;;  %v6609_v2 = vadd.f32 %v6603_v27, %v6593_v47  ;;  %v6611_v58 = vadd.f32 %v6603_v27, %v6595_v5  ;;  %v6947_v27 = vld [vmem:[%s18670_s2 + $0x578] sm:$0xff]  ;;  %v6944_v52 = vld [vmem:[%s18670_s2 + $0x560] sm:$0xff] }
 0xbbf   :  { %v6612_v25 = vmax.f32 %v6604_v31, 0.0  ;;  %v6614_v23 = vmax.f32 %v6606_v22, 0.0  ;;  %v6616_v39 = vmax.f32 %v6608_v32, 0.0  ;;  %v6618_v54 = vmax.f32 %v6610_v29, 0.0  ;;  %v6946_v22 = vld [vmem:[%s18670_s2 + $0x570] sm:$0xff]  ;;  %v6949_v32 = vld [vmem:[%s18670_s2 + $0x588] sm:$0xff] }
 0xbc0   :  { %v6613_v62 = vmax.f32 %v6605_v20, 0.0  ;;  %v6615_v36 = vmax.f32 %v6607_v10, 0.0  ;;  %v6617_v57 = vmax.f32 %v6609_v2, 0.0  ;;  %v6619_v38 = vmax.f32 %v6611_v58, 0.0  ;;  %v6792_v29 = vld [vmem:[#allocation3 + $0xa0] sm:$0x1] }
 0xbc1   :  { %v6628_v33 = vrot.slane %v6612_v25, 7  ;;  %v6630_v45 = vrot.slane %v6614_v23, 7  ;;  %v6634_v4 = vrot.slane %v6616_v39, 7  ;;  %v6636_v55 = vrot.slane %v6618_v54, 7  ;;  %v6951_v20 = vld [vmem:[%s18670_s2 + $0x598] sm:$0xff] }
 0xbc2   :  { %v6629_v14 = vrot.slane %v6613_v62, 7  ;;  %v6632_v37 = vrot.slane %v6615_v36, 7  ;;  %v6635_v41 = vrot.slane %v6617_v57, 7  ;;  %v6638_v9 = vrot.slane %v6619_v38, 7  ;;  %v17013_v10 = vld [vmem:[#allocation3 + $0x38] sm:$0xff]  ;;  %v6948_v36 = vld [vmem:[%s18670_s2 + $0x580] sm:$0xff] }
 0xbc3   :  { %v16951_v59 = vsel %vm2828_vm4, %v6628_v33, %v6630_v45  ;;  %v16954_v12 = vsel %vm2828_vm4, %v6634_v4, %v6636_v55  ;;  %6652 = vst [vmem:[#allocation3 + $0x8] sm:$0xfe] %v6628_v33  ;;  %6656 = vst [vmem:[#allocation3 + $0x48] sm:$0x1] %v6630_v45  ;;  %v6833_v18 = vsel %vm3372_vm6, %v16967_v60, %v6832_v19  ;;  %v6840_v44 = vrot.slane %v6788_v63, 1  ;;  %v6950_v57 = vld [vmem:[%s18670_s2 + $0x590] sm:$0xff] }
 0xbc4   :  { %6658 = vst [vmem:[#allocation3 + $0x68] sm:$0xfe] %v6634_v4  ;;  %6662 = vst [vmem:[#allocation3 + $0xa8] sm:$0x1] %v6636_v55  ;;  %v16959_v42 = vsel %vm2828_vm4, %v6629_v14, %v6632_v37  ;;  %v16962_v0 = vsel %vm2828_vm4, %v6635_v41, %v6638_v9  ;;  %v6824_v51 = vrot.slane %v16951_v59, 1  ;;  %v11412_v30 = vpack.c.bf16 %v6942_v15, %v6940_v34  ;;  %v6953_v45 = vld [vmem:[%s18670_s2 + $0x5a8] sm:$0xff] }
 0xbc5   :  { %6654 = vst [vmem:[#allocation3 + $0x28] sm:$0xff] %v16951_v59  ;;  %6660 = vst [vmem:[#allocation3 + $0x88] sm:$0xff] %v16954_v12  ;;  %v6844_v5 = vrot.slane %v16954_v12, 1  ;;  %v11414_v31 = vpack.c.bf16 %v6947_v27, %v6945_v11  ;;  %v6783_v2 = vld [vmem:[#allocation3 + $0x18] sm:$0xfe]  ;;  %v6842_v23 = vsel %vm3372_vm6, %v6840_v44, %v16967_v60  ;;  %v11416_v39 = vpack.c.bf16 %v6946_v22, %v6944_v52  ;;  %v6966_v34 = vld [vmem:[%s18670_s2 + $0x610] sm:$0xff] }
 0xbc6   :  { %6653 = vst [vmem:[#allocation3 + $0x10] sm:$0xfe] %v6629_v14  ;;  %6657 = vst [vmem:[#allocation3 + $0x50] sm:$0x1] %v6632_v37  ;;  %v6852_v54 = vrot.slane %v6792_v29, 1  ;;  %v11418_v62 = vpack.c.bf16 %v6951_v20, %v6949_v32  ;;  %v6829_v38 = vrot.slane %v6783_v2, 1  ;;  %v11420_v14 = vpack.c.bf16 %v6950_v57, %v6948_v36 }
 0xbc7   :  { %6659 = vst [vmem:[#allocation3 + $0x70] sm:$0xfe] %v6635_v41  ;;  %6663 = vst [vmem:[#allocation3 + $0xb0] sm:$0x1] %v6638_v9  ;;  %v6830_v33 = vrot.slane %v17013_v10, 1  ;;  %v6955_v4 = vld [vmem:[%s18670_s2 + $0x5b8] sm:$0xff] }
 0xbc8   :  { %6655 = vst [vmem:[#allocation3 + $0x30] sm:$0xff] %v16959_v42  ;;  %6661 = vst [vmem:[#allocation3 + $0x90] sm:$0xff] %v16962_v0  ;;  %v6853_v37 = vsel %vm3372_vm6, %v16967_v60, %v6852_v54  ;;  %v11422_v41 = vpack.c.bf16 %v6955_v4, %v6953_v45  ;;  %v6952_v9 = vld [vmem:[%s18670_s2 + $0x5a0] sm:$0xff]  ;;  %v6959_v60 = vld [vmem:[%s18670_s2 + $0x5d8] sm:$0xff] }
 0xbc9   :  { %v6831_v48 = vsel %vm3372_vm6, %v6829_v38, %v6830_v33  ;;  %v11424_v28 = vpack.c.bf16 %v6954_v7, %v6952_v9  ;;  %v11426_v8 = vpack.c.bf16 %v6959_v60, %v6957_v56  ;;  %v6967_v19 = vld [vmem:[%s18670_s2 + $0x618] sm:$0xff]  ;;  %v6969_v15 = vld [vmem:[%s18670_s2 + $0x628] sm:$0xff]  ;;  %v6682_v22 = vld [vmem:[%s18670_s2 + $0x10] sm:$0xff] }
 0xbca   :  { %v6781_v61 = vld [vmem:[#allocation3 + $0x8] sm:$0xfe]  ;;  %v6785_v24 = vld [vmem:[#allocation3 + $0x48] sm:$0x1]  ;;  %v6971_v63 = vld [vmem:[%s18670_s2 + $0x638] sm:$0xff] }
 0xbcb   :  { %v6823_v21 = vrot.slane %v6781_v61, 1  ;;  %v6834_v16 = vrot.slane %v6785_v24, 1  ;;  %v6789_v13 = vld [vmem:[#allocation3 + $0x68] sm:$0xfe]  ;;  %v6793_v47 = vld [vmem:[#allocation3 + $0xa8] sm:$0x1]  ;;  %v11438_v27 = vpack.c.bf16 %v6971_v63, %v6969_v15 }
 0xbcc   :  { %v6843_v40 = vrot.slane %v6789_v13, 1  ;;  %v6854_v25 = vrot.slane %v6793_v47, 1  ;;  %v6958_v61 = vld [vmem:[%s18670_s2 + $0x5d0] sm:$0xff]  ;;  %v6961_v24 = vld [vmem:[%s18670_s2 + $0x5e8] sm:$0xff]  ;;  %v6787_v44 = vld [vmem:[#allocation3 + $0x58] sm:$0x1] }
 0xbcd   :  { %v6825_v53 = vsel %vm3372_vm6, %v6823_v21, %v6824_v51  ;;  %v6835_v46 = vsel %vm3372_vm6, %v6824_v51, %v6834_v16  ;;  %v11428_v21 = vpack.c.bf16 %v6958_v61, %v6956_v26  ;;  %v11430_v51 = vpack.c.bf16 %v6963_v3, %v6961_v24  ;;  %v6960_v16 = vld [vmem:[%s18670_s2 + $0x5e0] sm:$0xff]  ;;  %v6782_v52 = vld [vmem:[#allocation3 + $0x10] sm:$0xfe]  ;;  %v6685_v29 = vld [vmem:[%s18670_s2 + $0x28] sm:$0xff] }
 0xbce   :  { %7044 = vmatprep.mubr.f32.mxu0 %v6825_v53  ;;  %v6845_v58 = vsel %vm3372_vm6, %v6843_v40, %v6844_v5  ;;  %v6855_v55 = vsel %vm3372_vm6, %v6844_v5, %v6854_v25  ;;  %v6970_v40 = vld [vmem:[%s18670_s2 + $0x630] sm:$0xff]  ;;  %v6838_v32 = vrot.slane %v6787_v44, 1  ;;  %v6826_v20 = vrot.slane %v6782_v52, 1  ;;  %v6687_v2 = vld [vmem:[%s18670_s2 + $0x38] sm:$0xff]  ;;  %v6684_v57 = vld [vmem:[%s18670_s2 + $0x20] sm:$0xff] }
 0xbcf   :  { %7045 = vmatmul.mubr.f32.vlgmr.msra.gmra.mrb[44].mxu0 %v6822_v43  ;;  %v6962_v43 = vld [vmem:[%s18670_s2 + $0x5f0] sm:$0xff]  ;;  %v6791_v25 = vld [vmem:[#allocation3 + $0x78] sm:$0xfe]  ;;  %v11446_v36 = vpack.c.bf16 %v6687_v2, %v6685_v29  ;;  %v6688_v60 = vld [vmem:[%s18670_s2 + $0x40] sm:$0xff] }
 0xbd0   :  { %11409 = vmatpush1.bf16.msra.mxu0 %v11408_v1  ;;  %7050 = vmatprep.mubr.f32.mxu0 %v6835_v46  ;;  %v6965_v1 = vld [vmem:[%s18670_s2 + $0x608] sm:$0xff]  ;;  %v11432_v13 = vpack.c.bf16 %v6962_v43, %v6960_v16  ;;  %v6968_v46 = vld [vmem:[%s18670_s2 + $0x620] sm:$0xff]  ;;  %v6686_v38 = vld [vmem:[%s18670_s2 + $0x30] sm:$0xff]  ;;  %v6849_v45 = vrot.slane %v6791_v25, 1 }
 0xbd1   :  { %11411 = vmatprep.subr.bf16.mxu0 %v11410_v17  ;;  %v11434_v53 = vpack.c.bf16 %v6967_v19, %v6965_v1  ;;  %v6964_v17 = vld [vmem:[%s18670_s2 + $0x600] sm:$0xff]  ;;  %v11440_v47 = vpack.c.bf16 %v6970_v40, %v6968_v46  ;;  %v6790_v9 = vld [vmem:[#allocation3 + $0x70] sm:$0xfe]  ;;  %v11448_v7 = vpack.c.bf16 %v6686_v38, %v6684_v57  ;;  %v6693_v24 = vld [vmem:[%s18670_s2 + $0x68] sm:$0xff] }
 0xbd2   :  { %v11436_v11 = vpack.c.bf16 %v6966_v34, %v6964_v17  ;;  %v6846_v61 = vrot.slane %v6790_v9, 1  ;;  %v6695_v3 = vld [vmem:[%s18670_s2 + $0x78] sm:$0xff]  ;;  %v6692_v19 = vld [vmem:[%s18670_s2 + $0x60] sm:$0xff]  ;;  %v6697_v34 = vld [vmem:[%s18670_s2 + $0x88] sm:$0xff] }
 0xbd3   :  { %7051 = vmatmul.mubr.f32.gmra.mrb[46].mxu0 %v6833_v18  ;;  %v6681_v18 = vld [vmem:[%s18670_s2 + $0x8] sm:$0xff]  ;;  %v11454_v1 = vpack.c.bf16 %v6695_v3, %v6693_v24  ;;  %v6699_v15 = vld [vmem:[%s18670_s2 + $0x98] sm:$0xff]  ;;  %v6698_v46 = vld [vmem:[%s18670_s2 + $0x90] sm:$0xff] }
 0xbd4   :  { %11413 = vmatpush1.bf16.msra.mxu0 %v11412_v30  ;;  %7056 = vmatprep.mubr.f32.mxu0 %v6845_v58  ;;  %v6683_v30 = vld [vmem:[%s18670_s2 + $0x18] sm:$0xff]  ;;  %v6665_v44 = vld [vmem:[#allocation3 + $0x8] sm:$0xff]  ;;  %v6704_v2 = vld [vmem:[%s18670_s2 + $0xc0] sm:$0xff] }
 0xbd5   :  { %11415 = vmatprep.subr.bf16.mxu0 %v11414_v31  ;;  %v11442_v5 = vpack.c.bf16 %v6683_v30, %v6681_v18  ;;  %v6680_v31 = vld [vmem:[%s18670_s2] sm:$0xff]  ;;  %v17110_v58 = vld [vmem:[#allocation3 + $0x98] sm:$0xff]  ;;  %v6701_v18 = vld [vmem:[%s18670_s2 + $0xa8] sm:$0xff] }
 0xbd6   :  { %v11444_v54 = vpack.c.bf16 %v6682_v22, %v6680_v31  ;;  %v6850_v4 = vrot.slane %v17110_v58, 1  ;;  %v6703_v30 = vld [vmem:[%s18670_s2 + $0xb8] sm:$0xff]  ;;  %v6702_v31 = vld [vmem:[%s18670_s2 + $0xb0] sm:$0xff]  ;;  %v6705_v22 = vld [vmem:[%s18670_s2 + $0xc8] sm:$0xff] }
 0xbd7   :  { %7057 = vmatmul.mubr.f32.gmra.mrb[48].mxu0 %v6842_v23  ;;  %v6786_v23 = vld [vmem:[#allocation3 + $0x50] sm:$0x1]  ;;  %v6713_v38 = vld [vmem:[%s18670_s2 + $0x108] sm:$0xff] }
 0xbd8   :  { %11417 = vmatpush1.bf16.msra.mxu0 %v11416_v39  ;;  %7062 = vmatprep.mubr.f32.mxu0 %v6855_v55  ;;  %v6827_v39 = vrot.slane %v16959_v42, 1  ;;  %v6706_v25 = vld [vmem:[%s18670_s2 + $0xd0] sm:$0xff]  ;;  %v6725_v3 = vld [vmem:[%s18670_s2 + $0x168] sm:$0xff] }
 0xbd9   :  { %11419 = vmatprep.subr.bf16.mxu0 %v11418_v62  ;;  %v6839_v62 = vsel %vm3372_vm6, %v6830_v33, %v6838_v32  ;;  %v6691_v33 = vld [vmem:[%s18670_s2 + $0x58] sm:$0xff]  ;;  %v6710_v57 = vld [vmem:[%s18670_s2 + $0xf0] sm:$0xff] }
 0xbda   :  { %v6828_v55 = vsel %vm3372_vm6, %v6826_v20, %v6827_v39  ;;  %v6707_v32 = vld [vmem:[%s18670_s2 + $0xd8] sm:$0xff]  ;;  %v6722_v24 = vld [vmem:[%s18670_s2 + $0x150] sm:$0xff] }
 0xbdb   :  { %7063 = vmatmul.mubr.f32.gmra.mrb[50].mxu0 %v6853_v37  ;;  %v6689_v37 = vld [vmem:[%s18670_s2 + $0x48] sm:$0xff]  ;;  %v11466_v20 = vpack.c.bf16 %v6707_v32, %v6705_v22  ;;  %v6743_v32 = vld [vmem:[%s18670_s2 + $0x1f8] sm:$0xff] }
 0xbdc   :  { %11421 = vmatpush1.bf16.msra.mxu0 %v11420_v14  ;;  %9288 = vmatprep.mubr.msk.f32.mxu0 %vm2991_vm5, %v6831_v48  ;;  %v6836_v14 = vrot.slane %v6786_v23, 1  ;;  %v6851_v48 = vsel %vm3372_vm6, %v6849_v45, %v6850_v4  ;;  %v11450_v56 = vpack.c.bf16 %v6691_v33, %v6689_v37  ;;  %v6709_v23 = vld [vmem:[%s18670_s2 + $0xe8] sm:$0xff]  ;;  %v6715_v45 = vld [vmem:[%s18670_s2 + $0x118] sm:$0xff]  ;;  %v6714_v37 = vld [vmem:[%s18670_s2 + $0x110] sm:$0xff] }
 0xbdd   :  { %11423 = vmatprep.subr.bf16.mxu0 %v11422_v41  ;;  %v6795_v41 = vld [vmem:[#allocation3 + $0xb8] sm:$0x1]  ;;  %v6717_v33 = vld [vmem:[%s18670_s2 + $0x128] sm:$0xff] }
 0xbde   :  { %v6837_v26 = vsel %vm3372_vm6, %v6827_v39, %v6836_v14  ;;  %v6711_v39 = vld [vmem:[%s18670_s2 + $0xf8] sm:$0xff]  ;;  %v6712_v14 = vld [vmem:[%s18670_s2 + $0x100] sm:$0xff]  ;;  %v6741_v22 = vld [vmem:[%s18670_s2 + $0x1e8] sm:$0xff] }
 0xbdf   :  { %v11476_v9 = vpack.c.bf16 %v6714_v37, %v6712_v14  ;;  %v6748_v14 = vld [vmem:[%s18670_s2 + $0x220] sm:$0xff]  ;;  %v6750_v37 = vld [vmem:[%s18670_s2 + $0x230] sm:$0xff] }
 0xbe0   :  { %11425 = vmatpush1.bf16.msra.mxu0 %v11424_v28  ;;  %v6690_v28 = vld [vmem:[%s18670_s2 + $0x50] sm:$0xff] }
 0xbe1   :  { %11427 = vmatprep.subr.bf16.mxu0 %v11426_v8  ;;  %v6858_v8 = vrot.slane %v6795_v41, 1  ;;  %v11452_v16 = vpack.c.bf16 %v6690_v28, %v6688_v60  ;;  %v6719_v41 = vld [vmem:[%s18670_s2 + $0x138] sm:$0xff]  ;;  %v6721_v60 = vld [vmem:[%s18670_s2 + $0x148] sm:$0xff] }
 0xbe2   :  { %v6723_v28 = vld [vmem:[%s18670_s2 + $0x158] sm:$0xff] }
 0xbe3   :  { %v6859_v43 = vsel %vm3372_vm6, %v6850_v4, %v6858_v8 }
 0xbe4   :  { %11429 = vmatpush1.bf16.msra.mxu0 %v11428_v21  ;;  %v6794_v21 = vld [vmem:[#allocation3 + $0xb0] sm:$0x1] }
 0xbe5   :  { %11431 = vmatprep.subr.bf16.mxu0 %v11430_v51  ;;  %v6847_v51 = vrot.slane %v16962_v0, 1  ;;  %v6856_v17 = vrot.slane %v6794_v21, 1  ;;  %v6727_v21 = vld [vmem:[%s18670_s2 + $0x178] sm:$0xff] }
 0xbe7   :  { %v6857_v40 = vsel %vm3372_vm6, %v6847_v51, %v6856_v17 }
 0xbe8   :  { %11433 = vmatpush1.bf16.msra.mxu0 %v11432_v13  ;;  %v6694_v13 = vld [vmem:[%s18670_s2 + $0x70] sm:$0xff] }
 0xbe9   :  { %11435 = vmatprep.subr.bf16.mxu0 %v11434_v53  ;;  %v6848_v53 = vsel %vm3372_vm6, %v6846_v61, %v6847_v51  ;;  %v11456_v63 = vpack.c.bf16 %v6694_v13, %v6692_v19  ;;  %v6720_v61 = vld [vmem:[%s18670_s2 + $0x140] sm:$0xff]  ;;  %v6729_v19 = vld [vmem:[%s18670_s2 + $0x188] sm:$0xff]  ;;  %v6731_v13 = vld [vmem:[%s18670_s2 + $0x198] sm:$0xff] }
 0xbea   :  { %v11484_v51 = vpack.c.bf16 %v6722_v24, %v6720_v61  ;;  %v11490_v17 = vpack.c.bf16 %v6731_v13, %v6729_v19  ;;  %v6756_v24 = vld [vmem:[%s18670_s2 + $0x260] sm:$0xff]  ;;  %v6762_v19 = vld [vmem:[%s18670_s2 + $0x290] sm:$0xff]  ;;  %v6667_v13 = vld [vmem:[#allocation3 + $0x18] sm:$0xff] }
 0xbec   :  { %11437 = vmatpush1.bf16.msra.mxu0 %v11436_v11  ;;  %v11458_v11 = vpack.c.bf16 %v6699_v15, %v6697_v34  ;;  %v6728_v34 = vld [vmem:[%s18670_s2 + $0x180] sm:$0xff]  ;;  %v6730_v15 = vld [vmem:[%s18670_s2 + $0x190] sm:$0xff] }
 0xbed   :  { %11439 = vmatprep.subr.bf16.mxu0 %v11438_v27  ;;  %v6696_v27 = vld [vmem:[%s18670_s2 + $0x80] sm:$0xff] }
 0xbee   :  { %v11460_v52 = vpack.c.bf16 %v6698_v46, %v6696_v27  ;;  %v11492_v27 = vpack.c.bf16 %v6730_v15, %v6728_v34  ;;  %v6764_v15 = vld [vmem:[%s18670_s2 + $0x2a0] sm:$0xff] }
 0xbf0   :  { %11441 = vmatpush1.bf16.msra.mxu0 %v11440_v47  ;;  %v11462_v47 = vpack.c.bf16 %v6703_v30, %v6701_v18  ;;  %v6734_v18 = vld [vmem:[%s18670_s2 + $0x1b0] sm:$0xff]  ;;  %v6737_v30 = vld [vmem:[%s18670_s2 + $0x1c8] sm:$0xff] }
 0xbf1   :  { %11443 = vmatprep.subr.bf16.mxu0 %v11442_v5  ;;  %v6700_v5 = vld [vmem:[%s18670_s2 + $0xa0] sm:$0xff] }
 0xbf2   :  { %v11464_v29 = vpack.c.bf16 %v6702_v31, %v6700_v5  ;;  %v6736_v5 = vld [vmem:[%s18670_s2 + $0x1c0] sm:$0xff]  ;;  %v6738_v31 = vld [vmem:[%s18670_s2 + $0x1d0] sm:$0xff] }
 0xbf3   :  { %7134 = vmatmul.mubr.f32.vlgmr.msra.gmra.mrb[44].mxu0 %v6828_v55  ;;  %v11474_v55 = vpack.c.bf16 %v6715_v45, %v6713_v38  ;;  %v6749_v38 = vld [vmem:[%s18670_s2 + $0x228] sm:$0xff]  ;;  %v6751_v45 = vld [vmem:[%s18670_s2 + $0x238] sm:$0xff] }
 0xbf4   :  { %11445 = vmatpush1.bf16.msra.mxu0 %v11444_v54  ;;  %9289 = vmatprep.mubr.msk.f32.mxu0 %vm2991_vm5, %v6839_v62  ;;  %v11468_v54 = vpack.c.bf16 %v6706_v25, %v6704_v2  ;;  %v11470_v62 = vpack.c.bf16 %v6711_v39, %v6709_v23  ;;  %v6740_v2 = vld [vmem:[%s18670_s2 + $0x1e0] sm:$0xff]  ;;  %v6742_v25 = vld [vmem:[%s18670_s2 + $0x1f0] sm:$0xff]  ;;  %v6745_v23 = vld [vmem:[%s18670_s2 + $0x208] sm:$0xff] }
 0xbf5   :  { %11447 = vmatprep.subr.bf16.mxu0 %v11446_v36  ;;  %v6708_v36 = vld [vmem:[%s18670_s2 + $0xe0] sm:$0xff]  ;;  %v6747_v39 = vld [vmem:[%s18670_s2 + $0x218] sm:$0xff] }
 0xbf6   :  { %v11472_v4 = vpack.c.bf16 %v6710_v57, %v6708_v36  ;;  %v6744_v36 = vld [vmem:[%s18670_s2 + $0x200] sm:$0xff]  ;;  %v6746_v57 = vld [vmem:[%s18670_s2 + $0x210] sm:$0xff] }
 0xbf7   :  { %7140 = vmatmul.mubr.f32.gmra.mrb[46].mxu0 %v6837_v26  ;;  %v11482_v26 = vpack.c.bf16 %v6723_v28, %v6721_v60  ;;  %v6757_v60 = vld [vmem:[%s18670_s2 + $0x268] sm:$0xff]  ;;  %v6759_v28 = vld [vmem:[%s18670_s2 + $0x278] sm:$0xff] }
 0xbf8   :  { %11449 = vmatpush1.bf16.msra.mxu0 %v11448_v7  ;;  %9290 = vmatprep.mubr.msk.f32.mxu0 %vm2991_vm5, %v6851_v48  ;;  %v11478_v7 = vpack.c.bf16 %v6719_v41, %v6717_v33  ;;  %v6716_v48 = vld [vmem:[%s18670_s2 + $0x120] sm:$0xff]  ;;  %v6753_v33 = vld [vmem:[%s18670_s2 + $0x248] sm:$0xff]  ;;  %v6755_v41 = vld [vmem:[%s18670_s2 + $0x258] sm:$0xff]  ;;  %v11518_v61 = vpack.c.bf16 %v6759_v28, %v6757_v60 }
 0xbf9   :  { %11451 = vmatprep.subr.bf16.mxu0 %v11450_v56  ;;  %v6718_v56 = vld [vmem:[%s18670_s2 + $0x130] sm:$0xff]  ;;  %v7438_v28 = vld [vmem:[%s18670_s2 + $0x680] sm:$0xff] }
 0xbfa   :  { %v11480_v8 = vpack.c.bf16 %v6718_v56, %v6716_v48  ;;  %v6752_v48 = vld [vmem:[%s18670_s2 + $0x240] sm:$0xff]  ;;  %v6754_v56 = vld [vmem:[%s18670_s2 + $0x250] sm:$0xff] }
 0xbfb   :  { %7146 = vmatmul.mubr.f32.gmra.mrb[48].mxu0 %v6848_v53 }
 0xbfc   :  { %11453 = vmatpush1.bf16.msra.mxu0 %v11452_v16  ;;  %9291 = vmatprep.mubr.msk.f32.mxu0 %vm2991_vm5, %v6859_v43  ;;  %v11486_v16 = vpack.c.bf16 %v6727_v21, %v6725_v3  ;;  %v6724_v43 = vld [vmem:[%s18670_s2 + $0x160] sm:$0xff]  ;;  %v6758_v3 = vld [vmem:[%s18670_s2 + $0x270] sm:$0xff]  ;;  %v6761_v21 = vld [vmem:[%s18670_s2 + $0x288] sm:$0xff] }
 0xbfd   :  { %11455 = vmatprep.subr.bf16.mxu0 %v11454_v1  ;;  %v6726_v1 = vld [vmem:[%s18670_s2 + $0x170] sm:$0xff] }
 0xbfe   :  { %v11488_v53 = vpack.c.bf16 %v6726_v1, %v6724_v43  ;;  %v6760_v1 = vld [vmem:[%s18670_s2 + $0x280] sm:$0xff] }
 0xbff   :  { %7152 = vmatmul.mubr.f32.gmra.mrb[50].mxu0 %v6857_v40  ;;  %v6732_v40 = vld [vmem:[%s18670_s2 + $0x1a0] sm:$0xff] }
 0xc00   :  { %11457 = vmatpush1.bf16.msra.mxu0 %v11456_v63  ;;  %7232 = vmatprep.mubr.f32.mxu0 %v6665_v44  ;;  %v6733_v63 = vld [vmem:[%s18670_s2 + $0x1a8] sm:$0xff]  ;;  %v6739_v44 = vld [vmem:[%s18670_s2 + $0x1d8] sm:$0xff] }
 0xc01   :  { %11459 = vmatprep.subr.bf16.mxu0 %v11458_v11  ;;  %v6735_v11 = vld [vmem:[%s18670_s2 + $0x1b8] sm:$0xff] }
 0xc02   :  { %v11494_v46 = vpack.c.bf16 %v6735_v11, %v6733_v63  ;;  %v6766_v63 = vld [vmem:[%s18670_s2 + $0x2b0] sm:$0xff]  ;;  %v6769_v11 = vld [vmem:[%s18670_s2 + $0x2c8] sm:$0xff] }
 0xc04   :  { %11461 = vmatpush1.bf16.msra.mxu0 %v11460_v52  ;;  %v11496_v52 = vpack.c.bf16 %v6734_v18, %v6732_v40  ;;  %v6768_v18 = vld [vmem:[%s18670_s2 + $0x2c0] sm:$0xff] }
 0xc05   :  { %11463 = vmatprep.subr.bf16.mxu0 %v11462_v47  ;;  %v11498_v47 = vpack.c.bf16 %v6739_v44, %v6737_v30  ;;  %v6770_v30 = vld [vmem:[%s18670_s2 + $0x2d0] sm:$0xff]  ;;  %v6773_v44 = vld [vmem:[%s18670_s2 + $0x2e8] sm:$0xff] }
 0xc08   :  { %11465 = vmatpush1.bf16.msra.mxu0 %v11464_v29  ;;  %v11500_v29 = vpack.c.bf16 %v6738_v31, %v6736_v5  ;;  %v6772_v31 = vld [vmem:[%s18670_s2 + $0x2e0] sm:$0xff] }
 0xc09   :  { %11467 = vmatprep.subr.bf16.mxu0 %v11466_v20  ;;  %v11502_v20 = vpack.c.bf16 %v6743_v32, %v6741_v22  ;;  %v6774_v22 = vld [vmem:[%s18670_s2 + $0x2f0] sm:$0xff]  ;;  %v6777_v32 = vld [vmem:[%s18670_s2 + $0x308] sm:$0xff] }
 0xc0c   :  { %11469 = vmatpush1.bf16.msra.mxu0 %v11468_v54  ;;  %v11504_v54 = vpack.c.bf16 %v6742_v25, %v6740_v2  ;;  %v6776_v25 = vld [vmem:[%s18670_s2 + $0x300] sm:$0xff] }
 0xc0d   :  { %11471 = vmatprep.subr.bf16.mxu0 %v11470_v62  ;;  %v11506_v62 = vpack.c.bf16 %v6747_v39, %v6745_v23  ;;  %v6778_v23 = vld [vmem:[%s18670_s2 + $0x310] sm:$0xff]  ;;  %v7431_v39 = vld [vmem:[%s18670_s2 + $0x648] sm:$0xff] }
 0xc10   :  { %11473 = vmatpush1.bf16.msra.mxu0 %v11472_v4  ;;  %v11508_v4 = vpack.c.bf16 %v6746_v57, %v6744_v36  ;;  %v7430_v57 = vld [vmem:[%s18670_s2 + $0x640] sm:$0xff] }
 0xc11   :  { %11475 = vmatprep.subr.bf16.mxu0 %v11474_v55  ;;  %v11510_v55 = vpack.c.bf16 %v6751_v45, %v6749_v38  ;;  %v7432_v38 = vld [vmem:[%s18670_s2 + $0x650] sm:$0xff]  ;;  %v7435_v45 = vld [vmem:[%s18670_s2 + $0x668] sm:$0xff] }
 0xc14   :  { %11477 = vmatpush1.bf16.msra.mxu0 %v11476_v9  ;;  %v11512_v9 = vpack.c.bf16 %v6750_v37, %v6748_v14  ;;  %v7434_v37 = vld [vmem:[%s18670_s2 + $0x660] sm:$0xff] }
 0xc15   :  { %11479 = vmatprep.subr.bf16.mxu0 %v11478_v7  ;;  %v11514_v7 = vpack.c.bf16 %v6755_v41, %v6753_v33  ;;  %v7436_v33 = vld [vmem:[%s18670_s2 + $0x670] sm:$0xff] }
 0xc16   :  { %v6666_v41 = vld [vmem:[#allocation3 + $0x10] sm:$0xff] }
 0xc18   :  { %11481 = vmatpush1.bf16.msra.mxu0 %v11480_v8  ;;  %v6673_v8 = vld [vmem:[#allocation3 + $0x68] sm:$0xff] }
 0xc19   :  { %11483 = vmatprep.subr.bf16.mxu0 %v11482_v26  ;;  %v11516_v26 = vpack.c.bf16 %v6754_v56, %v6752_v48  ;;  %v11548_v48 = vpack.c.bf16 %v7436_v33, %v7434_v37  ;;  %v6675_v56 = vld [vmem:[#allocation3 + $0x78] sm:$0xff]  ;;  %v7471_v37 = vld [vmem:[%s18670_s2 + $0x788] sm:$0xff] }
 0xc1a   :  { %v7473_v33 = vld [vmem:[%s18670_s2 + $0x798] sm:$0xff] }
 0xc1c   :  { %11485 = vmatpush1.bf16.msra.mxu0 %v11484_v51  ;;  %v17358_v51 = vld [vmem:[#allocation3] sm:$0xff] }
 0xc1d   :  { %11487 = vmatprep.subr.bf16.mxu0 %v11486_v16  ;;  %v11520_v16 = vpack.c.bf16 %v6758_v3, %v6756_v24  ;;  %v7347_v3 = vld [vmem:[#allocation3 + $0x8] sm:$0xfc] }
 0xc20   :  { %11489 = vmatpush1.bf16.msra.mxu0 %v11488_v53  ;;  %v6765_v53 = vld [vmem:[%s18670_s2 + $0x2a8] sm:$0xff] }
 0xc21   :  { %11491 = vmatprep.subr.bf16.mxu0 %v11490_v17  ;;  %v11524_v17 = vpack.c.bf16 %v6762_v19, %v6760_v1  ;;  %v7449_v1 = vld [vmem:[%s18670_s2 + $0x6d8] sm:$0xff]  ;;  %v7381_v19 = vrot.slane %v7347_v3, 2 }
 0xc22   :  { %v7481_v3 = vld [vmem:[%s18670_s2 + $0x7d8] sm:$0xff] }
 0xc24   :  { %11493 = vmatpush1.bf16.msra.mxu0 %v11492_v27  ;;  %v6771_v27 = vld [vmem:[%s18670_s2 + $0x2d8] sm:$0xff] }
 0xc25   :  { %11495 = vmatprep.subr.bf16.mxu0 %v11494_v46  ;;  %v11528_v46 = vpack.c.bf16 %v6766_v63, %v6764_v15  ;;  %v11530_v40 = vpack.c.bf16 %v6771_v27, %v6769_v11  ;;  %v7451_v15 = vld [vmem:[%s18670_s2 + $0x6e8] sm:$0xff]  ;;  %v7453_v63 = vld [vmem:[%s18670_s2 + $0x6f8] sm:$0xff] }
 0xc28   :  { %11497 = vmatpush1.bf16.msra.mxu0 %v11496_v52  ;;  %v6775_v52 = vld [vmem:[%s18670_s2 + $0x2f8] sm:$0xff] }
 0xc29   :  { %11499 = vmatprep.subr.bf16.mxu0 %v11498_v47  ;;  %v11532_v47 = vpack.c.bf16 %v6770_v30, %v6768_v18  ;;  %v11534_v5 = vpack.c.bf16 %v6775_v52, %v6773_v44  ;;  %v7452_v18 = vld [vmem:[%s18670_s2 + $0x6f0] sm:$0xff]  ;;  %v7457_v30 = vld [vmem:[%s18670_s2 + $0x718] sm:$0xff] }
 0xc2c   :  { %11501 = vmatpush1.bf16.msra.mxu0 %v11500_v29  ;;  %v6779_v29 = vld [vmem:[%s18670_s2 + $0x318] sm:$0xff] }
 0xc2d   :  { %11503 = vmatprep.subr.bf16.mxu0 %v11502_v20  ;;  %v11536_v20 = vpack.c.bf16 %v6774_v22, %v6772_v31  ;;  %v11538_v2 = vpack.c.bf16 %v6779_v29, %v6777_v32  ;;  %v7459_v31 = vld [vmem:[%s18670_s2 + $0x728] sm:$0xff]  ;;  %v7461_v22 = vld [vmem:[%s18670_s2 + $0x738] sm:$0xff] }
 0xc2e   :  { %v11570_v29 = vpack.c.bf16 %v7461_v22, %v7459_v31  ;;  %v7497_v31 = vld [vmem:[%s18670_s2 + $0x858] sm:$0xff] }
 0xc30   :  { %11505 = vmatpush1.bf16.msra.mxu0 %v11504_v54  ;;  %v7433_v54 = vld [vmem:[%s18670_s2 + $0x658] sm:$0xff] }
 0xc31   :  { %11507 = vmatprep.subr.bf16.mxu0 %v11506_v62  ;;  %v11540_v62 = vpack.c.bf16 %v6778_v23, %v6776_v25  ;;  %v11542_v36 = vpack.c.bf16 %v7433_v54, %v7431_v39  ;;  %v7463_v25 = vld [vmem:[%s18670_s2 + $0x748] sm:$0xff]  ;;  %v7465_v23 = vld [vmem:[%s18670_s2 + $0x758] sm:$0xff] }
 0xc32   :  { %v11574_v54 = vpack.c.bf16 %v7465_v23, %v7463_v25  ;;  %v7494_v25 = vld [vmem:[%s18670_s2 + $0x840] sm:$0xff]  ;;  %v7496_v23 = vld [vmem:[%s18670_s2 + $0x850] sm:$0xff] }
 0xc33   :  { %7233 = vmatmul.mubr.f32.vlgmr.msra.gmra.mrb[44].mxu0 %v16717_v49 }
 0xc34   :  { %7238 = vmatprep.mubr.f32.mxu0 %v16951_v59  ;;  %11509 = vmatpush1.bf16.msra.mxu0 %v11508_v4  ;;  %v7437_v4 = vld [vmem:[%s18670_s2 + $0x678] sm:$0xff] }
 0xc35   :  { %11511 = vmatprep.subr.bf16.mxu0 %v11510_v55  ;;  %v11544_v55 = vpack.c.bf16 %v7432_v38, %v7430_v57  ;;  %v11546_v14 = vpack.c.bf16 %v7437_v4, %v7435_v45  ;;  %v7467_v57 = vld [vmem:[%s18670_s2 + $0x768] sm:$0xff]  ;;  %v7469_v38 = vld [vmem:[%s18670_s2 + $0x778] sm:$0xff] }
 0xc36   :  { %v11578_v4 = vpack.c.bf16 %v7469_v38, %v7467_v57  ;;  %v11608_v38 = vpack.c.bf16 %v7496_v23, %v7494_v25  ;;  %v7518_v23 = vld [vmem:[%s18670_s2 + $0x900] sm:$0xff] }
 0xc37   :  { %7239 = vmatmul.mubr.f32.gmra.mrb[46].mxu0 %v16717_v49  ;;  %v6763_v49 = vld [vmem:[%s18670_s2 + $0x298] sm:$0xff] }
 0xc38   :  { %7244 = vmatprep.mubr.f32.mxu0 %v6673_v8  ;;  %11513 = vmatpush1.bf16.msra.mxu0 %v11512_v9  ;;  %v11522_v43 = vpack.c.bf16 %v6763_v49, %v6761_v21  ;;  %v7439_v9 = vld [vmem:[%s18670_s2 + $0x688] sm:$0xff]  ;;  %v7440_v8 = vld [vmem:[%s18670_s2 + $0x690] sm:$0xff]  ;;  %v7442_v49 = vld [vmem:[%s18670_s2 + $0x6a0] sm:$0xff] }
 0xc39   :  { %11515 = vmatprep.subr.bf16.mxu0 %v11514_v7  ;;  %v7441_v7 = vld [vmem:[%s18670_s2 + $0x698] sm:$0xff]  ;;  %v11552_v24 = vpack.c.bf16 %v7440_v8, %v7438_v28 }
 0xc3a   :  { %v11550_v60 = vpack.c.bf16 %v7441_v7, %v7439_v9  ;;  %v11582_v9 = vpack.c.bf16 %v7473_v33, %v7471_v37  ;;  %v7470_v7 = vld [vmem:[%s18670_s2 + $0x780] sm:$0xff]  ;;  %v7500_v37 = vld [vmem:[%s18670_s2 + $0x870] sm:$0xff] }
 0xc3b   :  { %7245 = vmatmul.mubr.f32.gmra.mrb[48].mxu0 %v17358_v51  ;;  %v7354_v33 = vld [vmem:[#allocation3 + $0x60] sm:$0xfc] }
 0xc3c   :  { %7250 = vmatprep.mubr.f32.mxu0 %v16954_v12  ;;  %11517 = vmatpush1.bf16.msra.mxu0 %v11516_v26  ;;  %v6767_v12 = vld [vmem:[%s18670_s2 + $0x2b8] sm:$0xff]  ;;  %v7443_v26 = vld [vmem:[%s18670_s2 + $0x6a8] sm:$0xff] }
 0xc3d   :  { %11519 = vmatprep.subr.bf16.mxu0 %v11518_v61  ;;  %v11526_v34 = vpack.c.bf16 %v6767_v12, %v6765_v53  ;;  %v7445_v61 = vld [vmem:[%s18670_s2 + $0x6b8] sm:$0xff]  ;;  %v7382_v53 = vrot.slane %v16951_v59, 2  ;;  %v7504_v59 = vld [vmem:[%s18670_s2 + $0x890] sm:$0xff] }
 0xc3e   :  { %v11554_v21 = vpack.c.bf16 %v7445_v61, %v7443_v26  ;;  %v7474_v26 = vld [vmem:[%s18670_s2 + $0x7a0] sm:$0xff]  ;;  %v7476_v61 = vld [vmem:[%s18670_s2 + $0x7b0] sm:$0xff] }
 0xc3f   :  { %7251 = vmatmul.mubr.f32.gmra.mrb[50].mxu0 %v17358_v51  ;;  %v7383_v11 = vsel %vm440_vm1, %v7381_v19, %v7382_v53 }
 0xc40   :  { %11521 = vmatpush1.bf16.msra.mxu0 %v11520_v16  ;;  %9292 = vmatprep.mubr.msk.f32.mxu0 %vm2991_vm5, %v6667_v13  ;;  %v7444_v16 = vld [vmem:[%s18670_s2 + $0x6b0] sm:$0xff] }
 0xc41   :  { %11523 = vmatprep.subr.bf16.mxu0 %v11522_v43  ;;  %v6674_v43 = vld [vmem:[#allocation3 + $0x70] sm:$0xff]  ;;  %v11556_v13 = vpack.c.bf16 %v7444_v16, %v7442_v49  ;;  %v7478_v16 = vld [vmem:[%s18670_s2 + $0x7c0] sm:$0xff] }
 0xc44   :  { %11525 = vmatpush1.bf16.msra.mxu0 %v11524_v17  ;;  %v7446_v17 = vld [vmem:[%s18670_s2 + $0x6c0] sm:$0xff] }
 0xc45   :  { %11527 = vmatprep.subr.bf16.mxu0 %v11526_v34  ;;  %v7448_v34 = vld [vmem:[%s18670_s2 + $0x6d0] sm:$0xff] }
 0xc46   :  { %v11560_v27 = vpack.c.bf16 %v7448_v34, %v7446_v17  ;;  %v7484_v17 = vld [vmem:[%s18670_s2 + $0x7f0] sm:$0xff]  ;;  %v7487_v34 = vld [vmem:[%s18670_s2 + $0x808] sm:$0xff] }
 0xc48   :  { %11529 = vmatpush1.bf16.msra.mxu0 %v11528_v46  ;;  %v11562_v46 = vpack.c.bf16 %v7453_v63, %v7451_v15  ;;  %v7489_v15 = vld [vmem:[%s18670_s2 + $0x818] sm:$0xff] }
 0xc49   :  { %11531 = vmatprep.subr.bf16.mxu0 %v11530_v40  ;;  %v7450_v40 = vld [vmem:[%s18670_s2 + $0x6e0] sm:$0xff] }
 0xc4a   :  { %v11564_v44 = vpack.c.bf16 %v7452_v18, %v7450_v40  ;;  %v7491_v40 = vld [vmem:[%s18670_s2 + $0x828] sm:$0xff]  ;;  %v7493_v18 = vld [vmem:[%s18670_s2 + $0x838] sm:$0xff] }
 0xc4c   :  { %11533 = vmatpush1.bf16.msra.mxu0 %v11532_v47  ;;  %v7454_v47 = vld [vmem:[%s18670_s2 + $0x700] sm:$0xff] }
 0xc4d   :  { %11535 = vmatprep.subr.bf16.mxu0 %v11534_v5  ;;  %v7456_v5 = vld [vmem:[%s18670_s2 + $0x710] sm:$0xff] }
 0xc4e   :  { %v11568_v32 = vpack.c.bf16 %v7456_v5, %v7454_v47  ;;  %v7346_v47 = vld [vmem:[#allocation3] sm:$0xfc]  ;;  %v7495_v5 = vld [vmem:[%s18670_s2 + $0x848] sm:$0xff] }
 0xc50   :  { %11537 = vmatpush1.bf16.msra.mxu0 %v11536_v20  ;;  %v7458_v20 = vld [vmem:[%s18670_s2 + $0x720] sm:$0xff] }
 0xc51   :  { %11539 = vmatprep.subr.bf16.mxu0 %v11538_v2  ;;  %v7460_v2 = vld [vmem:[%s18670_s2 + $0x730] sm:$0xff] }
 0xc52   :  { %v11572_v39 = vpack.c.bf16 %v7460_v2, %v7458_v20  ;;  %v7351_v20 = vld [vmem:[#allocation3 + $0x48] sm:$0x3]  ;;  %v11606_v2 = vpack.c.bf16 %v7497_v31, %v7495_v5 }
 0xc54   :  { %11541 = vmatpush1.bf16.msra.mxu0 %v11540_v62  ;;  %v7462_v62 = vld [vmem:[%s18670_s2 + $0x740] sm:$0xff] }
 0xc55   :  { %11543 = vmatprep.subr.bf16.mxu0 %v11542_v36  ;;  %v7464_v36 = vld [vmem:[%s18670_s2 + $0x750] sm:$0xff] }
 0xc56   :  { %v11576_v45 = vpack.c.bf16 %v7464_v36, %v7462_v62  ;;  %v7501_v62 = vld [vmem:[%s18670_s2 + $0x878] sm:$0xff]  ;;  %v7392_v36 = vrot.slane %v7351_v20, 2 }
 0xc57   :  { %7322 = vmatmul.mubr.f32.vlgmr.msra.gmra.mrb[44].mxu0 %v6666_v41  ;;  %v7521_v20 = vld [vmem:[%s18670_s2 + $0x918] sm:$0xff] }
 0xc58   :  { %11545 = vmatpush1.bf16.msra.mxu0 %v11544_v55  ;;  %9293 = vmatprep.mubr.msk.f32.mxu0 %vm2991_vm5, %v17013_v10  ;;  %v7466_v55 = vld [vmem:[%s18670_s2 + $0x760] sm:$0xff] }
 0xc59   :  { %11547 = vmatprep.subr.bf16.mxu0 %v11546_v14  ;;  %v7468_v14 = vld [vmem:[%s18670_s2 + $0x770] sm:$0xff] }
 0xc5a   :  { %v11580_v41 = vpack.c.bf16 %v7468_v14, %v7466_v55  ;;  %v7498_v14 = vld [vmem:[%s18670_s2 + $0x860] sm:$0xff] }
 0xc5b   :  { %7328 = vmatmul.mubr.f32.gmra.mrb[46].mxu0 %v16959_v42  ;;  %v7447_v42 = vld [vmem:[%s18670_s2 + $0x6c8] sm:$0xff] }
 0xc5c   :  { %11549 = vmatpush1.bf16.msra.mxu0 %v11548_v48  ;;  %9294 = vmatprep.mubr.msk.f32.mxu0 %vm2991_vm5, %v6675_v56  ;;  %v11558_v12 = vpack.c.bf16 %v7449_v1, %v7447_v42  ;;  %v7472_v48 = vld [vmem:[%s18670_s2 + $0x790] sm:$0xff]  ;;  %v7475_v56 = vld [vmem:[%s18670_s2 + $0x7a8] sm:$0xff]  ;;  %v7485_v1 = vld [vmem:[%s18670_s2 + $0x7f8] sm:$0xff] }
 0xc5d   :  { %11551 = vmatprep.subr.bf16.mxu0 %v11550_v60  ;;  %v7477_v60 = vld [vmem:[%s18670_s2 + $0x7b8] sm:$0xff]  ;;  %v11584_v28 = vpack.c.bf16 %v7472_v48, %v7470_v7  ;;  %v7483_v42 = vld [vmem:[%s18670_s2 + $0x7e8] sm:$0xff]  ;;  %v7393_v7 = vsel %vm440_vm1, %v7382_v53, %v7392_v36  ;;  %v7358_v53 = vld [vmem:[#allocation3 + $0xa0] sm:$0x3] }
 0xc5e   :  { %v11586_v8 = vpack.c.bf16 %v7477_v60, %v7475_v56  ;;  %v11612_v60 = vpack.c.bf16 %v7500_v37, %v7498_v14 }
 0xc5f   :  { %7334 = vmatmul.mubr.f32.gmra.mrb[48].mxu0 %v6674_v43  ;;  %v7480_v43 = vld [vmem:[%s18670_s2 + $0x7d0] sm:$0xff] }
 0xc60   :  { %11553 = vmatpush1.bf16.msra.mxu0 %v11552_v24  ;;  %9295 = vmatprep.mubr.msk.f32.mxu0 %vm2991_vm5, %v17110_v58  ;;  %v7479_v24 = vld [vmem:[%s18670_s2 + $0x7c8] sm:$0xff]  ;;  %v11592_v19 = vpack.c.bf16 %v7480_v43, %v7478_v16  ;;  %v7349_v16 = vld [vmem:[#allocation3 + $0x18] sm:$0xfc] }
 0xc61   :  { %11555 = vmatprep.subr.bf16.mxu0 %v11554_v21  ;;  %v11588_v21 = vpack.c.bf16 %v7476_v61, %v7474_v26  ;;  %v11590_v49 = vpack.c.bf16 %v7481_v3, %v7479_v24  ;;  %v12139_v26 = vld [vmem:[#allocation3 + $0x88] sm:$0xff]  ;;  %v7502_v3 = vld [vmem:[%s18670_s2 + $0x880] sm:$0xff] }
 0xc62   :  { %v7402_v61 = vrot.slane %v12139_v26, 2  ;;  %v12140_v26 = vld [vmem:[#allocation3 + $0x30] sm:$0xff] }
 0xc63   :  { %7340 = vmatmul.mubr.f32.gmra.mrb[50].mxu0 %v16962_v0  ;;  %v7455_v0 = vld [vmem:[%s18670_s2 + $0x708] sm:$0xff] }
 0xc64   :  { %11557 = vmatpush1.bf16.msra.mxu0 %v11556_v13  ;;  %7602 = vmatprep.mubr.f32.mxu0 %v7383_v11  ;;  %v11566_v52 = vpack.c.bf16 %v7457_v30, %v7455_v0  ;;  %v11594_v13 = vpack.c.bf16 %v7485_v1, %v7483_v42  ;;  %v11598_v11 = vpack.c.bf16 %v7489_v15, %v7487_v34  ;;  %v7508_v34 = vld [vmem:[%s18670_s2 + $0x8b0] sm:$0xff]  ;;  %v7387_v15 = vrot.slane %v7349_v16, 2 }
 0xc65   :  { %11559 = vmatprep.subr.bf16.mxu0 %v11558_v12  ;;  %v7482_v12 = vld [vmem:[%s18670_s2 + $0x7e0] sm:$0xff]  ;;  %v11602_v30 = vpack.c.bf16 %v7493_v18, %v7491_v40  ;;  %v7356_v16 = vld [vmem:[#allocation3 + $0x70] sm:$0xfc] }
 0xc66   :  { %v11596_v63 = vpack.c.bf16 %v7484_v17, %v7482_v12  ;;  %v7506_v17 = vld [vmem:[%s18670_s2 + $0x8a0] sm:$0xff] }
 0xc67   :  { %v11620_v40 = vpack.c.bf16 %v7508_v34, %v7506_v17 }
 0xc68   :  { %11561 = vmatpush1.bf16.msra.mxu0 %v11560_v27  ;;  %v7486_v27 = vld [vmem:[%s18670_s2 + $0x800] sm:$0xff] }
 0xc69   :  { %11563 = vmatprep.subr.bf16.mxu0 %v11562_v46  ;;  %v7488_v46 = vld [vmem:[%s18670_s2 + $0x810] sm:$0xff] }
 0xc6a   :  { %v11600_v0 = vpack.c.bf16 %v7488_v46, %v7486_v27  ;;  %v7513_v27 = vld [vmem:[%s18670_s2 + $0x8d8] sm:$0xff] }
 0xc6c   :  { %11565 = vmatpush1.bf16.msra.mxu0 %v11564_v44  ;;  %v7490_v44 = vld [vmem:[%s18670_s2 + $0x820] sm:$0xff] }
 0xc6d   :  { %11567 = vmatprep.subr.bf16.mxu0 %v11566_v52  ;;  %v7492_v52 = vld [vmem:[%s18670_s2 + $0x830] sm:$0xff] }
 0xc6e   :  { %v11604_v22 = vpack.c.bf16 %v7492_v52, %v7490_v44  ;;  %v7515_v52 = vld [vmem:[%s18670_s2 + $0x8e8] sm:$0xff] }
 0xc70   :  { %11569 = vmatpush1.bf16.msra.mxu0 %v11568_v32  ;;  %v7378_v32 = vrot.slane %v7346_v47, 2  ;;  %v7517_v47 = vld [vmem:[%s18670_s2 + $0x8f8] sm:$0xff] }
 0xc71   :  { %11571 = vmatprep.subr.bf16.mxu0 %v11570_v29  ;;  %v17628_v29 = vrot.slane %v17358_v51, 2  ;;  %v11626_v31 = vpack.c.bf16 %v7517_v47, %v7515_v52  ;;  %v7770_v52 = vld [vmem:[%s18675_s7 + $0x10] sm:$0xff]  ;;  %v7771_v47 = vld [vmem:[%s18675_s7 + $0x18] sm:$0xff] }
 0xc73   :  { %v7380_v57 = vsel %vm440_vm1, %v7378_v32, %v17628_v29  ;;  %v7516_v32 = vld [vmem:[%s18670_s2 + $0x8f0] sm:$0xff] }
 0xc74   :  { %11573 = vmatpush1.bf16.msra.mxu0 %v11572_v39  ;;  %v7350_v39 = vld [vmem:[#allocation3 + $0x40] sm:$0x3] }
 0xc75   :  { %11575 = vmatprep.subr.bf16.mxu0 %v11574_v54  ;;  %v7499_v54 = vld [vmem:[%s18670_s2 + $0x868] sm:$0xff] }
 0xc76   :  { %v11610_v55 = vpack.c.bf16 %v7501_v62, %v7499_v54  ;;  %v7523_v54 = vld [vmem:[%s18670_s2 + $0x928] sm:$0xff]  ;;  %v7525_v62 = vld [vmem:[%s18670_s2 + $0x938] sm:$0xff] }
 0xc78   :  { %11577 = vmatpush1.bf16.msra.mxu0 %v11576_v45  ;;  %v7390_v45 = vrot.slane %v7350_v39, 2  ;;  %v7520_v39 = vld [vmem:[%s18670_s2 + $0x910] sm:$0xff] }
 0xc79   :  { %11579 = vmatprep.subr.bf16.mxu0 %v11578_v4  ;;  %v7355_v4 = vld [vmem:[#allocation3 + $0x68] sm:$0xfc]  ;;  %v11632_v36 = vpack.c.bf16 %v7520_v39, %v7518_v23  ;;  %v7791_v23 = vld [vmem:[%s18675_s7 + $0xb8] sm:$0xff]  ;;  %v7774_v39 = vld [vmem:[%s18675_s7 + $0x30] sm:$0xff] }
 0xc7a   :  { %v7401_v48 = vrot.slane %v7355_v4, 2  ;;  %v7391_v56 = vsel %vm440_vm1, %v17628_v29, %v7390_v45  ;;  %v7524_v45 = vld [vmem:[%s18670_s2 + $0x930] sm:$0xff]  ;;  %v7527_v4 = vld [vmem:[%s18670_s2 + $0x948] sm:$0xff] }
 0xc7c   :  { %11581 = vmatpush1.bf16.msra.mxu0 %v11580_v41  ;;  %v7503_v41 = vld [vmem:[%s18670_s2 + $0x888] sm:$0xff]  ;;  %v7403_v43 = vsel %vm440_vm1, %v7401_v48, %v7402_v61 }
 0xc7d   :  { %11583 = vmatprep.subr.bf16.mxu0 %v11582_v9  ;;  %v7505_v9 = vld [vmem:[%s18670_s2 + $0x898] sm:$0xff] }
 0xc7e   :  { %v11614_v24 = vpack.c.bf16 %v7505_v9, %v7503_v41  ;;  %v7528_v41 = vld [vmem:[%s18670_s2 + $0x950] sm:$0xff]  ;;  %v7353_v9 = vld [vmem:[#allocation3 + $0x58] sm:$0x3] }
 0xc80   :  { %11585 = vmatpush1.bf16.msra.mxu0 %v11584_v28  ;;  %v7398_v28 = vrot.slane %v7354_v33, 2  ;;  %v7526_v33 = vld [vmem:[%s18670_s2 + $0x940] sm:$0xff] }
 0xc81   :  { %11587 = vmatprep.subr.bf16.mxu0 %v11586_v8  ;;  %v7359_v8 = vld [vmem:[#allocation3 + $0xa8] sm:$0x3]  ;;  %v11640_v48 = vpack.c.bf16 %v7528_v41, %v7526_v33 }
 0xc82   :  { %v7412_v42 = vrot.slane %v7359_v8, 2  ;;  %v7400_v1 = vsel %vm440_vm1, %v7398_v28, %v17628_v29  ;;  %v7357_v28 = vld [vmem:[#allocation3 + $0x78] sm:$0xfc]  ;;  %v7352_v8 = vld [vmem:[#allocation3 + $0x50] sm:$0x3] }
 0xc84   :  { %11589 = vmatpush1.bf16.msra.mxu0 %v11588_v21  ;;  %v7507_v21 = vld [vmem:[%s18670_s2 + $0x8a8] sm:$0xff]  ;;  %v7413_v46 = vsel %vm440_vm1, %v7402_v61, %v7412_v42  ;;  %v7385_v61 = vrot.slane %v12140_v26, 2 }
 0xc85   :  { %11591 = vmatprep.subr.bf16.mxu0 %v11590_v49  ;;  %v7509_v49 = vld [vmem:[%s18670_s2 + $0x8b8] sm:$0xff]  ;;  %v7781_v26 = vld [vmem:[%s18675_s7 + $0x68] sm:$0xff] }
 0xc86   :  { %v11618_v12 = vpack.c.bf16 %v7509_v49, %v7507_v21  ;;  %v7394_v21 = vrot.slane %v7352_v8, 2  ;;  %v7361_v49 = vld [vmem:[#allocation3 + $0xb8] sm:$0x3]  ;;  %v7780_v8 = vld [vmem:[%s18675_s7 + $0x60] sm:$0xff] }
 0xc87   :  { %v7416_v42 = vrot.slane %v7361_v49, 2 }
 0xc88   :  { %11593 = vmatpush1.bf16.msra.mxu0 %v11592_v19  ;;  %v11616_v19 = vpack.c.bf16 %v7504_v59, %v7502_v3  ;;  %v7407_v3 = vrot.slane %v7357_v28, 2  ;;  %v7408_v59 = vrot.slane %v17110_v58, 2 }
 0xc89   :  { %11595 = vmatprep.subr.bf16.mxu0 %v11594_v13  ;;  %v7410_v13 = vrot.slane %v7358_v53, 2 }
 0xc8a   :  { %v7417_v17 = vsel %vm440_vm1, %v7408_v59, %v7416_v42 }
 0xc8b   :  { %v7411_v18 = vsel %vm440_vm1, %v17628_v29, %v7410_v13  ;;  %v7519_v29 = vld [vmem:[%s18670_s2 + $0x908] sm:$0xff]  ;;  %v7360_v13 = vld [vmem:[#allocation3 + $0xb0] sm:$0x3] }
 0xc8c   :  { %11597 = vmatpush1.bf16.msra.mxu0 %v11596_v63  ;;  %v7388_v63 = vrot.slane %v17013_v10, 2  ;;  %v7510_v10 = vld [vmem:[%s18670_s2 + $0x8c0] sm:$0xff]  ;;  %v11630_v25 = vpack.c.bf16 %v7521_v20, %v7519_v29  ;;  %v7773_v20 = vld [vmem:[%s18675_s7 + $0x28] sm:$0xff] }
 0xc8d   :  { %11599 = vmatprep.subr.bf16.mxu0 %v11598_v11  ;;  %v7511_v11 = vld [vmem:[%s18670_s2 + $0x8c8] sm:$0xff]  ;;  %v7772_v29 = vld [vmem:[%s18675_s7 + $0x20] sm:$0xff] }
 0xc8e   :  { %v7389_v44 = vsel %vm440_vm1, %v7387_v15, %v7388_v63  ;;  %v7414_v15 = vrot.slane %v7360_v13, 2 }
 0xc90   :  { %11601 = vmatpush1.bf16.msra.mxu0 %v11600_v0  ;;  %v11622_v0 = vpack.c.bf16 %v7513_v27, %v7511_v11  ;;  %v7784_v11 = vld [vmem:[%s18675_s7 + $0x80] sm:$0xff]  ;;  %v7785_v27 = vld [vmem:[%s18675_s7 + $0x88] sm:$0xff] }
 0xc91   :  { %11603 = vmatprep.subr.bf16.mxu0 %v11602_v30  ;;  %v7512_v30 = vld [vmem:[%s18670_s2 + $0x8d0] sm:$0xff] }
 0xc92   :  { %v11624_v5 = vpack.c.bf16 %v7512_v30, %v7510_v10  ;;  %v7786_v10 = vld [vmem:[%s18675_s7 + $0x90] sm:$0xff]  ;;  %v7787_v30 = vld [vmem:[%s18675_s7 + $0x98] sm:$0xff] }
 0xc94   :  { %11605 = vmatpush1.bf16.msra.mxu0 %v11604_v22  ;;  %v7514_v22 = vld [vmem:[%s18670_s2 + $0x8e0] sm:$0xff] }
 0xc95   :  { %11607 = vmatprep.subr.bf16.mxu0 %v11606_v2  ;;  %v11628_v2 = vpack.c.bf16 %v7516_v32, %v7514_v22  ;;  %v7789_v22 = vld [vmem:[%s18675_s7 + $0xa8] sm:$0xff] }
 0xc97   :  { %7603 = vmatmul.mubr.f32.vlgmr.msra.gmra.mrb[44].mxu0 %v7380_v57  ;;  %v11634_v57 = vpack.c.bf16 %v7525_v62, %v7523_v54  ;;  %v7775_v62 = vld [vmem:[%s18675_s7 + $0x38] sm:$0xff] }
 0xc98   :  { %7608 = vmatprep.mubr.f32.mxu0 %v7393_v7  ;;  %11609 = vmatpush1.bf16.msra.mxu0 %v11608_v38  ;;  %v7522_v38 = vld [vmem:[%s18670_s2 + $0x920] sm:$0xff]  ;;  %v7348_v7 = vld [vmem:[#allocation3 + $0x10] sm:$0xfc] }
 0xc99   :  { %11611 = vmatprep.subr.bf16.mxu0 %v11610_v55  ;;  %v7529_v55 = vld [vmem:[%s18670_s2 + $0x958] sm:$0xff]  ;;  %v11636_v14 = vpack.c.bf16 %v7524_v45, %v7522_v38  ;;  %v11656_v38 = vpack.c.bf16 %v7775_v62, %v7774_v39 }
 0xc9a   :  { %v11638_v37 = vpack.c.bf16 %v7529_v55, %v7527_v4  ;;  %v7776_v4 = vld [vmem:[%s18675_s7 + $0x40] sm:$0xff]  ;;  %v7777_v55 = vld [vmem:[%s18675_s7 + $0x48] sm:$0xff] }
 0xc9b   :  { %7609 = vmatmul.mubr.f32.gmra.mrb[46].mxu0 %v7391_v56  ;;  %v7396_v56 = vrot.slane %v7353_v9, 2  ;;  %v11660_v33 = vpack.c.bf16 %v7777_v55, %v7776_v4  ;;  %v7778_v9 = vld [vmem:[%s18675_s7 + $0x50] sm:$0xff] }
 0xc9c   :  { %7614 = vmatprep.mubr.f32.mxu0 %v7403_v43  ;;  %11613 = vmatpush1.bf16.msra.mxu0 %v11612_v60  ;;  %v7384_v60 = vrot.slane %v7348_v7, 2  ;;  %v7409_v43 = vsel %vm440_vm1, %v7407_v3, %v7408_v59  ;;  %v7779_v7 = vld [vmem:[%s18675_s7 + $0x58] sm:$0xff]  ;;  %v11668_v3 = vpack.c.bf16 %v7781_v26, %v7780_v8 }
 0xc9d   :  { %11615 = vmatprep.subr.bf16.mxu0 %v11614_v24  ;;  %v7397_v24 = vsel %vm440_vm1, %v7388_v63, %v7396_v56  ;;  %v7797_v56 = vld [vmem:[%s18675_s7 + $0xe8] sm:$0xff] }
 0xc9e   :  { %v7386_v53 = vsel %vm440_vm1, %v7384_v60, %v7385_v61  ;;  %v11664_v60 = vpack.c.bf16 %v7779_v7, %v7778_v9 }
 0xc9f   :  { %7615 = vmatmul.mubr.f32.gmra.mrb[48].mxu0 %v7400_v1  ;;  %v7395_v1 = vsel %vm440_vm1, %v7385_v61, %v7394_v21  ;;  %v7798_v61 = vld [vmem:[%s18675_s7 + $0xf0] sm:$0xff]  ;;  %v7783_v21 = vld [vmem:[%s18675_s7 + $0x78] sm:$0xff] }
 0xca0   :  { %7620 = vmatprep.mubr.f32.mxu0 %v7413_v46  ;;  %11617 = vmatpush1.bf16.msra.mxu0 %v11616_v19  ;;  %v7404_v19 = vrot.slane %v7356_v16, 2  ;;  %v11642_v46 = vpack.c.bf16 %v7785_v27, %v7784_v11 }
 0xca1   :  { %11619 = vmatprep.subr.bf16.mxu0 %v11618_v12  ;;  %v12141_v12 = vld [vmem:[#allocation3 + $0x90] sm:$0xff] }
 0xca2   :  { %v7405_v58 = vrot.slane %v12141_v12, 2  ;;  %11643 = vmatprep.subr.bf16.mxu1 %v11642_v46 }
 0xca3   :  { %7621 = vmatmul.mubr.f32.gmra.mrb[50].mxu0 %v7411_v18  ;;  %v7769_v18 = vld [vmem:[%s18675_s7 + $0x8] sm:$0xff] }
 0xca4   :  { %11621 = vmatpush1.bf16.msra.mxu0 %v11620_v40  ;;  %9296 = vmatprep.mubr.msk.f32.mxu0 %vm2991_vm5, %v7389_v44  ;;  %v7406_v34 = vsel %vm440_vm1, %v7404_v19, %v7405_v58  ;;  %v7415_v63 = vsel %vm440_vm1, %v7405_v58, %v7414_v15  ;;  %v7768_v40 = vld [vmem:[%s18675_s7] sm:$0xff]  ;;  %v11646_v44 = vpack.c.bf16 %v7787_v30, %v7786_v10 }
 0xca5   :  { %11623 = vmatprep.subr.bf16.mxu0 %v11622_v0  ;;  %v11644_v0 = vpack.c.bf16 %v7769_v18, %v7768_v40 }
 0xca7   :  { %11645 = vmatpush3.bf16.msra.mxu1 %v11644_v0 }
 0xca8   :  { %11625 = vmatpush1.bf16.msra.mxu0 %v11624_v5  ;;  %v11648_v5 = vpack.c.bf16 %v7771_v47, %v7770_v52  ;;  %11647 = vmatprep.subr.bf16.mxu1 %v11646_v44 }
 0xca9   :  { %11627 = vmatprep.subr.bf16.mxu0 %v11626_v31  ;;  %v7788_v31 = vld [vmem:[%s18675_s7 + $0xa0] sm:$0xff] }
 0xcaa   :  { %v11650_v32 = vpack.c.bf16 %v7789_v22, %v7788_v31 }
 0xcab   :  { %11649 = vmatpush3.bf16.msra.mxu1 %v11648_v5 }
 0xcac   :  { %11629 = vmatpush1.bf16.msra.mxu0 %v11628_v2  ;;  %v11652_v2 = vpack.c.bf16 %v7773_v20, %v7772_v29  ;;  %11651 = vmatprep.subr.bf16.mxu1 %v11650_v32 }
 0xcad   :  { %11631 = vmatprep.subr.bf16.mxu0 %v11630_v25  ;;  %v7790_v25 = vld [vmem:[%s18675_s7 + $0xb0] sm:$0xff] }
 0xcae   :  { %v11654_v54 = vpack.c.bf16 %v7791_v23, %v7790_v25 }
 0xcaf   :  { %11653 = vmatpush3.bf16.msra.mxu1 %v11652_v2 }
 0xcb0   :  { %11633 = vmatpush1.bf16.msra.mxu0 %v11632_v36  ;;  %v7792_v36 = vld [vmem:[%s18675_s7 + $0xc0] sm:$0xff]  ;;  %11655 = vmatprep.subr.bf16.mxu1 %v11654_v54 }
 0xcb1   :  { %11635 = vmatprep.subr.bf16.mxu0 %v11634_v57  ;;  %v7793_v57 = vld [vmem:[%s18675_s7 + $0xc8] sm:$0xff] }
 0xcb2   :  { %v11658_v45 = vpack.c.bf16 %v7793_v57, %v7792_v36 }
 0xcb3   :  { %11657 = vmatpush3.bf16.msra.mxu1 %v11656_v38 }
 0xcb4   :  { %11637 = vmatpush1.bf16.msra.mxu0 %v11636_v14  ;;  %v7794_v14 = vld [vmem:[%s18675_s7 + $0xd0] sm:$0xff]  ;;  %11659 = vmatprep.subr.bf16.mxu1 %v11658_v45 }
 0xcb5   :  { %11639 = vmatprep.subr.bf16.mxu0 %v11638_v37  ;;  %v7795_v37 = vld [vmem:[%s18675_s7 + $0xd8] sm:$0xff] }
 0xcb6   :  { %v11662_v41 = vpack.c.bf16 %v7795_v37, %v7794_v14 }
 0xcb7   :  { %11661 = vmatpush3.bf16.msra.mxu1 %v11660_v33 }
 0xcb8   :  { %11641 = vmatpush1.bf16.msra.mxu0 %v11640_v48  ;;  %v7796_v48 = vld [vmem:[%s18675_s7 + $0xe0] sm:$0xff]  ;;  %11663 = vmatprep.subr.bf16.mxu1 %v11662_v41 }
 0xcb9   :  { %v11666_v28 = vpack.c.bf16 %v7797_v56, %v7796_v48 }
 0xcbb   :  { %7692 = vmatmul.mubr.f32.vlgmr.msra.gmra.mrb[44].mxu0 %v7386_v53  ;;  %11665 = vmatpush3.bf16.msra.mxu1 %v11664_v60  ;;  %v7782_v53 = vld [vmem:[%s18675_s7 + $0x70] sm:$0xff] }
 0xcbc   :  { %9297 = vmatprep.mubr.msk.f32.mxu0 %vm2991_vm5, %v7397_v24  ;;  %v7799_v24 = vld [vmem:[%s18675_s7 + $0xf8] sm:$0xff]  ;;  %11667 = vmatprep.subr.bf16.mxu1 %v11666_v28  ;;  %v11672_v49 = vpack.c.bf16 %v7783_v21, %v7782_v53  ;;  %v7802_v21 = vld [vmem:[%s18674_s6 + $0x10] sm:$0xff] }
 0xcbd   :  { %v11670_v59 = vpack.c.bf16 %v7799_v24, %v7798_v61  ;;  %v7801_v24 = vld [vmem:[%s18674_s6 + $0x8] sm:$0xff] }
 0xcbf   :  { %7698 = vmatmul.mubr.f32.gmra.mrb[46].mxu0 %v7395_v1  ;;  %11669 = vmatpush3.bf16.msra.mxu1 %v11668_v3  ;;  %v7803_v3 = vld [vmem:[%s18674_s6 + $0x18] sm:$0xff] }
 0xcc0   :  { %9298 = vmatprep.mubr.msk.f32.mxu0 %vm2991_vm5, %v7409_v43  ;;  %11671 = vmatprep.subr.bf16.mxu1 %v11670_v59  ;;  %v7800_v59 = vld [vmem:[%s18674_s6] sm:$0xff]  ;;  %v11674_v53 = vpack.c.bf16 %v7803_v3, %v7801_v24  ;;  %v8156_v24 = vld [vmem:[%s18679_s11 + $0xd8] sm:$0xff] }
 0xcc3   :  { %7704 = vmatmul.mubr.f32.gmra.mrb[48].mxu0 %v7406_v34  ;;  %11673 = vmatpush3.bf16.msra.mxu1 %v11672_v49  ;;  %v11676_v49 = vpack.c.bf16 %v7802_v21, %v7800_v59  ;;  %v8140_v21 = vld [vmem:[%s18679_s11 + $0x58] sm:$0xff] }
 0xcc4   :  { %9299 = vmatprep.mubr.msk.f32.mxu0 %vm2991_vm5, %v7417_v17  ;;  %11675 = vmatprep.subr.bf16.mxu1 %v11674_v53  ;;  %v8139_v53 = vld [vmem:[%s18679_s11 + $0x50] sm:$0xff] }
 0xcc7   :  { %7710 = vmatmul.mubr.f32.gmra.mrb[50].mxu0 %v7415_v63 }
 0xd8e   :  { %v17855_v16 = vpop.f32.mrb[44].mxu0 }
 0xd8f   :  { %v17857_v43 = vpop.f32.mrb[45].mxu0  ;;  %v7742_v1 = vmul.f32 %v17855_v16, %v17855_v16 }
 0xd90   :  { %v7743_v58 = vmul.f32 %v17857_v43, %v17857_v43 }
 0xd92   :  { %v17859_v42 = vpop.f32.mrb[46].mxu0 }
 0xd93   :  { %v7724_v19 = vadd.f32 %v17859_v42, %v17855_v16  ;;  %v7744_v13 = vmul.f32 %v17859_v42, %v17859_v42  ;;  %v17867_v12 = vpop.f32.mrb[47].mxu0 }
 0xd94   :  { %v7733_v17 = vadd.f32 %v17867_v12, %v17857_v43  ;;  %v7745_v34 = vmul.f32 %v17867_v12, %v17867_v12 }
 0xd95   :  { %v7750_v15 = vadd.f32 %v7744_v13, %v7742_v1 }
 0xd96   :  { %v7759_v63 = vadd.f32 %v7745_v34, %v7743_v58  ;;  %v17875_v11 = vpop.f32.mrb[48].mxu0 }
 0xd97   :  { %v7725_v27 = vadd.f32 %v7724_v19, %v17875_v11  ;;  %v7746_v46 = vmul.f32 %v17875_v11, %v17875_v11  ;;  %v17880_v40 = vpop.f32.mrb[49].mxu0 }
 0xd98   :  { %v7734_v18 = vadd.f32 %v7733_v17, %v17880_v40  ;;  %v7747_v0 = vmul.f32 %v17880_v40, %v17880_v40 }
 0xd99   :  { %v7751_v10 = vadd.f32 %v7750_v15, %v7746_v46 }
 0xd9a   :  { %v7760_v30 = vadd.f32 %v7759_v63, %v7747_v0  ;;  %v17885_v44 = vpop.f32.mrb[50].mxu0 }
 0xd9b   :  { %v7726_v52 = vadd.f32 %v7725_v27, %v17885_v44  ;;  %v7748_v47 = vmul.f32 %v17885_v44, %v17885_v44  ;;  %v17890_v5 = vpop.f32.mrb[51].mxu0 }
 0xd9c   :  { %v7735_v31 = vadd.f32 %v7734_v18, %v17890_v5  ;;  %v7749_v22 = vmul.f32 %v17890_v5, %v17890_v5  ;;  %v12142_v18 = vld [vmem:[%s18671_s3 + $0x4] sm:$0x1] }
 0xd9d   :  { %v7727_v32 = vrot.slane %v7726_v52, 4  ;;  %v7752_v29 = vadd.f32 %v7751_v10, %v7748_v47 }
 0xd9e   :  { %v7736_v20 = vrot.slane %v7735_v31, 4  ;;  %v7761_v2 = vadd.f32 %v7760_v30, %v7749_v22  ;;  %v12143_v30 = vld [vmem:[%s18671_s3 + $0x5] sm:$0x1]  ;;  %s12252_s3 = smov [#allocation10]  }
 0xd9f   :  { %v7728_v25 = vadd.f32 %v7727_v32, %v7726_v52  ;;  %v7753_v23 = vrot.slane %v7752_v29, 4  ;;  %v8145_v22 = vld [vmem:[%s18679_s11 + $0x80] sm:$0xff]  ;;  %v8146_v32 = vld [vmem:[%s18679_s11 + $0x88] sm:$0xff]  ;;  %s9174_s23 = sshll.u32 %s12252_s3, 4  ;;  %s9175_s23 = int_to_ptr.vmem [resolvable:$true] %s9174_s23 }
 0xda0   :  { %v7737_v39 = vadd.f32 %v7736_v20, %v7735_v31  ;;  %v7762_v54 = vrot.slane %v7761_v2, 4  ;;  %v8129_v20 = vld [vmem:[%s18679_s11] sm:$0xff]  ;;  %s12213_s26 = scalar_lea.vmem %s9175_s23, 32  ;;  %p12218_p11 = scmp.lt.s32.totalorder %s9175_s23, %s9175_s23 }
 0xda1   :  { %v7729_v62 = vrot.slane %v7728_v25, 2  ;;  %v7754_v36 = vadd.f32 %v7753_v23, %v7752_v29  ;;  %v11688_v29 = vpack.c.bf16 %v8146_v32, %v8145_v22  ;;  %v8148_v23 = vld [vmem:[%s18679_s11 + $0x98] sm:$0xff]  ;;  %p12214_p10 = scmp.ne.s32.totalorder %s9175_s23, %s12213_s26  ;;  %p12219_p12 = scmp.lt.s32.totalorder %s12213_s26, %s12213_s26 }
 0xda2   :  { %v7738_v57 = vrot.slane %v7737_v39, 2  ;;  %v7763_v38 = vadd.f32 %v7762_v54, %v7761_v2  ;;  %v8130_v2 = vld [vmem:[%s18679_s11 + $0x8] sm:$0xff]  ;;  %v8131_v54 = vld [vmem:[%s18679_s11 + $0x10] sm:$0xff] }
 0xda3   :  { %v7730_v45 = vadd.f32 %v7729_v62, %v7728_v25  ;;  %v7755_v4 = vrot.slane %v7754_v36, 2  ;;  %v11690_v25 = vpack.c.bf16 %v8130_v2, %v8129_v20  ;;  %11689 = vmatprep.subr.bf16.mxu0 %v11688_v29  ;;  %v8132_v62 = vld [vmem:[%s18679_s11 + $0x18] sm:$0xff]  ;;  %p12220_p13 = por %p12219_p12, %p12218_p11 }
 0xda4   :  { %v7739_v55 = vadd.f32 %v7738_v57, %v7737_v39  ;;  %v7764_v14 = vrot.slane %v7763_v38, 2  ;;  %v8149_v57 = vld [vmem:[%s18679_s11 + $0xa0] sm:$0xff] }
 0xda5   :  { %v7731_v37 = vrot.slane %v7730_v45, 1  ;;  %v7756_v33 = vadd.f32 %v7755_v4, %v7754_v36  ;;  %11691 = vmatpush3.bf16.msra.mxu0 %v11690_v25  ;;  %v11694_v36 = vpack.c.bf16 %v8132_v62, %v8131_v54  ;;  %v8133_v4 = vld [vmem:[%s18679_s11 + $0x20] sm:$0xff]  ;;  %p12221_p0 = pnand %p12220_p13, %p12214_p10 }
 0xda6   :  { %v7740_v41 = vrot.slane %v7739_v55, 1  ;;  %v7765_v9 = vadd.f32 %v7764_v14, %v7763_v38  ;;  %v8150_v38 = vld [vmem:[%s18679_s11 + $0xa8] sm:$0xff] }
 0xda7   :  { %v7757_v7 = vrot.slane %v7756_v33, 1  ;;  %v7732_v56 = vadd.f32 %v7731_v37, %v7730_v45  ;;  %v11696_v45 = vpack.c.bf16 %v8150_v38, %v8149_v57  ;;  %v8151_v37 = vld [vmem:[%s18679_s11 + $0xb0] sm:$0xff] }
 0xda8   :  { %v7766_v48 = vrot.slane %v7765_v9, 1  ;;  %v7741_v28 = vadd.f32 %v7740_v41, %v7739_v55  ;;  %v8134_v55 = vld [vmem:[%s18679_s11 + $0x28] sm:$0xff] }
 0xda9   :  { %v7758_v60 = vadd.f32 %v7757_v7, %v7756_v33  ;;  %v11698_v14 = vpack.c.bf16 %v8134_v55, %v8133_v4  ;;  %v8152_v33 = vld [vmem:[%s18679_s11 + $0xb8] sm:$0xff] }
 0xdaa   :  { %v7767_v8 = vadd.f32 %v7766_v48, %v7765_v9  ;;  %v11700_v41 = vpack.c.bf16 %v8152_v33, %v8151_v37  ;;  %v8135_v9 = vld [vmem:[%s18679_s11 + $0x30] sm:$0xff]  ;;  %v8136_v7 = vld [vmem:[%s18679_s11 + $0x38] sm:$0xff]  ;;  %v8153_v48 = vld [vmem:[%s18679_s11 + $0xc0] sm:$0xff] }
 0xdab   :  { %v7804_v26 = vsel %vm2828_vm4, %v7732_v56, %v7758_v60  ;;  %v8154_v56 = vld [vmem:[%s18679_s11 + $0xc8] sm:$0xff]  ;;  %v11702_v60 = vpack.c.bf16 %v8136_v7, %v8135_v9 }
 0xdac   :  { %v7805_v61 = vsel %vm2828_vm4, %v7741_v28, %v7767_v8  ;;  %v11704_v28 = vpack.c.bf16 %v8154_v56, %v8153_v48  ;;  %v8137_v8 = vld [vmem:[%s18679_s11 + $0x40] sm:$0xff] }
 0xdad   :  { %7870 = vmatprep.mubr.f32.mxu1 %v7805_v61  ;;  %v8155_v61 = vld [vmem:[%s18679_s11 + $0xd0] sm:$0xff] }
 0xdae   :  { %7871 = vmatmul.mubr.f32.vlgmr.msra.gmra.mrb[46].mxu1 %v7804_v26  ;;  %v8138_v26 = vld [vmem:[%s18679_s11 + $0x48] sm:$0xff]  ;;  %v11708_v59 = vpack.c.bf16 %v8156_v24, %v8155_v61 }
 0xdaf   :  { %7961 = vmatprep.mubr.f32.mxu1 %v17358_v51  ;;  %11677 = vmatpush1.bf16.msra.mxu1 %v11676_v49  ;;  %v11706_v3 = vpack.c.bf16 %v8138_v26, %v8137_v8  ;;  %v8157_v49 = vld [vmem:[%s18679_s11 + $0xe0] sm:$0xff] }
 0xe81   :  { %v9515_v1 = vpop.f32.mrb[46].mxu1 }
 0xe82   :  { %v9516_v19 = vpop.f32.mrb[47].mxu1 }
 0xe83   :  { %v9517_v13 = vadd.f32 %v9516_v19, %v9515_v1  ;;  %v8158_v1 = vld [vmem:[%s18679_s11 + $0xe8] sm:$0xff]  ;;  %v11710_v19 = vpack.c.bf16 %v8140_v21, %v8139_v53 }
 0xe85   :  { %v7876_v58 = vmul.f32 0.001953125, %v9517_v13  ;;  %v11712_v13 = vpack.c.bf16 %v8158_v1, %v8157_v49 }
 0xe87   :  { %v7877_v17 = vmul.f32 %v7876_v58, %v7876_v58 }
 0xe89   :  { %v7879_v34 = vrot.slane %v7877_v17, 7  ;;  %v8142_v17 = vld [vmem:[%s18679_s11 + $0x68] sm:$0xff] }
 0xe8b   :  { %v7881_v15 = vsub.f32 %v7876_v58, %v7879_v34  ;;  %v8159_v34 = vld [vmem:[%s18679_s11 + $0xf0] sm:$0xff] }
 0xe8d   :  { %v7882_v63 = vadd.f32 1e-05, %v7881_v15  ;;  %v8160_v15 = vld [vmem:[%s18679_s11 + $0xf8] sm:$0xff] }
 0xe8f   :  { %12128 = vrsqrt.f32 %v7882_v63 }
 0xe99   :  { %v12129_v27 = vpop.eup %12128 }
 0xe9a   :  { %v7885_v46 = vrot.slane %v12129_v27, 1  ;;  %v11716_v27 = vpack.c.bf16 %v8160_v15, %v8159_v34  ;;  %v8236_v34 = vld [vmem:[%s18680_s12] sm:$0xff]  ;;  %v8237_v15 = vld [vmem:[%s18680_s12 + $0x8] sm:$0xff] }
 0xe9c   :  { %v7887_v0 = vmul.f32 %v12142_v18, %v7885_v46 }
 0xe9e   :  { %v7888_v10 = vmul.f32 %v7887_v0, %v7876_v58  ;;  %v8141_v58 = vld [vmem:[%s18679_s11 + $0x60] sm:$0xff] }
 0xe9f   :  { %v11714_v63 = vpack.c.bf16 %v8142_v17, %v8141_v58  ;;  %v8253_v58 = vld [vmem:[%s18680_s12 + $0x88] sm:$0xff] }
 0xea0   :  { %v7889_v52 = vsub.f32 %v12143_v30, %v7888_v10 }
 0xea2   :  { %v7891_v47 = vrot.slane %v7889_v52, 7 }
 0xea4   :  { %v7893_v31 = vsel %vm2828_vm4, %v7887_v0, %v7891_v47 }
 0xea5   :  { %9300 = vmatmul.mubr.msk.f32.vlgmr.msra.gmra.mrb[48].mxu1 %vm2991_vm5, %v7893_v31 }
 0xea6   :  { %8116 = vmatprep.mubr.f32.mxu1 %v17358_v51  ;;  %v8147_v51 = vld [vmem:[%s18679_s11 + $0x90] sm:$0xff] }
 0xea7   :  { %v11692_v39 = vpack.c.bf16 %v8148_v23, %v8147_v51 }
 0xea9   :  { %11693 = vmatprep.subr.bf16.mxu0 %v11692_v39 }
 0xeaa   :  { %11695 = vmatpush3.bf16.msra.mxu0 %v11694_v36 }
 0xeab   :  { %11697 = vmatprep.subr.bf16.mxu0 %v11696_v45 }
 0xeae   :  { %11699 = vmatpush3.bf16.msra.mxu0 %v11698_v14 }
 0xeaf   :  { %11701 = vmatprep.subr.bf16.mxu0 %v11700_v41 }
 0xeb2   :  { %11703 = vmatpush3.bf16.msra.mxu0 %v11702_v60 }
 0xeb3   :  { %11705 = vmatprep.subr.bf16.mxu0 %v11704_v28 }
 0xeb6   :  { %11707 = vmatpush3.bf16.msra.mxu0 %v11706_v3 }
 0xeb7   :  { %11709 = vmatprep.subr.bf16.mxu0 %v11708_v59 }
 0xeba   :  { %11711 = vmatpush3.bf16.msra.mxu0 %v11710_v19 }
 0xebb   :  { %11713 = vmatprep.subr.bf16.mxu0 %v11712_v13  ;;  %v8252_v13 = vld [vmem:[%s18680_s12 + $0x80] sm:$0xff] }
 0xebc   :  { %v11720_v17 = vpack.c.bf16 %v8253_v58, %v8252_v13  ;;  %v8364_v13 = vld [vmem:[%s18681_s13 + $0x98] sm:$0xff]  ;;  %v8347_v58 = vld [vmem:[%s18681_s13 + $0x10] sm:$0xff] }
 0xebe   :  { %11715 = vmatpush3.bf16.msra.mxu0 %v11714_v63  ;;  %v8254_v63 = vld [vmem:[%s18680_s12 + $0x90] sm:$0xff] }
 0xebf   :  { %11717 = vmatprep.subr.bf16.mxu0 %v11716_v27  ;;  %v8255_v27 = vld [vmem:[%s18680_s12 + $0x98] sm:$0xff] }
 0xf78   :  { %v7963_v46 = vpop.f32.mrb[48].mxu1 }
 0xf79   :  { %v7971_v18 = vrot.slane %v7963_v46, %v19156_v50  ;;  %v7965_v0 = vpop.f32.mrb[49].mxu1  ;;  %v7987_v10 = vrot.slane %v7963_v46, %v19157_v35  ;;  %v11722_v46 = vpack.c.bf16 %v8237_v15, %v8236_v34 }
 0xf7a   :  { %v7975_v30 = vrot.slane %v7965_v0, %v19156_v50  ;;  %v7991_v52 = vrot.slane %v7965_v0, %v19157_v35  ;;  %v8238_v0 = vld [vmem:[%s18680_s12 + $0x10] sm:$0xff] }
 0xf7b   :  { %v7976_v47 = vmul.f32 %v7971_v18, %v17855_v16  ;;  %v7978_v31 = vmul.f32 %v7971_v18, %v17859_v42  ;;  %v7980_v22 = vmul.f32 %v7971_v18, %v17875_v11  ;;  %v7982_v32 = vmul.f32 %v7971_v18, %v17885_v44 }
 0xf7c   :  { %v7977_v29 = vmul.f32 %v7975_v30, %v17857_v43  ;;  %v7979_v20 = vmul.f32 %v7975_v30, %v17867_v12  ;;  %v7981_v2 = vmul.f32 %v7975_v30, %v17880_v40  ;;  %v7983_v25 = vmul.f32 %v7975_v30, %v17890_v5  ;;  %v8256_v30 = vld [vmem:[%s18680_s12 + $0xa0] sm:$0xff] }
 0xf7d   :  { %v7992_v51 = vadd.f32 %v7987_v10, %v7976_v47  ;;  %v7994_v50 = vadd.f32 %v7987_v10, %v7978_v31  ;;  %v7996_v23 = vadd.f32 %v7987_v10, %v7980_v22  ;;  %v7998_v35 = vadd.f32 %v7987_v10, %v7982_v32  ;;  %v8239_v10 = vld [vmem:[%s18680_s12 + $0x18] sm:$0xff]  ;;  %v18065_v47 = vld [vmem:[#allocation3] sm:$0xff] }
 0xf7e   :  { %v7997_v39 = vadd.f32 %v7991_v52, %v7981_v2  ;;  %v7999_v16 = vadd.f32 %v7991_v52, %v7983_v25  ;;  %v7993_v54 = vadd.f32 %v7991_v52, %v7977_v29  ;;  %v7995_v42 = vadd.f32 %v7991_v52, %v7979_v20  ;;  %v12144_v52 = vld [vmem:[%s18676_s8] sm:$0xff]  ;;  %v8241_v29 = vld [vmem:[%s18680_s12 + $0x28] sm:$0xff]  ;;  %v8258_v20 = vld [vmem:[%s18680_s12 + $0xb0] sm:$0xff] }
 0xf7f   :  { %v8000_v62 = vmax.f32 %v7992_v51, 0.0  ;;  %v8002_v11 = vmax.f32 %v7994_v50, 0.0  ;;  %v8004_v36 = vmax.f32 %v7996_v23, 0.0  ;;  %v8006_v44 = vmax.f32 %v7998_v35, 0.0  ;;  %v8240_v32 = vld [vmem:[%s18680_s12 + $0x20] sm:$0xff]  ;;  %v8259_v2 = vld [vmem:[%s18680_s12 + $0xb8] sm:$0xff] }
 0xf80   :  { %v8005_v57 = vmax.f32 %v7997_v39, 0.0  ;;  %v8007_v43 = vmax.f32 %v7999_v16, 0.0  ;;  %v8001_v38 = vmax.f32 %v7993_v54, 0.0  ;;  %v8003_v12 = vmax.f32 %v7995_v42, 0.0  ;;  %v12146_v25 = vld [vmem:[%s18676_s8 + $0x8] sm:$0xff]  ;;  %v8242_v23 = vld [vmem:[%s18680_s12 + $0x30] sm:$0xff] }
 0xf81   :  { %v8016_v45 = vrot.slane %v8000_v62, 1  ;;  %v8017_v40 = vrot.slane %v8002_v11, 1  ;;  %v8022_v4 = vrot.slane %v8004_v36, 1  ;;  %v8026_v5 = vrot.slane %v8006_v44, 1  ;;  %v8243_v35 = vld [vmem:[%s18680_s12 + $0x38] sm:$0xff]  ;;  %v8260_v39 = vld [vmem:[%s18680_s12 + $0xc0] sm:$0xff] }
 0xf82   :  { %v8019_v55 = vrot.slane %v8001_v38, 1  ;;  %v8020_v14 = vrot.slane %v8003_v12, 1  ;;  %v8024_v37 = vrot.slane %v8005_v57, 1  ;;  %v8028_v33 = vrot.slane %v8007_v43, 1  ;;  %v8261_v16 = vld [vmem:[%s18680_s12 + $0xc8] sm:$0xff] }
 0xf83   :  { %v8027_v41 = vsel %vm3372_vm6, %v8022_v4, %v8026_v5  ;;  %v8044_v9 = vmax.f32 %v8006_v44, %v8026_v5  ;;  %v8018_v7 = vsel %vm3372_vm6, %v8016_v45, %v8017_v40  ;;  %v8023_v48 = vsel %vm3372_vm6, %v8017_v40, %v8022_v4  ;;  %v8263_v44 = vld [vmem:[%s18680_s12 + $0xd8] sm:$0xff]  ;;  %v8264_v45 = vld [vmem:[%s18680_s12 + $0xe0] sm:$0xff]  ;;  %v8265_v40 = vld [vmem:[%s18680_s12 + $0xe8] sm:$0xff] }
 0xf84   :  { %v8042_v56 = vmax.f32 %v8004_v36, %v8027_v41  ;;  %v8021_v60 = vsel %vm3372_vm6, %v8019_v55, %v8020_v14  ;;  %v8025_v28 = vsel %vm3372_vm6, %v8020_v14, %v8024_v37  ;;  %v8038_v8 = vmax.f32 %v8000_v62, %v8018_v7  ;;  %v8244_v62 = vld [vmem:[%s18680_s12 + $0x40] sm:$0xff]  ;;  %v8262_v36 = vld [vmem:[%s18680_s12 + $0xd0] sm:$0xff]  ;;  %v8249_v14 = vld [vmem:[%s18680_s12 + $0x68] sm:$0xff] }
 0xf85   :  { %v8039_v26 = vmax.f32 %v8001_v38, %v8021_v60  ;;  %v8041_v61 = vmax.f32 %v8003_v12, %v8025_v28  ;;  %v8040_v24 = vmax.f32 %v8002_v11, %v8023_v48  ;;  %v8029_v3 = vsel %vm3372_vm6, %v8024_v37, %v8028_v33  ;;  %v8245_v11 = vld [vmem:[%s18680_s12 + $0x48] sm:$0xff]  ;;  %v8246_v38 = vld [vmem:[%s18680_s12 + $0x50] sm:$0xff]  ;;  %v8247_v12 = vld [vmem:[%s18680_s12 + $0x58] sm:$0xff] }
 0xf86   :  { %v8043_v59 = vmax.f32 %v8005_v57, %v8029_v3  ;;  %v8045_v53 = vmax.f32 %v8007_v43, %v8028_v33  ;;  %v11685_v21 = vpack.c.bf16 %v8044_v9, %v8042_v56  ;;  %v11724_v18 = vpack.c.bf16 %v8255_v27, %v8254_v63  ;;  %v8248_v55 = vld [vmem:[%s18680_s12 + $0x60] sm:$0xff]  ;;  %v8266_v37 = vld [vmem:[%s18680_s12 + $0xf0] sm:$0xff]  ;;  %v8267_v33 = vld [vmem:[%s18680_s12 + $0xf8] sm:$0xff] }
 0xf87   :  { %v11678_v49 = vpack.c.bf16 %v8041_v61, %v8039_v26  ;;  %v11680_v1 = vpack.c.bf16 %v8040_v24, %v8038_v8  ;;  %v11726_v31 = vpack.c.bf16 %v8239_v10, %v8238_v0  ;;  %v11728_v22 = vpack.c.bf16 %v8257_v6, %v8256_v30  ;;  %v8143_v7 = vld [vmem:[%s18679_s11 + $0x70] sm:$0xff]  ;;  %v8144_v48 = vld [vmem:[%s18679_s11 + $0x78] sm:$0xff]  ;;  %v8361_v61 = vld [vmem:[%s18681_s13 + $0x80] sm:$0xff] }
 0xf88   :  { %v11682_v19 = vpack.c.bf16 %v8045_v53, %v8043_v59  ;;  %v11730_v51 = vpack.c.bf16 %v8241_v29, %v8240_v32  ;;  %v11732_v50 = vpack.c.bf16 %v8259_v2, %v8258_v20  ;;  %v11734_v54 = vpack.c.bf16 %v8243_v35, %v8242_v23  ;;  %v8250_v56 = vld [vmem:[%s18680_s12 + $0x70] sm:$0xff]  ;;  %v8251_v28 = vld [vmem:[%s18680_s12 + $0x78] sm:$0xff]  ;;  %v8362_v24 = vld [vmem:[%s18681_s13 + $0x88] sm:$0xff] }
 0xf89   :  { %11679 = vmatprep.subr.bf16.mxu1 %v11678_v49  ;;  %v11736_v42 = vpack.c.bf16 %v8261_v16, %v8260_v39  ;;  %v11738_v57 = vpack.c.bf16 %v8245_v11, %v8244_v62  ;;  %v11740_v43 = vpack.c.bf16 %v8263_v44, %v8262_v36  ;;  %v11742_v4 = vpack.c.bf16 %v8247_v12, %v8246_v38  ;;  %v8345_v3 = vld [vmem:[%s18681_s13] sm:$0xff]  ;;  %v8346_v59 = vld [vmem:[%s18681_s13 + $0x8] sm:$0xff]  ;;  %v8352_v32 = vld [vmem:[%s18681_s13 + $0x38] sm:$0xff] }
 0xf8a   :  { %11681 = vmatpush1.bf16.msra.mxu1 %v11680_v1  ;;  %v11744_v5 = vpack.c.bf16 %v8265_v40, %v8264_v45  ;;  %v11746_v41 = vpack.c.bf16 %v8249_v14, %v8248_v55  ;;  %v11748_v9 = vpack.c.bf16 %v8267_v33, %v8266_v37  ;;  %v11718_v60 = vpack.c.bf16 %v8144_v48, %v8143_v7  ;;  %v8363_v1 = vld [vmem:[%s18681_s13 + $0x90] sm:$0xff]  ;;  %v8365_v27 = vld [vmem:[%s18681_s13 + $0xa0] sm:$0xff]  ;;  %v8350_v10 = vld [vmem:[%s18681_s13 + $0x28] sm:$0xff] }
 0xf8b   :  { %11684 = vmatprep.subr.msk.bf16.mxu1 %vm14560_vm9, %v11682_v19  ;;  %v11750_v8 = vpack.c.bf16 %v8251_v28, %v8250_v56  ;;  %v12250_v26 = vmov 0.0|0.0   ;;  %v11777_v49 = vpack.c.bf16 %v8346_v59, %v8345_v3  ;;  %v11756_v15 = vpack.c.bf16 %v8364_v13, %v8363_v1  ;;  %v8349_v0 = vld [vmem:[%s18681_s13 + $0x20] sm:$0xff]  ;;  %v8371_v39 = vld [vmem:[%s18681_s13 + $0xd0] sm:$0xff]  ;;  %v8372_v16 = vld [vmem:[%s18681_s13 + $0xd8] sm:$0xff] }
 0xf8c   :  { %11719 = vmatpush3.bf16.msra.mxu0 %v11718_v60  ;;  %v11783_v6 = vpack.c.bf16 %v8350_v10, %v8349_v0  ;;  %v8369_v2 = vld [vmem:[%s18681_s13 + $0xc0] sm:$0xff]  ;;  %v8356_v62 = vld [vmem:[%s18681_s13 + $0x58] sm:$0xff]  ;;  %v8374_v44 = vld [vmem:[%s18681_s13 + $0xe8] sm:$0xff] }
 0xf8d   :  { %11752 = vmatprep.subr.bf16.mxu0 %v12250_v26  ;;  %v8373_v11 = vld [vmem:[%s18681_s13 + $0xe0] sm:$0xff]  ;;  %v8358_v38 = vld [vmem:[%s18681_s13 + $0x68] sm:$0xff]  ;;  %v8375_v12 = vld [vmem:[%s18681_s13 + $0xf0] sm:$0xff] }
 0xf8e   :  { %11687 = vmatpush1.bf16.msk.msra.mxu1 %vm14560_vm9, %v11685_v21  ;;  %v11753_v21 = vpack.c.bf16 %v8362_v24, %v8361_v61  ;;  %v8376_v40 = vld [vmem:[%s18681_s13 + $0xf8] sm:$0xff]  ;;  %v8526_v56 = vld [vmem:[%s18681_s13 + $0x100] sm:$0xff]  ;;  %v8527_v61 = vld [vmem:[%s18681_s13 + $0x108] sm:$0xff] }
 0xf8f   :  { %11721 = vmatprep.subr.bf16.mxu1 %v11720_v17  ;;  %v8348_v17 = vld [vmem:[%s18681_s13 + $0x18] sm:$0xff]  ;;  %v11774_v55 = vpack.c.bf16 %v8376_v40, %v8375_v12  ;;  %v8617_v24 = vld [vmem:[%s18681_s13 + $0x180] sm:$0xff]  ;;  %v8618_v3 = vld [vmem:[%s18681_s13 + $0x188] sm:$0xff]  ;;  %v11801_v13 = vpack.c.bf16 %v8527_v61, %v8526_v56 }
 0xf90   :  { %v11780_v63 = vpack.c.bf16 %v8348_v17, %v8347_v58  ;;  %v11825_v58 = vpack.c.bf16 %v8618_v3, %v8617_v24  ;;  %v8624_v40 = vld [vmem:[%s18681_s13 + $0x1b8] sm:$0xff]  ;;  %v8627_v56 = vld [vmem:[%s18681_s13 + $0x1d0] sm:$0xff]  ;;  %v8539_v61 = vld [vmem:[%s18681_s13 + $0x168] sm:$0xff] }
 0xf91   :  { %9303 = vmatmul.mubr.msk.f32.vlgmr.msra.gmra.mrb[50].mxu1 %vm3433_vm7, %v12144_v52  ;;  %v8367_v52 = vld [vmem:[%s18681_s13 + $0xb0] sm:$0xff]  ;;  %v8629_v3 = vld [vmem:[%s18681_s13 + $0x1e0] sm:$0xff] }
 0xf92   :  { %8122 = vmatprep.mubr.f32.mxu1 %v18065_v47  ;;  %11723 = vmatpush3.bf16.msra.mxu1 %v11722_v46 }
 0xf93   :  { %11725 = vmatprep.subr.bf16.mxu1 %v11724_v18  ;;  %v8366_v18 = vld [vmem:[%s18681_s13 + $0xa8] sm:$0xff] }
 0xf94   :  { %v11759_v30 = vpack.c.bf16 %v8366_v18, %v8365_v27 }
 0xf95   :  { %9304 = vmatmul.mubr.msk.f32.gmra.mrb[52].mxu1 %vm3433_vm7, %v12146_v25  ;;  %v8370_v25 = vld [vmem:[%s18681_s13 + $0xc8] sm:$0xff] }
 0xf96   :  { %11727 = vmatpush3.bf16.msra.mxu1 %v11726_v31  ;;  %v8368_v31 = vld [vmem:[%s18681_s13 + $0xb8] sm:$0xff]  ;;  %v11765_v23 = vpack.c.bf16 %v8370_v25, %v8369_v2 }
 0xf97   :  { %11729 = vmatprep.subr.bf16.mxu1 %v11728_v22  ;;  %v8351_v22 = vld [vmem:[%s18681_s13 + $0x30] sm:$0xff]  ;;  %v11762_v29 = vpack.c.bf16 %v8368_v31, %v8367_v52 }
 0xf98   :  { %v11786_v20 = vpack.c.bf16 %v8352_v32, %v8351_v22  ;;  %v8619_v31 = vld [vmem:[%s18681_s13 + $0x190] sm:$0xff]  ;;  %v8620_v22 = vld [vmem:[%s18681_s13 + $0x198] sm:$0xff] }
 0xf9a   :  { %11731 = vmatpush3.bf16.msra.mxu1 %v11730_v51  ;;  %v8353_v51 = vld [vmem:[%s18681_s13 + $0x40] sm:$0xff] }
 0xf9b   :  { %11733 = vmatprep.subr.bf16.mxu1 %v11732_v50  ;;  %v8354_v50 = vld [vmem:[%s18681_s13 + $0x48] sm:$0xff] }
 0xf9c   :  { %v11789_v35 = vpack.c.bf16 %v8354_v50, %v8353_v51 }
 0xf9e   :  { %11735 = vmatpush3.bf16.msra.mxu1 %v11734_v54  ;;  %v11768_v54 = vpack.c.bf16 %v8372_v16, %v8371_v39  ;;  %v8531_v39 = vld [vmem:[%s18681_s13 + $0x128] sm:$0xff] }
 0xf9f   :  { %11737 = vmatprep.subr.bf16.mxu1 %v11736_v42  ;;  %v8355_v42 = vld [vmem:[%s18681_s13 + $0x50] sm:$0xff] }
 0xfa0   :  { %v11792_v36 = vpack.c.bf16 %v8356_v62, %v8355_v42  ;;  %v11828_v62 = vpack.c.bf16 %v8620_v22, %v8619_v31  ;;  %v8712_v31 = vld [vmem:[%s18681_s13 + $0x220] sm:$0xff]  ;;  %v8713_v22 = vld [vmem:[%s18681_s13 + $0x228] sm:$0xff] }
 0xfa2   :  { %11739 = vmatpush3.bf16.msra.mxu1 %v11738_v57  ;;  %v11771_v57 = vpack.c.bf16 %v8374_v44, %v8373_v11  ;;  %v8622_v44 = vld [vmem:[%s18681_s13 + $0x1a8] sm:$0xff] }
 0xfa3   :  { %11741 = vmatprep.subr.bf16.mxu1 %v11740_v43  ;;  %v8357_v43 = vld [vmem:[%s18681_s13 + $0x60] sm:$0xff] }
 0xfa4   :  { %v11795_v45 = vpack.c.bf16 %v8358_v38, %v8357_v43  ;;  %v8532_v43 = vld [vmem:[%s18681_s13 + $0x130] sm:$0xff]  ;;  %v8533_v38 = vld [vmem:[%s18681_s13 + $0x138] sm:$0xff] }
 0xfa6   :  { %11743 = vmatpush3.bf16.msra.mxu1 %v11742_v4  ;;  %v8359_v4 = vld [vmem:[%s18681_s13 + $0x70] sm:$0xff] }
 0xfa7   :  { %11745 = vmatprep.subr.bf16.mxu1 %v11744_v5  ;;  %v8360_v5 = vld [vmem:[%s18681_s13 + $0x78] sm:$0xff] }
 0xfa8   :  { %v11798_v14 = vpack.c.bf16 %v8360_v5, %v8359_v4  ;;  %v11810_v4 = vpack.c.bf16 %v8533_v38, %v8532_v43  ;;  %v8534_v5 = vld [vmem:[%s18681_s13 + $0x140] sm:$0xff]  ;;  %v8808_v43 = vld [vmem:[%s18681_s13 + $0x2c8] sm:$0xff] }
 0xfaa   :  { %11747 = vmatpush3.bf16.msra.mxu1 %v11746_v41 }
 0xfab   :  { %11749 = vmatprep.subr.bf16.mxu1 %v11748_v9 }
 0xfae   :  { %11751 = vmatpush3.bf16.msra.mxu1 %v11750_v8 }
 0xfaf   :  { %11776 = vmatprep.subr.bf16.mxu1 %v12250_v26 }
0x1064   :  { %v8118_v53 = vpop.f32.mrb[50].mxu1 }
0x1065   :  { %v8120_v19 = vpop.f32.mrb[51].mxu1 }
0x1066   :  { %8225 = vmatprep.mubr.f32.mxu0 %v8120_v19  ;;  %8332 = vmatprep.mubr.f32.mxu1 %v8120_v19 }
0x1067   :  { %8226 = vmatmul.mubr.f32.vlgmr.msra.gmra.mrb[52].mxu0 %v8118_v53  ;;  %8333 = vmatmul.mubr.f32.vlgmr.msra.gmra.mrb[54].mxu1 %v8118_v53 }
0x1068   :  { %v8124_v34 = vpop.f32.mrb[52].mxu1  ;;  %11754 = vmatpush3.bf16.msra.mxu0 %v11753_v21  ;;  %11778 = vmatpush3.bf16.msra.mxu1 %v11777_v49  ;;  %v8528_v21 = vld [vmem:[%s18681_s13 + $0x110] sm:$0xff]  ;;  %v8529_v49 = vld [vmem:[%s18681_s13 + $0x118] sm:$0xff] }
0x1069   :  { %v8126_v46 = vpop.f32.mrb[53].mxu1  ;;  %11755 = vmatprep.subr.bf16.mxu0 %v12250_v26  ;;  %11779 = vmatprep.subr.bf16.mxu1 %v12250_v26 }
0x106a   :  { %8230 = vmatprep.mubr.f32.mxu0 %v8126_v46  ;;  %8337 = vmatprep.mubr.f32.mxu1 %v8126_v46 }
0x106b   :  { %8231 = vmatmul.mubr.f32.gmra.mrb[54].mxu0 %v8124_v34  ;;  %8338 = vmatmul.mubr.f32.gmra.mrb[56].mxu1 %v8124_v34 }
0x106c   :  { %11757 = vmatpush3.bf16.msra.mxu0 %v11756_v15  ;;  %11781 = vmatpush3.bf16.msra.mxu1 %v11780_v63  ;;  %v11804_v15 = vpack.c.bf16 %v8529_v49, %v8528_v21  ;;  %v8540_v21 = vld [vmem:[%s18681_s13 + $0x170] sm:$0xff]  ;;  %v8541_v49 = vld [vmem:[%s18681_s13 + $0x178] sm:$0xff] }
0x106d   :  { %11758 = vmatprep.subr.bf16.mxu0 %v12250_v26  ;;  %11782 = vmatprep.subr.bf16.mxu1 %v12250_v26 }
0x106e   :  { %9767 = vmatprep.mubr.msk.f32.mxu0 %vm12251_vm11, %v18065_v47  ;;  %9802 = vmatprep.mubr.msk.f32.mxu1 %vm12251_vm11, %v18065_v47 }
0x1070   :  { %11760 = vmatpush3.bf16.msra.mxu0 %v11759_v30  ;;  %11784 = vmatpush3.bf16.msra.mxu1 %v11783_v6 }
0x1071   :  { %11761 = vmatprep.subr.bf16.mxu0 %v12250_v26  ;;  %11785 = vmatprep.subr.bf16.mxu1 %v12250_v26 }
0x1074   :  { %11763 = vmatpush3.bf16.msra.mxu0 %v11762_v29  ;;  %11787 = vmatpush3.bf16.msra.mxu1 %v11786_v20 }
0x1075   :  { %11764 = vmatprep.subr.bf16.mxu0 %v12250_v26  ;;  %11788 = vmatprep.subr.bf16.mxu1 %v12250_v26 }
0x1078   :  { %11766 = vmatpush3.bf16.msra.mxu0 %v11765_v23  ;;  %11790 = vmatpush3.bf16.msra.mxu1 %v11789_v35  ;;  %v8530_v35 = vld [vmem:[%s18681_s13 + $0x120] sm:$0xff] }
0x1079   :  { %11767 = vmatprep.subr.bf16.mxu0 %v12250_v26  ;;  %11791 = vmatprep.subr.bf16.mxu1 %v12250_v26 }
0x107c   :  { %11769 = vmatpush3.bf16.msra.mxu0 %v11768_v54  ;;  %11793 = vmatpush3.bf16.msra.mxu1 %v11792_v36  ;;  %v8621_v36 = vld [vmem:[%s18681_s13 + $0x1a0] sm:$0xff] }
0x107d   :  { %11770 = vmatprep.subr.bf16.mxu0 %v12250_v26  ;;  %11794 = vmatprep.subr.bf16.mxu1 %v12250_v26  ;;  %v11831_v12 = vpack.c.bf16 %v8622_v44, %v8621_v36  ;;  %v8717_v36 = vld [vmem:[%s18681_s13 + $0x248] sm:$0xff] }
0x1080   :  { %11772 = vmatpush3.bf16.msra.mxu0 %v11771_v57  ;;  %11796 = vmatpush3.bf16.msra.mxu1 %v11795_v45  ;;  %v11807_v57 = vpack.c.bf16 %v8531_v39, %v8530_v35  ;;  %v8623_v45 = vld [vmem:[%s18681_s13 + $0x1b0] sm:$0xff]  ;;  %v8806_v35 = vld [vmem:[%s18681_s13 + $0x2b8] sm:$0xff] }
0x1081   :  { %11773 = vmatprep.subr.bf16.mxu0 %v12250_v26  ;;  %11797 = vmatprep.subr.bf16.mxu1 %v12250_v26 }
0x1084   :  { %11775 = vmatpush3.bf16.msra.mxu0 %v11774_v55  ;;  %11799 = vmatpush3.bf16.msra.mxu1 %v11798_v14  ;;  %v8535_v55 = vld [vmem:[%s18681_s13 + $0x148] sm:$0xff]  ;;  %v11834_v14 = vpack.c.bf16 %v8624_v40, %v8623_v45  ;;  %v8719_v45 = vld [vmem:[%s18681_s13 + $0x258] sm:$0xff] }
0x1085   :  { %11800 = vmatprep.subr.bf16.mxu0 %v12250_v26  ;;  %11824 = vmatprep.subr.bf16.mxu1 %v12250_v26 }
0x113a   :  { %v9550_v37 = vpop.f32.mrb[52].mxu0  ;;  %v9588_v33 = vpop.f32.mrb[54].mxu1 }
0x113b   :  { %v9551_v41 = vpop.f32.mrb[53].mxu0  ;;  %v9589_v9 = vpop.f32.mrb[55].mxu1 }
0x113c   :  { %v9552_v7 = vadd.f32 %v9551_v41, %v9550_v37  ;;  %v9590_v48 = vadd.f32 %v9589_v9, %v9588_v33  ;;  %v8625_v37 = vld [vmem:[%s18681_s13 + $0x1c0] sm:$0xff]  ;;  %v8626_v33 = vld [vmem:[%s18681_s13 + $0x1c8] sm:$0xff]  ;;  %v11813_v41 = vpack.c.bf16 %v8535_v55, %v8534_v5  ;;  %v8536_v9 = vld [vmem:[%s18681_s13 + $0x150] sm:$0xff] }
0x113d   :  { %v8810_v5 = vld [vmem:[%s18681_s13 + $0x2d8] sm:$0xff] }
0x113e   :  { %v8343_v60 = vmax.f32 %v9552_v7, %v9590_v48  ;;  %v9553_v28 = vpop.f32.mrb[54].mxu0  ;;  %v9591_v8 = vpop.f32.mrb[56].mxu1  ;;  %v8537_v7 = vld [vmem:[%s18681_s13 + $0x158] sm:$0xff]  ;;  %v11837_v48 = vpack.c.bf16 %v8626_v33, %v8625_v37  ;;  %v8721_v37 = vld [vmem:[%s18681_s13 + $0x268] sm:$0xff] }
0x113f   :  { %v9554_v59 = vpop.f32.mrb[55].mxu0  ;;  %v9592_v53 = vpop.f32.mrb[57].mxu1 }
0x1140   :  { %v9555_v1 = vadd.f32 %v9554_v59, %v9553_v28  ;;  %v9593_v19 = vadd.f32 %v9592_v53, %v9591_v8  ;;  %v8379_v34 = vrot.slane %v8343_v60, 1  ;;  %v8542_v63 = vrot.slane %v8343_v60, 2  ;;  %v8538_v8 = vld [vmem:[%s18681_s13 + $0x160] sm:$0xff]  ;;  %v8630_v59 = vld [vmem:[%s18681_s13 + $0x1e8] sm:$0xff] }
0x1141   :  { %v8633_v27 = vrot.slane %v8343_v60, 3  ;;  %v8724_v46 = vrot.slane %v8343_v60, 4  ;;  %v8815_v18 = vrot.slane %v8343_v60, 5  ;;  %v8906_v0 = vrot.slane %v8343_v60, 6 }
0x1142   :  { %v8344_v17 = vmax.f32 %v9555_v1, %v9593_v19  ;;  %v8997_v23 = vrot.slane %v8343_v60, 7  ;;  %v11816_v28 = vpack.c.bf16 %v8537_v7, %v8536_v9  ;;  %v11819_v53 = vpack.c.bf16 %v8539_v61, %v8538_v8  ;;  %v8631_v19 = vld [vmem:[%s18681_s13 + $0x1f0] sm:$0xff]  ;;  %v8812_v9 = vld [vmem:[%s18681_s13 + $0x2e8] sm:$0xff]  ;;  %v8814_v8 = vld [vmem:[%s18681_s13 + $0x2f8] sm:$0xff] }
0x1143   :  { %v11843_v1 = vpack.c.bf16 %v8630_v59, %v8629_v3  ;;  %v8891_v3 = vld [vmem:[%s18681_s13 + $0x308] sm:$0xff] }
0x1144   :  { %v8381_v10 = vsel %vm8380_vm12, %v8344_v17, %v8379_v34  ;;  %v8453_v30 = vrot.slane %v8344_v17, 7  ;;  %v8543_v6 = vrot.slane %v8344_v17, 1  ;;  %v8634_v52 = vrot.slane %v8344_v17, 2  ;;  %v8709_v34 = vld [vmem:[%s18681_s13 + $0x208] sm:$0xff] }
0x1145   :  { %9768 = vmatmul.mubr.f32.vlgmr.msra.gmra.mrb[56].mxu0 %v8381_v10  ;;  %v8725_v32 = vrot.slane %v8344_v17, 3  ;;  %v8816_v29 = vrot.slane %v8344_v17, 4  ;;  %v8907_v20 = vrot.slane %v8344_v17, 5  ;;  %v8998_v2 = vrot.slane %v8344_v17, 6  ;;  %v8708_v17 = vld [vmem:[%s18681_s13 + $0x200] sm:$0xff] }
0x1146   :  { %11802 = vmatpush3.bf16.msra.mxu0 %v11801_v13  ;;  %v8454_v25 = vsel %vm8380_vm12, %v8453_v30, %v8343_v60  ;;  %9837 = vmatprep.mubr.msk.f32.mxu0 %vm12251_vm11, %v18065_v47  ;;  %v18291_v51 = vsel %vm8380_vm12, %v8543_v6, %v8542_v63  ;;  %v18294_v50 = vsel %vm8380_vm12, %v8634_v52, %v8633_v27  ;;  %v8628_v60 = vld [vmem:[%s18681_s13 + $0x1d8] sm:$0xff]  ;;  %v8799_v63 = vld [vmem:[%s18681_s13 + $0x280] sm:$0xff]  ;;  %v8800_v27 = vld [vmem:[%s18681_s13 + $0x288] sm:$0xff] }
0x1147   :  { %9803 = vmatmul.mubr.f32.vlgmr.msra.gmra.mrb[58].mxu1 %v8454_v25  ;;  %11803 = vmatprep.subr.bf16.mxu0 %v12250_v26  ;;  %v18304_v16 = vsel %vm8380_vm12, %v8725_v32, %v8724_v46  ;;  %v18307_v54 = vsel %vm8380_vm12, %v8816_v29, %v8815_v18  ;;  %v18310_v42 = vsel %vm8380_vm12, %v8907_v20, %v8906_v0  ;;  %v8632_v13 = vld [vmem:[%s18681_s13 + $0x1f8] sm:$0xff]  ;;  %v8710_v18 = vld [vmem:[%s18681_s13 + $0x210] sm:$0xff]  ;;  %v8803_v29 = vld [vmem:[%s18681_s13 + $0x2a0] sm:$0xff] }
0x1148   :  { %11826 = vmatpush3.bf16.msra.mxu1 %v11825_v58  ;;  %9872 = vmatprep.mubr.msk.f32.mxu1 %vm12251_vm11, %v18065_v47  ;;  %v18315_v11 = vsel %vm8380_vm12, %v8998_v2, %v8997_v23  ;;  %v11840_v24 = vpack.c.bf16 %v8628_v60, %v8627_v56  ;;  %v11822_v58 = vpack.c.bf16 %v8541_v49, %v8540_v21  ;;  %v8711_v0 = vld [vmem:[%s18681_s13 + $0x218] sm:$0xff]  ;;  %v8801_v30 = vld [vmem:[%s18681_s13 + $0x290] sm:$0xff]  ;;  %v8804_v20 = vld [vmem:[%s18681_s13 + $0x2a8] sm:$0xff] }
0x1149   :  { %11827 = vmatprep.subr.bf16.mxu1 %v12250_v26  ;;  %v11849_v46 = vpack.c.bf16 %v8709_v34, %v8708_v17  ;;  %v11873_v10 = vpack.c.bf16 %v8800_v27, %v8799_v63  ;;  %v8802_v6 = vld [vmem:[%s18681_s13 + $0x298] sm:$0xff]  ;;  %v11852_v52 = vpack.c.bf16 %v8711_v0, %v8710_v18  ;;  %v11855_v2 = vpack.c.bf16 %v8713_v22, %v8712_v31  ;;  %v8714_v25 = vld [vmem:[%s18681_s13 + $0x230] sm:$0xff]  ;;  %v8982_v21 = vld [vmem:[%s18681_s13 + $0x388] sm:$0xff] }
0x114a   :  { %11805 = vmatpush3.bf16.msra.mxu0 %v11804_v15  ;;  %v11846_v15 = vpack.c.bf16 %v8632_v13, %v8631_v19  ;;  %v11876_v32 = vpack.c.bf16 %v8802_v6, %v8801_v30  ;;  %v8805_v23 = vld [vmem:[%s18681_s13 + $0x2b0] sm:$0xff]  ;;  %v8723_v56 = vld [vmem:[%s18681_s13 + $0x278] sm:$0xff]  ;;  %v8986_v27 = vld [vmem:[%s18681_s13 + $0x3a8] sm:$0xff] }
0x114b   :  { %11806 = vmatprep.subr.bf16.mxu0 %v12250_v26  ;;  %v11882_v44 = vpack.c.bf16 %v8806_v35, %v8805_v23  ;;  %v8893_v19 = vld [vmem:[%s18681_s13 + $0x318] sm:$0xff]  ;;  %v8896_v18 = vld [vmem:[%s18681_s13 + $0x330] sm:$0xff]  ;;  %v8898_v31 = vld [vmem:[%s18681_s13 + $0x340] sm:$0xff] }
0x114c   :  { %11829 = vmatpush3.bf16.msra.mxu1 %v11828_v62  ;;  %v8716_v62 = vld [vmem:[%s18681_s13 + $0x240] sm:$0xff]  ;;  %v8984_v17 = vld [vmem:[%s18681_s13 + $0x398] sm:$0xff]  ;;  %v8987_v30 = vld [vmem:[%s18681_s13 + $0x3b0] sm:$0xff] }
0x114d   :  { %11830 = vmatprep.subr.bf16.mxu1 %v12250_v26  ;;  %v11861_v38 = vpack.c.bf16 %v8717_v36, %v8716_v62  ;;  %v8897_v0 = vld [vmem:[%s18681_s13 + $0x338] sm:$0xff]  ;;  %v8899_v22 = vld [vmem:[%s18681_s13 + $0x348] sm:$0xff]  ;;  %v8991_v23 = vld [vmem:[%s18681_s13 + $0x3d0] sm:$0xff] }
0x114e   :  { %11808 = vmatpush3.bf16.msra.mxu0 %v11807_v57  ;;  %v8807_v57 = vld [vmem:[%s18681_s13 + $0x2c0] sm:$0xff]  ;;  %v8988_v6 = vld [vmem:[%s18681_s13 + $0x3b8] sm:$0xff]  ;;  %v8903_v36 = vld [vmem:[%s18681_s13 + $0x368] sm:$0xff] }
0x114f   :  { %11809 = vmatprep.subr.bf16.mxu0 %v12250_v26  ;;  %v11885_v40 = vpack.c.bf16 %v8808_v43, %v8807_v57  ;;  %v8992_v35 = vld [vmem:[%s18681_s13 + $0x3d8] sm:$0xff]  ;;  %v8902_v62 = vld [vmem:[%s18681_s13 + $0x360] sm:$0xff]  ;;  %v8994_v43 = vld [vmem:[%s18681_s13 + $0x3e8] sm:$0xff] }
0x1150   :  { %11832 = vmatpush3.bf16.msra.mxu1 %v11831_v12  ;;  %v8718_v12 = vld [vmem:[%s18681_s13 + $0x250] sm:$0xff]  ;;  %v8993_v57 = vld [vmem:[%s18681_s13 + $0x3e0] sm:$0xff] }
0x1151   :  { %11833 = vmatprep.subr.bf16.mxu1 %v12250_v26  ;;  %v11864_v55 = vpack.c.bf16 %v8719_v45, %v8718_v12  ;;  %v8904_v12 = vld [vmem:[%s18681_s13 + $0x370] sm:$0xff]  ;;  %v8905_v45 = vld [vmem:[%s18681_s13 + $0x378] sm:$0xff] }
0x1152   :  { %11811 = vmatpush3.bf16.msra.mxu0 %v11810_v4  ;;  %v8809_v4 = vld [vmem:[%s18681_s13 + $0x2d0] sm:$0xff] }
0x1153   :  { %11812 = vmatprep.subr.bf16.mxu0 %v12250_v26  ;;  %v11888_v33 = vpack.c.bf16 %v8810_v5, %v8809_v4  ;;  %v8995_v4 = vld [vmem:[%s18681_s13 + $0x3f0] sm:$0xff]  ;;  %v8996_v5 = vld [vmem:[%s18681_s13 + $0x3f8] sm:$0xff] }
0x1154   :  { %11835 = vmatpush3.bf16.msra.mxu1 %v11834_v14  ;;  %v8720_v14 = vld [vmem:[%s18681_s13 + $0x260] sm:$0xff] }
0x1155   :  { %11836 = vmatprep.subr.bf16.mxu1 %v12250_v26  ;;  %v11867_v7 = vpack.c.bf16 %v8721_v37, %v8720_v14  ;;  %v11942_v14 = vpack.c.bf16 %v8996_v5, %v8995_v4  ;;  %v9081_v37 = vld [vmem:[%s18683_s15] sm:$0xff] }
0x1156   :  { %11814 = vmatpush3.bf16.msra.mxu0 %v11813_v41  ;;  %v8811_v41 = vld [vmem:[%s18681_s13 + $0x2e0] sm:$0xff] }
0x1157   :  { %11815 = vmatprep.subr.bf16.mxu0 %v12250_v26  ;;  %v11891_v60 = vpack.c.bf16 %v8812_v9, %v8811_v41  ;;  %v9083_v41 = vld [vmem:[%s18683_s15 + $0x10] sm:$0xff] }
0x1158   :  { %11838 = vmatpush3.bf16.msra.mxu1 %v11837_v48  ;;  %v8722_v48 = vld [vmem:[%s18681_s13 + $0x270] sm:$0xff] }
0x1159   :  { %11839 = vmatprep.subr.bf16.mxu1 %v12250_v26  ;;  %v11870_v61 = vpack.c.bf16 %v8723_v56, %v8722_v48 }
0x115a   :  { %11817 = vmatpush3.bf16.msra.mxu0 %v11816_v28  ;;  %v8813_v28 = vld [vmem:[%s18681_s13 + $0x2f0] sm:$0xff] }
0x115b   :  { %11818 = vmatprep.subr.bf16.mxu0 %v12250_v26  ;;  %v11894_v59 = vpack.c.bf16 %v8814_v8, %v8813_v28 }
0x115c   :  { %11841 = vmatpush3.bf16.msra.mxu1 %v11840_v24  ;;  %v8890_v24 = vld [vmem:[%s18681_s13 + $0x300] sm:$0xff] }
0x115d   :  { %11842 = vmatprep.subr.bf16.mxu1 %v12250_v26  ;;  %v11897_v49 = vpack.c.bf16 %v8891_v3, %v8890_v24 }
0x115e   :  { %11820 = vmatpush3.bf16.msra.mxu0 %v11819_v53  ;;  %v8981_v53 = vld [vmem:[%s18681_s13 + $0x380] sm:$0xff] }
0x115f   :  { %11821 = vmatprep.subr.bf16.mxu0 %v12250_v26  ;;  %v11921_v13 = vpack.c.bf16 %v8982_v21, %v8981_v53 }
0x1160   :  { %11844 = vmatpush3.bf16.msra.mxu1 %v11843_v1  ;;  %v8892_v1 = vld [vmem:[%s18681_s13 + $0x310] sm:$0xff] }
0x1161   :  { %11845 = vmatprep.subr.bf16.mxu1 %v12250_v26  ;;  %v11900_v34 = vpack.c.bf16 %v8893_v19, %v8892_v1 }
0x1162   :  { %11823 = vmatpush3.bf16.msra.mxu0 %v11822_v58  ;;  %v8983_v58 = vld [vmem:[%s18681_s13 + $0x390] sm:$0xff] }
0x1163   :  { %11848 = vmatprep.subr.bf16.mxu0 %v12250_v26  ;;  %v11924_v63 = vpack.c.bf16 %v8984_v17, %v8983_v58 }
0x1164   :  { %11847 = vmatpush3.bf16.msra.mxu1 %v11846_v15  ;;  %v8895_v15 = vld [vmem:[%s18681_s13 + $0x328] sm:$0xff] }
0x1165   :  { %9838 = vmatmul.mubr.f32.vlgmr.msra.gmra.mrb[58].mxu0 %v18291_v51  ;;  %11872 = vmatprep.subr.bf16.mxu1 %v12250_v26  ;;  %v8715_v51 = vld [vmem:[%s18681_s13 + $0x238] sm:$0xff] }
0x1166   :  { %11850 = vmatpush3.bf16.msra.mxu0 %v11849_v46  ;;  %9907 = vmatprep.mubr.msk.f32.mxu0 %vm12251_vm11, %v18065_v47  ;;  %v11858_v39 = vpack.c.bf16 %v8715_v51, %v8714_v25  ;;  %v8900_v25 = vld [vmem:[%s18681_s13 + $0x350] sm:$0xff]  ;;  %v8901_v51 = vld [vmem:[%s18681_s13 + $0x358] sm:$0xff] }
0x1167   :  { %9873 = vmatmul.mubr.f32.vlgmr.msra.gmra.mrb[60].mxu1 %v18294_v50  ;;  %11851 = vmatprep.subr.bf16.mxu0 %v12250_v26  ;;  %v11879_v50 = vpack.c.bf16 %v8804_v20, %v8803_v29  ;;  %v8989_v29 = vld [vmem:[%s18681_s13 + $0x3c0] sm:$0xff]  ;;  %v8990_v20 = vld [vmem:[%s18681_s13 + $0x3c8] sm:$0xff] }
0x1168   :  { %11874 = vmatpush3.bf16.msra.mxu1 %v11873_v10  ;;  %9942 = vmatprep.mubr.msk.f32.mxu1 %vm12251_vm11, %v18065_v47 }
0x1169   :  { %11875 = vmatprep.subr.bf16.mxu1 %v12250_v26 }
0x116a   :  { %11853 = vmatpush3.bf16.msra.mxu0 %v11852_v52  ;;  %v11906_v52 = vpack.c.bf16 %v8897_v0, %v8896_v18 }
0x116b   :  { %11854 = vmatprep.subr.bf16.mxu0 %v12250_v26 }
0x116c   :  { %11877 = vmatpush3.bf16.msra.mxu1 %v11876_v32  ;;  %v11930_v32 = vpack.c.bf16 %v8988_v6, %v8987_v30 }
0x116d   :  { %11878 = vmatprep.subr.bf16.mxu1 %v12250_v26 }
0x116e   :  { %11856 = vmatpush3.bf16.msra.mxu0 %v11855_v2  ;;  %v11909_v2 = vpack.c.bf16 %v8899_v22, %v8898_v31 }
0x116f   :  { %11857 = vmatprep.subr.bf16.mxu0 %v12250_v26 }
0x1170   :  { %11880 = vmatpush3.bf16.msra.mxu1 %v11879_v50  ;;  %v11933_v50 = vpack.c.bf16 %v8990_v20, %v8989_v29 }
0x1171   :  { %11881 = vmatprep.subr.bf16.mxu1 %v12250_v26 }
0x1172   :  { %11859 = vmatpush3.bf16.msra.mxu0 %v11858_v39  ;;  %v11912_v39 = vpack.c.bf16 %v8901_v51, %v8900_v25 }
0x1173   :  { %11860 = vmatprep.subr.bf16.mxu0 %v12250_v26 }
0x1174   :  { %11883 = vmatpush3.bf16.msra.mxu1 %v11882_v44  ;;  %v11936_v44 = vpack.c.bf16 %v8992_v35, %v8991_v23 }
0x1175   :  { %11884 = vmatprep.subr.bf16.mxu1 %v12250_v26 }
0x1176   :  { %11862 = vmatpush3.bf16.msra.mxu0 %v11861_v38  ;;  %v11915_v38 = vpack.c.bf16 %v8903_v36, %v8902_v62 }
0x1177   :  { %11863 = vmatprep.subr.bf16.mxu0 %v12250_v26 }
0x1178   :  { %11886 = vmatpush3.bf16.msra.mxu1 %v11885_v40  ;;  %v11939_v40 = vpack.c.bf16 %v8994_v43, %v8993_v57 }
0x1179   :  { %11887 = vmatprep.subr.bf16.mxu1 %v12250_v26 }
0x117a   :  { %11865 = vmatpush3.bf16.msra.mxu0 %v11864_v55  ;;  %v11918_v55 = vpack.c.bf16 %v8905_v45, %v8904_v12 }
0x117b   :  { %11866 = vmatprep.subr.bf16.mxu0 %v12250_v26 }
0x117c   :  { %11889 = vmatpush3.bf16.msra.mxu1 %v11888_v33  ;;  %v9082_v33 = vld [vmem:[%s18683_s15 + $0x8] sm:$0xff] }
0x117d   :  { %11890 = vmatprep.subr.bf16.mxu1 %v12250_v26  ;;  %v11945_v9 = vpack.c.bf16 %v9082_v33, %v9081_v37 }
0x117e   :  { %11868 = vmatpush3.bf16.msra.mxu0 %v11867_v7 }
0x117f   :  { %11869 = vmatprep.subr.bf16.mxu0 %v12250_v26 }
0x1180   :  { %11892 = vmatpush3.bf16.msra.mxu1 %v11891_v60 }
0x1181   :  { %11893 = vmatprep.subr.bf16.mxu1 %v12250_v26 }
0x1182   :  { %11871 = vmatpush3.bf16.msra.mxu0 %v11870_v61 }
0x1183   :  { %11896 = vmatprep.subr.bf16.mxu0 %v12250_v26 }
0x1184   :  { %11895 = vmatpush3.bf16.msra.mxu1 %v11894_v59 }
0x1185   :  { %9908 = vmatmul.mubr.f32.vlgmr.msra.gmra.mrb[60].mxu0 %v18304_v16  ;;  %11920 = vmatprep.subr.bf16.mxu1 %v12250_v26  ;;  %v8894_v16 = vld [vmem:[%s18681_s13 + $0x320] sm:$0xff] }
0x1186   :  { %11898 = vmatpush3.bf16.msra.mxu0 %v11897_v49  ;;  %9977 = vmatprep.mubr.msk.f32.mxu0 %vm12251_vm11, %v18065_v47  ;;  %v11903_v46 = vpack.c.bf16 %v8895_v15, %v8894_v16  ;;  %v9305_v16 = vld [vmem:[%s18682_s14] ss:$0 sm:$0xff] }
0x1187   :  { %9943 = vmatmul.mubr.f32.vlgmr.msra.gmra.mrb[62].mxu1 %v18307_v54  ;;  %11899 = vmatprep.subr.bf16.mxu0 %v12250_v26  ;;  %v8985_v54 = vld [vmem:[%s18681_s13 + $0x3a0] sm:$0xff] }
0x1188   :  { %11922 = vmatpush3.bf16.msra.mxu1 %v11921_v13  ;;  %10012 = vmatprep.mubr.msk.f32.mxu1 %vm12251_vm11, %v18065_v47  ;;  %v11927_v10 = vpack.c.bf16 %v8986_v27, %v8985_v54 }
0x1189   :  { %11923 = vmatprep.subr.bf16.mxu1 %v12250_v26 }
0x118a   :  { %11901 = vmatpush3.bf16.msra.mxu0 %v11900_v34 }
0x118b   :  { %11902 = vmatprep.subr.bf16.mxu0 %v12250_v26 }
0x118c   :  { %11925 = vmatpush3.bf16.msra.mxu1 %v11924_v63 }
0x118d   :  { %11926 = vmatprep.subr.bf16.mxu1 %v12250_v26 }
0x118e   :  { %11904 = vmatpush3.bf16.msra.mxu0 %v11903_v46  ;;  %v9306_v46 = vld [vmem:[%s18684_s16] ss:$0 sm:$0xff] }
0x118f   :  { %11905 = vmatprep.subr.bf16.mxu0 %v12250_v26 }
0x1190   :  { %11928 = vmatpush3.bf16.msra.mxu1 %v11927_v10 }
0x1191   :  { %11929 = vmatprep.subr.bf16.mxu1 %v12250_v26 }
0x1192   :  { %11907 = vmatpush3.bf16.msra.mxu0 %v11906_v52 }
0x1193   :  { %11908 = vmatprep.subr.bf16.mxu0 %v12250_v26 }
0x1194   :  { %11931 = vmatpush3.bf16.msra.mxu1 %v11930_v32 }
0x1195   :  { %11932 = vmatprep.subr.bf16.mxu1 %v12250_v26 }
0x1196   :  { %11910 = vmatpush3.bf16.msra.mxu0 %v11909_v2 }
0x1197   :  { %11911 = vmatprep.subr.bf16.mxu0 %v12250_v26 }
0x1198   :  { %11934 = vmatpush3.bf16.msra.mxu1 %v11933_v50 }
0x1199   :  { %11935 = vmatprep.subr.bf16.mxu1 %v12250_v26 }
0x119a   :  { %11913 = vmatpush3.bf16.msra.mxu0 %v11912_v39 }
0x119b   :  { %11914 = vmatprep.subr.bf16.mxu0 %v12250_v26 }
0x119c   :  { %11937 = vmatpush3.bf16.msra.mxu1 %v11936_v44 }
0x119d   :  { %11938 = vmatprep.subr.bf16.mxu1 %v12250_v26 }
0x119e   :  { %11916 = vmatpush3.bf16.msra.mxu0 %v11915_v38 }
0x119f   :  { %11917 = vmatprep.subr.bf16.mxu0 %v12250_v26 }
0x11a0   :  { %11940 = vmatpush3.bf16.msra.mxu1 %v11939_v40 }
0x11a1   :  { %11941 = vmatprep.subr.bf16.mxu1 %v12250_v26 }
0x11a2   :  { %11919 = vmatpush3.bf16.msra.mxu0 %v11918_v55 }
0x11a3   :  { %11944 = vmatprep.subr.bf16.mxu0 %v12250_v26 }
0x11a4   :  { %11943 = vmatpush3.bf16.msra.mxu1 %v11942_v14 }
0x11a5   :  { %9978 = vmatmul.mubr.f32.vlgmr.msra.gmra.mrb[62].mxu0 %v18310_v42  ;;  %v9084_v42 = vld [vmem:[%s18683_s15 + $0x18] sm:$0xff] }
0x11a6   :  { %10023 = vmatprep.mubr.msk.f32.mxu0 %vm12251_vm11, %v18065_v47  ;;  %11946 = vmatpush3.bf16.msra.mxu0 %v11945_v9  ;;  %v11948_v47 = vpack.c.bf16 %v9084_v42, %v9083_v41 }
0x11a7   :  { %10013 = vmatmul.mubr.f32.vlgmr.msra.gmra.mrb[64].mxu1 %v18315_v11  ;;  %11947 = vmatprep.subr.bf16.mxu0 %v12250_v26 }
0x11aa   :  { %11949 = vmatpush3.bf16.msra.mxu0 %v11948_v47 }
0x1218   :  { %v8449_v11 = vpop.f32.mrb[56].mxu0 }
0x1219   :  { %v9769_v7 = vpop.f32.mrb[57].mxu0 }
0x121a   :  { %v8522_v48 = vpop.f32.mrb[58].mxu1 }
0x121b   :  { %v8523_v56 = vadd.f32 %v8522_v48, %v8449_v11  ;;  %v9804_v60 = vpop.f32.mrb[59].mxu1 }
0x1238   :  { %v8612_v28 = vpop.f32.mrb[58].mxu0 }
0x1239   :  { %v8616_v8 = vadd.f32 %v8612_v28, %v8523_v56  ;;  %v9839_v61 = vpop.f32.mrb[59].mxu0 }
0x123a   :  { %v8703_v24 = vpop.f32.mrb[60].mxu1 }
0x123b   :  { %v8707_v3 = vadd.f32 %v8703_v24, %v8616_v8  ;;  %v9874_v59 = vpop.f32.mrb[61].mxu1 }
0x1258   :  { %v8794_v53 = vpop.f32.mrb[60].mxu0 }
0x1259   :  { %v8798_v21 = vadd.f32 %v8794_v53, %v8707_v3  ;;  %v9909_v49 = vpop.f32.mrb[61].mxu0 }
0x125a   :  { %v8885_v1 = vpop.f32.mrb[62].mxu1 }
0x125b   :  { %v8889_v19 = vadd.f32 %v8885_v1, %v8798_v21  ;;  %v9944_v13 = vpop.f32.mrb[63].mxu1 }
0x1278   :  { %v8976_v58 = vpop.f32.mrb[62].mxu0 }
0x1279   :  { %v8980_v26 = vadd.f32 %v8976_v58, %v8889_v19  ;;  %v9979_v17 = vpop.f32.mrb[63].mxu0 }
0x127a   :  { %v9067_v34 = vpop.f32.mrb[64].mxu1 }
0x127b   :  { %v9071_v15 = vadd.f32 %v9067_v34, %v8980_v26  ;;  %v10014_v63 = vpop.f32.mrb[65].mxu1 }
0x127d   :  { %v9079_v54 = vadd.f32 %v9305_v16, %v9071_v15 }
0x127f   :  { %v9080_v27 = vmax.f32 %v9079_v54, 0.0 }
0x1281   :  { %10024 = vmatmul.mubr.msk.f32.vlgmr.msra.gmra.mrb[64].mxu0 %vm9092_vm13, %v9080_v27 }
0x1354   :  { %v9162_v18 = vpop.f32.mrb[64].mxu0 }
0x1355   :  { %v9163_v0 = vadd.f32 %v9306_v46, %v9162_v18  ;;  %v10025_v10 = vpop.f32.mrb[65].mxu0 }
0x1357   :  { %9167 = vst.msk [vmem:[#allocation10] sm:$0x3] %vm9166_vm14, %v9163_v0 }
0x1358   :  { %12224 = shalt.err (!%p12221_p0)
}
0x1359   :  { %s19158_s29 = sld [smem:[#allocation108_spill]] }
0x135f   :  { %s12225_s2 = scalar_lea.hbm %s19158_s29, 32 }
0x1360   :  { %p12226_p1 = scmp.ne.s32.totalorder %s19158_s29, %s12225_s2  ;;  %p12229_p2 = scmp.lt.u32.totalorder %s12225_s2, %s19158_s29 }
0x1362   :  { %p12231_p3 = pnand %p12229_p2, %p12226_p1 }
0x1364   :  { %12234 = shalt.err (!%p12231_p3)
}
0x1365   :  { %9177 = dma.vmem_to_hbm [thread:$0]  %s9175_s23, 32, %s19158_s29, [#allocation6]  }
0x1366   :  { %12239 = dma.done.wait [#allocation6], 32  }
0x1367   :  { %12240 = vsyncadd [#allocation6], 4294967264 }
0x1368   :  { %9181 = vsyncpa [#allocation5], 1 }
0x1369   :  { %9182 = vsyncpa [#allocation8], 1 }
0x136a   :  { %9183 = vsyncpa [#allocation6], 1 }

</bundles_post_ra>
